<compile_context>
chip_gen: v6e
topology: v6e:2x2x1
jax: 0.10.0
libtpu: 0.0.40
codegen_flags: <defaults>
</compile_context>

<pallas_src>
import functools

import jax
import jax.numpy as jnp
from jax.experimental import pallas as pl
from jax.experimental.pallas import tpu as pltpu

# dtype fed to the MXU (dot operands only). Elementwise math stays f32.
_MXU_DTYPE = jnp.bfloat16
_BN_EPS = 1e-5


# ------------------------------ kernel helpers ------------------------------

def _zero_halo(ref, h, w, c):
    """Zero only the 4 one-element halo strips of a (h+2, w+2, c) buffer."""
    z_row = jnp.zeros((1, w + 2, c), jnp.float32)
    z_col = jnp.zeros((h + 2, 1, c), jnp.float32)
    ref[0:1, :, :] = z_row
    ref[h + 1:h + 2, :, :] = z_row
    ref[:, 0:1, :] = z_col
    ref[:, w + 1:w + 2, :] = z_col


def _conv3x3(pad_ref, patch_ref, w_bf16, ho, wo, cin, stride):
    """3x3 'same' conv from a halo-padded VMEM ref via im2col + one MXU dot."""
    for ky in range(3):
        for kx in range(3):
            t = ky * 3 + kx
            if stride == 1:
                win = pad_ref[ky:ky + ho, kx:kx + wo, :]
            else:
                win = pad_ref[pl.ds(ky, ho, stride), pl.ds(kx, wo, stride), :]
            patch_ref[:, t * cin:(t + 1) * cin] = win.reshape(ho * wo, cin)
    lhs = patch_ref[:, 0:9 * cin].astype(_MXU_DTYPE)
    return jnp.dot(lhs, w_bf16, preferred_element_type=jnp.float32)


def _tree1_body(x_ref, w1l_ref, wstk_ref, wroot_ref, bias_ref, wsc_ref,
                o_ref, xpad_ref, hpad_ref, cat_ref, patch_ref,
                *, H, W, Cin, Cout, stride):
    # x_ref:    (1, H, W, Cin)       input image (f32)
    # w1l_ref:  (9*Cin, Cout)        left conv1, im2col layout, BN scale folded
    # wstk_ref: (3, 9*Cout, Cout)    [left conv2, right conv1, right conv2]
    # wroot_ref:(2*Cout, Cout)       root 1x1 (cat order: [out1 | out2])
    # bias_ref: (6, Cout)            [b1L, b2L, bscL, b1R, b2R, broot]
    # wsc_ref:  (Cin, Cout) or None  left projection shortcut (1x1, BN folded)
    # o_ref:    (1, Ho*Wo, Cout)     flat output
    Ho, Wo = H // stride, W // stride
    HW = Ho * Wo

    _zero_halo(xpad_ref, H, W, Cin)
    _zero_halo(hpad_ref, Ho, Wo, Cout)

    # stage the input into the halo-padded buffer (in-kernel zero padding)
    xpad_ref[1:H + 1, 1:W + 1, :] = x_ref[0]

    # ---------- left BasicBlock: conv-bn-relu, conv-bn, + shortcut, relu -----
    h = _conv3x3(xpad_ref, patch_ref, w1l_ref[...], Ho, Wo, Cin, stride)
    h = jnp.maximum(h + bias_ref[0:1, :], 0.0)
    hpad_ref[1:Ho + 1, 1:Wo + 1, :] = h.reshape(Ho, Wo, Cout)

    out = _conv3x3(hpad_ref, patch_ref, wstk_ref[0, :, :], Ho, Wo, Cout, 1)
    out = out + bias_ref[1:2, :]
    if wsc_ref is not None:                      # projection shortcut (1x1+bn)
        if stride == 1:
            xs = x_ref[0].reshape(HW, Cin)
        else:
            xs = xpad_ref[pl.ds(1, Ho, stride),
                          pl.ds(1, Wo, stride), :].reshape(HW, Cin)
        out = out + (jnp.dot(xs.astype(_MXU_DTYPE), wsc_ref[...],
                             preferred_element_type=jnp.float32)
                     + bias_ref[2:3, :])
    else:                                        # identity shortcut
        out = out + x_ref[0].reshape(HW, Cout)
    out1 = jnp.maximum(out, 0.0)
    cat_ref[:, 0:Cout] = out1                    # keep out1 for shortcut + root

    # ---------- right BasicBlock (stride 1, identity shortcut) ---------------
    hpad_ref[1:Ho + 1, 1:Wo + 1, :] = out1.reshape(Ho, Wo, Cout)
    h2 = _conv3x3(hpad_ref, patch_ref, wstk_ref[1, :, :], Ho, Wo, Cout, 1)
    h2 = jnp.maximum(h2 + bias_ref[3:4, :], 0.0)
    hpad_ref[1:Ho + 1, 1:Wo + 1, :] = h2.reshape(Ho, Wo, Cout)
    out2 = _conv3x3(hpad_ref, patch_ref, wstk_ref[2, :, :], Ho, Wo, Cout, 1)
    out2 = jnp.maximum(out2 + bias_ref[4:5, :] + cat_ref[:, 0:Cout], 0.0)
    cat_ref[:, Cout:2 * Cout] = out2

    # ---------- Root: relu(bn(conv1x1(cat(out1,out2)))) as ONE MXU dot -------
    r = jnp.dot(cat_ref[...].astype(_MXU_DTYPE), wroot_ref[...],
                preferred_element_type=jnp.float32)
    o_ref[0] = jnp.maximum(r + bias_ref[5:6, :], 0.0).astype(o_ref.dtype)


def _tree1_kernel_sc(x_ref, w1l, wstk, wroot, bias, wsc, o_ref,
                     xpad, hpad, cat, patch, *, H, W, Cin, Cout, stride):
    _tree1_body(x_ref, w1l, wstk, wroot, bias, wsc, o_ref,
                xpad, hpad, cat, patch,
                H=H, W=W, Cin=Cin, Cout=Cout, stride=stride)


def _tree1_kernel_id(x_ref, w1l, wstk, wroot, bias, o_ref,
                     xpad, hpad, cat, patch, *, H, W, Cin, Cout, stride):
    _tree1_body(x_ref, w1l, wstk, wroot, bias, None, o_ref,
                xpad, hpad, cat, patch,
                H=H, W=W, Cin=Cin, Cout=Cout, stride=stride)


def _root_kernel(a_ref, b_ref, w_ref, bias_ref, o_ref, cat_ref, *, C):
    # standalone Root (only used for level >= 2 trees)
    cat_ref[:, 0:C] = a_ref[0]
    cat_ref[:, C:2 * C] = b_ref[0]
    r = jnp.dot(cat_ref[...].astype(_MXU_DTYPE), w_ref[...],
                preferred_element_type=jnp.float32)
    o_ref[0] = jnp.maximum(r + bias_ref[0:1, :], 0.0).astype(o_ref.dtype)


# --------------------------------- wrappers ---------------------------------

def _fold_bn_conv3(w, s):
    """(3,3,ci,co) weight * per-channel BN scale -> im2col (9*ci, co) bf16."""
    ci, co = w.shape[2], w.shape[3]
    return (w * s).reshape(9 * ci, co).astype(_MXU_DTYPE)


def fused_tree_level1(x, p):
    """Entire level-1 Tree (left block -> right block -> root) in ONE call."""
    N, H, W, Cin = x.shape
    left, right, root = p["left"], p["right"], p["root"]
    Cout = left["w1"].shape[-1]
    s = int(left["stride"])
    assert H % s == 0 and W % s == 0, "H, W must be divisible by the stride"
    assert int(right["stride"]) == 1 and right["sc"] is None
    Ho, Wo = H // s, W // s
    HW = Ho * Wo
    Cmax = max(Cin, Cout)

    # Fold BN scale into the conv weights; kernels only add the bias.
    w1l = _fold_bn_conv3(left["w1"], left["s1"])
    wstk = jnp.stack([_fold_bn_conv3(left["w2"], left["s2"]),
                      _fold_bn_conv3(right["w1"], right["s1"]),
                      _fold_bn_conv3(right["w2"], right["s2"])])
    wroot = (root["w"] * root["s"]).astype(_MXU_DTYPE)

    has_sc = left["sc"] is not None
    bsc = left["sc"]["b"] if has_sc else jnp.zeros((Cout,), jnp.float32)
    bias = jnp.stack([left["b1"], left["b2"], bsc,
                      right["b1"], right["b2"], root["b"]]).astype(jnp.float32)

    args = [x, w1l, wstk, wroot, bias]
    in_specs = [
        pl.BlockSpec((1, H, W, Cin), lambda n: (n, 0, 0, 0)),
        pl.BlockSpec((9 * Cin, Cout), lambda n: (0, 0)),
        pl.BlockSpec((3, 9 * Cout, Cout), lambda n: (0, 0, 0)),
        pl.BlockSpec((2 * Cout, Cout), lambda n: (0, 0)),
        pl.BlockSpec((6, Cout), lambda n: (0, 0)),
    ]
    flops = 2 * N * HW * Cout * (9 * Cin + 3 * 9 * Cout + 2 * Cout)
    bytes_accessed = (4 * N * (H * W * Cin + HW * Cout)
                      + 2 * (9 * Cin * Cout + 27 * Cout * Cout
                             + 2 * Cout * Cout) + 4 * 6 * Cout)

    if has_sc:
        wsc = (left["sc"]["w"] * left["sc"]["s"]).astype(_MXU_DTYPE)
        args.append(wsc)
        in_specs.append(pl.BlockSpec((Cin, Cout), lambda n: (0, 0)))
        flops += 2 * N * HW * Cin * Cout
        bytes_accessed += 2 * Cin * Cout
        kern = functools.partial(_tree1_kernel_sc, H=H, W=W, Cin=Cin,
                                 Cout=Cout, stride=s)
    else:
        kern = functools.partial(_tree1_kernel_id, H=H, W=W, Cin=Cin,
                                 Cout=Cout, stride=s)

    out = pl.pallas_call(
        kern,
        out_shape=jax.ShapeDtypeStruct((N, HW, Cout), jnp.float32),
        grid=(N,),
        in_specs=in_specs,
        out_specs=pl.BlockSpec((1, HW, Cout), lambda n: (n, 0, 0)),
        scratch_shapes=[
            pltpu.VMEM((H + 2, W + 2, Cin), jnp.float32),     # padded input
            pltpu.VMEM((Ho + 2, Wo + 2, Cout), jnp.float32),  # padded intermed.
            pltpu.VMEM((HW, 2 * Cout), jnp.float32),          # [out1 | out2]
            pltpu.VMEM((HW, 9 * Cmax), jnp.float32),          # im2col patch
        ],
        compiler_params=pltpu.CompilerParams(
            dimension_semantics=("parallel",)),
        cost_estimate=pl.CostEstimate(flops=flops, transcendentals=0,
                                      bytes_accessed=bytes_accessed),
    )(*args)
    return out.reshape(N, Ho, Wo, Cout)


def fused_root(out1, out2, root):
    """Root(cat([out1, out2])) for level>=2 trees (one dot, concat in VMEM)."""
    N, H, W, C = out1.shape
    HW = H * W
    w = (root["w"] * root["s"]).astype(_MXU_DTYPE)
    bias = root["b"].reshape(1, C).astype(jnp.float32)
    a = out1.reshape(N, HW, C)
    b = out2.reshape(N, HW, C)
    kern = functools.partial(_root_kernel, C=C)
    out = pl.pallas_call(
        kern,
        out_shape=jax.ShapeDtypeStruct((N, HW, C), jnp.float32),
        grid=(N,),
        in_specs=[
            pl.BlockSpec((1, HW, C), lambda n: (n, 0, 0)),
            pl.BlockSpec((1, HW, C), lambda n: (n, 0, 0)),
            pl.BlockSpec((2 * C, C), lambda n: (0, 0)),
            pl.BlockSpec((1, C), lambda n: (0, 0)),
        ],
        out_specs=pl.BlockSpec((1, HW, C), lambda n: (n, 0, 0)),
        scratch_shapes=[pltpu.VMEM((HW, 2 * C), jnp.float32)],
        compiler_params=pltpu.CompilerParams(
            dimension_semantics=("parallel",)),
        cost_estimate=pl.CostEstimate(
            flops=2 * N * HW * 2 * C * C, transcendentals=0,
            bytes_accessed=4 * 3 * N * HW * C + 2 * 2 * C * C + 4 * C),
    )(a, b, w, bias)
    return out.reshape(N, H, W, C)


# ----------------------- parameter init (deterministic) ---------------------

def _init_bn(key, c):
    k1, k2, k3, k4 = jax.random.split(key, 4)
    gamma = 1.0 + 0.1 * jax.random.normal(k1, (c,), jnp.float32)
    beta = 0.1 * jax.random.normal(k2, (c,), jnp.float32)
    mean = 0.1 * jax.random.normal(k3, (c,), jnp.float32)
    var = 1.0 + 0.1 * jnp.abs(jax.random.normal(k4, (c,), jnp.float32))
    scale = gamma / jnp.sqrt(var + _BN_EPS)
    bias = beta - mean * scale
    return scale, bias


def basic_block_init(key, cin, cout, stride):
    k1, k2, k3, k4, k5, k6 = jax.random.split(key, 6)
    p = {
        "w1": 0.1 * jax.random.normal(k1, (3, 3, cin, cout), jnp.float32),
        "w2": 0.1 * jax.random.normal(k3, (3, 3, cout, cout), jnp.float32),
        "stride": stride,
        "sc": None,
    }
    p["s1"], p["b1"] = _init_bn(k2, cout)
    p["s2"], p["b2"] = _init_bn(k4, cout)
    if stride != 1 or cin != cout:
        ssc, bsc = _init_bn(k6, cout)
        p["sc"] = {
            "w": 0.1 * jax.random.normal(k5, (cin, cout), jnp.float32),
            "s": ssc,
            "b": bsc,
        }
    return p


def tree_init(key, cin, cout, level=1, stride=1):
    kl, kr, kroot, kbn = jax.random.split(key, 4)
    if level == 1:
        left = basic_block_init(kl, cin, cout, stride)
        right = basic_block_init(kr, cout, cout, 1)
    else:
        left = tree_init(kl, cin, cout, level - 1, stride)
        right = tree_init(kr, cout, cout, level - 1, 1)
    sr, br = _init_bn(kbn, cout)
    root = {"w": 0.1 * jax.random.normal(kroot, (2 * cout, cout), jnp.float32),
            "s": sr, "b": br}
    return {"left": left, "right": right, "root": root, "level": level}


# -------------------------------- forward -----------------------------------

def tree_apply(p, x):
    if p["level"] == 1:
        return fused_tree_level1(x, p)
    out1 = tree_apply(p["left"], x)
    out2 = tree_apply(p["right"], out1)
    return fused_root(out1, out2, p["root"])


# ---------------------------- pure-JAX reference ----------------------------

def _ref_conv3(x, w, s, b, relu, stride):
    out = jax.lax.conv_general_dilated(
        x, w, (stride, stride), ((1, 1), (1, 1)),
        dimension_numbers=("NHWC", "HWIO", "NHWC"))
    out = out * s + b
    return jnp.maximum(out, 0.0) if relu else out


def _ref_conv1(x, w, s, b, relu, stride=1):
    out = jax.lax.conv_general_dilated(
        x, w[None, None], (stride, stride), "VALID",
        dimension_numbers=("NHWC", "HWIO", "NHWC"))
    out = out * s + b
    return jnp.maximum(out, 0.0) if relu else out


def basic_block_ref(p, x):
    out = _ref_conv3(x, p["w1"], p["s1"], p["b1"], True, p["stride"])
    out = _ref_conv3(out, p["w2"], p["s2"], p["b2"], False, 1)
    if p["sc"] is None:
        short = x
    else:
        short = _ref_conv1(x, p["sc"]["w"], p["sc"]["s"], p["sc"]["b"],
                           False, p["stride"])
    return jnp.maximum(out + short, 0.0)


def tree_ref(p, x):
    if p["level"] == 1:
        o1 = basic_block_ref(p["left"], x)
        o2 = basic_block_ref(p["right"], o1)
    else:
        o1 = tree_ref(p["left"], x)
        o2 = tree_ref(p["right"], o1)
    return _ref_conv1(jnp.concatenate([o1, o2], -1),
                      p["root"]["w"], p["root"]["s"], p["root"]["b"], True)


# ----------------------------------- main -----------------------------------

if __name__ == "__main__":
    key = jax.random.PRNGKey(0)
    kx, kp = jax.random.split(key)

    N, Cin, Cout, H, W = 2, 4, 8, 16, 16
    x_nchw = jax.random.normal(kx, (N, Cin, H, W), jnp.float32)   # PyTorch NCHW
    params = tree_init(kp, Cin, Cout, level=1, stride=1)

    x_nhwc = jnp.transpose(x_nchw, (0, 2, 3, 1))

    fwd = jax.jit(lambda xx: tree_apply(params, xx))
    out = jax.block_until_ready(fwd(x_nhwc))
    assert out.shape == (N, H, W, Cout), out.shape

    ref = tree_ref(params, x_nhwc)
    err = float(jnp.max(jnp.abs(out - ref)))
    scale = float(jnp.max(jnp.abs(ref))) + 1.0
    # bf16 MXU operands => a few-permille relative error per conv stage; the
    # f32 reference comparison therefore uses a 4% tolerance (structural bugs
    # produce O(1) errors and are still caught).
    assert err < 4e-2 * scale, f"mismatch: max abs err = {err}"

    print("KERNEL_OK")
</pallas_src>

<mosaic_0001>
module attributes {stable_mosaic.version = 11 : i64} {
  func.func @_tree1_kernel_sc(%arg0: i32, %arg1: memref<1x16x16x4xf32, #tpu.memory_space<vmem>>, %arg2: memref<36x8xbf16, #tpu.memory_space<vmem>>, %arg3: memref<3x72x8xbf16, #tpu.memory_space<vmem>>, %arg4: memref<16x8xbf16, #tpu.memory_space<vmem>>, %arg5: memref<6x8xf32, #tpu.memory_space<vmem>>, %arg6: memref<4x8xbf16, #tpu.memory_space<vmem>>, %arg7: memref<1x256x8xf32, #tpu.memory_space<vmem>>, %arg8: memref<18x18x4xf32, #tpu.memory_space<vmem>>, %arg9: memref<18x18x8xf32, #tpu.memory_space<vmem>>, %arg10: memref<256x16xf32, #tpu.memory_space<vmem>>, %arg11: memref<256x72xf32, #tpu.memory_space<vmem>>) attributes {dimension_semantics = [#tpu.dimension_semantics<parallel>], iteration_bounds = array<i64: 2>, scalar_prefetch = 0 : i64, scratch_operands = 4 : i64, tpu.core_type = #tpu.core_type<tc>, window_params = [{transform_indices = @transform_0, window_bounds = array<i64: 1, 16, 16, 4>}, {pipeline_mode = #tpu.pipeline_mode<synchronous>, transform_indices = @transform_1, window_bounds = array<i64: 36, 8>}, {pipeline_mode = #tpu.pipeline_mode<synchronous>, transform_indices = @transform_2, window_bounds = array<i64: 3, 72, 8>}, {pipeline_mode = #tpu.pipeline_mode<synchronous>, transform_indices = @transform_3, window_bounds = array<i64: 16, 8>}, {pipeline_mode = #tpu.pipeline_mode<synchronous>, transform_indices = @transform_4, window_bounds = array<i64: 6, 8>}, {pipeline_mode = #tpu.pipeline_mode<synchronous>, transform_indices = @transform_5, window_bounds = array<i64: 4, 8>}, {transform_indices = @transform_6, window_bounds = array<i64: 1, 256, 8>}]} {
    %cst = arith.constant 0.000000e+00 : f32
    %0 = vector.broadcast %cst : f32 to vector<1x18x4xf32>
    %cst_0 = arith.constant 0.000000e+00 : f32
    %1 = vector.broadcast %cst_0 : f32 to vector<18x1x4xf32>
    %c0 = arith.constant 0 : index
    %c0_1 = arith.constant 0 : index
    %c0_2 = arith.constant 0 : index
    %2 = vector.load %arg8[%c0, %c0_1, %c0_2] : memref<18x18x4xf32, #tpu.memory_space<vmem>>, vector<1x18x4xf32>
    tpu.vector_store %arg8[%c0, %c0_1, %c0_2], %0 {strides = array<i32>} : memref<18x18x4xf32, #tpu.memory_space<vmem>>, vector<1x18x4xf32>,
    %c17 = arith.constant 17 : index
    %c0_3 = arith.constant 0 : index
    %c0_4 = arith.constant 0 : index
    %3 = vector.load %arg8[%c17, %c0_3, %c0_4] : memref<18x18x4xf32, #tpu.memory_space<vmem>>, vector<1x18x4xf32>
    tpu.vector_store %arg8[%c17, %c0_3, %c0_4], %0 {strides = array<i32>} : memref<18x18x4xf32, #tpu.memory_space<vmem>>, vector<1x18x4xf32>,
    %c0_5 = arith.constant 0 : index
    %c0_6 = arith.constant 0 : index
    %c0_7 = arith.constant 0 : index
    %4 = vector.load %arg8[%c0_5, %c0_6, %c0_7] : memref<18x18x4xf32, #tpu.memory_space<vmem>>, vector<18x1x4xf32>
    tpu.vector_store %arg8[%c0_5, %c0_6, %c0_7], %1 {strides = array<i32>} : memref<18x18x4xf32, #tpu.memory_space<vmem>>, vector<18x1x4xf32>,
    %c0_8 = arith.constant 0 : index
    %c17_9 = arith.constant 17 : index
    %c0_10 = arith.constant 0 : index
    %5 = vector.load %arg8[%c0_8, %c17_9, %c0_10] : memref<18x18x4xf32, #tpu.memory_space<vmem>>, vector<18x1x4xf32>
    tpu.vector_store %arg8[%c0_8, %c17_9, %c0_10], %1 {strides = array<i32>} : memref<18x18x4xf32, #tpu.memory_space<vmem>>, vector<18x1x4xf32>,
    %cst_11 = arith.constant 0.000000e+00 : f32
    %6 = vector.broadcast %cst_11 : f32 to vector<1x18x8xf32>
    %cst_12 = arith.constant 0.000000e+00 : f32
    %7 = vector.broadcast %cst_12 : f32 to vector<18x1x8xf32>
    %c0_13 = arith.constant 0 : index
    %c0_14 = arith.constant 0 : index
    %c0_15 = arith.constant 0 : index
    %8 = vector.load %arg9[%c0_13, %c0_14, %c0_15] : memref<18x18x8xf32, #tpu.memory_space<vmem>>, vector<1x18x8xf32>
    tpu.vector_store %arg9[%c0_13, %c0_14, %c0_15], %6 {strides = array<i32>} : memref<18x18x8xf32, #tpu.memory_space<vmem>>, vector<1x18x8xf32>,
    %c17_16 = arith.constant 17 : index
    %c0_17 = arith.constant 0 : index
    %c0_18 = arith.constant 0 : index
    %9 = vector.load %arg9[%c17_16, %c0_17, %c0_18] : memref<18x18x8xf32, #tpu.memory_space<vmem>>, vector<1x18x8xf32>
    tpu.vector_store %arg9[%c17_16, %c0_17, %c0_18], %6 {strides = array<i32>} : memref<18x18x8xf32, #tpu.memory_space<vmem>>, vector<1x18x8xf32>,
    %c0_19 = arith.constant 0 : index
    %c0_20 = arith.constant 0 : index
    %c0_21 = arith.constant 0 : index
    %10 = vector.load %arg9[%c0_19, %c0_20, %c0_21] : memref<18x18x8xf32, #tpu.memory_space<vmem>>, vector<18x1x8xf32>
    tpu.vector_store %arg9[%c0_19, %c0_20, %c0_21], %7 {strides = array<i32>} : memref<18x18x8xf32, #tpu.memory_space<vmem>>, vector<18x1x8xf32>,
    %c0_22 = arith.constant 0 : index
    %c17_23 = arith.constant 17 : index
    %c0_24 = arith.constant 0 : index
    %11 = vector.load %arg9[%c0_22, %c17_23, %c0_24] : memref<18x18x8xf32, #tpu.memory_space<vmem>>, vector<18x1x8xf32>
    tpu.vector_store %arg9[%c0_22, %c17_23, %c0_24], %7 {strides = array<i32>} : memref<18x18x8xf32, #tpu.memory_space<vmem>>, vector<18x1x8xf32>,
    %c0_25 = arith.constant 0 : index
    %c0_26 = arith.constant 0 : index
    %c0_27 = arith.constant 0 : index
    %c0_28 = arith.constant 0 : index
    %12 = vector.load %arg1[%c0_25, %c0_26, %c0_27, %c0_28] : memref<1x16x16x4xf32, #tpu.memory_space<vmem>>, vector<1x16x16x4xf32>
    %13 = vector.shape_cast %12 : vector<1x16x16x4xf32> to vector<16x16x4xf32>
    %c1 = arith.constant 1 : index
    %c1_29 = arith.constant 1 : index
    %c0_30 = arith.constant 0 : index
    %14 = vector.load %arg8[%c1, %c1_29, %c0_30] : memref<18x18x4xf32, #tpu.memory_space<vmem>>, vector<16x16x4xf32>
    tpu.vector_store %arg8[%c1, %c1_29, %c0_30], %13 {strides = array<i32>} : memref<18x18x4xf32, #tpu.memory_space<vmem>>, vector<16x16x4xf32>,
    %c0_31 = arith.constant 0 : index
    %c0_32 = arith.constant 0 : index
    %15 = vector.load %arg2[%c0_31, %c0_32] : memref<36x8xbf16, #tpu.memory_space<vmem>>, vector<36x8xbf16>
    %c0_33 = arith.constant 0 : index
    %c0_34 = arith.constant 0 : index
    %c0_35 = arith.constant 0 : index
    %16 = vector.load %arg8[%c0_33, %c0_34, %c0_35] : memref<18x18x4xf32, #tpu.memory_space<vmem>>, vector<16x16x4xf32>
    %17 = vector.shape_cast %16 : vector<16x16x4xf32> to vector<256x4xf32>
    %c0_36 = arith.constant 0 : index
    %c0_37 = arith.constant 0 : index
    %18 = vector.load %arg11[%c0_36, %c0_37] : memref<256x72xf32, #tpu.memory_space<vmem>>, vector<256x4xf32>
    tpu.vector_store %arg11[%c0_36, %c0_37], %17 {strides = array<i32>} : memref<256x72xf32, #tpu.memory_space<vmem>>, vector<256x4xf32>,
    %c0_38 = arith.constant 0 : index
    %c1_39 = arith.constant 1 : index
    %c0_40 = arith.constant 0 : index
    %19 = vector.load %arg8[%c0_38, %c1_39, %c0_40] : memref<18x18x4xf32, #tpu.memory_space<vmem>>, vector<16x16x4xf32>
    %20 = vector.shape_cast %19 : vector<16x16x4xf32> to vector<256x4xf32>
    %c0_41 = arith.constant 0 : index
    %c4 = arith.constant 4 : index
    %21 = vector.load %arg11[%c0_41, %c4] : memref<256x72xf32, #tpu.memory_space<vmem>>, vector<256x4xf32>
    tpu.vector_store %arg11[%c0_41, %c4], %20 {strides = array<i32>} : memref<256x72xf32, #tpu.memory_space<vmem>>, vector<256x4xf32>,
    %c0_42 = arith.constant 0 : index
    %c2 = arith.constant 2 : index
    %c0_43 = arith.constant 0 : index
    %22 = vector.load %arg8[%c0_42, %c2, %c0_43] : memref<18x18x4xf32, #tpu.memory_space<vmem>>, vector<16x16x4xf32>
    %23 = vector.shape_cast %22 : vector<16x16x4xf32> to vector<256x4xf32>
    %c0_44 = arith.constant 0 : index
    %c8 = arith.constant 8 : index
    %24 = vector.load %arg11[%c0_44, %c8] : memref<256x72xf32, #tpu.memory_space<vmem>>, vector<256x4xf32>
    tpu.vector_store %arg11[%c0_44, %c8], %23 {strides = array<i32>} : memref<256x72xf32, #tpu.memory_space<vmem>>, vector<256x4xf32>,
    %c1_45 = arith.constant 1 : index
    %c0_46 = arith.constant 0 : index
    %c0_47 = arith.constant 0 : index
    %25 = vector.load %arg8[%c1_45, %c0_46, %c0_47] : memref<18x18x4xf32, #tpu.memory_space<vmem>>, vector<16x16x4xf32>
    %26 = vector.shape_cast %25 : vector<16x16x4xf32> to vector<256x4xf32>
    %c0_48 = arith.constant 0 : index
    %c12 = arith.constant 12 : index
    %27 = vector.load %arg11[%c0_48, %c12] : memref<256x72xf32, #tpu.memory_space<vmem>>, vector<256x4xf32>
    tpu.vector_store %arg11[%c0_48, %c12], %26 {strides = array<i32>} : memref<256x72xf32, #tpu.memory_space<vmem>>, vector<256x4xf32>,
    %c1_49 = arith.constant 1 : index
    %c1_50 = arith.constant 1 : index
    %c0_51 = arith.constant 0 : index
    %28 = vector.load %arg8[%c1_49, %c1_50, %c0_51] : memref<18x18x4xf32, #tpu.memory_space<vmem>>, vector<16x16x4xf32>
    %29 = vector.shape_cast %28 : vector<16x16x4xf32> to vector<256x4xf32>
    %c0_52 = arith.constant 0 : index
    %c16 = arith.constant 16 : index
    %30 = vector.load %arg11[%c0_52, %c16] : memref<256x72xf32, #tpu.memory_space<vmem>>, vector<256x4xf32>
    tpu.vector_store %arg11[%c0_52, %c16], %29 {strides = array<i32>} : memref<256x72xf32, #tpu.memory_space<vmem>>, vector<256x4xf32>,
    %c1_53 = arith.constant 1 : index
    %c2_54 = arith.constant 2 : index
    %c0_55 = arith.constant 0 : index
    %31 = vector.load %arg8[%c1_53, %c2_54, %c0_55] : memref<18x18x4xf32, #tpu.memory_space<vmem>>, vector<16x16x4xf32>
    %32 = vector.shape_cast %31 : vector<16x16x4xf32> to vector<256x4xf32>
    %c0_56 = arith.constant 0 : index
    %c20 = arith.constant 20 : index
    %33 = vector.load %arg11[%c0_56, %c20] : memref<256x72xf32, #tpu.memory_space<vmem>>, vector<256x4xf32>
    tpu.vector_store %arg11[%c0_56, %c20], %32 {strides = array<i32>} : memref<256x72xf32, #tpu.memory_space<vmem>>, vector<256x4xf32>,
    %c2_57 = arith.constant 2 : index
    %c0_58 = arith.constant 0 : index
    %c0_59 = arith.constant 0 : index
    %34 = vector.load %arg8[%c2_57, %c0_58, %c0_59] : memref<18x18x4xf32, #tpu.memory_space<vmem>>, vector<16x16x4xf32>
    %35 = vector.shape_cast %34 : vector<16x16x4xf32> to vector<256x4xf32>
    %c0_60 = arith.constant 0 : index
    %c24 = arith.constant 24 : index
    %36 = vector.load %arg11[%c0_60, %c24] : memref<256x72xf32, #tpu.memory_space<vmem>>, vector<256x4xf32>
    tpu.vector_store %arg11[%c0_60, %c24], %35 {strides = array<i32>} : memref<256x72xf32, #tpu.memory_space<vmem>>, vector<256x4xf32>,
    %c2_61 = arith.constant 2 : index
    %c1_62 = arith.constant 1 : index
    %c0_63 = arith.constant 0 : index
    %37 = vector.load %arg8[%c2_61, %c1_62, %c0_63] : memref<18x18x4xf32, #tpu.memory_space<vmem>>, vector<16x16x4xf32>
    %38 = vector.shape_cast %37 : vector<16x16x4xf32> to vector<256x4xf32>
    %c0_64 = arith.constant 0 : index
    %c28 = arith.constant 28 : index
    %39 = vector.load %arg11[%c0_64, %c28] : memref<256x72xf32, #tpu.memory_space<vmem>>, vector<256x4xf32>
    tpu.vector_store %arg11[%c0_64, %c28], %38 {strides = array<i32>} : memref<256x72xf32, #tpu.memory_space<vmem>>, vector<256x4xf32>,
    %c2_65 = arith.constant 2 : index
    %c2_66 = arith.constant 2 : index
    %c0_67 = arith.constant 0 : index
    %40 = vector.load %arg8[%c2_65, %c2_66, %c0_67] : memref<18x18x4xf32, #tpu.memory_space<vmem>>, vector<16x16x4xf32>
    %41 = vector.shape_cast %40 : vector<16x16x4xf32> to vector<256x4xf32>
    %c0_68 = arith.constant 0 : index
    %c32 = arith.constant 32 : index
    %42 = vector.load %arg11[%c0_68, %c32] : memref<256x72xf32, #tpu.memory_space<vmem>>, vector<256x4xf32>
    tpu.vector_store %arg11[%c0_68, %c32], %41 {strides = array<i32>} : memref<256x72xf32, #tpu.memory_space<vmem>>, vector<256x4xf32>,
    %c0_69 = arith.constant 0 : index
    %c0_70 = arith.constant 0 : index
    %43 = vector.load %arg11[%c0_69, %c0_70] : memref<256x72xf32, #tpu.memory_space<vmem>>, vector<256x36xf32>
    %44 = arith.truncf %43 : vector<256x36xf32> to vector<256x36xbf16>
    %cst_71 = arith.constant dense<0.000000e+00> : vector<256x8xf32>
    %45 = tpu.matmul %44, %15, %cst_71 {dimension_numbers = #tpu.dot_dimension_numbers<[1], [0], [0], [1], [0, 0, 1, 1], [], []>} : vector<256x36xbf16>, vector<36x8xbf16>, vector<256x8xf32> -> vector<256x8xf32>
    %c0_72 = arith.constant 0 : index
    %c0_73 = arith.constant 0 : index
    %46 = vector.load %arg5[%c0_72, %c0_73] : memref<6x8xf32, #tpu.memory_space<vmem>>, vector<1x8xf32>
    %47 = vector.broadcast %46 : vector<1x8xf32> to vector<256x8xf32>
    %48 = arith.addf %45, %47 : vector<256x8xf32>
    %cst_74 = arith.constant 0.000000e+00 : f32
    %49 = vector.broadcast %cst_74 : f32 to vector<256x8xf32>
    %50 = arith.maximumf %48, %49 : vector<256x8xf32>
    %51 = vector.shape_cast %50 : vector<256x8xf32> to vector<16x16x8xf32>
    %c1_75 = arith.constant 1 : index
    %c1_76 = arith.constant 1 : index
    %c0_77 = arith.constant 0 : index
    %52 = vector.load %arg9[%c1_75, %c1_76, %c0_77] : memref<18x18x8xf32, #tpu.memory_space<vmem>>, vector<16x16x8xf32>
    tpu.vector_store %arg9[%c1_75, %c1_76, %c0_77], %51 {strides = array<i32>} : memref<18x18x8xf32, #tpu.memory_space<vmem>>, vector<16x16x8xf32>,
    %c0_78 = arith.constant 0 : index
    %c0_79 = arith.constant 0 : index
    %c0_80 = arith.constant 0 : index
    %53 = vector.load %arg3[%c0_78, %c0_79, %c0_80] : memref<3x72x8xbf16, #tpu.memory_space<vmem>>, vector<1x72x8xbf16>
    %54 = vector.shape_cast %53 : vector<1x72x8xbf16> to vector<72x8xbf16>
    %c0_81 = arith.constant 0 : index
    %c0_82 = arith.constant 0 : index
    %c0_83 = arith.constant 0 : index
    %55 = vector.load %arg9[%c0_81, %c0_82, %c0_83] : memref<18x18x8xf32, #tpu.memory_space<vmem>>, vector<16x16x8xf32>
    %56 = vector.shape_cast %55 : vector<16x16x8xf32> to vector<256x8xf32>
    %c0_84 = arith.constant 0 : index
    %c0_85 = arith.constant 0 : index
    %57 = vector.load %arg11[%c0_84, %c0_85] : memref<256x72xf32, #tpu.memory_space<vmem>>, vector<256x8xf32>
    tpu.vector_store %arg11[%c0_84, %c0_85], %56 {strides = array<i32>} : memref<256x72xf32, #tpu.memory_space<vmem>>, vector<256x8xf32>,
    %c0_86 = arith.constant 0 : index
    %c1_87 = arith.constant 1 : index
    %c0_88 = arith.constant 0 : index
    %58 = vector.load %arg9[%c0_86, %c1_87, %c0_88] : memref<18x18x8xf32, #tpu.memory_space<vmem>>, vector<16x16x8xf32>
    %59 = vector.shape_cast %58 : vector<16x16x8xf32> to vector<256x8xf32>
    %c0_89 = arith.constant 0 : index
    %c8_90 = arith.constant 8 : index
    %60 = vector.load %arg11[%c0_89, %c8_90] : memref<256x72xf32, #tpu.memory_space<vmem>>, vector<256x8xf32>
    tpu.vector_store %arg11[%c0_89, %c8_90], %59 {strides = array<i32>} : memref<256x72xf32, #tpu.memory_space<vmem>>, vector<256x8xf32>,
    %c0_91 = arith.constant 0 : index
    %c2_92 = arith.constant 2 : index
    %c0_93 = arith.constant 0 : index
    %61 = vector.load %arg9[%c0_91, %c2_92, %c0_93] : memref<18x18x8xf32, #tpu.memory_space<vmem>>, vector<16x16x8xf32>
    %62 = vector.shape_cast %61 : vector<16x16x8xf32> to vector<256x8xf32>
    %c0_94 = arith.constant 0 : index
    %c16_95 = arith.constant 16 : index
    %63 = vector.load %arg11[%c0_94, %c16_95] : memref<256x72xf32, #tpu.memory_space<vmem>>, vector<256x8xf32>
    tpu.vector_store %arg11[%c0_94, %c16_95], %62 {strides = array<i32>} : memref<256x72xf32, #tpu.memory_space<vmem>>, vector<256x8xf32>,
    %c1_96 = arith.constant 1 : index
    %c0_97 = arith.constant 0 : index
    %c0_98 = arith.constant 0 : index
    %64 = vector.load %arg9[%c1_96, %c0_97, %c0_98] : memref<18x18x8xf32, #tpu.memory_space<vmem>>, vector<16x16x8xf32>
    %65 = vector.shape_cast %64 : vector<16x16x8xf32> to vector<256x8xf32>
    %c0_99 = arith.constant 0 : index
    %c24_100 = arith.constant 24 : index
    %66 = vector.load %arg11[%c0_99, %c24_100] : memref<256x72xf32, #tpu.memory_space<vmem>>, vector<256x8xf32>
    tpu.vector_store %arg11[%c0_99, %c24_100], %65 {strides = array<i32>} : memref<256x72xf32, #tpu.memory_space<vmem>>, vector<256x8xf32>,
    %c1_101 = arith.constant 1 : index
    %c1_102 = arith.constant 1 : index
    %c0_103 = arith.constant 0 : index
    %67 = vector.load %arg9[%c1_101, %c1_102, %c0_103] : memref<18x18x8xf32, #tpu.memory_space<vmem>>, vector<16x16x8xf32>
    %68 = vector.shape_cast %67 : vector<16x16x8xf32> to vector<256x8xf32>
    %c0_104 = arith.constant 0 : index
    %c32_105 = arith.constant 32 : index
    %69 = vector.load %arg11[%c0_104, %c32_105] : memref<256x72xf32, #tpu.memory_space<vmem>>, vector<256x8xf32>
    tpu.vector_store %arg11[%c0_104, %c32_105], %68 {strides = array<i32>} : memref<256x72xf32, #tpu.memory_space<vmem>>, vector<256x8xf32>,
    %c1_106 = arith.constant 1 : index
    %c2_107 = arith.constant 2 : index
    %c0_108 = arith.constant 0 : index
    %70 = vector.load %arg9[%c1_106, %c2_107, %c0_108] : memref<18x18x8xf32, #tpu.memory_space<vmem>>, vector<16x16x8xf32>
    %71 = vector.shape_cast %70 : vector<16x16x8xf32> to vector<256x8xf32>
    %c0_109 = arith.constant 0 : index
    %c40 = arith.constant 40 : index
    %72 = vector.load %arg11[%c0_109, %c40] : memref<256x72xf32, #tpu.memory_space<vmem>>, vector<256x8xf32>
    tpu.vector_store %arg11[%c0_109, %c40], %71 {strides = array<i32>} : memref<256x72xf32, #tpu.memory_space<vmem>>, vector<256x8xf32>,
    %c2_110 = arith.constant 2 : index
    %c0_111 = arith.constant 0 : index
    %c0_112 = arith.constant 0 : index
    %73 = vector.load %arg9[%c2_110, %c0_111, %c0_112] : memref<18x18x8xf32, #tpu.memory_space<vmem>>, vector<16x16x8xf32>
    %74 = vector.shape_cast %73 : vector<16x16x8xf32> to vector<256x8xf32>
    %c0_113 = arith.constant 0 : index
    %c48 = arith.constant 48 : index
    %75 = vector.load %arg11[%c0_113, %c48] : memref<256x72xf32, #tpu.memory_space<vmem>>, vector<256x8xf32>
    tpu.vector_store %arg11[%c0_113, %c48], %74 {strides = array<i32>} : memref<256x72xf32, #tpu.memory_space<vmem>>, vector<256x8xf32>,
    %c2_114 = arith.constant 2 : index
    %c1_115 = arith.constant 1 : index
    %c0_116 = arith.constant 0 : index
    %76 = vector.load %arg9[%c2_114, %c1_115, %c0_116] : memref<18x18x8xf32, #tpu.memory_space<vmem>>, vector<16x16x8xf32>
    %77 = vector.shape_cast %76 : vector<16x16x8xf32> to vector<256x8xf32>
    %c0_117 = arith.constant 0 : index
    %c56 = arith.constant 56 : index
    %78 = vector.load %arg11[%c0_117, %c56] : memref<256x72xf32, #tpu.memory_space<vmem>>, vector<256x8xf32>
    tpu.vector_store %arg11[%c0_117, %c56], %77 {strides = array<i32>} : memref<256x72xf32, #tpu.memory_space<vmem>>, vector<256x8xf32>,
    %c2_118 = arith.constant 2 : index
    %c2_119 = arith.constant 2 : index
    %c0_120 = arith.constant 0 : index
    %79 = vector.load %arg9[%c2_118, %c2_119, %c0_120] : memref<18x18x8xf32, #tpu.memory_space<vmem>>, vector<16x16x8xf32>
    %80 = vector.shape_cast %79 : vector<16x16x8xf32> to vector<256x8xf32>
    %c0_121 = arith.constant 0 : index
    %c64 = arith.constant 64 : index
    %81 = vector.load %arg11[%c0_121, %c64] : memref<256x72xf32, #tpu.memory_space<vmem>>, vector<256x8xf32>
    tpu.vector_store %arg11[%c0_121, %c64], %80 {strides = array<i32>} : memref<256x72xf32, #tpu.memory_space<vmem>>, vector<256x8xf32>,
    %c0_122 = arith.constant 0 : index
    %c0_123 = arith.constant 0 : index
    %82 = vector.load %arg11[%c0_122, %c0_123] : memref<256x72xf32, #tpu.memory_space<vmem>>, vector<256x72xf32>
    %83 = arith.truncf %82 : vector<256x72xf32> to vector<256x72xbf16>
    %cst_124 = arith.constant dense<0.000000e+00> : vector<256x8xf32>
    %84 = tpu.matmul %83, %54, %cst_124 {dimension_numbers = #tpu.dot_dimension_numbers<[1], [0], [0], [1], [0, 0, 1, 1], [], []>} : vector<256x72xbf16>, vector<72x8xbf16>, vector<256x8xf32> -> vector<256x8xf32>
    %c1_125 = arith.constant 1 : index
    %c0_126 = arith.constant 0 : index
    %85 = vector.load %arg5[%c1_125, %c0_126] : memref<6x8xf32, #tpu.memory_space<vmem>>, vector<1x8xf32>
    %86 = vector.broadcast %85 : vector<1x8xf32> to vector<256x8xf32>
    %87 = arith.addf %84, %86 : vector<256x8xf32>
    %c0_127 = arith.constant 0 : index
    %c0_128 = arith.constant 0 : index
    %c0_129 = arith.constant 0 : index
    %c0_130 = arith.constant 0 : index
    %88 = vector.load %arg1[%c0_127, %c0_128, %c0_129, %c0_130] : memref<1x16x16x4xf32, #tpu.memory_space<vmem>>, vector<1x16x16x4xf32>
    %89 = vector.shape_cast %88 : vector<1x16x16x4xf32> to vector<16x16x4xf32>
    %90 = vector.shape_cast %89 : vector<16x16x4xf32> to vector<256x4xf32>
    %91 = arith.truncf %90 : vector<256x4xf32> to vector<256x4xbf16>
    %c0_131 = arith.constant 0 : index
    %c0_132 = arith.constant 0 : index
    %92 = vector.load %arg6[%c0_131, %c0_132] : memref<4x8xbf16, #tpu.memory_space<vmem>>, vector<4x8xbf16>
    %cst_133 = arith.constant dense<0.000000e+00> : vector<256x8xf32>
    %93 = tpu.matmul %91, %92, %cst_133 {dimension_numbers = #tpu.dot_dimension_numbers<[1], [0], [0], [1], [0, 0, 1, 1], [], []>} : vector<256x4xbf16>, vector<4x8xbf16>, vector<256x8xf32> -> vector<256x8xf32>
    %c2_134 = arith.constant 2 : index
    %c0_135 = arith.constant 0 : index
    %94 = vector.load %arg5[%c2_134, %c0_135] : memref<6x8xf32, #tpu.memory_space<vmem>>, vector<1x8xf32>
    %95 = vector.broadcast %94 : vector<1x8xf32> to vector<256x8xf32>
    %96 = arith.addf %93, %95 : vector<256x8xf32>
    %97 = arith.addf %87, %96 : vector<256x8xf32>
    %cst_136 = arith.constant 0.000000e+00 : f32
    %98 = vector.broadcast %cst_136 : f32 to vector<256x8xf32>
    %99 = arith.maximumf %97, %98 : vector<256x8xf32>
    %c0_137 = arith.constant 0 : index
    %c0_138 = arith.constant 0 : index
    %100 = vector.load %arg10[%c0_137, %c0_138] : memref<256x16xf32, #tpu.memory_space<vmem>>, vector<256x8xf32>
    tpu.vector_store %arg10[%c0_137, %c0_138], %99 {strides = array<i32>} : memref<256x16xf32, #tpu.memory_space<vmem>>, vector<256x8xf32>,
    %101 = vector.shape_cast %99 : vector<256x8xf32> to vector<16x16x8xf32>
    %c1_139 = arith.constant 1 : index
    %c1_140 = arith.constant 1 : index
    %c0_141 = arith.constant 0 : index
    %102 = vector.load %arg9[%c1_139, %c1_140, %c0_141] : memref<18x18x8xf32, #tpu.memory_space<vmem>>, vector<16x16x8xf32>
    tpu.vector_store %arg9[%c1_139, %c1_140, %c0_141], %101 {strides = array<i32>} : memref<18x18x8xf32, #tpu.memory_space<vmem>>, vector<16x16x8xf32>,
    %c1_142 = arith.constant 1 : index
    %c0_143 = arith.constant 0 : index
    %c0_144 = arith.constant 0 : index
    %103 = vector.load %arg3[%c1_142, %c0_143, %c0_144] : memref<3x72x8xbf16, #tpu.memory_space<vmem>>, vector<1x72x8xbf16>
    %104 = vector.shape_cast %103 : vector<1x72x8xbf16> to vector<72x8xbf16>
    %c0_145 = arith.constant 0 : index
    %c0_146 = arith.constant 0 : index
    %c0_147 = arith.constant 0 : index
    %105 = vector.load %arg9[%c0_145, %c0_146, %c0_147] : memref<18x18x8xf32, #tpu.memory_space<vmem>>, vector<16x16x8xf32>
    %106 = vector.shape_cast %105 : vector<16x16x8xf32> to vector<256x8xf32>
    %c0_148 = arith.constant 0 : index
    %c0_149 = arith.constant 0 : index
    %107 = vector.load %arg11[%c0_148, %c0_149] : memref<256x72xf32, #tpu.memory_space<vmem>>, vector<256x8xf32>
    tpu.vector_store %arg11[%c0_148, %c0_149], %106 {strides = array<i32>} : memref<256x72xf32, #tpu.memory_space<vmem>>, vector<256x8xf32>,
    %c0_150 = arith.constant 0 : index
    %c1_151 = arith.constant 1 : index
    %c0_152 = arith.constant 0 : index
    %108 = vector.load %arg9[%c0_150, %c1_151, %c0_152] : memref<18x18x8xf32, #tpu.memory_space<vmem>>, vector<16x16x8xf32>
    %109 = vector.shape_cast %108 : vector<16x16x8xf32> to vector<256x8xf32>
    %c0_153 = arith.constant 0 : index
    %c8_154 = arith.constant 8 : index
    %110 = vector.load %arg11[%c0_153, %c8_154] : memref<256x72xf32, #tpu.memory_space<vmem>>, vector<256x8xf32>
    tpu.vector_store %arg11[%c0_153, %c8_154], %109 {strides = array<i32>} : memref<256x72xf32, #tpu.memory_space<vmem>>, vector<256x8xf32>,
    %c0_155 = arith.constant 0 : index
    %c2_156 = arith.constant 2 : index
    %c0_157 = arith.constant 0 : index
    %111 = vector.load %arg9[%c0_155, %c2_156, %c0_157] : memref<18x18x8xf32, #tpu.memory_space<vmem>>, vector<16x16x8xf32>
    %112 = vector.shape_cast %111 : vector<16x16x8xf32> to vector<256x8xf32>
    %c0_158 = arith.constant 0 : index
    %c16_159 = arith.constant 16 : index
    %113 = vector.load %arg11[%c0_158, %c16_159] : memref<256x72xf32, #tpu.memory_space<vmem>>, vector<256x8xf32>
    tpu.vector_store %arg11[%c0_158, %c16_159], %112 {strides = array<i32>} : memref<256x72xf32, #tpu.memory_space<vmem>>, vector<256x8xf32>,
    %c1_160 = arith.constant 1 : index
    %c0_161 = arith.constant 0 : index
    %c0_162 = arith.constant 0 : index
    %114 = vector.load %arg9[%c1_160, %c0_161, %c0_162] : memref<18x18x8xf32, #tpu.memory_space<vmem>>, vector<16x16x8xf32>
    %115 = vector.shape_cast %114 : vector<16x16x8xf32> to vector<256x8xf32>
    %c0_163 = arith.constant 0 : index
    %c24_164 = arith.constant 24 : index
    %116 = vector.load %arg11[%c0_163, %c24_164] : memref<256x72xf32, #tpu.memory_space<vmem>>, vector<256x8xf32>
    tpu.vector_store %arg11[%c0_163, %c24_164], %115 {strides = array<i32>} : memref<256x72xf32, #tpu.memory_space<vmem>>, vector<256x8xf32>,
    %c1_165 = arith.constant 1 : index
    %c1_166 = arith.constant 1 : index
    %c0_167 = arith.constant 0 : index
    %117 = vector.load %arg9[%c1_165, %c1_166, %c0_167] : memref<18x18x8xf32, #tpu.memory_space<vmem>>, vector<16x16x8xf32>
    %118 = vector.shape_cast %117 : vector<16x16x8xf32> to vector<256x8xf32>
    %c0_168 = arith.constant 0 : index
    %c32_169 = arith.constant 32 : index
    %119 = vector.load %arg11[%c0_168, %c32_169] : memref<256x72xf32, #tpu.memory_space<vmem>>, vector<256x8xf32>
    tpu.vector_store %arg11[%c0_168, %c32_169], %118 {strides = array<i32>} : memref<256x72xf32, #tpu.memory_space<vmem>>, vector<256x8xf32>,
    %c1_170 = arith.constant 1 : index
    %c2_171 = arith.constant 2 : index
    %c0_172 = arith.constant 0 : index
    %120 = vector.load %arg9[%c1_170, %c2_171, %c0_172] : memref<18x18x8xf32, #tpu.memory_space<vmem>>, vector<16x16x8xf32>
    %121 = vector.shape_cast %120 : vector<16x16x8xf32> to vector<256x8xf32>
    %c0_173 = arith.constant 0 : index
    %c40_174 = arith.constant 40 : index
    %122 = vector.load %arg11[%c0_173, %c40_174] : memref<256x72xf32, #tpu.memory_space<vmem>>, vector<256x8xf32>
    tpu.vector_store %arg11[%c0_173, %c40_174], %121 {strides = array<i32>} : memref<256x72xf32, #tpu.memory_space<vmem>>, vector<256x8xf32>,
    %c2_175 = arith.constant 2 : index
    %c0_176 = arith.constant 0 : index
    %c0_177 = arith.constant 0 : index
    %123 = vector.load %arg9[%c2_175, %c0_176, %c0_177] : memref<18x18x8xf32, #tpu.memory_space<vmem>>, vector<16x16x8xf32>
    %124 = vector.shape_cast %123 : vector<16x16x8xf32> to vector<256x8xf32>
    %c0_178 = arith.constant 0 : index
    %c48_179 = arith.constant 48 : index
    %125 = vector.load %arg11[%c0_178, %c48_179] : memref<256x72xf32, #tpu.memory_space<vmem>>, vector<256x8xf32>
    tpu.vector_store %arg11[%c0_178, %c48_179], %124 {strides = array<i32>} : memref<256x72xf32, #tpu.memory_space<vmem>>, vector<256x8xf32>,
    %c2_180 = arith.constant 2 : index
    %c1_181 = arith.constant 1 : index
    %c0_182 = arith.constant 0 : index
    %126 = vector.load %arg9[%c2_180, %c1_181, %c0_182] : memref<18x18x8xf32, #tpu.memory_space<vmem>>, vector<16x16x8xf32>
    %127 = vector.shape_cast %126 : vector<16x16x8xf32> to vector<256x8xf32>
    %c0_183 = arith.constant 0 : index
    %c56_184 = arith.constant 56 : index
    %128 = vector.load %arg11[%c0_183, %c56_184] : memref<256x72xf32, #tpu.memory_space<vmem>>, vector<256x8xf32>
    tpu.vector_store %arg11[%c0_183, %c56_184], %127 {strides = array<i32>} : memref<256x72xf32, #tpu.memory_space<vmem>>, vector<256x8xf32>,
    %c2_185 = arith.constant 2 : index
    %c2_186 = arith.constant 2 : index
    %c0_187 = arith.constant 0 : index
    %129 = vector.load %arg9[%c2_185, %c2_186, %c0_187] : memref<18x18x8xf32, #tpu.memory_space<vmem>>, vector<16x16x8xf32>
    %130 = vector.shape_cast %129 : vector<16x16x8xf32> to vector<256x8xf32>
    %c0_188 = arith.constant 0 : index
    %c64_189 = arith.constant 64 : index
    %131 = vector.load %arg11[%c0_188, %c64_189] : memref<256x72xf32, #tpu.memory_space<vmem>>, vector<256x8xf32>
    tpu.vector_store %arg11[%c0_188, %c64_189], %130 {strides = array<i32>} : memref<256x72xf32, #tpu.memory_space<vmem>>, vector<256x8xf32>,
    %c0_190 = arith.constant 0 : index
    %c0_191 = arith.constant 0 : index
    %132 = vector.load %arg11[%c0_190, %c0_191] : memref<256x72xf32, #tpu.memory_space<vmem>>, vector<256x72xf32>
    %133 = arith.truncf %132 : vector<256x72xf32> to vector<256x72xbf16>
    %cst_192 = arith.constant dense<0.000000e+00> : vector<256x8xf32>
    %134 = tpu.matmul %133, %104, %cst_192 {dimension_numbers = #tpu.dot_dimension_numbers<[1], [0], [0], [1], [0, 0, 1, 1], [], []>} : vector<256x72xbf16>, vector<72x8xbf16>, vector<256x8xf32> -> vector<256x8xf32>
    %c3 = arith.constant 3 : index
    %c0_193 = arith.constant 0 : index
    %135 = vector.load %arg5[%c3, %c0_193] : memref<6x8xf32, #tpu.memory_space<vmem>>, vector<1x8xf32>
    %136 = vector.broadcast %135 : vector<1x8xf32> to vector<256x8xf32>
    %137 = arith.addf %134, %136 : vector<256x8xf32>
    %cst_194 = arith.constant 0.000000e+00 : f32
    %138 = vector.broadcast %cst_194 : f32 to vector<256x8xf32>
    %139 = arith.maximumf %137, %138 : vector<256x8xf32>
    %140 = vector.shape_cast %139 : vector<256x8xf32> to vector<16x16x8xf32>
    %c1_195 = arith.constant 1 : index
    %c1_196 = arith.constant 1 : index
    %c0_197 = arith.constant 0 : index
    %141 = vector.load %arg9[%c1_195, %c1_196, %c0_197] : memref<18x18x8xf32, #tpu.memory_space<vmem>>, vector<16x16x8xf32>
    tpu.vector_store %arg9[%c1_195, %c1_196, %c0_197], %140 {strides = array<i32>} : memref<18x18x8xf32, #tpu.memory_space<vmem>>, vector<16x16x8xf32>,
    %c2_198 = arith.constant 2 : index
    %c0_199 = arith.constant 0 : index
    %c0_200 = arith.constant 0 : index
    %142 = vector.load %arg3[%c2_198, %c0_199, %c0_200] : memref<3x72x8xbf16, #tpu.memory_space<vmem>>, vector<1x72x8xbf16>
    %143 = vector.shape_cast %142 : vector<1x72x8xbf16> to vector<72x8xbf16>
    %c0_201 = arith.constant 0 : index
    %c0_202 = arith.constant 0 : index
    %c0_203 = arith.constant 0 : index
    %144 = vector.load %arg9[%c0_201, %c0_202, %c0_203] : memref<18x18x8xf32, #tpu.memory_space<vmem>>, vector<16x16x8xf32>
    %145 = vector.shape_cast %144 : vector<16x16x8xf32> to vector<256x8xf32>
    %c0_204 = arith.constant 0 : index
    %c0_205 = arith.constant 0 : index
    %146 = vector.load %arg11[%c0_204, %c0_205] : memref<256x72xf32, #tpu.memory_space<vmem>>, vector<256x8xf32>
    tpu.vector_store %arg11[%c0_204, %c0_205], %145 {strides = array<i32>} : memref<256x72xf32, #tpu.memory_space<vmem>>, vector<256x8xf32>,
    %c0_206 = arith.constant 0 : index
    %c1_207 = arith.constant 1 : index
    %c0_208 = arith.constant 0 : index
    %147 = vector.load %arg9[%c0_206, %c1_207, %c0_208] : memref<18x18x8xf32, #tpu.memory_space<vmem>>, vector<16x16x8xf32>
    %148 = vector.shape_cast %147 : vector<16x16x8xf32> to vector<256x8xf32>
    %c0_209 = arith.constant 0 : index
    %c8_210 = arith.constant 8 : index
    %149 = vector.load %arg11[%c0_209, %c8_210] : memref<256x72xf32, #tpu.memory_space<vmem>>, vector<256x8xf32>
    tpu.vector_store %arg11[%c0_209, %c8_210], %148 {strides = array<i32>} : memref<256x72xf32, #tpu.memory_space<vmem>>, vector<256x8xf32>,
    %c0_211 = arith.constant 0 : index
    %c2_212 = arith.constant 2 : index
    %c0_213 = arith.constant 0 : index
    %150 = vector.load %arg9[%c0_211, %c2_212, %c0_213] : memref<18x18x8xf32, #tpu.memory_space<vmem>>, vector<16x16x8xf32>
    %151 = vector.shape_cast %150 : vector<16x16x8xf32> to vector<256x8xf32>
    %c0_214 = arith.constant 0 : index
    %c16_215 = arith.constant 16 : index
    %152 = vector.load %arg11[%c0_214, %c16_215] : memref<256x72xf32, #tpu.memory_space<vmem>>, vector<256x8xf32>
    tpu.vector_store %arg11[%c0_214, %c16_215], %151 {strides = array<i32>} : memref<256x72xf32, #tpu.memory_space<vmem>>, vector<256x8xf32>,
    %c1_216 = arith.constant 1 : index
    %c0_217 = arith.constant 0 : index
    %c0_218 = arith.constant 0 : index
    %153 = vector.load %arg9[%c1_216, %c0_217, %c0_218] : memref<18x18x8xf32, #tpu.memory_space<vmem>>, vector<16x16x8xf32>
    %154 = vector.shape_cast %153 : vector<16x16x8xf32> to vector<256x8xf32>
    %c0_219 = arith.constant 0 : index
    %c24_220 = arith.constant 24 : index
    %155 = vector.load %arg11[%c0_219, %c24_220] : memref<256x72xf32, #tpu.memory_space<vmem>>, vector<256x8xf32>
    tpu.vector_store %arg11[%c0_219, %c24_220], %154 {strides = array<i32>} : memref<256x72xf32, #tpu.memory_space<vmem>>, vector<256x8xf32>,
    %c1_221 = arith.constant 1 : index
    %c1_222 = arith.constant 1 : index
    %c0_223 = arith.constant 0 : index
    %156 = vector.load %arg9[%c1_221, %c1_222, %c0_223] : memref<18x18x8xf32, #tpu.memory_space<vmem>>, vector<16x16x8xf32>
    %157 = vector.shape_cast %156 : vector<16x16x8xf32> to vector<256x8xf32>
    %c0_224 = arith.constant 0 : index
    %c32_225 = arith.constant 32 : index
    %158 = vector.load %arg11[%c0_224, %c32_225] : memref<256x72xf32, #tpu.memory_space<vmem>>, vector<256x8xf32>
    tpu.vector_store %arg11[%c0_224, %c32_225], %157 {strides = array<i32>} : memref<256x72xf32, #tpu.memory_space<vmem>>, vector<256x8xf32>,
    %c1_226 = arith.constant 1 : index
    %c2_227 = arith.constant 2 : index
    %c0_228 = arith.constant 0 : index
    %159 = vector.load %arg9[%c1_226, %c2_227, %c0_228] : memref<18x18x8xf32, #tpu.memory_space<vmem>>, vector<16x16x8xf32>
    %160 = vector.shape_cast %159 : vector<16x16x8xf32> to vector<256x8xf32>
    %c0_229 = arith.constant 0 : index
    %c40_230 = arith.constant 40 : index
    %161 = vector.load %arg11[%c0_229, %c40_230] : memref<256x72xf32, #tpu.memory_space<vmem>>, vector<256x8xf32>
    tpu.vector_store %arg11[%c0_229, %c40_230], %160 {strides = array<i32>} : memref<256x72xf32, #tpu.memory_space<vmem>>, vector<256x8xf32>,
    %c2_231 = arith.constant 2 : index
    %c0_232 = arith.constant 0 : index
    %c0_233 = arith.constant 0 : index
    %162 = vector.load %arg9[%c2_231, %c0_232, %c0_233] : memref<18x18x8xf32, #tpu.memory_space<vmem>>, vector<16x16x8xf32>
    %163 = vector.shape_cast %162 : vector<16x16x8xf32> to vector<256x8xf32>
    %c0_234 = arith.constant 0 : index
    %c48_235 = arith.constant 48 : index
    %164 = vector.load %arg11[%c0_234, %c48_235] : memref<256x72xf32, #tpu.memory_space<vmem>>, vector<256x8xf32>
    tpu.vector_store %arg11[%c0_234, %c48_235], %163 {strides = array<i32>} : memref<256x72xf32, #tpu.memory_space<vmem>>, vector<256x8xf32>,
    %c2_236 = arith.constant 2 : index
    %c1_237 = arith.constant 1 : index
    %c0_238 = arith.constant 0 : index
    %165 = vector.load %arg9[%c2_236, %c1_237, %c0_238] : memref<18x18x8xf32, #tpu.memory_space<vmem>>, vector<16x16x8xf32>
    %166 = vector.shape_cast %165 : vector<16x16x8xf32> to vector<256x8xf32>
    %c0_239 = arith.constant 0 : index
    %c56_240 = arith.constant 56 : index
    %167 = vector.load %arg11[%c0_239, %c56_240] : memref<256x72xf32, #tpu.memory_space<vmem>>, vector<256x8xf32>
    tpu.vector_store %arg11[%c0_239, %c56_240], %166 {strides = array<i32>} : memref<256x72xf32, #tpu.memory_space<vmem>>, vector<256x8xf32>,
    %c2_241 = arith.constant 2 : index
    %c2_242 = arith.constant 2 : index
    %c0_243 = arith.constant 0 : index
    %168 = vector.load %arg9[%c2_241, %c2_242, %c0_243] : memref<18x18x8xf32, #tpu.memory_space<vmem>>, vector<16x16x8xf32>
    %169 = vector.shape_cast %168 : vector<16x16x8xf32> to vector<256x8xf32>
    %c0_244 = arith.constant 0 : index
    %c64_245 = arith.constant 64 : index
    %170 = vector.load %arg11[%c0_244, %c64_245] : memref<256x72xf32, #tpu.memory_space<vmem>>, vector<256x8xf32>
    tpu.vector_store %arg11[%c0_244, %c64_245], %169 {strides = array<i32>} : memref<256x72xf32, #tpu.memory_space<vmem>>, vector<256x8xf32>,
    %c0_246 = arith.constant 0 : index
    %c0_247 = arith.constant 0 : index
    %171 = vector.load %arg11[%c0_246, %c0_247] : memref<256x72xf32, #tpu.memory_space<vmem>>, vector<256x72xf32>
    %172 = arith.truncf %171 : vector<256x72xf32> to vector<256x72xbf16>
    %cst_248 = arith.constant dense<0.000000e+00> : vector<256x8xf32>
    %173 = tpu.matmul %172, %143, %cst_248 {dimension_numbers = #tpu.dot_dimension_numbers<[1], [0], [0], [1], [0, 0, 1, 1], [], []>} : vector<256x72xbf16>, vector<72x8xbf16>, vector<256x8xf32> -> vector<256x8xf32>
    %c4_249 = arith.constant 4 : index
    %c0_250 = arith.constant 0 : index
    %174 = vector.load %arg5[%c4_249, %c0_250] : memref<6x8xf32, #tpu.memory_space<vmem>>, vector<1x8xf32>
    %175 = vector.broadcast %174 : vector<1x8xf32> to vector<256x8xf32>
    %176 = arith.addf %173, %175 : vector<256x8xf32>
    %c0_251 = arith.constant 0 : index
    %c0_252 = arith.constant 0 : index
    %177 = vector.load %arg10[%c0_251, %c0_252] : memref<256x16xf32, #tpu.memory_space<vmem>>, vector<256x8xf32>
    %178 = arith.addf %176, %177 : vector<256x8xf32>
    %cst_253 = arith.constant 0.000000e+00 : f32
    %179 = vector.broadcast %cst_253 : f32 to vector<256x8xf32>
    %180 = arith.maximumf %178, %179 : vector<256x8xf32>
    %c0_254 = arith.constant 0 : index
    %c8_255 = arith.constant 8 : index
    %181 = vector.load %arg10[%c0_254, %c8_255] : memref<256x16xf32, #tpu.memory_space<vmem>>, vector<256x8xf32>
    tpu.vector_store %arg10[%c0_254, %c8_255], %180 {strides = array<i32>} : memref<256x16xf32, #tpu.memory_space<vmem>>, vector<256x8xf32>,
    %c0_256 = arith.constant 0 : index
    %c0_257 = arith.constant 0 : index
    %182 = vector.load %arg10[%c0_256, %c0_257] : memref<256x16xf32, #tpu.memory_space<vmem>>, vector<256x16xf32>
    %183 = arith.truncf %182 : vector<256x16xf32> to vector<256x16xbf16>
    %c0_258 = arith.constant 0 : index
    %c0_259 = arith.constant 0 : index
    %184 = vector.load %arg4[%c0_258, %c0_259] : memref<16x8xbf16, #tpu.memory_space<vmem>>, vector<16x8xbf16>
    %cst_260 = arith.constant dense<0.000000e+00> : vector<256x8xf32>
    %185 = tpu.matmul %183, %184, %cst_260 {dimension_numbers = #tpu.dot_dimension_numbers<[1], [0], [0], [1], [0, 0, 1, 1], [], []>} : vector<256x16xbf16>, vector<16x8xbf16>, vector<256x8xf32> -> vector<256x8xf32>
    %c5 = arith.constant 5 : index
    %c0_261 = arith.constant 0 : index
    %186 = vector.load %arg5[%c5, %c0_261] : memref<6x8xf32, #tpu.memory_space<vmem>>, vector<1x8xf32>
    %187 = vector.broadcast %186 : vector<1x8xf32> to vector<256x8xf32>
    %188 = arith.addf %185, %187 : vector<256x8xf32>
    %cst_262 = arith.constant 0.000000e+00 : f32
    %189 = vector.broadcast %cst_262 : f32 to vector<256x8xf32>
    %190 = arith.maximumf %188, %189 : vector<256x8xf32>
    %c0_263 = arith.constant 0 : index
    %c0_264 = arith.constant 0 : index
    %c0_265 = arith.constant 0 : index
    %191 = vector.load %arg7[%c0_263, %c0_264, %c0_265] : memref<1x256x8xf32, #tpu.memory_space<vmem>>, vector<1x256x8xf32>
    %192 = vector.shape_cast %191 : vector<1x256x8xf32> to vector<256x8xf32>
    %193 = vector.shape_cast %190 : vector<256x8xf32> to vector<1x256x8xf32>
    tpu.vector_store %arg7[%c0_263, %c0_264, %c0_265], %193 {strides = array<i32>} : memref<1x256x8xf32, #tpu.memory_space<vmem>>, vector<1x256x8xf32>,
    return
  }
  func.func @transform_0(%arg0: i32) -> (i32, i32, i32, i32) {
    %c0_i32 = arith.constant 0 : i32
    %c0_i32_0 = arith.constant 0 : i32
    %c0_i32_1 = arith.constant 0 : i32
    %c0_i32_2 = arith.constant 0 : i32
    return %arg0, %c0_i32, %c0_i32_0, %c0_i32_1 : i32, i32, i32, i32
  }
  func.func @transform_1(%arg0: i32) -> (i32, i32) {
    %c0_i32 = arith.constant 0 : i32
    %c0_i32_0 = arith.constant 0 : i32
    %c0_i32_1 = arith.constant 0 : i32
    return %c0_i32, %c0_i32_0 : i32, i32
  }
  func.func @transform_2(%arg0: i32) -> (i32, i32, i32) {
    %c0_i32 = arith.constant 0 : i32
    %c0_i32_0 = arith.constant 0 : i32
    %c0_i32_1 = arith.constant 0 : i32
    %c0_i32_2 = arith.constant 0 : i32
    return %c0_i32, %c0_i32_0, %c0_i32_1 : i32, i32, i32
  }
  func.func @transform_3(%arg0: i32) -> (i32, i32) {
    %c0_i32 = arith.constant 0 : i32
    %c0_i32_0 = arith.constant 0 : i32
    %c0_i32_1 = arith.constant 0 : i32
    return %c0_i32, %c0_i32_0 : i32, i32
  }
  func.func @transform_4(%arg0: i32) -> (i32, i32) {
    %c0_i32 = arith.constant 0 : i32
    %c0_i32_0 = arith.constant 0 : i32
    %c0_i32_1 = arith.constant 0 : i32
    return %c0_i32, %c0_i32_0 : i32, i32
  }
  func.func @transform_5(%arg0: i32) -> (i32, i32) {
    %c0_i32 = arith.constant 0 : i32
    %c0_i32_0 = arith.constant 0 : i32
    %c0_i32_1 = arith.constant 0 : i32
    return %c0_i32, %c0_i32_0 : i32, i32
  }
  func.func @transform_6(%arg0: i32) -> (i32, i32, i32) {
    %c0_i32 = arith.constant 0 : i32
    %c0_i32_0 = arith.constant 0 : i32
    %c0_i32_1 = arith.constant 0 : i32
    return %arg0, %c0_i32, %c0_i32_0 : i32, i32, i32
  }
}

</mosaic_0001>

<bundles_post_ra>
// kernel: _lambda_.1
= control target key start
LH: loop header
LB: loop body
LE: loop exit
PB: predicated region body
PF: predicated region fallthrough
CT: control target
= control target key end

     0   :  { %s9795_s21 = smov 0   ;;  %s14312_s0 = inlined_call_operand.vmem [shape: f32[2,16,16,4], index: 0, kind: input, shape index: {}]   ;;  %s14313_s1 = inlined_call_operand.vmem [shape: bf16[36,8], index: 1, kind: input, shape index: {}]   ;;  %s14314_s2 = inlined_call_operand.vmem [shape: bf16[3,72,8], index: 2, kind: input, shape index: {}]   ;;  %s14315_s3 = inlined_call_operand.vmem [shape: bf16[16,8], index: 3, kind: input, shape index: {}]   ;;  %s14316_s4 = inlined_call_operand.vmem [shape: f32[6,8], index: 4, kind: input, shape index: {}]   ;;  %s14317_s5 = inlined_call_operand.vmem [shape: bf16[4,8], index: 5, kind: input, shape index: {}]   ;;  %s14318_s6 = inlined_call_operand.vmem [shape: f32[2,256,8], index: 6, kind: output, shape index: {}]  }
   0x1 LB: > { %s9191_s22 = sadd.s32 4294967295, %s9745_s21   ;;  %p9195_p0 = scmp.ge.s32.totalorder %s9745_s21, 1  ;;  %s9745_s21 = sphi %s9795_s21, %s16_s21  }
   0x2   : > { %p212_p1 = scmp.lt.s32.totalorder %s9745_s21, 3 }
   0x4   : > { %p213_p2 = pnand %p9195_p0, %p212_p1 }
   0x6   : > { %216 = sbr.rel (%p213_p2) target bundleno = 3342 (0xd0e), region = 44 }
   0xb   : > { %vm253_vm0 = vcmask 31744   ;;  %vm262_vm1 = vcmask 24576   ;;  %p9805_p3 = scmp.lt.s32.totalorder %s9191_s22, 1  ;;  %vm256_vm2 = vcmask 25600   ;;  %v14319_v0 = vmov 0.0   ;;  %s9748_s28 = smov 4  }
   0xc   : > { %254 = vst.msk [vmem:[#allocation2] sm:$0xff] %vm253_vm0, %v14319_v0  ;;  %255 = vst.msk [vmem:[#allocation2 + $0x8] sm:$0xff] %vm253_vm0, %v14319_v0  ;;  %s9749_s29 = smov 8   ;;  %vm639_vm3 = vcmask 64544   ;;  %s9750_s30 = smov 12   ;;  %vm832_vm4 = vcmask 97344  }
   0xd   : > { %259 = vst.msk [vmem:[#allocation2 + $0x198] sm:$0xff] %vm253_vm0, %v14319_v0  ;;  %260 = vst.msk [vmem:[#allocation2 + $0x1a0] sm:$0xff] %vm253_vm0, %v14319_v0  ;;  %s14504_s22 = smov (!%p9805_p3, %s9191_s22), 1  ;;  %s9751_s7 = smov 16   ;;  %vm1025_vm5 = vcmask 130144   ;;  %vm1218_vm6 = vcmask 162944  }
   0xe   : > { %264 = vst.msk [vmem:[#allocation2 + $0x18] sm:$0x1] %vm262_vm1, %v14319_v0  ;;  %265 = vst.msk [vmem:[#allocation2 + $0x30] sm:$0x1] %vm262_vm1, %v14319_v0  ;;  %s9341_s24 = sshll.u32 %s14504_s22, 8  ;;  %s9752_s8 = smov 20  }
   0xf   : > { %266 = vst.msk [vmem:[#allocation2 + $0x48] sm:$0x1] %vm262_vm1, %v14319_v0  ;;  %267 = vst.msk [vmem:[#allocation2 + $0x60] sm:$0x1] %vm262_vm1, %v14319_v0  ;;  %s9905_s27 = scalar_lea.vmem %s14312_s0, %s9341_s24  ;;  %s9753_s9 = smov 24   ;;  %vm1411_vm7 = vcmask 195744  }
  0x10   : > { %268 = vst.msk [vmem:[#allocation2 + $0x78] sm:$0x1] %vm262_vm1, %v14319_v0  ;;  %269 = vst.msk [vmem:[#allocation2 + $0x90] sm:$0x1] %vm262_vm1, %v14319_v0  ;;  %v345_v1 = vld [vmem:[%s9905_s27] sm:$0xff]  ;;  %v346_v2 = vld [vmem:[%s9905_s27 + $0x8] sm:$0xff] }
  0x11   : > { %270 = vst.msk [vmem:[#allocation2 + $0xa8] sm:$0x1] %vm262_vm1, %v14319_v0  ;;  %271 = vst.msk [vmem:[#allocation2 + $0xc0] sm:$0x1] %vm262_vm1, %v14319_v0  ;;  %v347_v3 = vld [vmem:[%s9905_s27 + $0x10] sm:$0xff]  ;;  %v348_v4 = vld [vmem:[%s9905_s27 + $0x18] sm:$0xff] }
  0x12   : > { %272 = vst.msk [vmem:[#allocation2 + $0xd8] sm:$0x1] %vm262_vm1, %v14319_v0  ;;  %273 = vst.msk [vmem:[#allocation2 + $0xf0] sm:$0x1] %vm262_vm1, %v14319_v0  ;;  %v349_v5 = vld [vmem:[%s9905_s27 + $0x20] sm:$0xff]  ;;  %v350_v6 = vld [vmem:[%s9905_s27 + $0x28] sm:$0xff] }
  0x13   : > { %274 = vst.msk [vmem:[#allocation2 + $0x108] sm:$0x1] %vm262_vm1, %v14319_v0  ;;  %275 = vst.msk [vmem:[#allocation2 + $0x120] sm:$0x1] %vm262_vm1, %v14319_v0  ;;  %v479_v7 = vld [vmem:[#allocation2 + $0x1] sm:$0xff]  ;;  %v351_v9 = vld [vmem:[%s9905_s27 + $0x30] sm:$0xff] }
  0x14   : > { %276 = vst.msk [vmem:[#allocation2 + $0x138] sm:$0x1] %vm262_vm1, %v14319_v0  ;;  %277 = vst.msk [vmem:[#allocation2 + $0x150] sm:$0x1] %vm262_vm1, %v14319_v0  ;;  %543 = vrot.lane.b32.xlu0 %v479_v7, %s9748_s28  ;;  %v352_v10 = vld [vmem:[%s9905_s27 + $0x38] sm:$0xff]  ;;  %v353_v11 = vld [vmem:[%s9905_s27 + $0x40] sm:$0xff] }
  0x15   : > { %278 = vst.msk [vmem:[#allocation2 + $0x168] sm:$0x1] %vm262_vm1, %v14319_v0  ;;  %279 = vst.msk [vmem:[#allocation2 + $0x180] sm:$0x1] %vm262_vm1, %v14319_v0  ;;  %v354_v12 = vld [vmem:[%s9905_s27 + $0x48] sm:$0xff]  ;;  %v355_v13 = vld [vmem:[%s9905_s27 + $0x50] sm:$0xff] }
  0x16   : > { %282 = vst.msk [vmem:[#allocation2 + $0x29] sm:$0x1] %vm262_vm1, %v14319_v0  ;;  %283 = vst.msk [vmem:[#allocation2 + $0x41] sm:$0x1] %vm262_vm1, %v14319_v0  ;;  %v356_v14 = vld [vmem:[%s9905_s27 + $0x58] sm:$0xff]  ;;  %v357_v15 = vld [vmem:[%s9905_s27 + $0x60] sm:$0xff] }
  0x17   : > { %284 = vst.msk [vmem:[#allocation2 + $0x59] sm:$0x1] %vm262_vm1, %v14319_v0  ;;  %285 = vst.msk [vmem:[#allocation2 + $0x71] sm:$0x1] %vm262_vm1, %v14319_v0  ;;  %v358_v16 = vld [vmem:[%s9905_s27 + $0x68] sm:$0xff]  ;;  %v359_v17 = vld [vmem:[%s9905_s27 + $0x70] sm:$0xff] }
  0x18   : > { %286 = vst.msk [vmem:[#allocation2 + $0x89] sm:$0x1] %vm262_vm1, %v14319_v0  ;;  %287 = vst.msk [vmem:[#allocation2 + $0xa1] sm:$0x1] %vm262_vm1, %v14319_v0  ;;  %v360_v18 = vld [vmem:[%s9905_s27 + $0x78] sm:$0xff]  ;;  %v361_v19 = vld [vmem:[%s9905_s27 + $0x80] sm:$0xff] }
  0x19   : > { %288 = vst.msk [vmem:[#allocation2 + $0xb9] sm:$0x1] %vm262_vm1, %v14319_v0  ;;  %289 = vst.msk [vmem:[#allocation2 + $0xd1] sm:$0x1] %vm262_vm1, %v14319_v0  ;;  %v362_v20 = vld [vmem:[%s9905_s27 + $0x88] sm:$0xff]  ;;  %v363_v21 = vld [vmem:[%s9905_s27 + $0x90] sm:$0xff] }
  0x1a   : > { %290 = vst.msk [vmem:[#allocation2 + $0xe9] sm:$0x1] %vm262_vm1, %v14319_v0  ;;  %291 = vst.msk [vmem:[#allocation2 + $0x101] sm:$0x1] %vm262_vm1, %v14319_v0  ;;  %v364_v22 = vld [vmem:[%s9905_s27 + $0x98] sm:$0xff]  ;;  %v365_v23 = vld [vmem:[%s9905_s27 + $0xa0] sm:$0xff] }
  0x1b   : > { %292 = vst.msk [vmem:[#allocation2 + $0x119] sm:$0x1] %vm262_vm1, %v14319_v0  ;;  %293 = vst.msk [vmem:[#allocation2 + $0x131] sm:$0x1] %vm262_vm1, %v14319_v0  ;;  %v366_v24 = vld [vmem:[%s9905_s27 + $0xa8] sm:$0xff]  ;;  %v367_v28 = vld [vmem:[%s9905_s27 + $0xb0] sm:$0xff] }
  0x1c   : > { %294 = vst.msk [vmem:[#allocation2 + $0x149] sm:$0x1] %vm262_vm1, %v14319_v0  ;;  %295 = vst.msk [vmem:[#allocation2 + $0x161] sm:$0x1] %vm262_vm1, %v14319_v0  ;;  %v368_v29 = vld [vmem:[%s9905_s27 + $0xb8] sm:$0xff]  ;;  %v369_v33 = vld [vmem:[%s9905_s27 + $0xc0] sm:$0xff] }
  0x1d   : > { %296 = vst.msk [vmem:[#allocation2 + $0x179] sm:$0x1] %vm262_vm1, %v14319_v0  ;;  %297 = vst.msk [vmem:[#allocation2 + $0x191] sm:$0x1] %vm262_vm1, %v14319_v0  ;;  %v370_v34 = vld [vmem:[%s9905_s27 + $0xc8] sm:$0xff]  ;;  %v371_v35 = vld [vmem:[%s9905_s27 + $0xd0] sm:$0xff] }
  0x1e   : > { %257 = vst.msk [vmem:[#allocation2 + $0x10] sm:$0x3] %vm256_vm2, %v14319_v0  ;;  %261 = vst.msk [vmem:[#allocation2 + $0x1a8] sm:$0x3] %vm256_vm2, %v14319_v0  ;;  %v372_v36 = vld [vmem:[%s9905_s27 + $0xd8] sm:$0xff]  ;;  %v373_v37 = vld [vmem:[%s9905_s27 + $0xe0] sm:$0xff] }
  0x1f   : > { %263 = vst.msk [vmem:[#allocation2] sm:$0x1] %vm262_vm1, %v14319_v0  ;;  %280 = vst.msk [vmem:[#allocation2 + $0x198] sm:$0x1] %vm262_vm1, %v14319_v0  ;;  %v374_v38 = vld [vmem:[%s9905_s27 + $0xe8] sm:$0xff]  ;;  %s9754_s10 = smov 28  }
  0x20   : > { %281 = vst.msk [vmem:[#allocation2 + $0x11] sm:$0x1] %vm262_vm1, %v14319_v0  ;;  %298 = vst.msk [vmem:[#allocation2 + $0x1a9] sm:$0x1] %vm262_vm1, %v14319_v0  ;;  %v416_v48 = vld [vmem:[#allocation2 + $0x8] sm:$0xff]  ;;  %vm1605_vm8 = vcmask 228544  }
  0x21   : > { %378 = vst.msk [vmem:[#allocation2 + $0x19] sm:$0xff] %vm253_vm0, %v345_v1  ;;  %379 = vst.msk [vmem:[#allocation2 + $0x21] sm:$0xff] %vm253_vm0, %v346_v2  ;;  %vm2141_vm9 = vcmask 1041408   ;;  %s9755_s15 = smov 32   ;;  %vm1798_vm10 = vcmask 261344   ;;  %vm299_vm11 = vcmask 64512  }
  0x22   : > { %380 = vst.msk [vmem:[#allocation2 + $0x31] sm:$0xff] %vm253_vm0, %v347_v3  ;;  %381 = vst.msk [vmem:[#allocation2 + $0x39] sm:$0xff] %vm253_vm0, %v348_v4  ;;  %vm1991_vm12 = vcmask 294144   ;;  %vm2092_vm13 = vcmask 293888   ;;  %vm308_vm14 = vcmask 57344   ;;  %vm302_vm15 = vcmask 58368  }
  0x23   : > { %382 = vst.msk [vmem:[#allocation2 + $0x49] sm:$0xff] %vm253_vm0, %v349_v5  ;;  %383 = vst.msk [vmem:[#allocation2 + $0x51] sm:$0xff] %vm253_vm0, %v350_v6  ;;  %vm2604_vm1 = vcmask 130112   ;;  %vm2797_vm2 = vcmask 195712   ;;  %s9756_s20 = smov 40   ;;  %s9757_s23 = smov 48  }
  0x24   : > { %384 = vst.msk [vmem:[#allocation2 + $0x61] sm:$0xff] %vm253_vm0, %v351_v9  ;;  %385 = vst.msk [vmem:[#allocation2 + $0x69] sm:$0xff] %vm253_vm0, %v352_v10  ;;  %s9758_s25 = smov 56   ;;  %s9759_s19 = smov 64  }
  0x25   : > { %v480_v8 = vld [vmem:[#allocation2 + $0x9] sm:$0xff]  ;;  %386 = vst.msk [vmem:[#allocation2 + $0x79] sm:$0xff] %vm253_vm0, %v353_v11  ;;  %387 = vst.msk [vmem:[#allocation2 + $0x81] sm:$0xff] %vm253_vm0, %v354_v12 }
  0x26   : > { %388 = vst.msk [vmem:[#allocation2 + $0x91] sm:$0xff] %vm253_vm0, %v355_v13  ;;  %389 = vst.msk [vmem:[#allocation2 + $0x99] sm:$0xff] %vm253_vm0, %v356_v14  ;;  %545 = vrot.lane.b32.xlu0 %v480_v8, %s9748_s28  ;;  %v415_v45 = vld [vmem:[#allocation2] sm:$0xff] }
  0x27   : > { %390 = vst.msk [vmem:[#allocation2 + $0xa9] sm:$0xff] %vm253_vm0, %v357_v15  ;;  %391 = vst.msk [vmem:[#allocation2 + $0xb1] sm:$0xff] %vm253_vm0, %v358_v16 }
  0x28   : > { %392 = vst.msk [vmem:[#allocation2 + $0xc1] sm:$0xff] %vm253_vm0, %v359_v17  ;;  %393 = vst.msk [vmem:[#allocation2 + $0xc9] sm:$0xff] %vm253_vm0, %v360_v18  ;;  %v9950_v25 = vld [vmem:[#allocation2 + $0x19] sm:$0xff]  ;;  %v9959_v27 = vld [vmem:[#allocation2 + $0x21] sm:$0xff] }
  0x29   : > { %394 = vst.msk [vmem:[#allocation2 + $0xd9] sm:$0xff] %vm253_vm0, %v361_v19  ;;  %395 = vst.msk [vmem:[#allocation2 + $0xe1] sm:$0xff] %vm253_vm0, %v362_v20  ;;  %v9952_v26 = vld [vmem:[#allocation2 + $0x31] sm:$0xff]  ;;  %547 = vrot.lane.b32.xlu1 %v9950_v25, %s9748_s28  ;;  %v9971_v31 = vld [vmem:[#allocation2 + $0x39] sm:$0xff] }
  0x2a   : > { %396 = vst.msk [vmem:[#allocation2 + $0xf1] sm:$0xff] %vm253_vm0, %v363_v21  ;;  %397 = vst.msk [vmem:[#allocation2 + $0xf9] sm:$0xff] %vm253_vm0, %v364_v22  ;;  %551 = vrot.lane.b32.xlu0 %v9952_v26, %s9748_s28  ;;  %v9967_v30 = vld [vmem:[#allocation2 + $0x49] sm:$0xff]  ;;  %v9988_v39 = vld [vmem:[#allocation2 + $0x51] sm:$0xff] }
  0x2b   : > { %398 = vst.msk [vmem:[#allocation2 + $0x109] sm:$0xff] %vm253_vm0, %v365_v23  ;;  %399 = vst.msk [vmem:[#allocation2 + $0x111] sm:$0xff] %vm253_vm0, %v366_v24  ;;  %v9975_v32 = vld [vmem:[#allocation2 + $0x61] sm:$0xff]  ;;  %v9999_v41 = vld [vmem:[#allocation2 + $0x69] sm:$0xff] }
  0x2c   : > { %400 = vst.msk [vmem:[#allocation2 + $0x121] sm:$0xff] %vm253_vm0, %v367_v28  ;;  %401 = vst.msk [vmem:[#allocation2 + $0x129] sm:$0xff] %vm253_vm0, %v368_v29  ;;  %v9995_v40 = vld [vmem:[#allocation2 + $0x79] sm:$0xff]  ;;  %v10007_v43 = vld [vmem:[#allocation2 + $0x81] sm:$0xff] }
  0x2d   : > { %549 = vrot.lane.b32.xlu1 %v9959_v27, %s9748_s28  ;;  %402 = vst.msk [vmem:[#allocation2 + $0x139] sm:$0xff] %vm253_vm0, %v369_v33  ;;  %403 = vst.msk [vmem:[#allocation2 + $0x141] sm:$0xff] %vm253_vm0, %v370_v34  ;;  %v10003_v42 = vld [vmem:[#allocation2 + $0x91] sm:$0xff]  ;;  %v10017_v47 = vld [vmem:[#allocation2 + $0x99] sm:$0xff] }
  0x2e   : > { %555 = vrot.lane.b32.xlu0 %v9967_v30, %s9748_s28  ;;  %404 = vst.msk [vmem:[#allocation2 + $0x151] sm:$0xff] %vm253_vm0, %v371_v35  ;;  %405 = vst.msk [vmem:[#allocation2 + $0x159] sm:$0xff] %vm253_vm0, %v372_v36  ;;  %v10011_v44 = vld [vmem:[#allocation2 + $0xa9] sm:$0xff]  ;;  %v10015_v46 = vld [vmem:[#allocation2 + $0x18] sm:$0xff] }
  0x2f   : > { %406 = vst.msk [vmem:[#allocation2 + $0x169] sm:$0xff] %vm253_vm0, %v373_v37  ;;  %407 = vst.msk [vmem:[#allocation2 + $0x171] sm:$0xff] %vm253_vm0, %v374_v38  ;;  %v10025_v49 = vld [vmem:[#allocation2 + $0x20] sm:$0xff]  ;;  %v10031_v51 = vld [vmem:[#allocation2 + $0x30] sm:$0xff] }
  0x30   : > { %447 = vst.msk [vmem:[#allocation5] sm:$0xff] %vm253_vm0, %v415_v45  ;;  %449 = vst.msk [vmem:[#allocation5 + $0x10] sm:$0xff] %vm253_vm0, %v10015_v46  ;;  %v10027_v50 = vld [vmem:[#allocation2 + $0xc1] sm:$0xff]  ;;  %v10033_v52 = vld [vmem:[#allocation2 + $0x38] sm:$0xff] }
  0x31   : > { %553 = vrot.lane.b32.xlu1 %v9971_v31, %s9748_s28  ;;  %448 = vst.msk [vmem:[#allocation5 + $0x8] sm:$0xff] %vm253_vm0, %v416_v48  ;;  %450 = vst.msk [vmem:[#allocation5 + $0x18] sm:$0xff] %vm253_vm0, %v10025_v49  ;;  %v10037_v53 = vld [vmem:[#allocation2 + $0xb1] sm:$0xff]  ;;  %v10043_v54 = vld [vmem:[#allocation2 + $0x48] sm:$0xff] }
  0x32   : > { %559 = vrot.lane.b32.xlu0 %v9975_v32, %s9748_s28  ;;  %451 = vst.msk [vmem:[#allocation5 + $0x20] sm:$0xff] %vm253_vm0, %v10031_v51  ;;  %452 = vst.msk [vmem:[#allocation5 + $0x28] sm:$0xff] %vm253_vm0, %v10033_v52  ;;  %v10045_v55 = vld [vmem:[#allocation2 + $0x50] sm:$0xff]  ;;  %v10047_v56 = vld [vmem:[#allocation2 + $0xd9] sm:$0xff] }
  0x33   : > { %453 = vst.msk [vmem:[#allocation5 + $0x30] sm:$0xff] %vm253_vm0, %v10043_v54  ;;  %454 = vst.msk [vmem:[#allocation5 + $0x38] sm:$0xff] %vm253_vm0, %v10045_v55  ;;  %v10053_v57 = vld [vmem:[#allocation2 + $0x60] sm:$0xff]  ;;  %v10055_v58 = vld [vmem:[#allocation2 + $0x68] sm:$0xff] }
  0x34   : > { %v10057_v59 = vld [vmem:[#allocation2 + $0x78] sm:$0xff]  ;;  %455 = vst.msk [vmem:[#allocation5 + $0x40] sm:$0xff] %vm253_vm0, %v10053_v57  ;;  %456 = vst.msk [vmem:[#allocation5 + $0x48] sm:$0xff] %vm253_vm0, %v10055_v58  ;;  %v10067_v60 = vld [vmem:[#allocation2 + $0x80] sm:$0xff] }
  0x35   : > { %557 = vrot.lane.b32.xlu1 %v9988_v39, %s9748_s28  ;;  %457 = vst.msk [vmem:[#allocation5 + $0x50] sm:$0xff] %vm253_vm0, %v10057_v59  ;;  %v10069_v61 = vld [vmem:[#allocation2 + $0x90] sm:$0xff]  ;;  %v10071_v62 = vld [vmem:[#allocation2 + $0x98] sm:$0xff]  ;;  %458 = vst.msk [vmem:[#allocation5 + $0x58] sm:$0xff] %vm253_vm0, %v10067_v60 }
  0x36   : > { %563 = vrot.lane.b32.xlu0 %v9995_v40, %s9748_s28  ;;  %v10073_v63 = vld [vmem:[#allocation2 + $0xc9] sm:$0xff]  ;;  %459 = vst.msk [vmem:[#allocation5 + $0x60] sm:$0xff] %vm253_vm0, %v10069_v61  ;;  %460 = vst.msk [vmem:[#allocation5 + $0x68] sm:$0xff] %vm253_vm0, %v10071_v62  ;;  %v10085_v3 = vld [vmem:[#allocation2 + $0xc0] sm:$0xff] }
  0x37   : > { %v10081_v1 = vld [vmem:[#allocation2 + $0xa8] sm:$0xff]  ;;  %v10083_v2 = vld [vmem:[#allocation2 + $0xb0] sm:$0xff]  ;;  %463 = vst.msk [vmem:[#allocation5 + $0x80] sm:$0xff] %vm253_vm0, %v10085_v3  ;;  %v10097_v5 = vld [vmem:[#allocation2 + $0xd8] sm:$0xff] }
  0x38   : > { %461 = vst.msk [vmem:[#allocation5 + $0x70] sm:$0xff] %vm253_vm0, %v10081_v1  ;;  %462 = vst.msk [vmem:[#allocation5 + $0x78] sm:$0xff] %vm253_vm0, %v10083_v2  ;;  %v10095_v4 = vld [vmem:[#allocation2 + $0xc8] sm:$0xff]  ;;  %v10099_v6 = vld [vmem:[#allocation2 + $0xe0] sm:$0xff] }
  0x39   : > { %561 = vrot.lane.b32.xlu1 %v9999_v41, %s9748_s28  ;;  %v10101_v7 = vld [vmem:[#allocation2 + $0xf1] sm:$0xff]  ;;  %464 = vst.msk [vmem:[#allocation5 + $0x88] sm:$0xff] %vm253_vm0, %v10095_v4  ;;  %465 = vst.msk [vmem:[#allocation5 + $0x90] sm:$0xff] %vm253_vm0, %v10097_v5  ;;  %v10113_v10 = vld [vmem:[#allocation2 + $0x108] sm:$0xff] }
  0x3a   : > { %567 = vrot.lane.b32.xlu0 %v10003_v42, %s9748_s28  ;;  %466 = vst.msk [vmem:[#allocation5 + $0x98] sm:$0xff] %vm253_vm0, %v10099_v6  ;;  %v10109_v8 = vld [vmem:[#allocation2 + $0xf0] sm:$0xff]  ;;  %v10111_v9 = vld [vmem:[#allocation2 + $0xf8] sm:$0xff]  ;;  %469 = vst.msk [vmem:[#allocation5 + $0xb0] sm:$0xff] %vm253_vm0, %v10113_v10 }
  0x3b   : > { %467 = vst.msk [vmem:[#allocation5 + $0xa0] sm:$0xff] %vm253_vm0, %v10109_v8  ;;  %468 = vst.msk [vmem:[#allocation5 + $0xa8] sm:$0xff] %vm253_vm0, %v10111_v9  ;;  %v10123_v11 = vld [vmem:[#allocation2 + $0x110] sm:$0xff]  ;;  %v10125_v12 = vld [vmem:[#allocation2 + $0xe1] sm:$0xff] }
  0x3c   : > { %470 = vst.msk [vmem:[#allocation5 + $0xb8] sm:$0xff] %vm253_vm0, %v10123_v11  ;;  %v10131_v13 = vld [vmem:[#allocation2 + $0x120] sm:$0xff]  ;;  %v10133_v14 = vld [vmem:[#allocation2 + $0x128] sm:$0xff]  ;;  %v10147_v17 = vld [vmem:[#allocation2 + $0x138] sm:$0xff] }
  0x3d   : > { %565 = vrot.lane.b32.xlu1 %v10007_v43, %s9748_s28  ;;  %v10135_v15 = vld [vmem:[#allocation2 + $0x109] sm:$0xff]  ;;  %471 = vst.msk [vmem:[#allocation5 + $0xc0] sm:$0xff] %vm253_vm0, %v10131_v13  ;;  %472 = vst.msk [vmem:[#allocation5 + $0xc8] sm:$0xff] %vm253_vm0, %v10133_v14  ;;  %v10143_v16 = vld [vmem:[#allocation2 + $0xf9] sm:$0xff] }
  0x3e   : > { %571 = vrot.lane.b32.xlu0 %v10011_v44, %s9748_s28  ;;  %v10149_v18 = vld [vmem:[#allocation2 + $0x140] sm:$0xff]  ;;  %473 = vst.msk [vmem:[#allocation5 + $0xd0] sm:$0xff] %vm253_vm0, %v10147_v17  ;;  %v10161_v20 = vld [vmem:[#allocation2 + $0x150] sm:$0xff]  ;;  %v10163_v21 = vld [vmem:[#allocation2 + $0x158] sm:$0xff] }
  0x3f   : > { %474 = vst.msk [vmem:[#allocation5 + $0xd8] sm:$0xff] %vm253_vm0, %v10149_v18  ;;  %v10157_v19 = vld [vmem:[#allocation2 + $0x121] sm:$0xff]  ;;  %v10165_v22 = vld [vmem:[#allocation2 + $0x111] sm:$0xff]  ;;  %475 = vst.msk [vmem:[#allocation5 + $0xe0] sm:$0xff] %vm253_vm0, %v10161_v20 }
  0x40   : > { %476 = vst.msk [vmem:[#allocation5 + $0xe8] sm:$0xff] %vm253_vm0, %v10163_v21  ;;  %v10173_v23 = vld [vmem:[#allocation2 + $0x139] sm:$0xff]  ;;  %v10177_v24 = vld [vmem:[#allocation2 + $0x168] sm:$0xff]  ;;  %v10179_v28 = vld [vmem:[#allocation2 + $0x170] sm:$0xff] }
  0x41   : > { %569 = vrot.lane.b32.xlu1 %v10017_v47, %s9748_s28  ;;  %v10181_v29 = vld [vmem:[#allocation2 + $0x129] sm:$0xff]  ;;  %477 = vst.msk [vmem:[#allocation5 + $0xf0] sm:$0xff] %vm253_vm0, %v10177_v24  ;;  %478 = vst.msk [vmem:[#allocation5 + $0xf8] sm:$0xff] %vm253_vm0, %v10179_v28  ;;  %v10189_v33 = vld [vmem:[#allocation2 + $0x151] sm:$0xff] }
  0x42   : > { %575 = vrot.lane.b32.xlu0 %v10027_v50, %s9748_s28  ;;  %v10193_v34 = vld [vmem:[#allocation2 + $0x141] sm:$0xff]  ;;  %v10197_v35 = vld [vmem:[#allocation2 + $0x169] sm:$0xff]  ;;  %v376_v37 = vld [vmem:[%s9905_s27 + $0xf8] sm:$0xff] }
  0x43   : > { %14382 = vst [vmem:[#allocation6_spill] sm:$0xff] %v10193_v34  ;;  %14383 = vst [vmem:[#allocation7_spill] sm:$0xff] %v10197_v35  ;;  %v375_v36 = vld [vmem:[%s9905_s27 + $0xf0] sm:$0xff]  ;;  %v10205_v38 = vld [vmem:[#allocation2 + $0x159] sm:$0xff] }
  0x44   : > { %408 = vst.msk [vmem:[#allocation2 + $0x181] sm:$0xff] %vm253_vm0, %v375_v36  ;;  %409 = vst.msk [vmem:[#allocation2 + $0x189] sm:$0xff] %vm253_vm0, %v376_v37  ;;  %v672_v45 = vld [vmem:[#allocation2 + $0x2] sm:$0xff]  ;;  %v10211_v48 = vld [vmem:[#allocation2 + $0x171] sm:$0xff] }
  0x45   : > { %573 = vrot.lane.b32.xlu1 %v10037_v53, %s9748_s28  ;;  %14384 = vst [vmem:[#allocation8_spill] sm:$0xff] %v10205_v38  ;;  %14385 = vst [vmem:[#allocation9_spill] sm:$0xff] %v10211_v48  ;;  %v10214_v0 = vld [vmem:[#allocation2 + $0x1a] sm:$0xff]  ;;  %v673_v36 = vld [vmem:[#allocation2 + $0xa] sm:$0xff] }
  0x46   : > { %579 = vrot.lane.b32.xlu0 %v10047_v56, %s9748_s28  ;;  %14386 = vst [vmem:[#allocation10_spill] sm:$0xff] %v10214_v0  ;;  %v10220_v37 = vld [vmem:[#allocation2 + $0x32] sm:$0xff] }
  0x47   : > { %14387 = vst [vmem:[#allocation11_spill] sm:$0xff] %v10220_v37 }
  0x49   : > { %577 = vrot.lane.b32.xlu1 %v10073_v63, %s9748_s28 }
  0x4a   : > { %583 = vrot.lane.b32.xlu0 %v10101_v7, %s9748_s28 }
  0x4d   : > { %581 = vrot.lane.b32.xlu1 %v10125_v12, %s9748_s28 }
  0x4e   : > { %587 = vrot.lane.b32.xlu0 %v10135_v15, %s9748_s28 }
  0x51   : > { %585 = vrot.lane.b32.xlu1 %v10143_v16, %s9748_s28 }
  0x52   : > { %591 = vrot.lane.b32.xlu0 %v10157_v19, %s9748_s28 }
  0x55   : > { %589 = vrot.lane.b32.xlu1 %v10165_v22, %s9748_s28 }
  0x56   : > { %595 = vrot.lane.b32.xlu0 %v10173_v23, %s9748_s28 }
  0x59   : > { %593 = vrot.lane.b32.xlu1 %v10181_v29, %s9748_s28 }
  0x5a   : > { %599 = vrot.lane.b32.xlu0 %v10189_v33, %s9748_s28 }
  0x5d   : > { %597 = vrot.lane.b32.xlu1 %v10193_v34, %s9748_s28 }
  0x5e   : > { %603 = vrot.lane.b32.xlu0 %v10197_v35, %s9748_s28  ;;  %v10223_v35 = vld [vmem:[#allocation2 + $0x22] sm:$0xff] }
  0x5f   : > { %14388 = vst [vmem:[#allocation12_spill] sm:$0xff] %v10223_v35 }
  0x61   : > { %601 = vrot.lane.b32.xlu1 %v10205_v38, %s9748_s28  ;;  %v10227_v38 = vld [vmem:[#allocation2 + $0x4a] sm:$0xff] }
  0x62   : > { %736 = vrot.lane.b32.xlu0 %v672_v45, %s9749_s29  ;;  %14389 = vst [vmem:[#allocation13_spill] sm:$0xff] %v10227_v38  ;;  %v10231_v45 = vld [vmem:[#allocation2 + $0x3a] sm:$0xff] }
  0x63   : > { %14390 = vst [vmem:[#allocation14_spill] sm:$0xff] %v10231_v45 }
  0x65   : > { %605 = vrot.lane.b32.xlu1 %v10211_v48, %s9748_s28  ;;  %v10311_v48 = vld [vmem:[#allocation2 + $0x12a] sm:$0xff] }
  0x66   : > { %740 = vrot.lane.b32.xlu0 %v10214_v0, %s9749_s29  ;;  %v10235_v0 = vld [vmem:[#allocation2 + $0x62] sm:$0xff]  ;;  %14410 = vst [vmem:[#allocation34_spill] sm:$0xff] %v10311_v48 }
  0x67   : > { %14391 = vst [vmem:[#allocation15_spill] sm:$0xff] %v10235_v0 }
  0x69   : > { %738 = vrot.lane.b32.xlu1 %v673_v36, %s9749_s29  ;;  %v10239_v36 = vld [vmem:[#allocation2 + $0x52] sm:$0xff] }
  0x6a   : > { %744 = vrot.lane.b32.xlu0 %v10220_v37, %s9749_s29  ;;  %14392 = vst [vmem:[#allocation16_spill] sm:$0xff] %v10239_v36  ;;  %v10243_v37 = vld [vmem:[#allocation2 + $0x7a] sm:$0xff] }
  0x6b   : > { %14393 = vst [vmem:[#allocation17_spill] sm:$0xff] %v10243_v37 }
  0x6d   : > { %742 = vrot.lane.b32.xlu1 %v10223_v35, %s9749_s29  ;;  %v10247_v35 = vld [vmem:[#allocation2 + $0x6a] sm:$0xff] }
  0x6e   : > { %748 = vrot.lane.b32.xlu0 %v10227_v38, %s9749_s29  ;;  %14394 = vst [vmem:[#allocation18_spill] sm:$0xff] %v10247_v35  ;;  %v10251_v38 = vld [vmem:[#allocation2 + $0x92] sm:$0xff] }
  0x6f   : > { %14395 = vst [vmem:[#allocation19_spill] sm:$0xff] %v10251_v38 }
  0x71   : > { %746 = vrot.lane.b32.xlu1 %v10231_v45, %s9749_s29  ;;  %v10255_v45 = vld [vmem:[#allocation2 + $0x82] sm:$0xff] }
  0x72   : > { %752 = vrot.lane.b32.xlu0 %v10235_v0, %s9749_s29  ;;  %14396 = vst [vmem:[#allocation20_spill] sm:$0xff] %v10255_v45  ;;  %v10259_v0 = vld [vmem:[#allocation2 + $0xaa] sm:$0xff] }
  0x73   : > { %14397 = vst [vmem:[#allocation21_spill] sm:$0xff] %v10259_v0 }
  0x75   : > { %750 = vrot.lane.b32.xlu1 %v10239_v36, %s9749_s29  ;;  %v10263_v36 = vld [vmem:[#allocation2 + $0x9a] sm:$0xff] }
  0x76   : > { %756 = vrot.lane.b32.xlu0 %v10243_v37, %s9749_s29  ;;  %14398 = vst [vmem:[#allocation22_spill] sm:$0xff] %v10263_v36  ;;  %v10267_v37 = vld [vmem:[#allocation2 + $0xc2] sm:$0xff] }
  0x77   : > { %14399 = vst [vmem:[#allocation23_spill] sm:$0xff] %v10267_v37 }
  0x79   : > { %754 = vrot.lane.b32.xlu1 %v10247_v35, %s9749_s29  ;;  %v10271_v35 = vld [vmem:[#allocation2 + $0xb2] sm:$0xff] }
  0x7a   : > { %760 = vrot.lane.b32.xlu0 %v10251_v38, %s9749_s29  ;;  %14400 = vst [vmem:[#allocation24_spill] sm:$0xff] %v10271_v35  ;;  %v10275_v38 = vld [vmem:[#allocation2 + $0xda] sm:$0xff] }
  0x7b   : > { %14401 = vst [vmem:[#allocation25_spill] sm:$0xff] %v10275_v38 }
  0x7d   : > { %758 = vrot.lane.b32.xlu1 %v10255_v45, %s9749_s29  ;;  %v10279_v45 = vld [vmem:[#allocation2 + $0xca] sm:$0xff] }
  0x7e   : > { %764 = vrot.lane.b32.xlu0 %v10259_v0, %s9749_s29  ;;  %14402 = vst [vmem:[#allocation26_spill] sm:$0xff] %v10279_v45  ;;  %v10283_v0 = vld [vmem:[#allocation2 + $0xf2] sm:$0xff] }
  0x7f   : > { %14403 = vst [vmem:[#allocation27_spill] sm:$0xff] %v10283_v0 }
  0x81   : > { %762 = vrot.lane.b32.xlu1 %v10263_v36, %s9749_s29  ;;  %v10287_v36 = vld [vmem:[#allocation2 + $0xe2] sm:$0xff] }
  0x82   : > { %768 = vrot.lane.b32.xlu0 %v10267_v37, %s9749_s29  ;;  %14404 = vst [vmem:[#allocation28_spill] sm:$0xff] %v10287_v36  ;;  %v10291_v37 = vld [vmem:[#allocation2 + $0x10a] sm:$0xff] }
  0x83   : > { %14405 = vst [vmem:[#allocation29_spill] sm:$0xff] %v10291_v37 }
  0x85   : > { %766 = vrot.lane.b32.xlu1 %v10271_v35, %s9749_s29  ;;  %v10295_v35 = vld [vmem:[#allocation2 + $0xfa] sm:$0xff] }
  0x86   : > { %772 = vrot.lane.b32.xlu0 %v10275_v38, %s9749_s29  ;;  %14406 = vst [vmem:[#allocation30_spill] sm:$0xff] %v10295_v35  ;;  %v10299_v38 = vld [vmem:[#allocation2 + $0x122] sm:$0xff] }
  0x87   : > { %14407 = vst [vmem:[#allocation31_spill] sm:$0xff] %v10299_v38 }
  0x89   : > { %770 = vrot.lane.b32.xlu1 %v10279_v45, %s9749_s29  ;;  %v10303_v45 = vld [vmem:[#allocation2 + $0x112] sm:$0xff] }
  0x8a   : > { %776 = vrot.lane.b32.xlu0 %v10283_v0, %s9749_s29  ;;  %14408 = vst [vmem:[#allocation32_spill] sm:$0xff] %v10303_v45  ;;  %v10307_v0 = vld [vmem:[#allocation2 + $0x13a] sm:$0xff] }
  0x8b   : > { %14409 = vst [vmem:[#allocation33_spill] sm:$0xff] %v10307_v0 }
  0x8d   : > { %774 = vrot.lane.b32.xlu1 %v10287_v36, %s9749_s29  ;;  %v544_v36 = vpop.permute.xlu0 %543 }
  0x8e   : > { %780 = vrot.lane.b32.xlu0 %v10291_v37, %s9749_s29  ;;  %640 = vst.msk [vmem:[#allocation5] sm:$0xff] %vm639_vm3, %v544_v36  ;;  %v10320_v37 = vld [vmem:[#allocation2 + $0x142] sm:$0xff]  ;;  %v10326_v36 = vld [vmem:[#allocation2 + $0x16a] sm:$0xff] }
  0x8f   : > { %14411 = vst [vmem:[#allocation35_spill] sm:$0xff] %v10320_v37 }
  0x91   : > { %778 = vrot.lane.b32.xlu1 %v10295_v35, %s9749_s29  ;;  %v10316_v35 = vld [vmem:[#allocation2 + $0x152] sm:$0xff] }
  0x92   : > { %784 = vrot.lane.b32.xlu0 %v10299_v38, %s9749_s29 }
  0x95   : > { %782 = vrot.lane.b32.xlu1 %v10303_v45, %s9749_s29  ;;  %v10330_v45 = vld [vmem:[#allocation2 + $0x15a] sm:$0xff] }
  0x96   : > { %788 = vrot.lane.b32.xlu0 %v10307_v0, %s9749_s29 }
  0x98   : > { %v546_v38 = vpop.permute.xlu0 %545 }
  0x99   : > { %786 = vrot.lane.b32.xlu1 %v10311_v48, %s9749_s29  ;;  %641 = vst.msk [vmem:[#allocation5 + $0x8] sm:$0xff] %vm639_vm3, %v546_v38  ;;  %v10338_v38 = vld [vmem:[#allocation2 + $0x172] sm:$0xff] }
  0x9a   : > { %792 = vrot.lane.b32.xlu0 %v10316_v35, %s9749_s29 }
  0x9b   : > { %v548_v34 = vpop.permute.xlu1 %547 }
  0x9c   : > { %642 = vst.msk [vmem:[#allocation5 + $0x10] sm:$0xff] %vm639_vm3, %v548_v34  ;;  %v552_v0 = vpop.permute.xlu0 %551 }
  0x9d   : > { %790 = vrot.lane.b32.xlu1 %v10320_v37, %s9749_s29  ;;  %644 = vst.msk [vmem:[#allocation5 + $0x20] sm:$0xff] %vm639_vm3, %v552_v0 }
  0x9e   : > { %796 = vrot.lane.b32.xlu0 %v10326_v36, %s9749_s29 }
  0x9f   : > { %v550_v48 = vpop.permute.xlu1 %549 }
  0xa0   : > { %643 = vst.msk [vmem:[#allocation5 + $0x18] sm:$0xff] %vm639_vm3, %v550_v48  ;;  %v556_v34 = vpop.permute.xlu0 %555 }
  0xa1   : > { %794 = vrot.lane.b32.xlu1 %v10330_v45, %s9749_s29  ;;  %646 = vst.msk [vmem:[#allocation5 + $0x30] sm:$0xff] %vm639_vm3, %v556_v34 }
  0xa2   : > { %929 = vrot.lane.b32.xlu0 %v10015_v46, %s9750_s30 }
  0xa3   : > { %v554_v37 = vpop.permute.xlu1 %553 }
  0xa4   : > { %645 = vst.msk [vmem:[#allocation5 + $0x28] sm:$0xff] %vm639_vm3, %v554_v37  ;;  %v560_v0 = vpop.permute.xlu0 %559 }
  0xa5   : > { %798 = vrot.lane.b32.xlu1 %v10338_v38, %s9749_s29  ;;  %648 = vst.msk [vmem:[#allocation5 + $0x40] sm:$0xff] %vm639_vm3, %v560_v0 }
  0xa6   : > { %933 = vrot.lane.b32.xlu0 %v10031_v51, %s9750_s30 }
  0xa7   : > { %v558_v48 = vpop.permute.xlu1 %557 }
  0xa8   : > { %647 = vst.msk [vmem:[#allocation5 + $0x38] sm:$0xff] %vm639_vm3, %v558_v48  ;;  %v564_v34 = vpop.permute.xlu0 %563 }
  0xa9   : > { %931 = vrot.lane.b32.xlu1 %v10025_v49, %s9750_s30  ;;  %650 = vst.msk [vmem:[#allocation5 + $0x50] sm:$0xff] %vm639_vm3, %v564_v34 }
  0xaa   : > { %937 = vrot.lane.b32.xlu0 %v10043_v54, %s9750_s30 }
  0xab   : > { %v562_v46 = vpop.permute.xlu1 %561 }
  0xac   : > { %649 = vst.msk [vmem:[#allocation5 + $0x48] sm:$0xff] %vm639_vm3, %v562_v46  ;;  %v568_v37 = vpop.permute.xlu0 %567 }
  0xad   : > { %935 = vrot.lane.b32.xlu1 %v10033_v52, %s9750_s30  ;;  %652 = vst.msk [vmem:[#allocation5 + $0x60] sm:$0xff] %vm639_vm3, %v568_v37 }
  0xae   : > { %941 = vrot.lane.b32.xlu0 %v10053_v57, %s9750_s30 }
  0xaf   : > { %v566_v0 = vpop.permute.xlu1 %565 }
  0xb0   : > { %651 = vst.msk [vmem:[#allocation5 + $0x58] sm:$0xff] %vm639_vm3, %v566_v0  ;;  %v572_v49 = vpop.permute.xlu0 %571 }
  0xb1   : > { %939 = vrot.lane.b32.xlu1 %v10045_v55, %s9750_s30  ;;  %654 = vst.msk [vmem:[#allocation5 + $0x70] sm:$0xff] %vm639_vm3, %v572_v49 }
  0xb2   : > { %945 = vrot.lane.b32.xlu0 %v10057_v59, %s9750_s30 }
  0xb3   : > { %v570_v48 = vpop.permute.xlu1 %569 }
  0xb4   : > { %653 = vst.msk [vmem:[#allocation5 + $0x68] sm:$0xff] %vm639_vm3, %v570_v48  ;;  %v576_v34 = vpop.permute.xlu0 %575 }
  0xb5   : > { %943 = vrot.lane.b32.xlu1 %v10055_v58, %s9750_s30  ;;  %656 = vst.msk [vmem:[#allocation5 + $0x80] sm:$0xff] %vm639_vm3, %v576_v34 }
  0xb6   : > { %949 = vrot.lane.b32.xlu0 %v10069_v61, %s9750_s30 }
  0xb7   : > { %v574_v46 = vpop.permute.xlu1 %573 }
  0xb8   : > { %655 = vst.msk [vmem:[#allocation5 + $0x78] sm:$0xff] %vm639_vm3, %v574_v46  ;;  %v580_v37 = vpop.permute.xlu0 %579 }
  0xb9   : > { %947 = vrot.lane.b32.xlu1 %v10067_v60, %s9750_s30  ;;  %658 = vst.msk [vmem:[#allocation5 + $0x90] sm:$0xff] %vm639_vm3, %v580_v37 }
  0xba   : > { %953 = vrot.lane.b32.xlu0 %v10081_v1, %s9750_s30 }
  0xbb   : > { %v578_v0 = vpop.permute.xlu1 %577 }
  0xbc   : > { %657 = vst.msk [vmem:[#allocation5 + $0x88] sm:$0xff] %vm639_vm3, %v578_v0  ;;  %v584_v49 = vpop.permute.xlu0 %583 }
  0xbd   : > { %951 = vrot.lane.b32.xlu1 %v10071_v62, %s9750_s30  ;;  %660 = vst.msk [vmem:[#allocation5 + $0xa0] sm:$0xff] %vm639_vm3, %v584_v49 }
  0xbe   : > { %957 = vrot.lane.b32.xlu0 %v10085_v3, %s9750_s30 }
  0xbf   : > { %v582_v48 = vpop.permute.xlu1 %581 }
  0xc0   : > { %659 = vst.msk [vmem:[#allocation5 + $0x98] sm:$0xff] %vm639_vm3, %v582_v48  ;;  %v588_v34 = vpop.permute.xlu0 %587 }
  0xc1   : > { %955 = vrot.lane.b32.xlu1 %v10083_v2, %s9750_s30  ;;  %662 = vst.msk [vmem:[#allocation5 + $0xb0] sm:$0xff] %vm639_vm3, %v588_v34 }
  0xc2   : > { %961 = vrot.lane.b32.xlu0 %v10097_v5, %s9750_s30 }
  0xc3   : > { %v586_v46 = vpop.permute.xlu1 %585 }
  0xc4   : > { %661 = vst.msk [vmem:[#allocation5 + $0xa8] sm:$0xff] %vm639_vm3, %v586_v46  ;;  %v592_v37 = vpop.permute.xlu0 %591 }
  0xc5   : > { %959 = vrot.lane.b32.xlu1 %v10095_v4, %s9750_s30  ;;  %664 = vst.msk [vmem:[#allocation5 + $0xc0] sm:$0xff] %vm639_vm3, %v592_v37 }
  0xc6   : > { %965 = vrot.lane.b32.xlu0 %v10109_v8, %s9750_s30 }
  0xc7   : > { %v590_v0 = vpop.permute.xlu1 %589 }
  0xc8   : > { %663 = vst.msk [vmem:[#allocation5 + $0xb8] sm:$0xff] %vm639_vm3, %v590_v0  ;;  %v596_v49 = vpop.permute.xlu0 %595 }
  0xc9   : > { %963 = vrot.lane.b32.xlu1 %v10099_v6, %s9750_s30  ;;  %666 = vst.msk [vmem:[#allocation5 + $0xd0] sm:$0xff] %vm639_vm3, %v596_v49 }
  0xca   : > { %969 = vrot.lane.b32.xlu0 %v10113_v10, %s9750_s30 }
  0xcb   : > { %v594_v48 = vpop.permute.xlu1 %593 }
  0xcc   : > { %665 = vst.msk [vmem:[#allocation5 + $0xc8] sm:$0xff] %vm639_vm3, %v594_v48  ;;  %v600_v34 = vpop.permute.xlu0 %599 }
  0xcd   : > { %967 = vrot.lane.b32.xlu1 %v10111_v9, %s9750_s30  ;;  %668 = vst.msk [vmem:[#allocation5 + $0xe0] sm:$0xff] %vm639_vm3, %v600_v34 }
  0xce   : > { %973 = vrot.lane.b32.xlu0 %v10131_v13, %s9750_s30 }
  0xcf   : > { %v598_v46 = vpop.permute.xlu1 %597 }
  0xd0   : > { %667 = vst.msk [vmem:[#allocation5 + $0xd8] sm:$0xff] %vm639_vm3, %v598_v46  ;;  %v604_v37 = vpop.permute.xlu0 %603 }
  0xd1   : > { %971 = vrot.lane.b32.xlu1 %v10123_v11, %s9750_s30  ;;  %670 = vst.msk [vmem:[#allocation5 + $0xf0] sm:$0xff] %vm639_vm3, %v604_v37  ;;  %v10428_v37 = vld [vmem:[#allocation2 + $0x180] sm:$0xff] }
  0xd2   : > { %977 = vrot.lane.b32.xlu0 %v10147_v17, %s9750_s30 }
  0xd3   : > { %v602_v0 = vpop.permute.xlu1 %601 }
  0xd4   : > { %669 = vst.msk [vmem:[#allocation5 + $0xe8] sm:$0xff] %vm639_vm3, %v602_v0  ;;  %v737_v49 = vpop.permute.xlu0 %736 }
  0xd5   : > { %975 = vrot.lane.b32.xlu1 %v10133_v14, %s9750_s30  ;;  %833 = vst.msk [vmem:[#allocation5] sm:$0xff] %vm832_vm4, %v737_v49 }
  0xd6   : > { %981 = vrot.lane.b32.xlu0 %v10161_v20, %s9750_s30 }
  0xd7   : > { %v606_v48 = vpop.permute.xlu1 %605 }
  0xd8   : > { %671 = vst.msk [vmem:[#allocation5 + $0xf8] sm:$0xff] %vm639_vm3, %v606_v48  ;;  %v741_v34 = vpop.permute.xlu0 %740  ;;  %vm2990_vm3 = vcmask 261312  }
  0xd9   : > { %979 = vrot.lane.b32.xlu1 %v10149_v18, %s9750_s30  ;;  %835 = vst.msk [vmem:[#allocation5 + $0x10] sm:$0xff] %vm832_vm4, %v741_v34  ;;  %v10438_v34 = vld [vmem:[#allocation2 + $0x188] sm:$0xff] }
  0xda   : > { %985 = vrot.lane.b32.xlu0 %v10177_v24, %s9750_s30 }
  0xdb   : > { %v739_v46 = vpop.permute.xlu1 %738 }
  0xdc   : > { %834 = vst.msk [vmem:[#allocation5 + $0x8] sm:$0xff] %vm832_vm4, %v739_v46  ;;  %v745_v0 = vpop.permute.xlu0 %744 }
  0xdd   : > { %983 = vrot.lane.b32.xlu1 %v10163_v21, %s9750_s30  ;;  %837 = vst.msk [vmem:[#allocation5 + $0x20] sm:$0xff] %vm832_vm4, %v745_v0 }
  0xde   : > { %989 = vrot.lane.b32.xlu0 %v10428_v37, %s9750_s30 }
  0xdf   : > { %v743_v49 = vpop.permute.xlu1 %742 }
  0xe0   : > { %836 = vst.msk [vmem:[#allocation5 + $0x18] sm:$0xff] %vm832_vm4, %v743_v49  ;;  %v749_v48 = vpop.permute.xlu0 %748 }
  0xe1   : > { %987 = vrot.lane.b32.xlu1 %v10179_v28, %s9750_s30  ;;  %839 = vst.msk [vmem:[#allocation5 + $0x30] sm:$0xff] %vm832_vm4, %v749_v48 }
  0xe2   : > { %1122 = vrot.lane.b32.xlu0 %v9950_v25, %s9751_s7 }
  0xe3   : > { %v747_v46 = vpop.permute.xlu1 %746 }
  0xe4   : > { %838 = vst.msk [vmem:[#allocation5 + $0x28] sm:$0xff] %vm832_vm4, %v747_v46  ;;  %v753_v0 = vpop.permute.xlu0 %752 }
  0xe5   : > { %991 = vrot.lane.b32.xlu1 %v10438_v34, %s9750_s30  ;;  %841 = vst.msk [vmem:[#allocation5 + $0x40] sm:$0xff] %vm832_vm4, %v753_v0  ;;  %s14195_s30 = scalar_lea.vmem %s14318_s6, %s9341_s24 }
  0xe6   : > { %1126 = vrot.lane.b32.xlu0 %v9952_v26, %s9751_s7 }
  0xe7   : > { %v751_v49 = vpop.permute.xlu1 %750 }
  0xe8   : > { %840 = vst.msk [vmem:[#allocation5 + $0x38] sm:$0xff] %vm832_vm4, %v751_v49  ;;  %v757_v48 = vpop.permute.xlu0 %756  ;;  %v14413_v49 = vld [vmem:[#allocation7_spill] sm:$0xff] }
  0xe9   : > { %1124 = vrot.lane.b32.xlu1 %v9959_v27, %s9751_s7  ;;  %843 = vst.msk [vmem:[#allocation5 + $0x50] sm:$0xff] %vm832_vm4, %v757_v48  ;;  %v14414_v48 = vld [vmem:[#allocation8_spill] sm:$0xff] }
  0xea   : > { %1130 = vrot.lane.b32.xlu0 %v9967_v30, %s9751_s7 }
  0xeb   : > { %v755_v25 = vpop.permute.xlu1 %754 }
  0xec   : > { %842 = vst.msk [vmem:[#allocation5 + $0x48] sm:$0xff] %vm832_vm4, %v755_v25  ;;  %v761_v46 = vpop.permute.xlu0 %760 }
  0xed   : > { %1128 = vrot.lane.b32.xlu1 %v9971_v31, %s9751_s7  ;;  %845 = vst.msk [vmem:[#allocation5 + $0x60] sm:$0xff] %vm832_vm4, %v761_v46  ;;  %v14415_v46 = vld [vmem:[#allocation9_spill] sm:$0xff] }
  0xee   : > { %1134 = vrot.lane.b32.xlu0 %v9975_v32, %s9751_s7 }
  0xef   : > { %v759_v26 = vpop.permute.xlu1 %758 }
  0xf0   : > { %844 = vst.msk [vmem:[#allocation5 + $0x58] sm:$0xff] %vm832_vm4, %v759_v26  ;;  %v765_v27 = vpop.permute.xlu0 %764 }
  0xf1   : > { %1132 = vrot.lane.b32.xlu1 %v9988_v39, %s9751_s7  ;;  %847 = vst.msk [vmem:[#allocation5 + $0x70] sm:$0xff] %vm832_vm4, %v765_v27  ;;  %v10538_v27 = vld [vmem:[#allocation2 + $0x189] sm:$0xff] }
  0xf2   : > { %1138 = vrot.lane.b32.xlu0 %v9995_v40, %s9751_s7 }
  0xf3   : > { %v763_v30 = vpop.permute.xlu1 %762 }
  0xf4   : > { %846 = vst.msk [vmem:[#allocation5 + $0x68] sm:$0xff] %vm832_vm4, %v763_v30  ;;  %v769_v31 = vpop.permute.xlu0 %768 }
  0xf5   : > { %1136 = vrot.lane.b32.xlu1 %v9999_v41, %s9751_s7  ;;  %849 = vst.msk [vmem:[#allocation5 + $0x80] sm:$0xff] %vm832_vm4, %v769_v31  ;;  %v14416_v31 = vld [vmem:[#allocation10_spill] sm:$0xff] }
  0xf6   : > { %1142 = vrot.lane.b32.xlu0 %v10003_v42, %s9751_s7 }
  0xf7   : > { %v767_v32 = vpop.permute.xlu1 %766 }
  0xf8   : > { %848 = vst.msk [vmem:[#allocation5 + $0x78] sm:$0xff] %vm832_vm4, %v767_v32  ;;  %v773_v39 = vpop.permute.xlu0 %772 }
  0xf9   : > { %1140 = vrot.lane.b32.xlu1 %v10007_v43, %s9751_s7  ;;  %851 = vst.msk [vmem:[#allocation5 + $0x90] sm:$0xff] %vm832_vm4, %v773_v39 }
  0xfa   : > { %1146 = vrot.lane.b32.xlu0 %v10011_v44, %s9751_s7 }
  0xfb   : > { %v771_v40 = vpop.permute.xlu1 %770 }
  0xfc   : > { %850 = vst.msk [vmem:[#allocation5 + $0x88] sm:$0xff] %vm832_vm4, %v771_v40  ;;  %v777_v41 = vpop.permute.xlu0 %776  ;;  %v14417_v40 = vld [vmem:[#allocation11_spill] sm:$0xff] }
  0xfd   : > { %1144 = vrot.lane.b32.xlu1 %v10017_v47, %s9751_s7  ;;  %853 = vst.msk [vmem:[#allocation5 + $0xa0] sm:$0xff] %vm832_vm4, %v777_v41  ;;  %v14418_v41 = vld [vmem:[#allocation12_spill] sm:$0xff] }
  0xfe   : > { %1150 = vrot.lane.b32.xlu0 %v10027_v50, %s9751_s7 }
  0xff   : > { %v775_v42 = vpop.permute.xlu1 %774 }
 0x100   : > { %852 = vst.msk [vmem:[#allocation5 + $0x98] sm:$0xff] %vm832_vm4, %v775_v42  ;;  %v781_v43 = vpop.permute.xlu0 %780 }
 0x101   : > { %1148 = vrot.lane.b32.xlu1 %v10037_v53, %s9751_s7  ;;  %855 = vst.msk [vmem:[#allocation5 + $0xb0] sm:$0xff] %vm832_vm4, %v781_v43 }
 0x102   : > { %1154 = vrot.lane.b32.xlu0 %v10047_v56, %s9751_s7 }
 0x103   : > { %v779_v44 = vpop.permute.xlu1 %778 }
 0x104   : > { %854 = vst.msk [vmem:[#allocation5 + $0xa8] sm:$0xff] %vm832_vm4, %v779_v44  ;;  %v785_v47 = vpop.permute.xlu0 %784  ;;  %v14419_v44 = vld [vmem:[#allocation13_spill] sm:$0xff] }
 0x105   : > { %1152 = vrot.lane.b32.xlu1 %v10073_v63, %s9751_s7  ;;  %857 = vst.msk [vmem:[#allocation5 + $0xc0] sm:$0xff] %vm832_vm4, %v785_v47  ;;  %v14420_v47 = vld [vmem:[#allocation14_spill] sm:$0xff] }
 0x106   : > { %1158 = vrot.lane.b32.xlu0 %v10101_v7, %s9751_s7 }
 0x107   : > { %v783_v50 = vpop.permute.xlu1 %782 }
 0x108   : > { %856 = vst.msk [vmem:[#allocation5 + $0xb8] sm:$0xff] %vm832_vm4, %v783_v50  ;;  %v789_v53 = vpop.permute.xlu0 %788 }
 0x109   : > { %1156 = vrot.lane.b32.xlu1 %v10125_v12, %s9751_s7  ;;  %859 = vst.msk [vmem:[#allocation5 + $0xd0] sm:$0xff] %vm832_vm4, %v789_v53 }
 0x10a   : > { %1162 = vrot.lane.b32.xlu0 %v10135_v15, %s9751_s7 }
 0x10b   : > { %v787_v56 = vpop.permute.xlu1 %786 }
 0x10c   : > { %858 = vst.msk [vmem:[#allocation5 + $0xc8] sm:$0xff] %vm832_vm4, %v787_v56  ;;  %v793_v63 = vpop.permute.xlu0 %792  ;;  %v14421_v56 = vld [vmem:[#allocation15_spill] sm:$0xff] }
 0x10d   : > { %1160 = vrot.lane.b32.xlu1 %v10143_v16, %s9751_s7  ;;  %861 = vst.msk [vmem:[#allocation5 + $0xe0] sm:$0xff] %vm832_vm4, %v793_v63  ;;  %v14422_v63 = vld [vmem:[#allocation16_spill] sm:$0xff] }
 0x10e   : > { %1166 = vrot.lane.b32.xlu0 %v10157_v19, %s9751_s7 }
 0x10f   : > { %v791_v7 = vpop.permute.xlu1 %790 }
 0x110   : > { %860 = vst.msk [vmem:[#allocation5 + $0xd8] sm:$0xff] %vm832_vm4, %v791_v7  ;;  %v797_v12 = vpop.permute.xlu0 %796 }
 0x111   : > { %1164 = vrot.lane.b32.xlu1 %v10165_v22, %s9751_s7  ;;  %863 = vst.msk [vmem:[#allocation5 + $0xf0] sm:$0xff] %vm832_vm4, %v797_v12  ;;  %v14412_v22 = vld [vmem:[#allocation6_spill] sm:$0xff] }
 0x112   : > { %1170 = vrot.lane.b32.xlu0 %v10173_v23, %s9751_s7 }
 0x113   : > { %v795_v15 = vpop.permute.xlu1 %794 }
 0x114   : > { %862 = vst.msk [vmem:[#allocation5 + $0xe8] sm:$0xff] %vm832_vm4, %v795_v15  ;;  %v930_v16 = vpop.permute.xlu0 %929  ;;  %v14423_v15 = vld [vmem:[#allocation17_spill] sm:$0xff] }
 0x115   : > { %1168 = vrot.lane.b32.xlu1 %v10181_v29, %s9751_s7  ;;  %1026 = vst.msk [vmem:[#allocation5] sm:$0xff] %vm1025_vm5, %v930_v16  ;;  %v10528_v29 = vld [vmem:[#allocation2 + $0x181] sm:$0xff] }
 0x116   : > { %1174 = vrot.lane.b32.xlu0 %v10189_v33, %s9751_s7  ;;  %v14424_v16 = vld [vmem:[#allocation18_spill] sm:$0xff] }
 0x117   : > { %v799_v19 = vpop.permute.xlu1 %798 }
 0x118   : > { %864 = vst.msk [vmem:[#allocation5 + $0xf8] sm:$0xff] %vm832_vm4, %v799_v19  ;;  %v934_v0 = vpop.permute.xlu0 %933  ;;  %vm3183_vm4 = vcmask 326912  }
 0x119   : > { %1172 = vrot.lane.b32.xlu1 %v14412_v22, %s9751_s7  ;;  %1028 = vst.msk [vmem:[#allocation5 + $0x10] sm:$0xff] %vm1025_vm5, %v934_v0  ;;  %v14425_v0 = vld [vmem:[#allocation19_spill] sm:$0xff] }
 0x11a   : > { %1178 = vrot.lane.b32.xlu0 %v14413_v49, %s9751_s7 }
 0x11b   : > { %v932_v23 = vpop.permute.xlu1 %931 }
 0x11c   : > { %1027 = vst.msk [vmem:[#allocation5 + $0x8] sm:$0xff] %vm1025_vm5, %v932_v23  ;;  %v938_v33 = vpop.permute.xlu0 %937  ;;  %v14426_v23 = vld [vmem:[#allocation20_spill] sm:$0xff] }
 0x11d   : > { %1176 = vrot.lane.b32.xlu1 %v14414_v48, %s9751_s7  ;;  %1030 = vst.msk [vmem:[#allocation5 + $0x20] sm:$0xff] %vm1025_vm5, %v938_v33  ;;  %v14427_v33 = vld [vmem:[#allocation21_spill] sm:$0xff] }
 0x11e   : > { %1182 = vrot.lane.b32.xlu0 %v10528_v29, %s9751_s7 }
 0x11f   : > { %v936_v25 = vpop.permute.xlu1 %935 }
 0x120   : > { %1029 = vst.msk [vmem:[#allocation5 + $0x18] sm:$0xff] %vm1025_vm5, %v936_v25  ;;  %v942_v26 = vpop.permute.xlu0 %941  ;;  %v14428_v25 = vld [vmem:[#allocation22_spill] sm:$0xff] }
 0x121   : > { %1180 = vrot.lane.b32.xlu1 %v14415_v46, %s9751_s7  ;;  %1032 = vst.msk [vmem:[#allocation5 + $0x30] sm:$0xff] %vm1025_vm5, %v942_v26 }
 0x122   : > { %1315 = vrot.lane.b32.xlu0 %v14416_v31, %s9752_s8  ;;  %v14430_v31 = vld [vmem:[#allocation24_spill] sm:$0xff] }
 0x123   : > { %v940_v30 = vpop.permute.xlu1 %939 }
 0x124   : > { %1031 = vst.msk [vmem:[#allocation5 + $0x28] sm:$0xff] %vm1025_vm5, %v940_v30  ;;  %v946_v32 = vpop.permute.xlu0 %945  ;;  %v14429_v30 = vld [vmem:[#allocation23_spill] sm:$0xff] }
 0x125   : > { %1184 = vrot.lane.b32.xlu1 %v10538_v27, %s9751_s7  ;;  %1034 = vst.msk [vmem:[#allocation5 + $0x40] sm:$0xff] %vm1025_vm5, %v946_v32 }
 0x126   : > { %1319 = vrot.lane.b32.xlu0 %v14417_v40, %s9752_s8  ;;  %v14431_v40 = vld [vmem:[#allocation25_spill] sm:$0xff] }
 0x127   : > { %v944_v39 = vpop.permute.xlu1 %943 }
 0x128   : > { %1033 = vst.msk [vmem:[#allocation5 + $0x38] sm:$0xff] %vm1025_vm5, %v944_v39  ;;  %v950_v42 = vpop.permute.xlu0 %949 }
 0x129   : > { %1317 = vrot.lane.b32.xlu1 %v14418_v41, %s9752_s8  ;;  %1036 = vst.msk [vmem:[#allocation5 + $0x50] sm:$0xff] %vm1025_vm5, %v950_v42  ;;  %v14432_v41 = vld [vmem:[#allocation26_spill] sm:$0xff] }
 0x12a   : > { %1323 = vrot.lane.b32.xlu0 %v14419_v44, %s9752_s8  ;;  %v14433_v44 = vld [vmem:[#allocation27_spill] sm:$0xff] }
 0x12b   : > { %v948_v43 = vpop.permute.xlu1 %947 }
 0x12c   : > { %1035 = vst.msk [vmem:[#allocation5 + $0x48] sm:$0xff] %vm1025_vm5, %v948_v43  ;;  %v954_v50 = vpop.permute.xlu0 %953 }
 0x12d   : > { %1321 = vrot.lane.b32.xlu1 %v14420_v47, %s9752_s8  ;;  %1038 = vst.msk [vmem:[#allocation5 + $0x60] sm:$0xff] %vm1025_vm5, %v954_v50  ;;  %v14434_v47 = vld [vmem:[#allocation28_spill] sm:$0xff] }
 0x12e   : > { %1327 = vrot.lane.b32.xlu0 %v14421_v56, %s9752_s8  ;;  %v14435_v56 = vld [vmem:[#allocation29_spill] sm:$0xff] }
 0x12f   : > { %v952_v53 = vpop.permute.xlu1 %951 }
 0x130   : > { %1037 = vst.msk [vmem:[#allocation5 + $0x58] sm:$0xff] %vm1025_vm5, %v952_v53  ;;  %v958_v7 = vpop.permute.xlu0 %957 }
 0x131   : > { %1325 = vrot.lane.b32.xlu1 %v14422_v63, %s9752_s8  ;;  %1040 = vst.msk [vmem:[#allocation5 + $0x70] sm:$0xff] %vm1025_vm5, %v958_v7  ;;  %v14436_v63 = vld [vmem:[#allocation30_spill] sm:$0xff] }
 0x132   : > { %1331 = vrot.lane.b32.xlu0 %v14423_v15, %s9752_s8  ;;  %v14437_v15 = vld [vmem:[#allocation31_spill] sm:$0xff] }
 0x133   : > { %v956_v12 = vpop.permute.xlu1 %955 }
 0x134   : > { %1039 = vst.msk [vmem:[#allocation5 + $0x68] sm:$0xff] %vm1025_vm5, %v956_v12  ;;  %v962_v19 = vpop.permute.xlu0 %961 }
 0x135   : > { %1329 = vrot.lane.b32.xlu1 %v14424_v16, %s9752_s8  ;;  %1042 = vst.msk [vmem:[#allocation5 + $0x80] sm:$0xff] %vm1025_vm5, %v962_v19  ;;  %v14438_v16 = vld [vmem:[#allocation32_spill] sm:$0xff] }
 0x136   : > { %1335 = vrot.lane.b32.xlu0 %v14425_v0, %s9752_s8  ;;  %v14439_v0 = vld [vmem:[#allocation33_spill] sm:$0xff] }
 0x137   : > { %v960_v22 = vpop.permute.xlu1 %959 }
 0x138   : > { %1041 = vst.msk [vmem:[#allocation5 + $0x78] sm:$0xff] %vm1025_vm5, %v960_v22  ;;  %v966_v49 = vpop.permute.xlu0 %965 }
 0x139   : > { %1333 = vrot.lane.b32.xlu1 %v14426_v23, %s9752_s8  ;;  %1044 = vst.msk [vmem:[#allocation5 + $0x90] sm:$0xff] %vm1025_vm5, %v966_v49  ;;  %v14440_v23 = vld [vmem:[#allocation34_spill] sm:$0xff] }
 0x13a   : > { %1339 = vrot.lane.b32.xlu0 %v14427_v33, %s9752_s8  ;;  %v14441_v33 = vld [vmem:[#allocation35_spill] sm:$0xff] }
 0x13b   : > { %v964_v48 = vpop.permute.xlu1 %963 }
 0x13c   : > { %1043 = vst.msk [vmem:[#allocation5 + $0x88] sm:$0xff] %vm1025_vm5, %v964_v48  ;;  %v970_v46 = vpop.permute.xlu0 %969 }
 0x13d   : > { %1337 = vrot.lane.b32.xlu1 %v14428_v25, %s9752_s8  ;;  %1046 = vst.msk [vmem:[#allocation5 + $0xa0] sm:$0xff] %vm1025_vm5, %v970_v46 }
 0x13e   : > { %1343 = vrot.lane.b32.xlu0 %v14429_v30, %s9752_s8 }
 0x13f   : > { %v968_v26 = vpop.permute.xlu1 %967 }
 0x140   : > { %1045 = vst.msk [vmem:[#allocation5 + $0x98] sm:$0xff] %vm1025_vm5, %v968_v26  ;;  %v974_v32 = vpop.permute.xlu0 %973  ;;  %v10628_v26 = vld [vmem:[#allocation2 + $0x182] sm:$0xff] }
 0x141   : > { %1341 = vrot.lane.b32.xlu1 %v14430_v31, %s9752_s8  ;;  %1048 = vst.msk [vmem:[#allocation5 + $0xb0] sm:$0xff] %vm1025_vm5, %v974_v32  ;;  %v10638_v31 = vld [vmem:[#allocation2 + $0x18a] sm:$0xff] }
 0x142   : > { %1347 = vrot.lane.b32.xlu0 %v14431_v40, %s9752_s8 }
 0x143   : > { %v972_v39 = vpop.permute.xlu1 %971 }
 0x144   : > { %1047 = vst.msk [vmem:[#allocation5 + $0xa8] sm:$0xff] %vm1025_vm5, %v972_v39  ;;  %v978_v42 = vpop.permute.xlu0 %977 }
 0x145   : > { %1345 = vrot.lane.b32.xlu1 %v14432_v41, %s9752_s8  ;;  %1050 = vst.msk [vmem:[#allocation5 + $0xc0] sm:$0xff] %vm1025_vm5, %v978_v42 }
 0x146   : > { %1351 = vrot.lane.b32.xlu0 %v14433_v44, %s9752_s8 }
 0x147   : > { %v976_v43 = vpop.permute.xlu1 %975 }
 0x148   : > { %1049 = vst.msk [vmem:[#allocation5 + $0xb8] sm:$0xff] %vm1025_vm5, %v976_v43  ;;  %v982_v50 = vpop.permute.xlu0 %981 }
 0x149   : > { %1349 = vrot.lane.b32.xlu1 %v14434_v47, %s9752_s8  ;;  %1052 = vst.msk [vmem:[#allocation5 + $0xd0] sm:$0xff] %vm1025_vm5, %v982_v50  ;;  %v1639_v47 = vld [vmem:[#allocation2 + $0x39] sm:$0xff] }
 0x14a   : > { %1355 = vrot.lane.b32.xlu0 %v14435_v56, %s9752_s8  ;;  %v1641_v56 = vld [vmem:[#allocation2 + $0x51] sm:$0xff] }
 0x14b   : > { %v980_v53 = vpop.permute.xlu1 %979 }
 0x14c   : > { %1051 = vst.msk [vmem:[#allocation5 + $0xc8] sm:$0xff] %vm1025_vm5, %v980_v53  ;;  %v986_v7 = vpop.permute.xlu0 %985 }
 0x14d   : > { %1353 = vrot.lane.b32.xlu1 %v14436_v63, %s9752_s8  ;;  %1054 = vst.msk [vmem:[#allocation5 + $0xe0] sm:$0xff] %vm1025_vm5, %v986_v7  ;;  %v1644_v7 = vld [vmem:[#allocation2 + $0x79] sm:$0xff] }
 0x14e   : > { %1359 = vrot.lane.b32.xlu0 %v14437_v15, %s9752_s8  ;;  %v1643_v15 = vld [vmem:[#allocation2 + $0x69] sm:$0xff] }
 0x14f   : > { %v984_v12 = vpop.permute.xlu1 %983 }
 0x150   : > { %1053 = vst.msk [vmem:[#allocation5 + $0xd8] sm:$0xff] %vm1025_vm5, %v984_v12  ;;  %v990_v19 = vpop.permute.xlu0 %989 }
 0x151   : > { %1357 = vrot.lane.b32.xlu1 %v14438_v16, %s9752_s8  ;;  %1056 = vst.msk [vmem:[#allocation5 + $0xf0] sm:$0xff] %vm1025_vm5, %v990_v19  ;;  %v1646_v19 = vld [vmem:[#allocation2 + $0x91] sm:$0xff] }
 0x152   : > { %1363 = vrot.lane.b32.xlu0 %v14439_v0, %s9752_s8  ;;  %v1645_v0 = vld [vmem:[#allocation2 + $0x81] sm:$0xff] }
 0x153   : > { %v988_v22 = vpop.permute.xlu1 %987 }
 0x154   : > { %1055 = vst.msk [vmem:[#allocation5 + $0xe8] sm:$0xff] %vm1025_vm5, %v988_v22  ;;  %v1123_v49 = vpop.permute.xlu0 %1122 }
 0x155   : > { %1361 = vrot.lane.b32.xlu1 %v14440_v23, %s9752_s8  ;;  %1219 = vst.msk [vmem:[#allocation5] sm:$0xff] %vm1218_vm6, %v1123_v49  ;;  %v1648_v49 = vld [vmem:[#allocation2 + $0xa9] sm:$0xff] }
 0x156   : > { %1367 = vrot.lane.b32.xlu0 %v10316_v35, %s9752_s8 }
 0x157   : > { %v992_v48 = vpop.permute.xlu1 %991 }
 0x158   : > { %1057 = vst.msk [vmem:[#allocation5 + $0xf8] sm:$0xff] %vm1025_vm5, %v992_v48  ;;  %v1127_v25 = vpop.permute.xlu0 %1126  ;;  %vm3376_vm5 = vcmask 392512  }
 0x159   : > { %1365 = vrot.lane.b32.xlu1 %v14441_v33, %s9752_s8  ;;  %1221 = vst.msk [vmem:[#allocation5 + $0x10] sm:$0xff] %vm1218_vm6, %v1127_v25  ;;  %v1647_v33 = vld [vmem:[#allocation2 + $0x99] sm:$0xff] }
 0x15a   : > { %1371 = vrot.lane.b32.xlu0 %v10326_v36, %s9752_s8 }
 0x15b   : > { %v1125_v46 = vpop.permute.xlu1 %1124 }
 0x15c   : > { %1220 = vst.msk [vmem:[#allocation5 + $0x8] sm:$0xff] %vm1218_vm6, %v1125_v46  ;;  %v1131_v35 = vpop.permute.xlu0 %1130  ;;  %v1650_v46 = vld [vmem:[#allocation2 + $0xc1] sm:$0xff] }
 0x15d   : > { %1369 = vrot.lane.b32.xlu1 %v10330_v45, %s9752_s8  ;;  %1223 = vst.msk [vmem:[#allocation5 + $0x20] sm:$0xff] %vm1218_vm6, %v1131_v35 }
 0x15e   : > { %1375 = vrot.lane.b32.xlu0 %v10628_v26, %s9752_s8 }
 0x15f   : > { %v1129_v30 = vpop.permute.xlu1 %1128 }
 0x160   : > { %1222 = vst.msk [vmem:[#allocation5 + $0x18] sm:$0xff] %vm1218_vm6, %v1129_v30  ;;  %v1135_v36 = vpop.permute.xlu0 %1134  ;;  %v1649_v30 = vld [vmem:[#allocation2 + $0xb1] sm:$0xff] }
 0x161   : > { %1373 = vrot.lane.b32.xlu1 %v10338_v38, %s9752_s8  ;;  %1225 = vst.msk [vmem:[#allocation5 + $0x30] sm:$0xff] %vm1218_vm6, %v1135_v36 }
 0x162   : > { %1509 = vrot.lane.b32.xlu0 %v10031_v51, %s9753_s9 }
 0x163   : > { %v1133_v32 = vpop.permute.xlu1 %1132 }
 0x164   : > { %1224 = vst.msk [vmem:[#allocation5 + $0x28] sm:$0xff] %vm1218_vm6, %v1133_v32  ;;  %v1139_v45 = vpop.permute.xlu0 %1138  ;;  %v1652_v32 = vld [vmem:[#allocation2 + $0xd9] sm:$0xff] }
 0x165   : > { %1377 = vrot.lane.b32.xlu1 %v10638_v31, %s9752_s8  ;;  %1227 = vst.msk [vmem:[#allocation5 + $0x40] sm:$0xff] %vm1218_vm6, %v1139_v45 }
 0x166   : > { %1513 = vrot.lane.b32.xlu0 %v10043_v54, %s9753_s9 }
 0x167   : > { %v1137_v39 = vpop.permute.xlu1 %1136 }
 0x168   : > { %1226 = vst.msk [vmem:[#allocation5 + $0x38] sm:$0xff] %vm1218_vm6, %v1137_v39  ;;  %v1143_v38 = vpop.permute.xlu0 %1142  ;;  %v1651_v39 = vld [vmem:[#allocation2 + $0xc9] sm:$0xff] }
 0x169   : > { %1511 = vrot.lane.b32.xlu1 %v10033_v52, %s9753_s9  ;;  %1229 = vst.msk [vmem:[#allocation5 + $0x50] sm:$0xff] %vm1218_vm6, %v1143_v38 }
 0x16a   : > { %1517 = vrot.lane.b32.xlu0 %v10053_v57, %s9753_s9 }
 0x16b   : > { %v1141_v51 = vpop.permute.xlu1 %1140 }
 0x16c   : > { %1228 = vst.msk [vmem:[#allocation5 + $0x48] sm:$0xff] %vm1218_vm6, %v1141_v51  ;;  %v1147_v40 = vpop.permute.xlu0 %1146  ;;  %v1654_v51 = vld [vmem:[#allocation2 + $0xf1] sm:$0xff] }
 0x16d   : > { %1515 = vrot.lane.b32.xlu1 %v10045_v55, %s9753_s9  ;;  %1231 = vst.msk [vmem:[#allocation5 + $0x60] sm:$0xff] %vm1218_vm6, %v1147_v40 }
 0x16e   : > { %1521 = vrot.lane.b32.xlu0 %v10057_v59, %s9753_s9 }
 0x16f   : > { %v1145_v54 = vpop.permute.xlu1 %1144 }
 0x170   : > { %1230 = vst.msk [vmem:[#allocation5 + $0x58] sm:$0xff] %vm1218_vm6, %v1145_v54  ;;  %v1151_v52 = vpop.permute.xlu0 %1150  ;;  %v1653_v54 = vld [vmem:[#allocation2 + $0xe1] sm:$0xff] }
 0x171   : > { %1519 = vrot.lane.b32.xlu1 %v10055_v58, %s9753_s9  ;;  %1233 = vst.msk [vmem:[#allocation5 + $0x70] sm:$0xff] %vm1218_vm6, %v1151_v52 }
 0x172   : > { %1525 = vrot.lane.b32.xlu0 %v10069_v61, %s9753_s9 }
 0x173   : > { %v1149_v57 = vpop.permute.xlu1 %1148 }
 0x174   : > { %1232 = vst.msk [vmem:[#allocation5 + $0x68] sm:$0xff] %vm1218_vm6, %v1149_v57  ;;  %v1155_v55 = vpop.permute.xlu0 %1154  ;;  %v1656_v57 = vld [vmem:[#allocation2 + $0x109] sm:$0xff] }
 0x175   : > { %1523 = vrot.lane.b32.xlu1 %v10067_v60, %s9753_s9  ;;  %1235 = vst.msk [vmem:[#allocation5 + $0x80] sm:$0xff] %vm1218_vm6, %v1155_v55 }
 0x176   : > { %1529 = vrot.lane.b32.xlu0 %v10081_v1, %s9753_s9 }
 0x177   : > { %v1153_v59 = vpop.permute.xlu1 %1152 }
 0x178   : > { %1234 = vst.msk [vmem:[#allocation5 + $0x78] sm:$0xff] %vm1218_vm6, %v1153_v59  ;;  %v1159_v58 = vpop.permute.xlu0 %1158  ;;  %v1655_v59 = vld [vmem:[#allocation2 + $0xf9] sm:$0xff] }
 0x179   : > { %1527 = vrot.lane.b32.xlu1 %v10071_v62, %s9753_s9  ;;  %1237 = vst.msk [vmem:[#allocation5 + $0x90] sm:$0xff] %vm1218_vm6, %v1159_v58 }
 0x17a   : > { %1533 = vrot.lane.b32.xlu0 %v10085_v3, %s9753_s9 }
 0x17b   : > { %v1157_v61 = vpop.permute.xlu1 %1156 }
 0x17c   : > { %1236 = vst.msk [vmem:[#allocation5 + $0x88] sm:$0xff] %vm1218_vm6, %v1157_v61  ;;  %v1163_v60 = vpop.permute.xlu0 %1162  ;;  %v1658_v61 = vld [vmem:[#allocation2 + $0x121] sm:$0xff] }
 0x17d   : > { %1531 = vrot.lane.b32.xlu1 %v10083_v2, %s9753_s9  ;;  %1239 = vst.msk [vmem:[#allocation5 + $0xa0] sm:$0xff] %vm1218_vm6, %v1163_v60 }
 0x17e   : > { %1537 = vrot.lane.b32.xlu0 %v10097_v5, %s9753_s9 }
 0x17f   : > { %v1161_v1 = vpop.permute.xlu1 %1160 }
 0x180   : > { %1238 = vst.msk [vmem:[#allocation5 + $0x98] sm:$0xff] %vm1218_vm6, %v1161_v1  ;;  %v1167_v62 = vpop.permute.xlu0 %1166  ;;  %v1657_v1 = vld [vmem:[#allocation2 + $0x111] sm:$0xff] }
 0x181   : > { %1535 = vrot.lane.b32.xlu1 %v10095_v4, %s9753_s9  ;;  %1241 = vst.msk [vmem:[#allocation5 + $0xb0] sm:$0xff] %vm1218_vm6, %v1167_v62 }
 0x182   : > { %1541 = vrot.lane.b32.xlu0 %v10109_v8, %s9753_s9 }
 0x183   : > { %v1165_v3 = vpop.permute.xlu1 %1164 }
 0x184   : > { %1240 = vst.msk [vmem:[#allocation5 + $0xa8] sm:$0xff] %vm1218_vm6, %v1165_v3  ;;  %v1171_v2 = vpop.permute.xlu0 %1170  ;;  %v1660_v3 = vld [vmem:[#allocation2 + $0x139] sm:$0xff] }
 0x185   : > { %1539 = vrot.lane.b32.xlu1 %v10099_v6, %s9753_s9  ;;  %1243 = vst.msk [vmem:[#allocation5 + $0xc0] sm:$0xff] %vm1218_vm6, %v1171_v2 }
 0x186   : > { %1545 = vrot.lane.b32.xlu0 %v10113_v10, %s9753_s9 }
 0x187   : > { %v1169_v5 = vpop.permute.xlu1 %1168 }
 0x188   : > { %1242 = vst.msk [vmem:[#allocation5 + $0xb8] sm:$0xff] %vm1218_vm6, %v1169_v5  ;;  %v1175_v4 = vpop.permute.xlu0 %1174  ;;  %v1659_v5 = vld [vmem:[#allocation2 + $0x129] sm:$0xff] }
 0x189   : > { %1543 = vrot.lane.b32.xlu1 %v10111_v9, %s9753_s9  ;;  %1245 = vst.msk [vmem:[#allocation5 + $0xd0] sm:$0xff] %vm1218_vm6, %v1175_v4 }
 0x18a   : > { %1549 = vrot.lane.b32.xlu0 %v10131_v13, %s9753_s9 }
 0x18b   : > { %v1173_v8 = vpop.permute.xlu1 %1172 }
 0x18c   : > { %1244 = vst.msk [vmem:[#allocation5 + $0xc8] sm:$0xff] %vm1218_vm6, %v1173_v8  ;;  %v1179_v6 = vpop.permute.xlu0 %1178  ;;  %v1662_v8 = vld [vmem:[#allocation2 + $0x151] sm:$0xff] }
 0x18d   : > { %1547 = vrot.lane.b32.xlu1 %v10123_v11, %s9753_s9  ;;  %1247 = vst.msk [vmem:[#allocation5 + $0xe0] sm:$0xff] %vm1218_vm6, %v1179_v6 }
 0x18e   : > { %1553 = vrot.lane.b32.xlu0 %v10147_v17, %s9753_s9 }
 0x18f   : > { %v1177_v10 = vpop.permute.xlu1 %1176 }
 0x190   : > { %1246 = vst.msk [vmem:[#allocation5 + $0xd8] sm:$0xff] %vm1218_vm6, %v1177_v10  ;;  %v1183_v9 = vpop.permute.xlu0 %1182  ;;  %v1661_v10 = vld [vmem:[#allocation2 + $0x141] sm:$0xff] }
 0x191   : > { %1551 = vrot.lane.b32.xlu1 %v10133_v14, %s9753_s9  ;;  %1249 = vst.msk [vmem:[#allocation5 + $0xf0] sm:$0xff] %vm1218_vm6, %v1183_v9 }
 0x192   : > { %1557 = vrot.lane.b32.xlu0 %v10161_v20, %s9753_s9 }
 0x193   : > { %v1181_v13 = vpop.permute.xlu1 %1180 }
 0x194   : > { %1248 = vst.msk [vmem:[#allocation5 + $0xe8] sm:$0xff] %vm1218_vm6, %v1181_v13  ;;  %v1316_v11 = vpop.permute.xlu0 %1315  ;;  %v1664_v13 = vld [vmem:[#allocation2 + $0x169] sm:$0xff] }
 0x195   : > { %1555 = vrot.lane.b32.xlu1 %v10149_v18, %s9753_s9  ;;  %1412 = vst.msk [vmem:[#allocation5] sm:$0xff] %vm1411_vm7, %v1316_v11  ;;  %v1475_v18 = vld [vmem:[#allocation2 + $0x198] sm:$0xff] }
 0x196   : > { %1561 = vrot.lane.b32.xlu0 %v10177_v24, %s9753_s9 }
 0x197   : > { %v1185_v17 = vpop.permute.xlu1 %1184 }
 0x198   : > { %1250 = vst.msk [vmem:[#allocation5 + $0xf8] sm:$0xff] %vm1218_vm6, %v1185_v17  ;;  %v1320_v14 = vpop.permute.xlu0 %1319  ;;  %v1663_v17 = vld [vmem:[#allocation2 + $0x159] sm:$0xff]  ;;  %vm4118_vm6 = vcmask 1043456  }
 0x199   : > { %1559 = vrot.lane.b32.xlu1 %v10163_v21, %s9753_s9  ;;  %1414 = vst.msk [vmem:[#allocation5 + $0x10] sm:$0xff] %vm1411_vm7, %v1320_v14  ;;  %v1638_v21 = vld [vmem:[#allocation2 + $0x31] sm:$0xff] }
 0x19a   : > { %1565 = vrot.lane.b32.xlu0 %v10428_v37, %s9753_s9  ;;  %v1476_v37 = vld [vmem:[#allocation2 + $0x1a0] sm:$0xff] }
 0x19b   : > { %v1318_v20 = vpop.permute.xlu1 %1317 }
 0x19c   : > { %1413 = vst.msk [vmem:[#allocation5 + $0x8] sm:$0xff] %vm1411_vm7, %v1318_v20  ;;  %v1324_v41 = vpop.permute.xlu0 %1323 }
 0x19d   : > { %1563 = vrot.lane.b32.xlu1 %v10179_v28, %s9753_s9  ;;  %1416 = vst.msk [vmem:[#allocation5 + $0x20] sm:$0xff] %vm1411_vm7, %v1324_v41  ;;  %v1640_v28 = vld [vmem:[#allocation2 + $0x49] sm:$0xff] }
 0x19e   : > { %1569 = vrot.lane.b32.xlu0 %v1475_v18, %s9753_s9  ;;  %v1665_v18 = vld [vmem:[#allocation2 + $0x171] sm:$0xff] }
 0x19f   : > { %v1322_v24 = vpop.permute.xlu1 %1321 }
 0x1a0   : > { %1415 = vst.msk [vmem:[#allocation5 + $0x18] sm:$0xff] %vm1411_vm7, %v1322_v24  ;;  %v1328_v42 = vpop.permute.xlu0 %1327  ;;  %v1668_v24 = vld [vmem:[#allocation2 + $0x199] sm:$0xff] }
 0x1a1   : > { %1567 = vrot.lane.b32.xlu1 %v10438_v34, %s9753_s9  ;;  %1418 = vst.msk [vmem:[#allocation5 + $0x30] sm:$0xff] %vm1411_vm7, %v1328_v42  ;;  %v1642_v34 = vld [vmem:[#allocation2 + $0x61] sm:$0xff] }
 0x1a2   : > { %1702 = vrot.lane.b32.xlu0 %v1638_v21, %s9754_s10  ;;  %v9717_v21 = vld [vmem:[%s14313_s1 + $0x10] ss:$0 sps:$4 sm:$0x33]  }
 0x1a3   : > { %v1326_v43 = vpop.permute.xlu1 %1325  ;;  %9691 = vmatprep.subr.msk.bf16.mxu0 %vm2141_vm9, %v9717_v21 }
 0x1a4   : > { %1417 = vst.msk [vmem:[#allocation5 + $0x28] sm:$0xff] %vm1411_vm7, %v1326_v43  ;;  %v1332_v44 = vpop.permute.xlu0 %1331 }
 0x1a5   : > { %1571 = vrot.lane.b32.xlu1 %v1476_v37, %s9753_s9  ;;  %1420 = vst.msk [vmem:[#allocation5 + $0x40] sm:$0xff] %vm1411_vm7, %v1332_v44  ;;  %v2143_v37 = vsel %vm2141_vm9, %v9717_v21, 0 }
 0x1a6   : > { %1706 = vrot.lane.b32.xlu0 %v1640_v28, %s9754_s10  ;;  %9460 = vmatpush3.bf16.msra.mxu0 %v2143_v37  ;;  %v9718_v28 = vld [vmem:[%s14313_s1 + $0x8] sm:$0xff]  }
 0x1a7   : > { %v1330_v50 = vpop.permute.xlu1 %1329  ;;  %9461 = vmatprep.subr.bf16.mxu0 %v9718_v28 }
 0x1a8   : > { %1419 = vst.msk [vmem:[#allocation5 + $0x38] sm:$0xff] %vm1411_vm7, %v1330_v50  ;;  %v1336_v53 = vpop.permute.xlu0 %1335 }
 0x1a9   : > { %1704 = vrot.lane.b32.xlu1 %v1639_v47, %s9754_s10  ;;  %1422 = vst.msk [vmem:[#allocation5 + $0x50] sm:$0xff] %vm1411_vm7, %v1336_v53  ;;  %v1669_v47 = vld [vmem:[#allocation2 + $0x1a1] sm:$0xff] }
 0x1aa   : > { %1710 = vrot.lane.b32.xlu0 %v1642_v34, %s9754_s10  ;;  %9462 = vmatpush3.bf16.msra.mxu0 %v9718_v28  ;;  %v1833_v34 = vld [vmem:[#allocation2 + $0x4a] sm:$0xff]  ;;  %v9719_v53 = vld [vmem:[%s14313_s1] sm:$0xff]  }
 0x1ab   : > { %v1334_v63 = vpop.permute.xlu1 %1333  ;;  %9463 = vmatprep.subr.bf16.mxu0 %v9719_v53 }
 0x1ac   : > { %1421 = vst.msk [vmem:[#allocation5 + $0x48] sm:$0xff] %vm1411_vm7, %v1334_v63  ;;  %v1340_v12 = vpop.permute.xlu0 %1339 }
 0x1ad   : > { %1708 = vrot.lane.b32.xlu1 %v1641_v56, %s9754_s10  ;;  %1424 = vst.msk [vmem:[#allocation5 + $0x60] sm:$0xff] %vm1411_vm7, %v1340_v12  ;;  %v1832_v56 = vld [vmem:[#allocation2 + $0x3a] sm:$0xff] }
 0x1ae   : > { %1714 = vrot.lane.b32.xlu0 %v1644_v7, %s9754_s10  ;;  %9464 = vmatpush3.bf16.msra.mxu0 %v9719_v53  ;;  %v1835_v7 = vld [vmem:[#allocation2 + $0x62] sm:$0xff] }
 0x1af   : > { %v1338_v16 = vpop.permute.xlu1 %1337 }
 0x1b0   : > { %1423 = vst.msk [vmem:[#allocation5 + $0x58] sm:$0xff] %vm1411_vm7, %v1338_v16  ;;  %v1344_v22 = vpop.permute.xlu0 %1343 }
 0x1b1   : > { %1712 = vrot.lane.b32.xlu1 %v1643_v15, %s9754_s10  ;;  %1426 = vst.msk [vmem:[#allocation5 + $0x70] sm:$0xff] %vm1411_vm7, %v1344_v22  ;;  %v1834_v15 = vld [vmem:[#allocation2 + $0x52] sm:$0xff] }
 0x1b2   : > { %1718 = vrot.lane.b32.xlu0 %v1646_v19, %s9754_s10  ;;  %v1837_v19 = vld [vmem:[#allocation2 + $0x7a] sm:$0xff] }
 0x1b3   : > { %v1342_v23 = vpop.permute.xlu1 %1341 }
 0x1b4   : > { %1425 = vst.msk [vmem:[#allocation5 + $0x68] sm:$0xff] %vm1411_vm7, %v1342_v23  ;;  %v1348_v48 = vpop.permute.xlu0 %1347 }
 0x1b5   : > { %1716 = vrot.lane.b32.xlu1 %v1645_v0, %s9754_s10  ;;  %1428 = vst.msk [vmem:[#allocation5 + $0x80] sm:$0xff] %vm1411_vm7, %v1348_v48  ;;  %v1836_v0 = vld [vmem:[#allocation2 + $0x6a] sm:$0xff] }
 0x1b6   : > { %1722 = vrot.lane.b32.xlu0 %v1648_v49, %s9754_s10  ;;  %v1839_v49 = vld [vmem:[#allocation2 + $0x92] sm:$0xff] }
 0x1b7   : > { %v1346_v25 = vpop.permute.xlu1 %1345 }
 0x1b8   : > { %1427 = vst.msk [vmem:[#allocation5 + $0x78] sm:$0xff] %vm1411_vm7, %v1346_v25  ;;  %v1352_v35 = vpop.permute.xlu0 %1351 }
 0x1b9   : > { %1720 = vrot.lane.b32.xlu1 %v1647_v33, %s9754_s10  ;;  %1430 = vst.msk [vmem:[#allocation5 + $0x90] sm:$0xff] %vm1411_vm7, %v1352_v35  ;;  %v1838_v33 = vld [vmem:[#allocation2 + $0x82] sm:$0xff] }
 0x1ba   : > { %1726 = vrot.lane.b32.xlu0 %v1650_v46, %s9754_s10  ;;  %v1841_v46 = vld [vmem:[#allocation2 + $0xaa] sm:$0xff] }
 0x1bb   : > { %v1350_v36 = vpop.permute.xlu1 %1349 }
 0x1bc   : > { %1429 = vst.msk [vmem:[#allocation5 + $0x88] sm:$0xff] %vm1411_vm7, %v1350_v36  ;;  %v1356_v45 = vpop.permute.xlu0 %1355 }
 0x1bd   : > { %1724 = vrot.lane.b32.xlu1 %v1649_v30, %s9754_s10  ;;  %1432 = vst.msk [vmem:[#allocation5 + $0xa0] sm:$0xff] %vm1411_vm7, %v1356_v45  ;;  %v1840_v30 = vld [vmem:[#allocation2 + $0x9a] sm:$0xff] }
 0x1be   : > { %1730 = vrot.lane.b32.xlu0 %v1652_v32, %s9754_s10  ;;  %v1843_v32 = vld [vmem:[#allocation2 + $0xc2] sm:$0xff] }
 0x1bf   : > { %v1354_v38 = vpop.permute.xlu1 %1353 }
 0x1c0   : > { %1431 = vst.msk [vmem:[#allocation5 + $0x98] sm:$0xff] %vm1411_vm7, %v1354_v38  ;;  %v1360_v40 = vpop.permute.xlu0 %1359 }
 0x1c1   : > { %1728 = vrot.lane.b32.xlu1 %v1651_v39, %s9754_s10  ;;  %1434 = vst.msk [vmem:[#allocation5 + $0xb0] sm:$0xff] %vm1411_vm7, %v1360_v40  ;;  %v1842_v39 = vld [vmem:[#allocation2 + $0xb2] sm:$0xff] }
 0x1c2   : > { %1734 = vrot.lane.b32.xlu0 %v1654_v51, %s9754_s10  ;;  %v1845_v51 = vld [vmem:[#allocation2 + $0xda] sm:$0xff] }
 0x1c3   : > { %v1358_v52 = vpop.permute.xlu1 %1357 }
 0x1c4   : > { %1433 = vst.msk [vmem:[#allocation5 + $0xa8] sm:$0xff] %vm1411_vm7, %v1358_v52  ;;  %v1364_v55 = vpop.permute.xlu0 %1363 }
 0x1c5   : > { %1732 = vrot.lane.b32.xlu1 %v1653_v54, %s9754_s10  ;;  %1436 = vst.msk [vmem:[#allocation5 + $0xc0] sm:$0xff] %vm1411_vm7, %v1364_v55  ;;  %v1844_v54 = vld [vmem:[#allocation2 + $0xca] sm:$0xff] }
 0x1c6   : > { %1738 = vrot.lane.b32.xlu0 %v1656_v57, %s9754_s10  ;;  %v1847_v57 = vld [vmem:[#allocation2 + $0xf2] sm:$0xff] }
 0x1c7   : > { %v1362_v58 = vpop.permute.xlu1 %1361 }
 0x1c8   : > { %1435 = vst.msk [vmem:[#allocation5 + $0xb8] sm:$0xff] %vm1411_vm7, %v1362_v58  ;;  %v1368_v60 = vpop.permute.xlu0 %1367 }
 0x1c9   : > { %1736 = vrot.lane.b32.xlu1 %v1655_v59, %s9754_s10  ;;  %1438 = vst.msk [vmem:[#allocation5 + $0xd0] sm:$0xff] %vm1411_vm7, %v1368_v60  ;;  %v1846_v59 = vld [vmem:[#allocation2 + $0xe2] sm:$0xff] }
 0x1ca   : > { %1742 = vrot.lane.b32.xlu0 %v1658_v61, %s9754_s10  ;;  %v1849_v61 = vld [vmem:[#allocation2 + $0x10a] sm:$0xff] }
 0x1cb   : > { %v1366_v62 = vpop.permute.xlu1 %1365 }
 0x1cc   : > { %1437 = vst.msk [vmem:[#allocation5 + $0xc8] sm:$0xff] %vm1411_vm7, %v1366_v62  ;;  %v1372_v2 = vpop.permute.xlu0 %1371 }
 0x1cd   : > { %1740 = vrot.lane.b32.xlu1 %v1657_v1, %s9754_s10  ;;  %1440 = vst.msk [vmem:[#allocation5 + $0xe0] sm:$0xff] %vm1411_vm7, %v1372_v2  ;;  %v1848_v1 = vld [vmem:[#allocation2 + $0xfa] sm:$0xff] }
 0x1ce   : > { %1746 = vrot.lane.b32.xlu0 %v1660_v3, %s9754_s10  ;;  %v1851_v3 = vld [vmem:[#allocation2 + $0x122] sm:$0xff] }
 0x1cf   : > { %v1370_v4 = vpop.permute.xlu1 %1369 }
 0x1d0   : > { %1439 = vst.msk [vmem:[#allocation5 + $0xd8] sm:$0xff] %vm1411_vm7, %v1370_v4  ;;  %v1376_v6 = vpop.permute.xlu0 %1375 }
 0x1d1   : > { %1744 = vrot.lane.b32.xlu1 %v1659_v5, %s9754_s10  ;;  %1442 = vst.msk [vmem:[#allocation5 + $0xf0] sm:$0xff] %vm1411_vm7, %v1376_v6  ;;  %v1850_v5 = vld [vmem:[#allocation2 + $0x112] sm:$0xff] }
 0x1d2   : > { %1750 = vrot.lane.b32.xlu0 %v1662_v8, %s9754_s10  ;;  %v1853_v8 = vld [vmem:[#allocation2 + $0x13a] sm:$0xff] }
 0x1d3   : > { %v1374_v9 = vpop.permute.xlu1 %1373 }
 0x1d4   : > { %1441 = vst.msk [vmem:[#allocation5 + $0xe8] sm:$0xff] %vm1411_vm7, %v1374_v9  ;;  %v1510_v11 = vpop.permute.xlu0 %1509 }
 0x1d5   : > { %1748 = vrot.lane.b32.xlu1 %v1661_v10, %s9754_s10  ;;  %1606 = vst.msk [vmem:[#allocation5] sm:$0xff] %vm1605_vm8, %v1510_v11  ;;  %v1852_v10 = vld [vmem:[#allocation2 + $0x12a] sm:$0xff] }
 0x1d6   : > { %1754 = vrot.lane.b32.xlu0 %v1664_v13, %s9754_s10  ;;  %v1855_v13 = vld [vmem:[#allocation2 + $0x152] sm:$0xff] }
 0x1d7   : > { %v1378_v14 = vpop.permute.xlu1 %1377 }
 0x1d8   : > { %1443 = vst.msk [vmem:[#allocation5 + $0xf8] sm:$0xff] %vm1411_vm7, %v1378_v14  ;;  %v1514_v20 = vpop.permute.xlu0 %1513  ;;  %vm3570_vm7 = vcmask 458112  }
 0x1d9   : > { %1752 = vrot.lane.b32.xlu1 %v1663_v17, %s9754_s10  ;;  %1608 = vst.msk [vmem:[#allocation5 + $0x10] sm:$0xff] %vm1605_vm8, %v1514_v20  ;;  %v1854_v17 = vld [vmem:[#allocation2 + $0x142] sm:$0xff]  ;;  %v1857_v20 = vld [vmem:[#allocation2 + $0x16a] sm:$0xff] }
 0x1da   : > { %1758 = vrot.lane.b32.xlu0 %v10528_v29, %s9754_s10  ;;  %v1831_v29 = vld [vmem:[#allocation2 + $0x32] sm:$0xff] }
 0x1db   : > { %v1512_v41 = vpop.permute.xlu1 %1511 }
 0x1dc   : > { %1607 = vst.msk [vmem:[#allocation5 + $0x8] sm:$0xff] %vm1605_vm8, %v1512_v41  ;;  %v1518_v42 = vpop.permute.xlu0 %1517  ;;  %v1856_v41 = vld [vmem:[#allocation2 + $0x15a] sm:$0xff] }
 0x1dd   : > { %1756 = vrot.lane.b32.xlu1 %v1665_v18, %s9754_s10  ;;  %1610 = vst.msk [vmem:[#allocation5 + $0x20] sm:$0xff] %vm1605_vm8, %v1518_v42  ;;  %v1858_v42 = vld [vmem:[#allocation2 + $0x172] sm:$0xff] }
 0x1de   : > { %1762 = vrot.lane.b32.xlu0 %v1668_v24, %s9754_s10 }
 0x1df   : > { %v1516_v43 = vpop.permute.xlu1 %1515 }
 0x1e0   : > { %1609 = vst.msk [vmem:[#allocation5 + $0x18] sm:$0xff] %vm1605_vm8, %v1516_v43  ;;  %v1522_v44 = vpop.permute.xlu0 %1521  ;;  %v1861_v43 = vld [vmem:[#allocation2 + $0x19a] sm:$0xff] }
 0x1e1   : > { %1760 = vrot.lane.b32.xlu1 %v10538_v27, %s9754_s10  ;;  %1612 = vst.msk [vmem:[#allocation5 + $0x30] sm:$0xff] %vm1605_vm8, %v1522_v44 }
 0x1e2   : > { %1895 = vrot.lane.b32.xlu0 %v1831_v29, %s9755_s15 }
 0x1e3   : > { %v1520_v50 = vpop.permute.xlu1 %1519 }
 0x1e4   : > { %1611 = vst.msk [vmem:[#allocation5 + $0x28] sm:$0xff] %vm1605_vm8, %v1520_v50  ;;  %v1526_v27 = vpop.permute.xlu0 %1525  ;;  %v14442_v50 = vmov 0.0  }
 0x1e5   : > { %1764 = vrot.lane.b32.xlu1 %v1669_v47, %s9754_s10  ;;  %1614 = vst.msk [vmem:[#allocation5 + $0x40] sm:$0xff] %vm1605_vm8, %v1526_v27  ;;  %v1862_v47 = vld [vmem:[#allocation2 + $0x1a2] sm:$0xff] }
 0x1e6   : > { %1899 = vrot.lane.b32.xlu0 %v1833_v34, %s9755_s15  ;;  %300 = vst.msk [vmem:[#allocation3] sm:$0xff] %vm299_vm11, %v14442_v50  ;;  %301 = vst.msk [vmem:[#allocation3 + $0x8] sm:$0xff] %vm299_vm11, %v14442_v50 }
 0x1e7   : > { %v1524_v63 = vpop.permute.xlu1 %1523  ;;  %305 = vst.msk [vmem:[#allocation3 + $0x198] sm:$0xff] %vm299_vm11, %v14442_v50  ;;  %306 = vst.msk [vmem:[#allocation3 + $0x1a0] sm:$0xff] %vm299_vm11, %v14442_v50 }
 0x1e8   : > { %1613 = vst.msk [vmem:[#allocation5 + $0x38] sm:$0xff] %vm1605_vm8, %v1524_v63  ;;  %v1530_v12 = vpop.permute.xlu0 %1529 }
 0x1e9   : > { %1897 = vrot.lane.b32.xlu1 %v1832_v56, %s9755_s15  ;;  %1616 = vst.msk [vmem:[#allocation5 + $0x50] sm:$0xff] %vm1605_vm8, %v1530_v12 }
 0x1ea   : > { %1903 = vrot.lane.b32.xlu0 %v1835_v7, %s9755_s15  ;;  %309 = vst.msk [vmem:[#allocation3] sm:$0x1] %vm308_vm14, %v14442_v50  ;;  %310 = vst.msk [vmem:[#allocation3 + $0x18] sm:$0x1] %vm308_vm14, %v14442_v50 }
 0x1eb   : > { %v1528_v16 = vpop.permute.xlu1 %1527  ;;  %311 = vst.msk [vmem:[#allocation3 + $0x30] sm:$0x1] %vm308_vm14, %v14442_v50  ;;  %312 = vst.msk [vmem:[#allocation3 + $0x48] sm:$0x1] %vm308_vm14, %v14442_v50 }
 0x1ec   : > { %1615 = vst.msk [vmem:[#allocation5 + $0x48] sm:$0xff] %vm1605_vm8, %v1528_v16  ;;  %v1534_v22 = vpop.permute.xlu0 %1533 }
 0x1ed   : > { %1901 = vrot.lane.b32.xlu1 %v1834_v15, %s9755_s15  ;;  %1618 = vst.msk [vmem:[#allocation5 + $0x60] sm:$0xff] %vm1605_vm8, %v1534_v22 }
 0x1ee   : > { %1907 = vrot.lane.b32.xlu0 %v1837_v19, %s9755_s15  ;;  %313 = vst.msk [vmem:[#allocation3 + $0x60] sm:$0x1] %vm308_vm14, %v14442_v50  ;;  %314 = vst.msk [vmem:[#allocation3 + $0x78] sm:$0x1] %vm308_vm14, %v14442_v50 }
 0x1ef   : > { %v1532_v23 = vpop.permute.xlu1 %1531  ;;  %315 = vst.msk [vmem:[#allocation3 + $0x90] sm:$0x1] %vm308_vm14, %v14442_v50  ;;  %316 = vst.msk [vmem:[#allocation3 + $0xa8] sm:$0x1] %vm308_vm14, %v14442_v50 }
 0x1f0   : > { %1617 = vst.msk [vmem:[#allocation5 + $0x58] sm:$0xff] %vm1605_vm8, %v1532_v23  ;;  %v1538_v48 = vpop.permute.xlu0 %1537 }
 0x1f1   : > { %1905 = vrot.lane.b32.xlu1 %v1836_v0, %s9755_s15  ;;  %1620 = vst.msk [vmem:[#allocation5 + $0x70] sm:$0xff] %vm1605_vm8, %v1538_v48 }
 0x1f2   : > { %1911 = vrot.lane.b32.xlu0 %v1839_v49, %s9755_s15  ;;  %317 = vst.msk [vmem:[#allocation3 + $0xc0] sm:$0x1] %vm308_vm14, %v14442_v50  ;;  %318 = vst.msk [vmem:[#allocation3 + $0xd8] sm:$0x1] %vm308_vm14, %v14442_v50 }
 0x1f3   : > { %v1536_v25 = vpop.permute.xlu1 %1535  ;;  %319 = vst.msk [vmem:[#allocation3 + $0xf0] sm:$0x1] %vm308_vm14, %v14442_v50  ;;  %320 = vst.msk [vmem:[#allocation3 + $0x108] sm:$0x1] %vm308_vm14, %v14442_v50 }
 0x1f4   : > { %1619 = vst.msk [vmem:[#allocation5 + $0x68] sm:$0xff] %vm1605_vm8, %v1536_v25  ;;  %v1542_v35 = vpop.permute.xlu0 %1541 }
 0x1f5   : > { %1909 = vrot.lane.b32.xlu1 %v1838_v33, %s9755_s15  ;;  %1622 = vst.msk [vmem:[#allocation5 + $0x80] sm:$0xff] %vm1605_vm8, %v1542_v35 }
 0x1f6   : > { %1915 = vrot.lane.b32.xlu0 %v1841_v46, %s9755_s15  ;;  %321 = vst.msk [vmem:[#allocation3 + $0x120] sm:$0x1] %vm308_vm14, %v14442_v50  ;;  %322 = vst.msk [vmem:[#allocation3 + $0x138] sm:$0x1] %vm308_vm14, %v14442_v50 }
 0x1f7   : > { %v1540_v36 = vpop.permute.xlu1 %1539  ;;  %323 = vst.msk [vmem:[#allocation3 + $0x150] sm:$0x1] %vm308_vm14, %v14442_v50  ;;  %324 = vst.msk [vmem:[#allocation3 + $0x168] sm:$0x1] %vm308_vm14, %v14442_v50 }
 0x1f8   : > { %1621 = vst.msk [vmem:[#allocation5 + $0x78] sm:$0xff] %vm1605_vm8, %v1540_v36  ;;  %v1546_v45 = vpop.permute.xlu0 %1545 }
 0x1f9   : > { %1913 = vrot.lane.b32.xlu1 %v1840_v30, %s9755_s15  ;;  %1624 = vst.msk [vmem:[#allocation5 + $0x90] sm:$0xff] %vm1605_vm8, %v1546_v45 }
 0x1fa   : > { %1919 = vrot.lane.b32.xlu0 %v1843_v32, %s9755_s15  ;;  %325 = vst.msk [vmem:[#allocation3 + $0x180] sm:$0x1] %vm308_vm14, %v14442_v50  ;;  %326 = vst.msk [vmem:[#allocation3 + $0x198] sm:$0x1] %vm308_vm14, %v14442_v50 }
 0x1fb   : > { %v1544_v38 = vpop.permute.xlu1 %1543  ;;  %328 = vst.msk [vmem:[#allocation3 + $0x29] sm:$0x1] %vm308_vm14, %v14442_v50  ;;  %329 = vst.msk [vmem:[#allocation3 + $0x41] sm:$0x1] %vm308_vm14, %v14442_v50 }
 0x1fc   : > { %1623 = vst.msk [vmem:[#allocation5 + $0x88] sm:$0xff] %vm1605_vm8, %v1544_v38  ;;  %v1550_v40 = vpop.permute.xlu0 %1549 }
 0x1fd   : > { %1917 = vrot.lane.b32.xlu1 %v1842_v39, %s9755_s15  ;;  %1626 = vst.msk [vmem:[#allocation5 + $0xa0] sm:$0xff] %vm1605_vm8, %v1550_v40 }
 0x1fe   : > { %1923 = vrot.lane.b32.xlu0 %v1845_v51, %s9755_s15  ;;  %330 = vst.msk [vmem:[#allocation3 + $0x59] sm:$0x1] %vm308_vm14, %v14442_v50  ;;  %331 = vst.msk [vmem:[#allocation3 + $0x71] sm:$0x1] %vm308_vm14, %v14442_v50 }
 0x1ff   : > { %v1548_v52 = vpop.permute.xlu1 %1547  ;;  %332 = vst.msk [vmem:[#allocation3 + $0x89] sm:$0x1] %vm308_vm14, %v14442_v50  ;;  %333 = vst.msk [vmem:[#allocation3 + $0xa1] sm:$0x1] %vm308_vm14, %v14442_v50 }
 0x200   : > { %1625 = vst.msk [vmem:[#allocation5 + $0x98] sm:$0xff] %vm1605_vm8, %v1548_v52  ;;  %v1554_v55 = vpop.permute.xlu0 %1553 }
 0x201   : > { %1921 = vrot.lane.b32.xlu1 %v1844_v54, %s9755_s15  ;;  %1628 = vst.msk [vmem:[#allocation5 + $0xb0] sm:$0xff] %vm1605_vm8, %v1554_v55 }
 0x202   : > { %1927 = vrot.lane.b32.xlu0 %v1847_v57, %s9755_s15  ;;  %334 = vst.msk [vmem:[#allocation3 + $0xb9] sm:$0x1] %vm308_vm14, %v14442_v50  ;;  %335 = vst.msk [vmem:[#allocation3 + $0xd1] sm:$0x1] %vm308_vm14, %v14442_v50 }
 0x203   : > { %v1552_v58 = vpop.permute.xlu1 %1551  ;;  %336 = vst.msk [vmem:[#allocation3 + $0xe9] sm:$0x1] %vm308_vm14, %v14442_v50  ;;  %337 = vst.msk [vmem:[#allocation3 + $0x101] sm:$0x1] %vm308_vm14, %v14442_v50 }
 0x204   : > { %1627 = vst.msk [vmem:[#allocation5 + $0xa8] sm:$0xff] %vm1605_vm8, %v1552_v58  ;;  %v1558_v60 = vpop.permute.xlu0 %1557 }
 0x205   : > { %1925 = vrot.lane.b32.xlu1 %v1846_v59, %s9755_s15  ;;  %1630 = vst.msk [vmem:[#allocation5 + $0xc0] sm:$0xff] %vm1605_vm8, %v1558_v60 }
 0x206   : > { %1931 = vrot.lane.b32.xlu0 %v1849_v61, %s9755_s15  ;;  %338 = vst.msk [vmem:[#allocation3 + $0x119] sm:$0x1] %vm308_vm14, %v14442_v50  ;;  %339 = vst.msk [vmem:[#allocation3 + $0x131] sm:$0x1] %vm308_vm14, %v14442_v50 }
 0x207   : > { %v1556_v62 = vpop.permute.xlu1 %1555  ;;  %340 = vst.msk [vmem:[#allocation3 + $0x149] sm:$0x1] %vm308_vm14, %v14442_v50  ;;  %341 = vst.msk [vmem:[#allocation3 + $0x161] sm:$0x1] %vm308_vm14, %v14442_v50 }
 0x208   : > { %1629 = vst.msk [vmem:[#allocation5 + $0xb8] sm:$0xff] %vm1605_vm8, %v1556_v62  ;;  %v1562_v2 = vpop.permute.xlu0 %1561 }
 0x209   : > { %1929 = vrot.lane.b32.xlu1 %v1848_v1, %s9755_s15  ;;  %1632 = vst.msk [vmem:[#allocation5 + $0xd0] sm:$0xff] %vm1605_vm8, %v1562_v2 }
 0x20a   : > { %1935 = vrot.lane.b32.xlu0 %v1851_v3, %s9755_s15  ;;  %342 = vst.msk [vmem:[#allocation3 + $0x179] sm:$0x1] %vm308_vm14, %v14442_v50  ;;  %343 = vst.msk [vmem:[#allocation3 + $0x191] sm:$0x1] %vm308_vm14, %v14442_v50 }
 0x20b   : > { %v1560_v4 = vpop.permute.xlu1 %1559  ;;  %303 = vst.msk [vmem:[#allocation3 + $0x10] sm:$0x3] %vm302_vm15, %v14442_v50  ;;  %307 = vst.msk [vmem:[#allocation3 + $0x1a8] sm:$0x3] %vm302_vm15, %v14442_v50 }
 0x20c   : > { %1631 = vst.msk [vmem:[#allocation5 + $0xc8] sm:$0xff] %vm1605_vm8, %v1560_v4  ;;  %v1566_v6 = vpop.permute.xlu0 %1565 }
 0x20d   : > { %1933 = vrot.lane.b32.xlu1 %v1850_v5, %s9755_s15  ;;  %1634 = vst.msk [vmem:[#allocation5 + $0xe0] sm:$0xff] %vm1605_vm8, %v1566_v6 }
 0x20e   : > { %1939 = vrot.lane.b32.xlu0 %v1853_v8, %s9755_s15  ;;  %327 = vst.msk [vmem:[#allocation3 + $0x11] sm:$0x1] %vm308_vm14, %v14442_v50  ;;  %344 = vst.msk [vmem:[#allocation3 + $0x1a9] sm:$0x1] %vm308_vm14, %v14442_v50 }
 0x20f   : > { %v1564_v9 = vpop.permute.xlu1 %1563 }
 0x210   : > { %1633 = vst.msk [vmem:[#allocation5 + $0xd8] sm:$0xff] %vm1605_vm8, %v1564_v9  ;;  %v1570_v11 = vpop.permute.xlu0 %1569 }
 0x211   : > { %1937 = vrot.lane.b32.xlu1 %v1852_v10, %s9755_s15  ;;  %1636 = vst.msk [vmem:[#allocation5 + $0xf0] sm:$0xff] %vm1605_vm8, %v1570_v11 }
 0x212   : > { %1943 = vrot.lane.b32.xlu0 %v1855_v13, %s9755_s15 }
 0x213   : > { %v1568_v14 = vpop.permute.xlu1 %1567 }
 0x214   : > { %1635 = vst.msk [vmem:[#allocation5 + $0xe8] sm:$0xff] %vm1605_vm8, %v1568_v14  ;;  %v1703_v18 = vpop.permute.xlu0 %1702 }
 0x215   : > { %1941 = vrot.lane.b32.xlu1 %v1854_v17, %s9755_s15  ;;  %1799 = vst.msk [vmem:[#allocation5] sm:$0xff] %vm1798_vm10, %v1703_v18 }
 0x216   : > { %1947 = vrot.lane.b32.xlu0 %v1857_v20, %s9755_s15 }
 0x217   : > { %v1572_v24 = vpop.permute.xlu1 %1571 }
 0x218   : > { %1637 = vst.msk [vmem:[#allocation5 + $0xf8] sm:$0xff] %vm1605_vm8, %v1572_v24  ;;  %v1707_v21 = vpop.permute.xlu0 %1706  ;;  %vm3763_vm8 = vcmask 523712  }
 0x219   : > { %1945 = vrot.lane.b32.xlu1 %v1856_v41, %s9755_s15  ;;  %1801 = vst.msk [vmem:[#allocation5 + $0x10] sm:$0xff] %vm1798_vm10, %v1707_v21 }
 0x21a   : > { %1951 = vrot.lane.b32.xlu0 %v10628_v26, %s9755_s15 }
 0x21b   : > { %v1705_v37 = vpop.permute.xlu1 %1704 }
 0x21c   : > { %1800 = vst.msk [vmem:[#allocation5 + $0x8] sm:$0xff] %vm1798_vm10, %v1705_v37  ;;  %v1711_v29 = vpop.permute.xlu0 %1710 }
 0x21d   : > { %1949 = vrot.lane.b32.xlu1 %v1858_v42, %s9755_s15  ;;  %1803 = vst.msk [vmem:[#allocation5 + $0x20] sm:$0xff] %vm1798_vm10, %v1711_v29 }
 0x21e   : > { %1955 = vrot.lane.b32.xlu0 %v1861_v43, %s9755_s15 }
 0x21f   : > { %v1709_v28 = vpop.permute.xlu1 %1708 }
 0x220   : > { %1802 = vst.msk [vmem:[#allocation5 + $0x18] sm:$0xff] %vm1798_vm10, %v1709_v28  ;;  %v1715_v44 = vpop.permute.xlu0 %1714 }
 0x221   : > { %1953 = vrot.lane.b32.xlu1 %v10638_v31, %s9755_s15  ;;  %1805 = vst.msk [vmem:[#allocation5 + $0x30] sm:$0xff] %vm1798_vm10, %v1715_v44 }
 0x223   : > { %v1713_v26 = vpop.permute.xlu1 %1712 }
 0x224   : > { %1804 = vst.msk [vmem:[#allocation5 + $0x28] sm:$0xff] %vm1798_vm10, %v1713_v26  ;;  %v1719_v31 = vpop.permute.xlu0 %1718 }
 0x225   : > { %1957 = vrot.lane.b32.xlu1 %v1862_v47, %s9755_s15  ;;  %1807 = vst.msk [vmem:[#allocation5 + $0x40] sm:$0xff] %vm1798_vm10, %v1719_v31 }
 0x227   : > { %v1717_v34 = vpop.permute.xlu1 %1716 }
 0x228   : > { %1806 = vst.msk [vmem:[#allocation5 + $0x38] sm:$0xff] %vm1798_vm10, %v1717_v34  ;;  %v1723_v53 = vpop.permute.xlu0 %1722 }
 0x229   : > { %1809 = vst.msk [vmem:[#allocation5 + $0x50] sm:$0xff] %vm1798_vm10, %v1723_v53 }
 0x22b   : > { %v1721_v27 = vpop.permute.xlu1 %1720 }
 0x22c   : > { %1808 = vst.msk [vmem:[#allocation5 + $0x48] sm:$0xff] %vm1798_vm10, %v1721_v27  ;;  %v1727_v56 = vpop.permute.xlu0 %1726 }
 0x22d   : > { %1811 = vst.msk [vmem:[#allocation5 + $0x60] sm:$0xff] %vm1798_vm10, %v1727_v56 }
 0x22f   : > { %v1725_v63 = vpop.permute.xlu1 %1724 }
 0x230   : > { %1810 = vst.msk [vmem:[#allocation5 + $0x58] sm:$0xff] %vm1798_vm10, %v1725_v63  ;;  %v1731_v7 = vpop.permute.xlu0 %1730 }
 0x231   : > { %1813 = vst.msk [vmem:[#allocation5 + $0x70] sm:$0xff] %vm1798_vm10, %v1731_v7 }
 0x233   : > { %v1729_v12 = vpop.permute.xlu1 %1728 }
 0x234   : > { %1812 = vst.msk [vmem:[#allocation5 + $0x68] sm:$0xff] %vm1798_vm10, %v1729_v12  ;;  %v1735_v15 = vpop.permute.xlu0 %1734 }
 0x235   : > { %1815 = vst.msk [vmem:[#allocation5 + $0x80] sm:$0xff] %vm1798_vm10, %v1735_v15 }
 0x237   : > { %v1733_v16 = vpop.permute.xlu1 %1732 }
 0x238   : > { %1814 = vst.msk [vmem:[#allocation5 + $0x78] sm:$0xff] %vm1798_vm10, %v1733_v16  ;;  %v1739_v19 = vpop.permute.xlu0 %1738 }
 0x239   : > { %1817 = vst.msk [vmem:[#allocation5 + $0x90] sm:$0xff] %vm1798_vm10, %v1739_v19 }
 0x23b   : > { %v1737_v22 = vpop.permute.xlu1 %1736 }
 0x23c   : > { %1816 = vst.msk [vmem:[#allocation5 + $0x88] sm:$0xff] %vm1798_vm10, %v1737_v22  ;;  %v1743_v0 = vpop.permute.xlu0 %1742 }
 0x23d   : > { %1819 = vst.msk [vmem:[#allocation5 + $0xa0] sm:$0xff] %vm1798_vm10, %v1743_v0 }
 0x23f   : > { %v1741_v23 = vpop.permute.xlu1 %1740 }
 0x240   : > { %1818 = vst.msk [vmem:[#allocation5 + $0x98] sm:$0xff] %vm1798_vm10, %v1741_v23  ;;  %v1747_v49 = vpop.permute.xlu0 %1746 }
 0x241   : > { %1821 = vst.msk [vmem:[#allocation5 + $0xb0] sm:$0xff] %vm1798_vm10, %v1747_v49 }
 0x243   : > { %v1745_v48 = vpop.permute.xlu1 %1744 }
 0x244   : > { %1820 = vst.msk [vmem:[#allocation5 + $0xa8] sm:$0xff] %vm1798_vm10, %v1745_v48  ;;  %v1751_v33 = vpop.permute.xlu0 %1750 }
 0x245   : > { %1823 = vst.msk [vmem:[#allocation5 + $0xc0] sm:$0xff] %vm1798_vm10, %v1751_v33 }
 0x247   : > { %v1749_v25 = vpop.permute.xlu1 %1748 }
 0x248   : > { %1822 = vst.msk [vmem:[#allocation5 + $0xb8] sm:$0xff] %vm1798_vm10, %v1749_v25  ;;  %v1755_v46 = vpop.permute.xlu0 %1754 }
 0x249   : > { %1825 = vst.msk [vmem:[#allocation5 + $0xd0] sm:$0xff] %vm1798_vm10, %v1755_v46 }
 0x24b   : > { %v1753_v35 = vpop.permute.xlu1 %1752 }
 0x24c   : > { %1824 = vst.msk [vmem:[#allocation5 + $0xc8] sm:$0xff] %vm1798_vm10, %v1753_v35  ;;  %v1759_v30 = vpop.permute.xlu0 %1758 }
 0x24d   : > { %1827 = vst.msk [vmem:[#allocation5 + $0xe0] sm:$0xff] %vm1798_vm10, %v1759_v30 }
 0x24f   : > { %v1757_v36 = vpop.permute.xlu1 %1756 }
 0x250   : > { %1826 = vst.msk [vmem:[#allocation5 + $0xd8] sm:$0xff] %vm1798_vm10, %v1757_v36  ;;  %v1763_v32 = vpop.permute.xlu0 %1762 }
 0x251   : > { %1829 = vst.msk [vmem:[#allocation5 + $0xf0] sm:$0xff] %vm1798_vm10, %v1763_v32 }
 0x253   : > { %v1761_v45 = vpop.permute.xlu1 %1760 }
 0x254   : > { %1828 = vst.msk [vmem:[#allocation5 + $0xe8] sm:$0xff] %vm1798_vm10, %v1761_v45  ;;  %v1896_v39 = vpop.permute.xlu0 %1895 }
 0x255   : > { %1992 = vst.msk [vmem:[#allocation5] sm:$0xff] %vm1991_vm12, %v1896_v39 }
 0x257   : > { %v1765_v38 = vpop.permute.xlu1 %1764 }
 0x258   : > { %1830 = vst.msk [vmem:[#allocation5 + $0xf8] sm:$0xff] %vm1798_vm10, %v1765_v38  ;;  %v1900_v51 = vpop.permute.xlu0 %1899  ;;  %vm8862_vm10 = vcmask 130048  }
 0x259   : > { %1994 = vst.msk [vmem:[#allocation5 + $0x10] sm:$0xff] %vm1991_vm12, %v1900_v51 }
 0x25b   : > { %v1898_v40 = vpop.permute.xlu1 %1897 }
 0x25c   : > { %1993 = vst.msk [vmem:[#allocation5 + $0x8] sm:$0xff] %vm1991_vm12, %v1898_v40  ;;  %v1904_v54 = vpop.permute.xlu0 %1903  ;;  %v2024_v57 = vld [vmem:[#allocation5] sm:$0xff] }
 0x25d   : > { %1996 = vst.msk [vmem:[#allocation5 + $0x20] sm:$0xff] %vm1991_vm12, %v1904_v54 }
 0x25f   : > { %v1902_v52 = vpop.permute.xlu1 %1901 }
 0x260   : > { %1995 = vst.msk [vmem:[#allocation5 + $0x18] sm:$0xff] %vm1991_vm12, %v1902_v52  ;;  %v1908_v55 = vpop.permute.xlu0 %1907  ;;  %v2026_v60 = vld [vmem:[#allocation5 + $0x10] sm:$0xff] }
 0x261   : > { %1998 = vst.msk [vmem:[#allocation5 + $0x30] sm:$0xff] %vm1991_vm12, %v1908_v55 }
 0x263   : > { %v1906_v59 = vpop.permute.xlu1 %1905  ;;  %v2025_v58 = vld [vmem:[#allocation5 + $0x8] sm:$0xff] }
 0x264   : > { %1997 = vst.msk [vmem:[#allocation5 + $0x28] sm:$0xff] %vm1991_vm12, %v1906_v59  ;;  %v2056_v61 = vpack.c.bf16 %v2025_v58, %v2024_v57  ;;  %v1912_v1 = vpop.permute.xlu0 %1911  ;;  %v2028_v5 = vld [vmem:[#allocation5 + $0x20] sm:$0xff] }
 0x265   : > { %2000 = vst.msk [vmem:[#allocation5 + $0x40] sm:$0xff] %vm1991_vm12, %v1912_v1 }
 0x266   : > { %9465 = vmatprep.mubr.msk.bf16.mxu0 %vm2092_vm13, %v2056_v61 }
 0x267   : > { %v1910_v62 = vpop.permute.xlu1 %1909  ;;  %v2027_v3 = vld [vmem:[#allocation5 + $0x18] sm:$0xff] }
 0x268   : > { %1999 = vst.msk [vmem:[#allocation5 + $0x38] sm:$0xff] %vm1991_vm12, %v1910_v62  ;;  %v2057_v2 = vpack.c.bf16 %v2027_v3, %v2026_v60  ;;  %v1916_v4 = vpop.permute.xlu0 %1915  ;;  %v2030_v9 = vld [vmem:[#allocation5 + $0x30] sm:$0xff] }
 0x269   : > { %2002 = vst.msk [vmem:[#allocation5 + $0x50] sm:$0xff] %vm1991_vm12, %v1916_v4 }
 0x26a   : > { %9466 = vmatmul.mubr.msk.bf16.vlgmr.msra.gmra.mxu0 %vm2092_vm13, %v2057_v2 }
 0x26b   : > { %v1914_v8 = vpop.permute.xlu1 %1913  ;;  %v2029_v6 = vld [vmem:[#allocation5 + $0x28] sm:$0xff] }
 0x26c   : > { %2001 = vst.msk [vmem:[#allocation5 + $0x48] sm:$0xff] %vm1991_vm12, %v1914_v8  ;;  %v2058_v10 = vpack.c.bf16 %v2029_v6, %v2028_v5  ;;  %v1920_v13 = vpop.permute.xlu0 %1919  ;;  %v2032_v20 = vld [vmem:[#allocation5 + $0x40] sm:$0xff]  ;;  %v2444_v8 = vld [vmem:[#allocation3 + $0x1] sm:$0xff] }
 0x26d   : > { %2004 = vst.msk [vmem:[#allocation5 + $0x60] sm:$0xff] %vm1991_vm12, %v1920_v13  ;;  %2508 = vrot.lane.b32.xlu0 %v2444_v8, %s9749_s29  ;;  %v2445_v6 = vld [vmem:[#allocation3 + $0x9] sm:$0xff] }
 0x26e   : > { %9469 = vmatprep.mubr.msk.bf16.mxu0 %vm2092_vm13, %v2058_v10  ;;  %2510 = vrot.lane.b32.xlu1 %v2445_v6, %s9749_s29  ;;  %v2380_v10 = vld [vmem:[#allocation3] sm:$0xff]  ;;  %v11042_v13 = vld [vmem:[%s14316_s4] ss:$0 sm:$0xff] }
 0x26f   : > { %v1918_v11 = vpop.permute.xlu1 %1917  ;;  %v2031_v17 = vld [vmem:[#allocation5 + $0x38] sm:$0xff]  ;;  %2412 = vst.msk [vmem:[#allocation5] sm:$0xff] %vm299_vm11, %v2380_v10 }
 0x270   : > { %2003 = vst.msk [vmem:[#allocation5 + $0x58] sm:$0xff] %vm1991_vm12, %v1918_v11  ;;  %v2059_v14 = vpack.c.bf16 %v2031_v17, %v2030_v9  ;;  %v1924_v18 = vpop.permute.xlu0 %1923  ;;  %v2034_v42 = vld [vmem:[#allocation5 + $0x50] sm:$0xff]  ;;  %v2381_v11 = vld [vmem:[#allocation3 + $0x8] sm:$0xff] }
 0x271   : > { %2006 = vst.msk [vmem:[#allocation5 + $0x70] sm:$0xff] %vm1991_vm12, %v1924_v18 }
 0x272   : > { %9470 = vmatmul.mubr.msk.bf16.gmra.mxu0 %vm2092_vm13, %v2059_v14  ;;  %2413 = vst.msk [vmem:[#allocation5 + $0x8] sm:$0xff] %vm299_vm11, %v2381_v11 }
 0x273   : > { %v1922_v41 = vpop.permute.xlu1 %1921  ;;  %v2033_v24 = vld [vmem:[#allocation5 + $0x48] sm:$0xff] }
 0x274   : > { %2005 = vst.msk [vmem:[#allocation5 + $0x68] sm:$0xff] %vm1991_vm12, %v1922_v41  ;;  %v2060_v21 = vpack.c.bf16 %v2033_v24, %v2032_v20  ;;  %v1928_v37 = vpop.permute.xlu0 %1927  ;;  %v2036_v44 = vld [vmem:[#allocation5 + $0x60] sm:$0xff] }
 0x275   : > { %2008 = vst.msk [vmem:[#allocation5 + $0x80] sm:$0xff] %vm1991_vm12, %v1928_v37 }
 0x276   : > { %9473 = vmatprep.mubr.msk.bf16.mxu0 %vm2092_vm13, %v2060_v21 }
 0x277   : > { %v1926_v43 = vpop.permute.xlu1 %1925  ;;  %v2035_v29 = vld [vmem:[#allocation5 + $0x58] sm:$0xff] }
 0x278   : > { %2007 = vst.msk [vmem:[#allocation5 + $0x78] sm:$0xff] %vm1991_vm12, %v1926_v43  ;;  %v2061_v28 = vpack.c.bf16 %v2035_v29, %v2034_v42  ;;  %v1932_v47 = vpop.permute.xlu0 %1931  ;;  %v2038_v53 = vld [vmem:[#allocation5 + $0x70] sm:$0xff] }
 0x279   : > { %2010 = vst.msk [vmem:[#allocation5 + $0x90] sm:$0xff] %vm1991_vm12, %v1932_v47 }
 0x27a   : > { %9474 = vmatmul.mubr.msk.bf16.gmra.mxu0 %vm2092_vm13, %v2061_v28 }
 0x27b   : > { %v1930_v26 = vpop.permute.xlu1 %1929  ;;  %v2037_v31 = vld [vmem:[#allocation5 + $0x68] sm:$0xff] }
 0x27c   : > { %2009 = vst.msk [vmem:[#allocation5 + $0x88] sm:$0xff] %vm1991_vm12, %v1930_v26  ;;  %v2062_v34 = vpack.c.bf16 %v2037_v31, %v2036_v44  ;;  %v1936_v27 = vpop.permute.xlu0 %1935  ;;  %v2040_v12 = vld [vmem:[#allocation5 + $0x80] sm:$0xff] }
 0x27d   : > { %2012 = vst.msk [vmem:[#allocation5 + $0xa0] sm:$0xff] %vm1991_vm12, %v1936_v27 }
 0x27e   : > { %9477 = vmatprep.mubr.msk.bf16.mxu0 %vm2092_vm13, %v2062_v34 }
 0x27f   : > { %v1934_v56 = vpop.permute.xlu1 %1933  ;;  %v2039_v63 = vld [vmem:[#allocation5 + $0x78] sm:$0xff] }
 0x280   : > { %2011 = vst.msk [vmem:[#allocation5 + $0x98] sm:$0xff] %vm1991_vm12, %v1934_v56  ;;  %v2063_v7 = vpack.c.bf16 %v2039_v63, %v2038_v53  ;;  %v1940_v15 = vpop.permute.xlu0 %1939  ;;  %v2042_v0 = vld [vmem:[#allocation5 + $0x90] sm:$0xff] }
 0x281   : > { %2014 = vst.msk [vmem:[#allocation5 + $0xb0] sm:$0xff] %vm1991_vm12, %v1940_v15 }
 0x282   : > { %9478 = vmatmul.mubr.msk.bf16.gmra.mxu0 %vm2092_vm13, %v2063_v7 }
 0x283   : > { %v1938_v16 = vpop.permute.xlu1 %1937  ;;  %v2041_v19 = vld [vmem:[#allocation5 + $0x88] sm:$0xff] }
 0x284   : > { %2013 = vst.msk [vmem:[#allocation5 + $0xa8] sm:$0xff] %vm1991_vm12, %v1938_v16  ;;  %v2064_v22 = vpack.c.bf16 %v2041_v19, %v2040_v12  ;;  %v1944_v23 = vpop.permute.xlu0 %1943  ;;  %v2044_v25 = vld [vmem:[#allocation5 + $0xa0] sm:$0xff] }
 0x285   : > { %2016 = vst.msk [vmem:[#allocation5 + $0xc0] sm:$0xff] %vm1991_vm12, %v1944_v23 }
 0x286   : > { %9481 = vmatprep.mubr.msk.bf16.mxu0 %vm2092_vm13, %v2064_v22 }
 0x287   : > { %v1942_v49 = vpop.permute.xlu1 %1941  ;;  %v2043_v48 = vld [vmem:[#allocation5 + $0x98] sm:$0xff] }
 0x288   : > { %2015 = vst.msk [vmem:[#allocation5 + $0xb8] sm:$0xff] %vm1991_vm12, %v1942_v49  ;;  %v2065_v33 = vpack.c.bf16 %v2043_v48, %v2042_v0  ;;  %v1948_v46 = vpop.permute.xlu0 %1947  ;;  %v2046_v32 = vld [vmem:[#allocation5 + $0xb0] sm:$0xff] }
 0x289   : > { %2018 = vst.msk [vmem:[#allocation5 + $0xd0] sm:$0xff] %vm1991_vm12, %v1948_v46 }
 0x28a   : > { %9482 = vmatmul.mubr.msk.bf16.gmra.mxu0 %vm2092_vm13, %v2065_v33 }
 0x28b   : > { %v1946_v35 = vpop.permute.xlu1 %1945  ;;  %v2045_v30 = vld [vmem:[#allocation5 + $0xa8] sm:$0xff] }
 0x28c   : > { %2017 = vst.msk [vmem:[#allocation5 + $0xc8] sm:$0xff] %vm1991_vm12, %v1946_v35  ;;  %v2066_v36 = vpack.c.bf16 %v2045_v30, %v2044_v25  ;;  %v1952_v45 = vpop.permute.xlu0 %1951  ;;  %v2048_v40 = vld [vmem:[#allocation5 + $0xc0] sm:$0xff] }
 0x28d   : > { %2020 = vst.msk [vmem:[#allocation5 + $0xe0] sm:$0xff] %vm1991_vm12, %v1952_v45 }
 0x28e   : > { %9485 = vmatprep.mubr.msk.bf16.mxu0 %vm2092_vm13, %v2066_v36 }
 0x28f   : > { %v1950_v39 = vpop.permute.xlu1 %1949  ;;  %v2047_v38 = vld [vmem:[#allocation5 + $0xb8] sm:$0xff] }
 0x290   : > { %2019 = vst.msk [vmem:[#allocation5 + $0xd8] sm:$0xff] %vm1991_vm12, %v1950_v39  ;;  %v2067_v51 = vpack.c.bf16 %v2047_v38, %v2046_v32  ;;  %v1956_v54 = vpop.permute.xlu0 %1955  ;;  %v2050_v59 = vld [vmem:[#allocation5 + $0xd0] sm:$0xff] }
 0x291   : > { %2022 = vst.msk [vmem:[#allocation5 + $0xf0] sm:$0xff] %vm1991_vm12, %v1956_v54 }
 0x292   : > { %9486 = vmatmul.mubr.msk.bf16.gmra.mxu0 %vm2092_vm13, %v2067_v51 }
 0x293   : > { %v1954_v52 = vpop.permute.xlu1 %1953  ;;  %v2049_v57 = vld [vmem:[#allocation5 + $0xc8] sm:$0xff] }
 0x294   : > { %2021 = vst.msk [vmem:[#allocation5 + $0xe8] sm:$0xff] %vm1991_vm12, %v1954_v52  ;;  %v2068_v55 = vpack.c.bf16 %v2049_v57, %v2048_v40  ;;  %v2052_v1 = vld [vmem:[#allocation5 + $0xe0] sm:$0xff] }
 0x296   : > { %9489 = vmatprep.mubr.msk.bf16.mxu0 %vm2092_vm13, %v2068_v55 }
 0x297   : > { %v1958_v58 = vpop.permute.xlu1 %1957  ;;  %v2051_v61 = vld [vmem:[#allocation5 + $0xd8] sm:$0xff] }
 0x298   : > { %2023 = vst.msk [vmem:[#allocation5 + $0xf8] sm:$0xff] %vm1991_vm12, %v1958_v58  ;;  %v2069_v60 = vpack.c.bf16 %v2051_v61, %v2050_v59  ;;  %v2054_v2 = vld [vmem:[#allocation5 + $0xf0] sm:$0xff] }
 0x29a   : > { %9490 = vmatmul.mubr.msk.bf16.gmra.mxu0 %vm2092_vm13, %v2069_v60 }
 0x29b   : > { %v2053_v62 = vld [vmem:[#allocation5 + $0xe8] sm:$0xff] }
 0x29c   : > { %v2070_v3 = vpack.c.bf16 %v2053_v62, %v2052_v1 }
 0x29e   : > { %9493 = vmatprep.mubr.msk.bf16.mxu0 %vm2092_vm13, %v2070_v3 }
 0x29f   : > { %v2055_v5 = vld [vmem:[#allocation5 + $0xf8] sm:$0xff] }
 0x2a0   : > { %v2071_v4 = vpack.c.bf16 %v2055_v5, %v2054_v2 }
 0x2a2   : > { %9494 = vmatmul.mubr.msk.bf16.gmra.mxu0 %vm2092_vm13, %v2071_v4 }
 0x2df   : > { %v2509_v9 = vpop.permute.xlu0 %2508 }
 0x2e0   : > { %2605 = vst.msk [vmem:[#allocation5] sm:$0xff] %vm2604_vm1, %v2509_v9  ;;  %v2511_v14 = vpop.permute.xlu1 %2510 }
 0x2e1   : > { %2606 = vst.msk [vmem:[#allocation5 + $0x8] sm:$0xff] %vm2604_vm1, %v2511_v14 }
 0x32a   : > { %v9467_v50 = vpop.f32.mrf.mxu0 }
 0x32b   : > { %v2188_v17 = vadd.f32 %v9467_v50, %v11042_v13 }
 0x32c   : > { %v2179_v20 = vpop.f32.mrf.mxu0 }
 0x32d   : > { %v2308_v18 = vmax.f32 %v2188_v17, 0.0  ;;  %v2180_v41 = vadd.f32 %v11042_v13, %v2179_v20 }
 0x32e   : > { %v9468_v24 = vpop.f32.mrf.mxu0 }
 0x32f   : > { %2341 = vst.msk [vmem:[#allocation3 + $0x31] sm:$0xff] %vm299_vm11, %v2308_v18  ;;  %v2306_v21 = vmax.f32 %v2180_v41, 0.0  ;;  %v2191_v42 = vadd.f32 %v9468_v24, %v11042_v13 }
 0x330   : > { %v2182_v37 = vpop.f32.mrf.mxu0 }
 0x331   : > { %2339 = vst.msk [vmem:[#allocation3 + $0x19] sm:$0xff] %vm299_vm11, %v2306_v21  ;;  %v2309_v43 = vmax.f32 %v2191_v42, 0.0  ;;  %v2183_v29 = vadd.f32 %v11042_v13, %v2182_v37 }
 0x332   : > { %v9471_v28 = vpop.f32.mrf.mxu0 }
 0x333   : > { %2342 = vst.msk [vmem:[#allocation3 + $0x39] sm:$0xff] %vm299_vm11, %v2309_v43  ;;  %v2307_v44 = vmax.f32 %v2183_v29, 0.0  ;;  %v2204_v47 = vadd.f32 %v9471_v28, %v11042_v13 }
 0x334   : > { %v2195_v26 = vpop.f32.mrf.mxu0 }
 0x335   : > { %2340 = vst.msk [vmem:[#allocation3 + $0x21] sm:$0xff] %vm299_vm11, %v2307_v44  ;;  %v2312_v31 = vmax.f32 %v2204_v47, 0.0  ;;  %v2196_v34 = vadd.f32 %v11042_v13, %v2195_v26 }
 0x336   : > { %v9472_v53 = vpop.f32.mrf.mxu0  ;;  %v11057_v27 = vld [vmem:[#allocation3 + $0x30] sm:$0xff] }
 0x337   : > { %2345 = vst.msk [vmem:[#allocation3 + $0x61] sm:$0xff] %vm299_vm11, %v2312_v31  ;;  %v2310_v56 = vmax.f32 %v2196_v34, 0.0  ;;  %v2207_v63 = vadd.f32 %v9472_v53, %v11042_v13  ;;  %2416 = vst.msk [vmem:[#allocation5 + $0x20] sm:$0xff] %vm299_vm11, %v11057_v27  ;;  %v11079_v25 = vld [vmem:[#allocation3 + $0x31] sm:$0xff] }
 0x338   : > { %v2198_v7 = vpop.f32.mrf.mxu0  ;;  %v11063_v12 = vld [vmem:[#allocation3 + $0x19] sm:$0xff] }
 0x339   : > { %v11065_v15 = vld [vmem:[#allocation3 + $0x18] sm:$0xff]  ;;  %2343 = vst.msk [vmem:[#allocation3 + $0x49] sm:$0xff] %vm299_vm11, %v2310_v56  ;;  %v2313_v16 = vmax.f32 %v2207_v63, 0.0  ;;  %v2199_v19 = vadd.f32 %v11042_v13, %v2198_v7  ;;  %2512 = vrot.lane.b32.xlu0 %v11063_v12, %s9749_s29 }
 0x33a   : > { %2414 = vst.msk [vmem:[#allocation5 + $0x10] sm:$0xff] %vm299_vm11, %v11065_v15  ;;  %v9475_v22 = vpop.f32.mrf.mxu0  ;;  %v11075_v49 = vld [vmem:[#allocation3 + $0x38] sm:$0xff] }
 0x33b   : > { %2346 = vst.msk [vmem:[#allocation3 + $0x69] sm:$0xff] %vm299_vm11, %v2313_v16  ;;  %v2311_v0 = vmax.f32 %v2199_v19, 0.0  ;;  %v2220_v23 = vadd.f32 %v9475_v22, %v11042_v13  ;;  %2417 = vst.msk [vmem:[#allocation5 + $0x28] sm:$0xff] %vm299_vm11, %v11075_v49  ;;  %v11099_v51 = vld [vmem:[#allocation3 + $0x39] sm:$0xff] }
 0x33c   : > { %v2211_v48 = vpop.f32.mrf.mxu0  ;;  %v11077_v33 = vld [vmem:[#allocation3 + $0x21] sm:$0xff] }
 0x33d   : > { %2344 = vst.msk [vmem:[#allocation3 + $0x51] sm:$0xff] %vm299_vm11, %v2311_v0  ;;  %v2316_v46 = vmax.f32 %v2220_v23, 0.0  ;;  %v2212_v35 = vadd.f32 %v11042_v13, %v2211_v48  ;;  %2514 = vrot.lane.b32.xlu1 %v11077_v33, %s9749_s29  ;;  %2516 = vrot.lane.b32.xlu0 %v11079_v25, %s9749_s29  ;;  %v11089_v30 = vld [vmem:[#allocation3 + $0x20] sm:$0xff] }
 0x33e   : > { %v9476_v36 = vpop.f32.mrf.mxu0  ;;  %2415 = vst.msk [vmem:[#allocation5 + $0x18] sm:$0xff] %vm299_vm11, %v11089_v30  ;;  %v11093_v32 = vld [vmem:[#allocation3 + $0x60] sm:$0xff] }
 0x33f   : > { %2349 = vst.msk [vmem:[#allocation3 + $0x91] sm:$0xff] %vm299_vm11, %v2316_v46  ;;  %v2314_v45 = vmax.f32 %v2212_v35, 0.0  ;;  %v2223_v39 = vadd.f32 %v9476_v36, %v11042_v13  ;;  %2420 = vst.msk [vmem:[#allocation5 + $0x40] sm:$0xff] %vm299_vm11, %v11093_v32  ;;  %v11119_v62 = vld [vmem:[#allocation3 + $0x61] sm:$0xff] }
 0x340   : > { %v2214_v38 = vpop.f32.mrf.mxu0  ;;  %v11101_v40 = vld [vmem:[#allocation3 + $0x49] sm:$0xff] }
 0x341   : > { %v11103_v54 = vld [vmem:[#allocation3 + $0x48] sm:$0xff]  ;;  %2347 = vst.msk [vmem:[#allocation3 + $0x79] sm:$0xff] %vm299_vm11, %v2314_v45  ;;  %v2317_v52 = vmax.f32 %v2223_v39, 0.0  ;;  %v2215_v57 = vadd.f32 %v11042_v13, %v2214_v38  ;;  %2518 = vrot.lane.b32.xlu1 %v11099_v51, %s9749_s29  ;;  %2520 = vrot.lane.b32.xlu0 %v11101_v40, %s9749_s29 }
 0x342   : > { %2418 = vst.msk [vmem:[#allocation5 + $0x30] sm:$0xff] %vm299_vm11, %v11103_v54  ;;  %v9479_v55 = vpop.f32.mrf.mxu0  ;;  %v11115_v61 = vld [vmem:[#allocation3 + $0x68] sm:$0xff] }
 0x343   : > { %2350 = vst.msk [vmem:[#allocation3 + $0x99] sm:$0xff] %vm299_vm11, %v2317_v52  ;;  %v2315_v59 = vmax.f32 %v2215_v57, 0.0  ;;  %v2236_v58 = vadd.f32 %v9479_v55, %v11042_v13  ;;  %2421 = vst.msk [vmem:[#allocation5 + $0x48] sm:$0xff] %vm299_vm11, %v11115_v61  ;;  %v11139_v11 = vld [vmem:[#allocation3 + $0x69] sm:$0xff] }
 0x344   : > { %v2227_v60 = vpop.f32.mrf.mxu0  ;;  %v11117_v1 = vld [vmem:[#allocation3 + $0x51] sm:$0xff] }
 0x345   : > { %2348 = vst.msk [vmem:[#allocation3 + $0x81] sm:$0xff] %vm299_vm11, %v2315_v59  ;;  %v2320_v3 = vmax.f32 %v2236_v58, 0.0  ;;  %v2228_v2 = vadd.f32 %v11042_v13, %v2227_v60  ;;  %2522 = vrot.lane.b32.xlu1 %v11117_v1, %s9749_s29  ;;  %2524 = vrot.lane.b32.xlu0 %v11119_v62, %s9749_s29  ;;  %v11129_v5 = vld [vmem:[#allocation3 + $0x50] sm:$0xff] }
 0x346   : > { %v9480_v4 = vpop.f32.mrf.mxu0  ;;  %2419 = vst.msk [vmem:[#allocation5 + $0x38] sm:$0xff] %vm299_vm11, %v11129_v5  ;;  %v11133_v8 = vld [vmem:[#allocation3 + $0x90] sm:$0xff] }
 0x347   : > { %2353 = vst.msk [vmem:[#allocation3 + $0xc1] sm:$0xff] %vm299_vm11, %v2320_v3  ;;  %v2318_v6 = vmax.f32 %v2228_v2, 0.0  ;;  %v2239_v10 = vadd.f32 %v9480_v4, %v11042_v13  ;;  %2424 = vst.msk [vmem:[#allocation5 + $0x60] sm:$0xff] %vm299_vm11, %v11133_v8  ;;  %v11159_v43 = vld [vmem:[#allocation3 + $0x91] sm:$0xff] }
 0x348   : > { %v2230_v9 = vpop.f32.mrf.mxu0  ;;  %v11141_v50 = vld [vmem:[#allocation3 + $0x79] sm:$0xff] }
 0x349   : > { %v11143_v17 = vld [vmem:[#allocation3 + $0x78] sm:$0xff]  ;;  %2351 = vst.msk [vmem:[#allocation3 + $0xa9] sm:$0xff] %vm299_vm11, %v2318_v6  ;;  %v2321_v14 = vmax.f32 %v2239_v10, 0.0  ;;  %v2231_v20 = vadd.f32 %v11042_v13, %v2230_v9  ;;  %2526 = vrot.lane.b32.xlu1 %v11139_v11, %s9749_s29  ;;  %2528 = vrot.lane.b32.xlu0 %v11141_v50, %s9749_s29 }
 0x34a   : > { %2422 = vst.msk [vmem:[#allocation5 + $0x50] sm:$0xff] %vm299_vm11, %v11143_v17  ;;  %v9483_v18 = vpop.f32.mrf.mxu0  ;;  %v11155_v21 = vld [vmem:[#allocation3 + $0x98] sm:$0xff] }
 0x34b   : > { %2354 = vst.msk [vmem:[#allocation3 + $0xc9] sm:$0xff] %vm299_vm11, %v2321_v14  ;;  %v2319_v41 = vmax.f32 %v2231_v20, 0.0  ;;  %v2252_v24 = vadd.f32 %v9483_v18, %v11042_v13  ;;  %2425 = vst.msk [vmem:[#allocation5 + $0x68] sm:$0xff] %vm299_vm11, %v11155_v21  ;;  %v11179_v56 = vld [vmem:[#allocation3 + $0x99] sm:$0xff] }
 0x34c   : > { %v2243_v42 = vpop.f32.mrf.mxu0  ;;  %v11157_v37 = vld [vmem:[#allocation3 + $0x81] sm:$0xff] }
 0x34d   : > { %2352 = vst.msk [vmem:[#allocation3 + $0xb1] sm:$0xff] %vm299_vm11, %v2319_v41  ;;  %v2324_v29 = vmax.f32 %v2252_v24, 0.0  ;;  %v2244_v28 = vadd.f32 %v11042_v13, %v2243_v42  ;;  %2530 = vrot.lane.b32.xlu1 %v11157_v37, %s9749_s29  ;;  %2532 = vrot.lane.b32.xlu0 %v11159_v43, %s9749_s29  ;;  %v11169_v44 = vld [vmem:[#allocation3 + $0x80] sm:$0xff] }
 0x34e   : > { %v9484_v47 = vpop.f32.mrf.mxu0  ;;  %2423 = vst.msk [vmem:[#allocation5 + $0x58] sm:$0xff] %vm299_vm11, %v11169_v44  ;;  %v11173_v26 = vld [vmem:[#allocation3 + $0xc0] sm:$0xff] }
 0x34f   : > { %2357 = vst.msk [vmem:[#allocation3 + $0xf1] sm:$0xff] %vm299_vm11, %v2324_v29  ;;  %v2322_v31 = vmax.f32 %v2244_v28, 0.0  ;;  %v2255_v34 = vadd.f32 %v9484_v47, %v11042_v13  ;;  %2428 = vst.msk [vmem:[#allocation5 + $0x80] sm:$0xff] %vm299_vm11, %v11173_v26  ;;  %v11199_v36 = vld [vmem:[#allocation3 + $0xc1] sm:$0xff] }
 0x350   : > { %v2246_v53 = vpop.f32.mrf.mxu0  ;;  %v11181_v63 = vld [vmem:[#allocation3 + $0xa9] sm:$0xff] }
 0x351   : > { %v11183_v7 = vld [vmem:[#allocation3 + $0xa8] sm:$0xff]  ;;  %2355 = vst.msk [vmem:[#allocation3 + $0xd9] sm:$0xff] %vm299_vm11, %v2322_v31  ;;  %v2325_v16 = vmax.f32 %v2255_v34, 0.0  ;;  %v2247_v19 = vadd.f32 %v11042_v13, %v2246_v53  ;;  %2534 = vrot.lane.b32.xlu1 %v11179_v56, %s9749_s29  ;;  %2536 = vrot.lane.b32.xlu0 %v11181_v63, %s9749_s29 }
 0x352   : > { %2426 = vst.msk [vmem:[#allocation5 + $0x70] sm:$0xff] %vm299_vm11, %v11183_v7  ;;  %v9487_v22 = vpop.f32.mrf.mxu0  ;;  %v11195_v48 = vld [vmem:[#allocation3 + $0xc8] sm:$0xff] }
 0x353   : > { %2358 = vst.msk [vmem:[#allocation3 + $0xf9] sm:$0xff] %vm299_vm11, %v2325_v16  ;;  %v2323_v0 = vmax.f32 %v2247_v19, 0.0  ;;  %v2268_v23 = vadd.f32 %v9487_v22, %v11042_v13  ;;  %2429 = vst.msk [vmem:[#allocation5 + $0x88] sm:$0xff] %vm299_vm11, %v11195_v48  ;;  %v11219_v60 = vld [vmem:[#allocation3 + $0xc9] sm:$0xff] }
 0x354   : > { %v2259_v46 = vpop.f32.mrf.mxu0  ;;  %v11197_v35 = vld [vmem:[#allocation3 + $0xb1] sm:$0xff] }
 0x355   : > { %2356 = vst.msk [vmem:[#allocation3 + $0xe1] sm:$0xff] %vm299_vm11, %v2323_v0  ;;  %v2328_v45 = vmax.f32 %v2268_v23, 0.0  ;;  %v2260_v39 = vadd.f32 %v11042_v13, %v2259_v46  ;;  %2538 = vrot.lane.b32.xlu1 %v11197_v35, %s9749_s29  ;;  %2540 = vrot.lane.b32.xlu0 %v11199_v36, %s9749_s29  ;;  %v11209_v38 = vld [vmem:[#allocation3 + $0xb0] sm:$0xff] }
 0x356   : > { %v9488_v52 = vpop.f32.mrf.mxu0  ;;  %2427 = vst.msk [vmem:[#allocation5 + $0x78] sm:$0xff] %vm299_vm11, %v11209_v38  ;;  %v11213_v57 = vld [vmem:[#allocation3 + $0xf0] sm:$0xff] }
 0x357   : > { %2361 = vst.msk [vmem:[#allocation3 + $0x121] sm:$0xff] %vm299_vm11, %v2328_v45  ;;  %v2326_v55 = vmax.f32 %v2260_v39, 0.0  ;;  %v2271_v59 = vadd.f32 %v9488_v52, %v11042_v13  ;;  %2432 = vst.msk [vmem:[#allocation5 + $0xa0] sm:$0xff] %vm299_vm11, %v11213_v57  ;;  %v11239_v24 = vld [vmem:[#allocation3 + $0xf1] sm:$0xff] }
 0x358   : > { %v2262_v58 = vpop.f32.mrf.mxu0  ;;  %v11221_v3 = vld [vmem:[#allocation3 + $0xd9] sm:$0xff] }
 0x359   : > { %v11223_v2 = vld [vmem:[#allocation3 + $0xd8] sm:$0xff]  ;;  %2359 = vst.msk [vmem:[#allocation3 + $0x109] sm:$0xff] %vm299_vm11, %v2326_v55  ;;  %v2329_v4 = vmax.f32 %v2271_v59, 0.0  ;;  %v2263_v6 = vadd.f32 %v11042_v13, %v2262_v58  ;;  %2542 = vrot.lane.b32.xlu1 %v11219_v60, %s9749_s29  ;;  %2544 = vrot.lane.b32.xlu0 %v11221_v3, %s9749_s29 }
 0x35a   : > { %2430 = vst.msk [vmem:[#allocation5 + $0x90] sm:$0xff] %vm299_vm11, %v11223_v2  ;;  %v9491_v10 = vpop.f32.mrf.mxu0  ;;  %v11235_v20 = vld [vmem:[#allocation3 + $0xf8] sm:$0xff] }
 0x35b   : > { %2362 = vst.msk [vmem:[#allocation3 + $0x129] sm:$0xff] %vm299_vm11, %v2329_v4  ;;  %v2327_v9 = vmax.f32 %v2263_v6, 0.0  ;;  %v2284_v14 = vadd.f32 %v9491_v10, %v11042_v13  ;;  %2433 = vst.msk [vmem:[#allocation5 + $0xa8] sm:$0xff] %vm299_vm11, %v11235_v20  ;;  %v11259_v19 = vld [vmem:[#allocation3 + $0xf9] sm:$0xff] }
 0x35c   : > { %v2275_v18 = vpop.f32.mrf.mxu0  ;;  %v11237_v41 = vld [vmem:[#allocation3 + $0xe1] sm:$0xff] }
 0x35d   : > { %2360 = vst.msk [vmem:[#allocation3 + $0x111] sm:$0xff] %vm299_vm11, %v2327_v9  ;;  %v2332_v42 = vmax.f32 %v2284_v14, 0.0  ;;  %v2276_v29 = vadd.f32 %v11042_v13, %v2275_v18  ;;  %2546 = vrot.lane.b32.xlu1 %v11237_v41, %s9749_s29  ;;  %2548 = vrot.lane.b32.xlu0 %v11239_v24, %s9749_s29  ;;  %v11249_v28 = vld [vmem:[#allocation3 + $0xe0] sm:$0xff] }
 0x35e   : > { %v9492_v47 = vpop.f32.mrf.mxu0  ;;  %2431 = vst.msk [vmem:[#allocation5 + $0x98] sm:$0xff] %vm299_vm11, %v11249_v28  ;;  %v11253_v31 = vld [vmem:[#allocation3 + $0x120] sm:$0xff] }
 0x35f   : > { %2365 = vst.msk [vmem:[#allocation3 + $0x151] sm:$0xff] %vm299_vm11, %v2332_v42  ;;  %v2330_v34 = vmax.f32 %v2276_v29, 0.0  ;;  %v2287_v53 = vadd.f32 %v9492_v47, %v11042_v13  ;;  %2436 = vst.msk [vmem:[#allocation5 + $0xc0] sm:$0xff] %vm299_vm11, %v11253_v31  ;;  %v11279_v4 = vld [vmem:[#allocation3 + $0x121] sm:$0xff] }
 0x360   : > { %v2278_v16 = vpop.f32.mrf.mxu0  ;;  %v11261_v22 = vld [vmem:[#allocation3 + $0x109] sm:$0xff] }
 0x361   : > { %v11263_v0 = vld [vmem:[#allocation3 + $0x108] sm:$0xff]  ;;  %2363 = vst.msk [vmem:[#allocation3 + $0x139] sm:$0xff] %vm299_vm11, %v2330_v34  ;;  %v2333_v23 = vmax.f32 %v2287_v53, 0.0  ;;  %v2279_v46 = vadd.f32 %v11042_v13, %v2278_v16  ;;  %2550 = vrot.lane.b32.xlu1 %v11259_v19, %s9749_s29  ;;  %2552 = vrot.lane.b32.xlu0 %v11261_v22, %s9749_s29 }
 0x362   : > { %2434 = vst.msk [vmem:[#allocation5 + $0xb0] sm:$0xff] %vm299_vm11, %v11263_v0  ;;  %v9495_v45 = vpop.f32.mrf.mxu0  ;;  %v11275_v55 = vld [vmem:[#allocation3 + $0x128] sm:$0xff] }
 0x363   : > { %2366 = vst.msk [vmem:[#allocation3 + $0x159] sm:$0xff] %vm299_vm11, %v2333_v23  ;;  %v2331_v39 = vmax.f32 %v2279_v46, 0.0  ;;  %v2300_v52 = vadd.f32 %v9495_v45, %v11042_v13  ;;  %2437 = vst.msk [vmem:[#allocation5 + $0xc8] sm:$0xff] %vm299_vm11, %v11275_v55  ;;  %v11299_v34 = vld [vmem:[#allocation3 + $0x129] sm:$0xff] }
 0x364   : > { %v2291_v59 = vpop.f32.mrf.mxu0  ;;  %v11277_v58 = vld [vmem:[#allocation3 + $0x111] sm:$0xff] }
 0x365   : > { %2364 = vst.msk [vmem:[#allocation3 + $0x141] sm:$0xff] %vm299_vm11, %v2331_v39  ;;  %v2336_v6 = vmax.f32 %v2300_v52, 0.0  ;;  %v2292_v10 = vadd.f32 %v11042_v13, %v2291_v59  ;;  %2554 = vrot.lane.b32.xlu1 %v11277_v58, %s9749_s29  ;;  %2556 = vrot.lane.b32.xlu0 %v11279_v4, %s9749_s29  ;;  %v11289_v9 = vld [vmem:[#allocation3 + $0x110] sm:$0xff] }
 0x366   : > { %v9496_v14 = vpop.f32.mrf.mxu0  ;;  %2435 = vst.msk [vmem:[#allocation5 + $0xb8] sm:$0xff] %vm299_vm11, %v11289_v9  ;;  %v11293_v18 = vld [vmem:[#allocation3 + $0x150] sm:$0xff] }
 0x367   : > { %2369 = vst.msk [vmem:[#allocation3 + $0x181] sm:$0xff] %vm299_vm11, %v2336_v6  ;;  %v2334_v42 = vmax.f32 %v2292_v10, 0.0  ;;  %v2303_v29 = vadd.f32 %v9496_v14, %v11042_v13  ;;  %2440 = vst.msk [vmem:[#allocation5 + $0xe0] sm:$0xff] %vm299_vm11, %v11293_v18  ;;  %v11318_v59 = vld [vmem:[#allocation3 + $0x151] sm:$0xff] }
 0x368   : > { %v2294_v47 = vpop.f32.mrf.mxu0  ;;  %v11301_v53 = vld [vmem:[#allocation3 + $0x139] sm:$0xff] }
 0x369   : > { %v11303_v16 = vld [vmem:[#allocation3 + $0x138] sm:$0xff]  ;;  %2367 = vst.msk [vmem:[#allocation3 + $0x169] sm:$0xff] %vm299_vm11, %v2334_v42  ;;  %v2337_v23 = vmax.f32 %v2303_v29, 0.0  ;;  %v2295_v46 = vadd.f32 %v11042_v13, %v2294_v47  ;;  %2558 = vrot.lane.b32.xlu1 %v11299_v34, %s9749_s29  ;;  %2560 = vrot.lane.b32.xlu0 %v11301_v53, %s9749_s29  ;;  %v2637_v42 = vld [vmem:[#allocation3 + $0x2] sm:$0xff] }
 0x36a   : > { %2438 = vst.msk [vmem:[#allocation5 + $0xd0] sm:$0xff] %vm299_vm11, %v11303_v16  ;;  %v11314_v39 = vld [vmem:[#allocation3 + $0x158] sm:$0xff] }
 0x36b   : > { %2370 = vst.msk [vmem:[#allocation3 + $0x189] sm:$0xff] %vm299_vm11, %v2337_v23  ;;  %v2335_v45 = vmax.f32 %v2295_v46, 0.0  ;;  %2441 = vst.msk [vmem:[#allocation5 + $0xe8] sm:$0xff] %vm299_vm11, %v11314_v39  ;;  %v11331_v6 = vld [vmem:[#allocation3 + $0x159] sm:$0xff]  ;;  %v2638_v23 = vld [vmem:[#allocation3 + $0xa] sm:$0xff] }
 0x36c   : > { %v11316_v52 = vld [vmem:[#allocation3 + $0x141] sm:$0xff]  ;;  %14443 = vst [vmem:[#allocation6_spill] sm:$0xff] %v11331_v6 }
 0x36d   : > { %2368 = vst.msk [vmem:[#allocation3 + $0x171] sm:$0xff] %vm299_vm11, %v2335_v45  ;;  %2562 = vrot.lane.b32.xlu1 %v11316_v52, %s9749_s29  ;;  %2564 = vrot.lane.b32.xlu0 %v11318_v59, %s9749_s29  ;;  %v11327_v13 = vld [vmem:[#allocation3 + $0x140] sm:$0xff] }
 0x36e   : > { %2439 = vst.msk [vmem:[#allocation5 + $0xd8] sm:$0xff] %vm299_vm11, %v11327_v13  ;;  %v11352_v46 = vld [vmem:[#allocation3 + $0x1a] sm:$0xff]  ;;  %v11357_v45 = vld [vmem:[#allocation3 + $0x22] sm:$0xff] }
 0x36f   : > { %14446 = vst [vmem:[#allocation9_spill] sm:$0xff] %v11352_v46  ;;  %14447 = vst [vmem:[#allocation10_spill] sm:$0xff] %v11357_v45 }
 0x370   : > { %v11333_v10 = vld [vmem:[#allocation3 + $0x169] sm:$0xff] }
 0x371   : > { %14444 = vst [vmem:[#allocation7_spill] sm:$0xff] %v11333_v10  ;;  %v11335_v14 = vld [vmem:[#allocation3 + $0x168] sm:$0xff]  ;;  %2566 = vrot.lane.b32.xlu1 %v11331_v6, %s9749_s29  ;;  %2568 = vrot.lane.b32.xlu0 %v11333_v10, %s9749_s29  ;;  %v11359_v10 = vld [vmem:[#allocation3 + $0x32] sm:$0xff] }
 0x372   : > { %2442 = vst.msk [vmem:[#allocation5 + $0xf0] sm:$0xff] %vm299_vm11, %v11335_v14  ;;  %14448 = vst [vmem:[#allocation11_spill] sm:$0xff] %v11359_v10  ;;  %v11456_v6 = vld [vmem:[#allocation3 + $0x152] sm:$0xff] }
 0x373   : > { %14472 = vst [vmem:[#allocation35_spill] sm:$0xff] %v11456_v6 }
 0x374   : > { %v11343_v29 = vld [vmem:[#allocation3 + $0x171] sm:$0xff] }
 0x375   : > { %14445 = vst [vmem:[#allocation8_spill] sm:$0xff] %v11343_v29  ;;  %2570 = vrot.lane.b32.xlu1 %v11343_v29, %s9749_s29  ;;  %2701 = vrot.lane.b32.xlu0 %v2637_v42, %s9751_s7  ;;  %v11348_v47 = vld [vmem:[#allocation3 + $0x170] sm:$0xff]  ;;  %v11365_v42 = vld [vmem:[#allocation3 + $0x3a] sm:$0xff] }
 0x376   : > { %2443 = vst.msk [vmem:[#allocation5 + $0xf8] sm:$0xff] %vm299_vm11, %v11348_v47  ;;  %14449 = vst [vmem:[#allocation12_spill] sm:$0xff] %v11365_v42  ;;  %v11367_v29 = vld [vmem:[#allocation3 + $0x4a] sm:$0xff] }
 0x377   : > { %14450 = vst [vmem:[#allocation13_spill] sm:$0xff] %v11367_v29 }
 0x379   : > { %2703 = vrot.lane.b32.xlu1 %v2638_v23, %s9751_s7  ;;  %2705 = vrot.lane.b32.xlu0 %v11352_v46, %s9751_s7  ;;  %v11373_v23 = vld [vmem:[#allocation3 + $0x52] sm:$0xff]  ;;  %v11375_v46 = vld [vmem:[#allocation3 + $0x62] sm:$0xff] }
 0x37a   : > { %14451 = vst [vmem:[#allocation14_spill] sm:$0xff] %v11373_v23  ;;  %14452 = vst [vmem:[#allocation15_spill] sm:$0xff] %v11375_v46 }
 0x37d   : > { %2707 = vrot.lane.b32.xlu1 %v11357_v45, %s9751_s7  ;;  %2709 = vrot.lane.b32.xlu0 %v11359_v10, %s9751_s7  ;;  %v11381_v10 = vld [vmem:[#allocation3 + $0x6a] sm:$0xff]  ;;  %v11383_v45 = vld [vmem:[#allocation3 + $0x7a] sm:$0xff] }
 0x37e   : > { %14453 = vst [vmem:[#allocation16_spill] sm:$0xff] %v11381_v10  ;;  %14454 = vst [vmem:[#allocation17_spill] sm:$0xff] %v11383_v45 }
 0x381   : > { %2711 = vrot.lane.b32.xlu1 %v11365_v42, %s9751_s7  ;;  %2713 = vrot.lane.b32.xlu0 %v11367_v29, %s9751_s7  ;;  %v11389_v29 = vld [vmem:[#allocation3 + $0x82] sm:$0xff]  ;;  %v11391_v42 = vld [vmem:[#allocation3 + $0x92] sm:$0xff] }
 0x382   : > { %14455 = vst [vmem:[#allocation18_spill] sm:$0xff] %v11389_v29  ;;  %14456 = vst [vmem:[#allocation19_spill] sm:$0xff] %v11391_v42 }
 0x385   : > { %2715 = vrot.lane.b32.xlu1 %v11373_v23, %s9751_s7  ;;  %2717 = vrot.lane.b32.xlu0 %v11375_v46, %s9751_s7  ;;  %v11397_v46 = vld [vmem:[#allocation3 + $0x9a] sm:$0xff]  ;;  %v11399_v23 = vld [vmem:[#allocation3 + $0xaa] sm:$0xff] }
 0x386   : > { %14457 = vst [vmem:[#allocation20_spill] sm:$0xff] %v11397_v46  ;;  %14458 = vst [vmem:[#allocation21_spill] sm:$0xff] %v11399_v23 }
 0x389   : > { %2719 = vrot.lane.b32.xlu1 %v11381_v10, %s9751_s7  ;;  %2721 = vrot.lane.b32.xlu0 %v11383_v45, %s9751_s7  ;;  %v11405_v45 = vld [vmem:[#allocation3 + $0xb2] sm:$0xff]  ;;  %v11407_v10 = vld [vmem:[#allocation3 + $0xc2] sm:$0xff] }
 0x38a   : > { %14459 = vst [vmem:[#allocation22_spill] sm:$0xff] %v11405_v45  ;;  %14460 = vst [vmem:[#allocation23_spill] sm:$0xff] %v11407_v10 }
 0x38d   : > { %2723 = vrot.lane.b32.xlu1 %v11389_v29, %s9751_s7  ;;  %2725 = vrot.lane.b32.xlu0 %v11391_v42, %s9751_s7  ;;  %v11413_v42 = vld [vmem:[#allocation3 + $0xca] sm:$0xff]  ;;  %v11415_v29 = vld [vmem:[#allocation3 + $0xda] sm:$0xff] }
 0x38e   : > { %14461 = vst [vmem:[#allocation24_spill] sm:$0xff] %v11413_v42  ;;  %14462 = vst [vmem:[#allocation25_spill] sm:$0xff] %v11415_v29 }
 0x391   : > { %2727 = vrot.lane.b32.xlu1 %v11397_v46, %s9751_s7  ;;  %2729 = vrot.lane.b32.xlu0 %v11399_v23, %s9751_s7  ;;  %v11421_v23 = vld [vmem:[#allocation3 + $0xe2] sm:$0xff]  ;;  %v11423_v46 = vld [vmem:[#allocation3 + $0xf2] sm:$0xff] }
 0x392   : > { %14463 = vst [vmem:[#allocation26_spill] sm:$0xff] %v11421_v23  ;;  %14464 = vst [vmem:[#allocation27_spill] sm:$0xff] %v11423_v46 }
 0x395   : > { %2731 = vrot.lane.b32.xlu1 %v11405_v45, %s9751_s7  ;;  %2733 = vrot.lane.b32.xlu0 %v11407_v10, %s9751_s7  ;;  %v11429_v10 = vld [vmem:[#allocation3 + $0xfa] sm:$0xff]  ;;  %v11431_v45 = vld [vmem:[#allocation3 + $0x10a] sm:$0xff] }
 0x396   : > { %14465 = vst [vmem:[#allocation28_spill] sm:$0xff] %v11429_v10  ;;  %14466 = vst [vmem:[#allocation29_spill] sm:$0xff] %v11431_v45 }
 0x399   : > { %2735 = vrot.lane.b32.xlu1 %v11413_v42, %s9751_s7  ;;  %2737 = vrot.lane.b32.xlu0 %v11415_v29, %s9751_s7  ;;  %v11437_v29 = vld [vmem:[#allocation3 + $0x112] sm:$0xff]  ;;  %v11439_v42 = vld [vmem:[#allocation3 + $0x122] sm:$0xff] }
 0x39a   : > { %14467 = vst [vmem:[#allocation30_spill] sm:$0xff] %v11437_v29  ;;  %14468 = vst [vmem:[#allocation31_spill] sm:$0xff] %v11439_v42 }
 0x39d   : > { %2739 = vrot.lane.b32.xlu1 %v11421_v23, %s9751_s7  ;;  %2741 = vrot.lane.b32.xlu0 %v11423_v46, %s9751_s7  ;;  %v11445_v46 = vld [vmem:[#allocation3 + $0x12a] sm:$0xff]  ;;  %v11447_v23 = vld [vmem:[#allocation3 + $0x13a] sm:$0xff] }
 0x39e   : > { %14469 = vst [vmem:[#allocation32_spill] sm:$0xff] %v11445_v46  ;;  %14470 = vst [vmem:[#allocation33_spill] sm:$0xff] %v11447_v23 }
 0x3a1   : > { %2743 = vrot.lane.b32.xlu1 %v11429_v10, %s9751_s7  ;;  %2745 = vrot.lane.b32.xlu0 %v11431_v45, %s9751_s7  ;;  %v11454_v10 = vld [vmem:[#allocation3 + $0x142] sm:$0xff] }
 0x3a2   : > { %14471 = vst [vmem:[#allocation34_spill] sm:$0xff] %v11454_v10 }
 0x3a5   : > { %2747 = vrot.lane.b32.xlu1 %v11437_v29, %s9751_s7  ;;  %2749 = vrot.lane.b32.xlu0 %v11439_v42, %s9751_s7 }
 0x3a9   : > { %2751 = vrot.lane.b32.xlu1 %v11445_v46, %s9751_s7  ;;  %2753 = vrot.lane.b32.xlu0 %v11447_v23, %s9751_s7  ;;  %v11464_v23 = vld [vmem:[#allocation3 + $0x15a] sm:$0xff]  ;;  %v11466_v46 = vld [vmem:[#allocation3 + $0x16a] sm:$0xff] }
 0x3ab   : > { %v2513_v45 = vpop.permute.xlu0 %2512 }
 0x3ac   : > { %2607 = vst.msk [vmem:[#allocation5 + $0x10] sm:$0xff] %vm2604_vm1, %v2513_v45 }
 0x3ad   : > { %2755 = vrot.lane.b32.xlu1 %v11454_v10, %s9751_s7  ;;  %2757 = vrot.lane.b32.xlu0 %v11456_v6, %s9751_s7  ;;  %v11474_v6 = vld [vmem:[#allocation3 + $0x172] sm:$0xff] }
 0x3af   : > { %v2515_v42 = vpop.permute.xlu1 %2514  ;;  %v2517_v29 = vpop.permute.xlu0 %2516 }
 0x3b0   : > { %2608 = vst.msk [vmem:[#allocation5 + $0x18] sm:$0xff] %vm2604_vm1, %v2515_v42  ;;  %2609 = vst.msk [vmem:[#allocation5 + $0x20] sm:$0xff] %vm2604_vm1, %v2517_v29 }
 0x3b1   : > { %2759 = vrot.lane.b32.xlu1 %v11464_v23, %s9751_s7  ;;  %2761 = vrot.lane.b32.xlu0 %v11466_v46, %s9751_s7 }
 0x3b3   : > { %v2519_v45 = vpop.permute.xlu1 %2518  ;;  %v2521_v10 = vpop.permute.xlu0 %2520 }
 0x3b4   : > { %2610 = vst.msk [vmem:[#allocation5 + $0x28] sm:$0xff] %vm2604_vm1, %v2519_v45  ;;  %2611 = vst.msk [vmem:[#allocation5 + $0x30] sm:$0xff] %vm2604_vm1, %v2521_v10 }
 0x3b5   : > { %2763 = vrot.lane.b32.xlu1 %v11474_v6, %s9751_s7  ;;  %2894 = vrot.lane.b32.xlu0 %v11065_v15, %s9753_s9 }
 0x3b7   : > { %v2523_v29 = vpop.permute.xlu1 %2522  ;;  %v2525_v42 = vpop.permute.xlu0 %2524 }
 0x3b8   : > { %2612 = vst.msk [vmem:[#allocation5 + $0x38] sm:$0xff] %vm2604_vm1, %v2523_v29  ;;  %2613 = vst.msk [vmem:[#allocation5 + $0x40] sm:$0xff] %vm2604_vm1, %v2525_v42 }
 0x3b9   : > { %2896 = vrot.lane.b32.xlu1 %v11089_v30, %s9753_s9  ;;  %2898 = vrot.lane.b32.xlu0 %v11057_v27, %s9753_s9 }
 0x3bb   : > { %v2527_v10 = vpop.permute.xlu1 %2526  ;;  %v2529_v45 = vpop.permute.xlu0 %2528 }
 0x3bc   : > { %2614 = vst.msk [vmem:[#allocation5 + $0x48] sm:$0xff] %vm2604_vm1, %v2527_v10  ;;  %2615 = vst.msk [vmem:[#allocation5 + $0x50] sm:$0xff] %vm2604_vm1, %v2529_v45 }
 0x3bd   : > { %2900 = vrot.lane.b32.xlu1 %v11075_v49, %s9753_s9  ;;  %2902 = vrot.lane.b32.xlu0 %v11103_v54, %s9753_s9 }
 0x3bf   : > { %v2531_v15 = vpop.permute.xlu1 %2530  ;;  %v2533_v29 = vpop.permute.xlu0 %2532 }
 0x3c0   : > { %2616 = vst.msk [vmem:[#allocation5 + $0x58] sm:$0xff] %vm2604_vm1, %v2531_v15  ;;  %2617 = vst.msk [vmem:[#allocation5 + $0x60] sm:$0xff] %vm2604_vm1, %v2533_v29 }
 0x3c1   : > { %2904 = vrot.lane.b32.xlu1 %v11129_v5, %s9753_s9  ;;  %2906 = vrot.lane.b32.xlu0 %v11093_v32, %s9753_s9 }
 0x3c3   : > { %v2535_v30 = vpop.permute.xlu1 %2534  ;;  %v2537_v42 = vpop.permute.xlu0 %2536 }
 0x3c4   : > { %2618 = vst.msk [vmem:[#allocation5 + $0x68] sm:$0xff] %vm2604_vm1, %v2535_v30  ;;  %2619 = vst.msk [vmem:[#allocation5 + $0x70] sm:$0xff] %vm2604_vm1, %v2537_v42 }
 0x3c5   : > { %2908 = vrot.lane.b32.xlu1 %v11115_v61, %s9753_s9  ;;  %2910 = vrot.lane.b32.xlu0 %v11143_v17, %s9753_s9 }
 0x3c7   : > { %v2539_v10 = vpop.permute.xlu1 %2538  ;;  %v2541_v45 = vpop.permute.xlu0 %2540 }
 0x3c8   : > { %2620 = vst.msk [vmem:[#allocation5 + $0x78] sm:$0xff] %vm2604_vm1, %v2539_v10  ;;  %2621 = vst.msk [vmem:[#allocation5 + $0x80] sm:$0xff] %vm2604_vm1, %v2541_v45 }
 0x3c9   : > { %2912 = vrot.lane.b32.xlu1 %v11169_v44, %s9753_s9  ;;  %2914 = vrot.lane.b32.xlu0 %v11133_v8, %s9753_s9 }
 0x3cb   : > { %v2543_v15 = vpop.permute.xlu1 %2542  ;;  %v2545_v29 = vpop.permute.xlu0 %2544 }
 0x3cc   : > { %2622 = vst.msk [vmem:[#allocation5 + $0x88] sm:$0xff] %vm2604_vm1, %v2543_v15  ;;  %2623 = vst.msk [vmem:[#allocation5 + $0x90] sm:$0xff] %vm2604_vm1, %v2545_v29 }
 0x3cd   : > { %2916 = vrot.lane.b32.xlu1 %v11155_v21, %s9753_s9  ;;  %2918 = vrot.lane.b32.xlu0 %v11183_v7, %s9753_s9 }
 0x3cf   : > { %v2547_v30 = vpop.permute.xlu1 %2546  ;;  %v2549_v42 = vpop.permute.xlu0 %2548 }
 0x3d0   : > { %2624 = vst.msk [vmem:[#allocation5 + $0x98] sm:$0xff] %vm2604_vm1, %v2547_v30  ;;  %2625 = vst.msk [vmem:[#allocation5 + $0xa0] sm:$0xff] %vm2604_vm1, %v2549_v42 }
 0x3d1   : > { %2920 = vrot.lane.b32.xlu1 %v11209_v38, %s9753_s9  ;;  %2922 = vrot.lane.b32.xlu0 %v11173_v26, %s9753_s9 }
 0x3d3   : > { %v2551_v10 = vpop.permute.xlu1 %2550  ;;  %v2553_v45 = vpop.permute.xlu0 %2552 }
 0x3d4   : > { %2626 = vst.msk [vmem:[#allocation5 + $0xa8] sm:$0xff] %vm2604_vm1, %v2551_v10  ;;  %2627 = vst.msk [vmem:[#allocation5 + $0xb0] sm:$0xff] %vm2604_vm1, %v2553_v45 }
 0x3d5   : > { %2924 = vrot.lane.b32.xlu1 %v11195_v48, %s9753_s9  ;;  %2926 = vrot.lane.b32.xlu0 %v11223_v2, %s9753_s9 }
 0x3d7   : > { %v2555_v15 = vpop.permute.xlu1 %2554  ;;  %v2557_v29 = vpop.permute.xlu0 %2556 }
 0x3d8   : > { %2628 = vst.msk [vmem:[#allocation5 + $0xb8] sm:$0xff] %vm2604_vm1, %v2555_v15  ;;  %2629 = vst.msk [vmem:[#allocation5 + $0xc0] sm:$0xff] %vm2604_vm1, %v2557_v29 }
 0x3d9   : > { %2928 = vrot.lane.b32.xlu1 %v11249_v28, %s9753_s9  ;;  %2930 = vrot.lane.b32.xlu0 %v11213_v57, %s9753_s9 }
 0x3db   : > { %v2559_v30 = vpop.permute.xlu1 %2558  ;;  %v2561_v42 = vpop.permute.xlu0 %2560 }
 0x3dc   : > { %2630 = vst.msk [vmem:[#allocation5 + $0xc8] sm:$0xff] %vm2604_vm1, %v2559_v30  ;;  %2631 = vst.msk [vmem:[#allocation5 + $0xd0] sm:$0xff] %vm2604_vm1, %v2561_v42 }
 0x3dd   : > { %2932 = vrot.lane.b32.xlu1 %v11235_v20, %s9753_s9  ;;  %2934 = vrot.lane.b32.xlu0 %v11263_v0, %s9753_s9 }
 0x3df   : > { %v2563_v10 = vpop.permute.xlu1 %2562  ;;  %v2565_v45 = vpop.permute.xlu0 %2564 }
 0x3e0   : > { %2632 = vst.msk [vmem:[#allocation5 + $0xd8] sm:$0xff] %vm2604_vm1, %v2563_v10  ;;  %2633 = vst.msk [vmem:[#allocation5 + $0xe0] sm:$0xff] %vm2604_vm1, %v2565_v45 }
 0x3e1   : > { %2936 = vrot.lane.b32.xlu1 %v11289_v9, %s9753_s9  ;;  %2938 = vrot.lane.b32.xlu0 %v11253_v31, %s9753_s9 }
 0x3e3   : > { %v2567_v15 = vpop.permute.xlu1 %2566  ;;  %v2569_v29 = vpop.permute.xlu0 %2568 }
 0x3e4   : > { %2634 = vst.msk [vmem:[#allocation5 + $0xe8] sm:$0xff] %vm2604_vm1, %v2567_v15  ;;  %2635 = vst.msk [vmem:[#allocation5 + $0xf0] sm:$0xff] %vm2604_vm1, %v2569_v29 }
 0x3e5   : > { %2940 = vrot.lane.b32.xlu1 %v11275_v55, %s9753_s9  ;;  %2942 = vrot.lane.b32.xlu0 %v11303_v16, %s9753_s9 }
 0x3e7   : > { %v2571_v30 = vpop.permute.xlu1 %2570  ;;  %v2702_v42 = vpop.permute.xlu0 %2701 }
 0x3e8   : > { %2636 = vst.msk [vmem:[#allocation5 + $0xf8] sm:$0xff] %vm2604_vm1, %v2571_v30  ;;  %v11566_v30 = vld [vmem:[#allocation3 + $0x180] sm:$0xff] }
 0x3e9   : > { %2798 = vst.msk [vmem:[#allocation5] sm:$0xff] %vm2797_vm2, %v2702_v42  ;;  %2944 = vrot.lane.b32.xlu1 %v11327_v13, %s9753_s9  ;;  %2946 = vrot.lane.b32.xlu0 %v11293_v18, %s9753_s9 }
 0x3eb   : > { %v2704_v10 = vpop.permute.xlu1 %2703  ;;  %v2706_v45 = vpop.permute.xlu0 %2705 }
 0x3ec   : > { %2799 = vst.msk [vmem:[#allocation5 + $0x8] sm:$0xff] %vm2797_vm2, %v2704_v10  ;;  %2800 = vst.msk [vmem:[#allocation5 + $0x10] sm:$0xff] %vm2797_vm2, %v2706_v45  ;;  %v11574_v45 = vld [vmem:[#allocation3 + $0x188] sm:$0xff] }
 0x3ed   : > { %2948 = vrot.lane.b32.xlu1 %v11314_v39, %s9753_s9  ;;  %2950 = vrot.lane.b32.xlu0 %v11335_v14, %s9753_s9 }
 0x3ef   : > { %v2708_v15 = vpop.permute.xlu1 %2707  ;;  %v2710_v29 = vpop.permute.xlu0 %2709 }
 0x3f0   : > { %2801 = vst.msk [vmem:[#allocation5 + $0x18] sm:$0xff] %vm2797_vm2, %v2708_v15  ;;  %2802 = vst.msk [vmem:[#allocation5 + $0x20] sm:$0xff] %vm2797_vm2, %v2710_v29 }
 0x3f1   : > { %2952 = vrot.lane.b32.xlu1 %v11348_v47, %s9753_s9  ;;  %2954 = vrot.lane.b32.xlu0 %v11566_v30, %s9753_s9 }
 0x3f3   : > { %v2712_v42 = vpop.permute.xlu1 %2711  ;;  %v2714_v10 = vpop.permute.xlu0 %2713 }
 0x3f4   : > { %2803 = vst.msk [vmem:[#allocation5 + $0x28] sm:$0xff] %vm2797_vm2, %v2712_v42  ;;  %2804 = vst.msk [vmem:[#allocation5 + $0x30] sm:$0xff] %vm2797_vm2, %v2714_v10 }
 0x3f5   : > { %2956 = vrot.lane.b32.xlu1 %v11574_v45, %s9753_s9  ;;  %3087 = vrot.lane.b32.xlu0 %v11063_v12, %s9755_s15 }
 0x3f7   : > { %v2716_v15 = vpop.permute.xlu1 %2715  ;;  %v2718_v29 = vpop.permute.xlu0 %2717 }
 0x3f8   : > { %2805 = vst.msk [vmem:[#allocation5 + $0x38] sm:$0xff] %vm2797_vm2, %v2716_v15  ;;  %2806 = vst.msk [vmem:[#allocation5 + $0x40] sm:$0xff] %vm2797_vm2, %v2718_v29 }
 0x3f9   : > { %3089 = vrot.lane.b32.xlu1 %v11077_v33, %s9755_s15  ;;  %3091 = vrot.lane.b32.xlu0 %v11079_v25, %s9755_s15 }
 0x3fb   : > { %v2720_v42 = vpop.permute.xlu1 %2719  ;;  %v2722_v10 = vpop.permute.xlu0 %2721 }
 0x3fc   : > { %2807 = vst.msk [vmem:[#allocation5 + $0x48] sm:$0xff] %vm2797_vm2, %v2720_v42  ;;  %2808 = vst.msk [vmem:[#allocation5 + $0x50] sm:$0xff] %vm2797_vm2, %v2722_v10 }
 0x3fd   : > { %3093 = vrot.lane.b32.xlu1 %v11099_v51, %s9755_s15  ;;  %3095 = vrot.lane.b32.xlu0 %v11101_v40, %s9755_s15 }
 0x3ff   : > { %v2724_v12 = vpop.permute.xlu1 %2723  ;;  %v2726_v15 = vpop.permute.xlu0 %2725 }
 0x400   : > { %2809 = vst.msk [vmem:[#allocation5 + $0x58] sm:$0xff] %vm2797_vm2, %v2724_v12  ;;  %2810 = vst.msk [vmem:[#allocation5 + $0x60] sm:$0xff] %vm2797_vm2, %v2726_v15  ;;  %v3054_v15 = vld [vmem:[#allocation3 + $0x189] sm:$0xff] }
 0x401   : > { %3097 = vrot.lane.b32.xlu1 %v11117_v1, %s9755_s15  ;;  %3099 = vrot.lane.b32.xlu0 %v11119_v62, %s9755_s15 }
 0x403   : > { %v2728_v33 = vpop.permute.xlu1 %2727  ;;  %v2730_v25 = vpop.permute.xlu0 %2729 }
 0x404   : > { %2811 = vst.msk [vmem:[#allocation5 + $0x68] sm:$0xff] %vm2797_vm2, %v2728_v33  ;;  %2812 = vst.msk [vmem:[#allocation5 + $0x70] sm:$0xff] %vm2797_vm2, %v2730_v25  ;;  %v14476_v33 = vld [vmem:[#allocation9_spill] sm:$0xff] }
 0x405   : > { %3101 = vrot.lane.b32.xlu1 %v11139_v11, %s9755_s15  ;;  %3103 = vrot.lane.b32.xlu0 %v11141_v50, %s9755_s15 }
 0x407   : > { %v2732_v51 = vpop.permute.xlu1 %2731  ;;  %v2734_v40 = vpop.permute.xlu0 %2733 }
 0x408   : > { %2813 = vst.msk [vmem:[#allocation5 + $0x78] sm:$0xff] %vm2797_vm2, %v2732_v51  ;;  %2814 = vst.msk [vmem:[#allocation5 + $0x80] sm:$0xff] %vm2797_vm2, %v2734_v40  ;;  %v14477_v40 = vld [vmem:[#allocation10_spill] sm:$0xff] }
 0x409   : > { %3105 = vrot.lane.b32.xlu1 %v11157_v37, %s9755_s15  ;;  %3107 = vrot.lane.b32.xlu0 %v11159_v43, %s9755_s15 }
 0x40b   : > { %v2736_v1 = vpop.permute.xlu1 %2735  ;;  %v2738_v62 = vpop.permute.xlu0 %2737 }
 0x40c   : > { %2815 = vst.msk [vmem:[#allocation5 + $0x88] sm:$0xff] %vm2797_vm2, %v2736_v1  ;;  %2816 = vst.msk [vmem:[#allocation5 + $0x90] sm:$0xff] %vm2797_vm2, %v2738_v62  ;;  %v14478_v1 = vld [vmem:[#allocation11_spill] sm:$0xff] }
 0x40d   : > { %3109 = vrot.lane.b32.xlu1 %v11179_v56, %s9755_s15  ;;  %3111 = vrot.lane.b32.xlu0 %v11181_v63, %s9755_s15 }
 0x40f   : > { %v2740_v11 = vpop.permute.xlu1 %2739  ;;  %v2742_v50 = vpop.permute.xlu0 %2741 }
 0x410   : > { %2817 = vst.msk [vmem:[#allocation5 + $0x98] sm:$0xff] %vm2797_vm2, %v2740_v11  ;;  %2818 = vst.msk [vmem:[#allocation5 + $0xa0] sm:$0xff] %vm2797_vm2, %v2742_v50  ;;  %v14479_v50 = vld [vmem:[#allocation12_spill] sm:$0xff] }
 0x411   : > { %3113 = vrot.lane.b32.xlu1 %v11197_v35, %s9755_s15  ;;  %3115 = vrot.lane.b32.xlu0 %v11199_v36, %s9755_s15 }
 0x413   : > { %v2744_v37 = vpop.permute.xlu1 %2743  ;;  %v2746_v43 = vpop.permute.xlu0 %2745 }
 0x414   : > { %2819 = vst.msk [vmem:[#allocation5 + $0xa8] sm:$0xff] %vm2797_vm2, %v2744_v37  ;;  %2820 = vst.msk [vmem:[#allocation5 + $0xb0] sm:$0xff] %vm2797_vm2, %v2746_v43  ;;  %v14480_v37 = vld [vmem:[#allocation13_spill] sm:$0xff] }
 0x415   : > { %3117 = vrot.lane.b32.xlu1 %v11219_v60, %s9755_s15  ;;  %3119 = vrot.lane.b32.xlu0 %v11221_v3, %s9755_s15 }
 0x417   : > { %v2748_v56 = vpop.permute.xlu1 %2747  ;;  %v2750_v63 = vpop.permute.xlu0 %2749 }
 0x418   : > { %2821 = vst.msk [vmem:[#allocation5 + $0xb8] sm:$0xff] %vm2797_vm2, %v2748_v56  ;;  %2822 = vst.msk [vmem:[#allocation5 + $0xc0] sm:$0xff] %vm2797_vm2, %v2750_v63  ;;  %v14481_v63 = vld [vmem:[#allocation14_spill] sm:$0xff] }
 0x419   : > { %3121 = vrot.lane.b32.xlu1 %v11237_v41, %s9755_s15  ;;  %3123 = vrot.lane.b32.xlu0 %v11239_v24, %s9755_s15 }
 0x41b   : > { %v2752_v35 = vpop.permute.xlu1 %2751  ;;  %v2754_v36 = vpop.permute.xlu0 %2753 }
 0x41c   : > { %2823 = vst.msk [vmem:[#allocation5 + $0xc8] sm:$0xff] %vm2797_vm2, %v2752_v35  ;;  %2824 = vst.msk [vmem:[#allocation5 + $0xd0] sm:$0xff] %vm2797_vm2, %v2754_v36  ;;  %v14482_v35 = vld [vmem:[#allocation15_spill] sm:$0xff] }
 0x41d   : > { %3125 = vrot.lane.b32.xlu1 %v11259_v19, %s9755_s15  ;;  %3127 = vrot.lane.b32.xlu0 %v11261_v22, %s9755_s15 }
 0x41f   : > { %v2756_v60 = vpop.permute.xlu1 %2755  ;;  %v2758_v3 = vpop.permute.xlu0 %2757 }
 0x420   : > { %2825 = vst.msk [vmem:[#allocation5 + $0xd8] sm:$0xff] %vm2797_vm2, %v2756_v60  ;;  %2826 = vst.msk [vmem:[#allocation5 + $0xe0] sm:$0xff] %vm2797_vm2, %v2758_v3  ;;  %v14483_v3 = vld [vmem:[#allocation16_spill] sm:$0xff] }
 0x421   : > { %3129 = vrot.lane.b32.xlu1 %v11277_v58, %s9755_s15  ;;  %3131 = vrot.lane.b32.xlu0 %v11279_v4, %s9755_s15 }
 0x423   : > { %v2760_v41 = vpop.permute.xlu1 %2759  ;;  %v2762_v24 = vpop.permute.xlu0 %2761 }
 0x424   : > { %2827 = vst.msk [vmem:[#allocation5 + $0xe8] sm:$0xff] %vm2797_vm2, %v2760_v41  ;;  %2828 = vst.msk [vmem:[#allocation5 + $0xf0] sm:$0xff] %vm2797_vm2, %v2762_v24  ;;  %v14484_v41 = vld [vmem:[#allocation17_spill] sm:$0xff] }
 0x425   : > { %3133 = vrot.lane.b32.xlu1 %v11299_v34, %s9755_s15  ;;  %3135 = vrot.lane.b32.xlu0 %v11301_v53, %s9755_s15  ;;  %v14473_v34 = vld [vmem:[#allocation6_spill] sm:$0xff]  ;;  %v14474_v53 = vld [vmem:[#allocation7_spill] sm:$0xff] }
 0x427   : > { %v2764_v19 = vpop.permute.xlu1 %2763  ;;  %v2895_v22 = vpop.permute.xlu0 %2894 }
 0x428   : > { %2829 = vst.msk [vmem:[#allocation5 + $0xf8] sm:$0xff] %vm2797_vm2, %v2764_v19 }
 0x429   : > { %2991 = vst.msk [vmem:[#allocation5] sm:$0xff] %vm2990_vm3, %v2895_v22  ;;  %3137 = vrot.lane.b32.xlu1 %v11316_v52, %s9755_s15  ;;  %3139 = vrot.lane.b32.xlu0 %v11318_v59, %s9755_s15  ;;  %v3053_v52 = vld [vmem:[#allocation3 + $0x181] sm:$0xff]  ;;  %v14485_v22 = vld [vmem:[#allocation18_spill] sm:$0xff] }
 0x42a   : > { %v14475_v59 = vld [vmem:[#allocation8_spill] sm:$0xff] }
 0x42b   : > { %v2897_v58 = vpop.permute.xlu1 %2896  ;;  %v2899_v4 = vpop.permute.xlu0 %2898 }
 0x42c   : > { %2992 = vst.msk [vmem:[#allocation5 + $0x8] sm:$0xff] %vm2990_vm3, %v2897_v58  ;;  %2993 = vst.msk [vmem:[#allocation5 + $0x10] sm:$0xff] %vm2990_vm3, %v2899_v4  ;;  %v14486_v58 = vld [vmem:[#allocation19_spill] sm:$0xff] }
 0x42d   : > { %3141 = vrot.lane.b32.xlu1 %v14473_v34, %s9755_s15  ;;  %3143 = vrot.lane.b32.xlu0 %v14474_v53, %s9755_s15  ;;  %v14487_v53 = vld [vmem:[#allocation20_spill] sm:$0xff] }
 0x42f   : > { %v2901_v29 = vpop.permute.xlu1 %2900  ;;  %v2903_v42 = vpop.permute.xlu0 %2902 }
 0x430   : > { %2994 = vst.msk [vmem:[#allocation5 + $0x18] sm:$0xff] %vm2990_vm3, %v2901_v29  ;;  %2995 = vst.msk [vmem:[#allocation5 + $0x20] sm:$0xff] %vm2990_vm3, %v2903_v42  ;;  %v14488_v29 = vld [vmem:[#allocation21_spill] sm:$0xff] }
 0x431   : > { %3145 = vrot.lane.b32.xlu1 %v14475_v59, %s9755_s15  ;;  %3147 = vrot.lane.b32.xlu0 %v3053_v52, %s9755_s15  ;;  %v14489_v59 = vld [vmem:[#allocation22_spill] sm:$0xff] }
 0x433   : > { %v2905_v10 = vpop.permute.xlu1 %2904  ;;  %v2907_v12 = vpop.permute.xlu0 %2906 }
 0x434   : > { %2996 = vst.msk [vmem:[#allocation5 + $0x28] sm:$0xff] %vm2990_vm3, %v2905_v10  ;;  %2997 = vst.msk [vmem:[#allocation5 + $0x30] sm:$0xff] %vm2990_vm3, %v2907_v12  ;;  %v14490_v10 = vld [vmem:[#allocation23_spill] sm:$0xff] }
 0x435   : > { %3149 = vrot.lane.b32.xlu1 %v3054_v15, %s9755_s15  ;;  %3280 = vrot.lane.b32.xlu0 %v14476_v33, %s9756_s20  ;;  %v14491_v33 = vld [vmem:[#allocation24_spill] sm:$0xff] }
 0x437   : > { %v2909_v25 = vpop.permute.xlu1 %2908  ;;  %v2911_v51 = vpop.permute.xlu0 %2910 }
 0x438   : > { %2998 = vst.msk [vmem:[#allocation5 + $0x38] sm:$0xff] %vm2990_vm3, %v2909_v25  ;;  %2999 = vst.msk [vmem:[#allocation5 + $0x40] sm:$0xff] %vm2990_vm3, %v2911_v51  ;;  %v14492_v25 = vld [vmem:[#allocation25_spill] sm:$0xff] }
 0x439   : > { %3282 = vrot.lane.b32.xlu1 %v14477_v40, %s9756_s20  ;;  %3284 = vrot.lane.b32.xlu0 %v14478_v1, %s9756_s20  ;;  %v14493_v1 = vld [vmem:[#allocation26_spill] sm:$0xff] }
 0x43b   : > { %v2913_v62 = vpop.permute.xlu1 %2912  ;;  %v2915_v11 = vpop.permute.xlu0 %2914 }
 0x43c   : > { %3000 = vst.msk [vmem:[#allocation5 + $0x48] sm:$0xff] %vm2990_vm3, %v2913_v62  ;;  %3001 = vst.msk [vmem:[#allocation5 + $0x50] sm:$0xff] %vm2990_vm3, %v2915_v11  ;;  %v14494_v62 = vld [vmem:[#allocation27_spill] sm:$0xff] }
 0x43d   : > { %3286 = vrot.lane.b32.xlu1 %v14479_v50, %s9756_s20  ;;  %3288 = vrot.lane.b32.xlu0 %v14480_v37, %s9756_s20  ;;  %v14495_v37 = vld [vmem:[#allocation28_spill] sm:$0xff] }
 0x43f   : > { %v2917_v43 = vpop.permute.xlu1 %2916  ;;  %v2919_v56 = vpop.permute.xlu0 %2918 }
 0x440   : > { %3002 = vst.msk [vmem:[#allocation5 + $0x58] sm:$0xff] %vm2990_vm3, %v2917_v43  ;;  %3003 = vst.msk [vmem:[#allocation5 + $0x60] sm:$0xff] %vm2990_vm3, %v2919_v56  ;;  %v14496_v43 = vld [vmem:[#allocation29_spill] sm:$0xff] }
 0x441   : > { %3290 = vrot.lane.b32.xlu1 %v14481_v63, %s9756_s20  ;;  %3292 = vrot.lane.b32.xlu0 %v14482_v35, %s9756_s20  ;;  %v14497_v35 = vld [vmem:[#allocation30_spill] sm:$0xff] }
 0x443   : > { %v2921_v36 = vpop.permute.xlu1 %2920  ;;  %v2923_v60 = vpop.permute.xlu0 %2922 }
 0x444   : > { %3004 = vst.msk [vmem:[#allocation5 + $0x68] sm:$0xff] %vm2990_vm3, %v2921_v36  ;;  %3005 = vst.msk [vmem:[#allocation5 + $0x70] sm:$0xff] %vm2990_vm3, %v2923_v60  ;;  %v14498_v36 = vld [vmem:[#allocation31_spill] sm:$0xff] }
 0x445   : > { %3294 = vrot.lane.b32.xlu1 %v14483_v3, %s9756_s20  ;;  %3296 = vrot.lane.b32.xlu0 %v14484_v41, %s9756_s20  ;;  %v14499_v41 = vld [vmem:[#allocation32_spill] sm:$0xff] }
 0x447   : > { %v2925_v24 = vpop.permute.xlu1 %2924  ;;  %v2927_v19 = vpop.permute.xlu0 %2926 }
 0x448   : > { %3006 = vst.msk [vmem:[#allocation5 + $0x78] sm:$0xff] %vm2990_vm3, %v2925_v24  ;;  %3007 = vst.msk [vmem:[#allocation5 + $0x80] sm:$0xff] %vm2990_vm3, %v2927_v19  ;;  %v14500_v24 = vld [vmem:[#allocation33_spill] sm:$0xff] }
 0x449   : > { %3298 = vrot.lane.b32.xlu1 %v14485_v22, %s9756_s20  ;;  %3300 = vrot.lane.b32.xlu0 %v14486_v58, %s9756_s20  ;;  %v14501_v58 = vld [vmem:[#allocation34_spill] sm:$0xff] }
 0x44b   : > { %v2929_v4 = vpop.permute.xlu1 %2928  ;;  %v2931_v34 = vpop.permute.xlu0 %2930 }
 0x44c   : > { %3008 = vst.msk [vmem:[#allocation5 + $0x88] sm:$0xff] %vm2990_vm3, %v2929_v4  ;;  %3009 = vst.msk [vmem:[#allocation5 + $0x90] sm:$0xff] %vm2990_vm3, %v2931_v34  ;;  %v14502_v4 = vld [vmem:[#allocation35_spill] sm:$0xff] }
 0x44d   : > { %3302 = vrot.lane.b32.xlu1 %v14487_v53, %s9756_s20  ;;  %3304 = vrot.lane.b32.xlu0 %v14488_v29, %s9756_s20 }
 0x44f   : > { %v2933_v42 = vpop.permute.xlu1 %2932  ;;  %v2935_v52 = vpop.permute.xlu0 %2934 }
 0x450   : > { %3010 = vst.msk [vmem:[#allocation5 + $0x98] sm:$0xff] %vm2990_vm3, %v2933_v42  ;;  %3011 = vst.msk [vmem:[#allocation5 + $0xa0] sm:$0xff] %vm2990_vm3, %v2935_v52  ;;  %v11760_v52 = vld [vmem:[#allocation3 + $0x182] sm:$0xff] }
 0x451   : > { %3306 = vrot.lane.b32.xlu1 %v14489_v59, %s9756_s20  ;;  %3308 = vrot.lane.b32.xlu0 %v14490_v10, %s9756_s20 }
 0x453   : > { %v2937_v12 = vpop.permute.xlu1 %2936  ;;  %v2939_v15 = vpop.permute.xlu0 %2938 }
 0x454   : > { %3012 = vst.msk [vmem:[#allocation5 + $0xa8] sm:$0xff] %vm2990_vm3, %v2937_v12  ;;  %3013 = vst.msk [vmem:[#allocation5 + $0xb0] sm:$0xff] %vm2990_vm3, %v2939_v15 }
 0x455   : > { %3310 = vrot.lane.b32.xlu1 %v14491_v33, %s9756_s20  ;;  %3312 = vrot.lane.b32.xlu0 %v14492_v25, %s9756_s20 }
 0x457   : > { %v2941_v51 = vpop.permute.xlu1 %2940  ;;  %v2943_v40 = vpop.permute.xlu0 %2942 }
 0x458   : > { %3014 = vst.msk [vmem:[#allocation5 + $0xb8] sm:$0xff] %vm2990_vm3, %v2941_v51  ;;  %3015 = vst.msk [vmem:[#allocation5 + $0xc0] sm:$0xff] %vm2990_vm3, %v2943_v40 }
 0x459   : > { %3314 = vrot.lane.b32.xlu1 %v14493_v1, %s9756_s20  ;;  %3316 = vrot.lane.b32.xlu0 %v14494_v62, %s9756_s20  ;;  %v3605_v1 = vld [vmem:[#allocation3 + $0x49] sm:$0xff] }
 0x45a   : > { %v4331_v62 = vld [vmem:[%s14317_s5] sm:$0x3] }
 0x45b   : > { %v2945_v11 = vpop.permute.xlu1 %2944  ;;  %v2947_v50 = vpop.permute.xlu0 %2946  ;;  %9693 = vmatprep.subr.msk.bf16.mxu0 %vm2141_vm9, %v4331_v62 }
 0x45c   : > { %3016 = vst.msk [vmem:[#allocation5 + $0xc8] sm:$0xff] %vm2990_vm3, %v2945_v11  ;;  %3017 = vst.msk [vmem:[#allocation5 + $0xd0] sm:$0xff] %vm2990_vm3, %v2947_v50  ;;  %v4386_v11 = vsel %vm2141_vm9, %v4331_v62, 0  ;;  %v3802_v62 = vld [vmem:[#allocation3 + $0x7a] sm:$0xff]  ;;  %vm4069_vm9 = vcmask 588800  }
 0x45d   : > { %3318 = vrot.lane.b32.xlu1 %v14495_v37, %s9756_s20  ;;  %3320 = vrot.lane.b32.xlu0 %v14496_v43, %s9756_s20  ;;  %v3606_v43 = vld [vmem:[#allocation3 + $0x51] sm:$0xff] }
 0x45e   : > { %9540 = vmatpush3.bf16.msra.mxu0 %v4386_v11  ;;  %v3803_v11 = vld [vmem:[#allocation3 + $0x82] sm:$0xff] }
 0x45f   : > { %v2949_v56 = vpop.permute.xlu1 %2948  ;;  %v2951_v63 = vpop.permute.xlu0 %2950 }
 0x460   : > { %3018 = vst.msk [vmem:[#allocation5 + $0xd8] sm:$0xff] %vm2990_vm3, %v2949_v56  ;;  %3019 = vst.msk [vmem:[#allocation5 + $0xe0] sm:$0xff] %vm2990_vm3, %v2951_v63  ;;  %v3607_v56 = vld [vmem:[#allocation3 + $0x61] sm:$0xff] }
 0x461   : > { %3322 = vrot.lane.b32.xlu1 %v14497_v35, %s9756_s20  ;;  %3324 = vrot.lane.b32.xlu0 %v14498_v36, %s9756_s20  ;;  %v3608_v36 = vld [vmem:[#allocation3 + $0x69] sm:$0xff] }
 0x463   : > { %v2953_v60 = vpop.permute.xlu1 %2952  ;;  %v2955_v3 = vpop.permute.xlu0 %2954 }
 0x464   : > { %3020 = vst.msk [vmem:[#allocation5 + $0xe8] sm:$0xff] %vm2990_vm3, %v2953_v60  ;;  %3021 = vst.msk [vmem:[#allocation5 + $0xf0] sm:$0xff] %vm2990_vm3, %v2955_v3  ;;  %v3609_v60 = vld [vmem:[#allocation3 + $0x79] sm:$0xff] }
 0x465   : > { %3326 = vrot.lane.b32.xlu1 %v14499_v41, %s9756_s20  ;;  %3328 = vrot.lane.b32.xlu0 %v14500_v24, %s9756_s20  ;;  %v3610_v24 = vld [vmem:[#allocation3 + $0x81] sm:$0xff] }
 0x467   : > { %v2957_v19 = vpop.permute.xlu1 %2956  ;;  %v3088_v22 = vpop.permute.xlu0 %3087 }
 0x468   : > { %3022 = vst.msk [vmem:[#allocation5 + $0xf8] sm:$0xff] %vm2990_vm3, %v2957_v19  ;;  %v3611_v19 = vld [vmem:[#allocation3 + $0x91] sm:$0xff] }
 0x469   : > { %3184 = vst.msk [vmem:[#allocation5] sm:$0xff] %vm3183_vm4, %v3088_v22  ;;  %3330 = vrot.lane.b32.xlu1 %v14501_v58, %s9756_s20  ;;  %3332 = vrot.lane.b32.xlu0 %v14502_v4, %s9756_s20  ;;  %v9720_v22 = vld [vmem:[%s14314_s2 + $0x20] ss:$0 sps:$4 sm:$0xff]  }
 0x46a   : > { %9692 = vmatprep.subr.msk.bf16.mxu1 %vm4118_vm6, %v9720_v22  ;;  %v4120_v58 = vsel %vm4118_vm6, %v9720_v22, 0  ;;  %v3806_v22 = vld [vmem:[#allocation3 + $0xaa] sm:$0xff] }
 0x46b   : > { %v3090_v34 = vpop.permute.xlu1 %3089  ;;  %v3092_v53 = vpop.permute.xlu0 %3091  ;;  %9498 = vmatpush3.bf16.msra.mxu1 %v4120_v58  ;;  %v3807_v58 = vld [vmem:[#allocation3 + $0xb2] sm:$0xff] }
 0x46c   : > { %3185 = vst.msk [vmem:[#allocation5 + $0x8] sm:$0xff] %vm3183_vm4, %v3090_v34  ;;  %3186 = vst.msk [vmem:[#allocation5 + $0x10] sm:$0xff] %vm3183_vm4, %v3092_v53  ;;  %v3612_v53 = vld [vmem:[#allocation3 + $0x99] sm:$0xff] }
 0x46d   : > { %3334 = vrot.lane.b32.xlu1 %v11464_v23, %s9756_s20  ;;  %3336 = vrot.lane.b32.xlu0 %v11466_v46, %s9756_s20  ;;  %v11768_v46 = vld [vmem:[#allocation3 + $0x18a] sm:$0xff] }
 0x46f   : > { %v3094_v29 = vpop.permute.xlu1 %3093  ;;  %v3096_v42 = vpop.permute.xlu0 %3095 }
 0x470   : > { %3187 = vst.msk [vmem:[#allocation5 + $0x18] sm:$0xff] %vm3183_vm4, %v3094_v29  ;;  %3188 = vst.msk [vmem:[#allocation5 + $0x20] sm:$0xff] %vm3183_vm4, %v3096_v42  ;;  %v3613_v29 = vld [vmem:[#allocation3 + $0xa9] sm:$0xff] }
 0x471   : > { %3338 = vrot.lane.b32.xlu1 %v11474_v6, %s9756_s20  ;;  %3340 = vrot.lane.b32.xlu0 %v11760_v52, %s9756_s20  ;;  %v9721_v42 = vld [vmem:[%s14314_s2 + $0x18] sm:$0xff]  }
 0x472   : > { %9499 = vmatprep.subr.bf16.mxu1 %v9721_v42 }
 0x473   : > { %v3098_v59 = vpop.permute.xlu1 %3097  ;;  %v3100_v10 = vpop.permute.xlu0 %3099  ;;  %9500 = vmatpush3.bf16.msra.mxu1 %v9721_v42  ;;  %v4295_v42 = vld [vmem:[%s9905_s27 + $0x60] sm:$0xff] }
 0x474   : > { %3189 = vst.msk [vmem:[#allocation5 + $0x28] sm:$0xff] %vm3183_vm4, %v3098_v59  ;;  %3190 = vst.msk [vmem:[#allocation5 + $0x30] sm:$0xff] %vm3183_vm4, %v3100_v10 }
 0x475   : > { %3342 = vrot.lane.b32.xlu1 %v11768_v46, %s9756_s20  ;;  %3474 = vrot.lane.b32.xlu0 %v11057_v27, %s9757_s23 }
 0x477   : > { %v3102_v23 = vpop.permute.xlu1 %3101  ;;  %v3104_v6 = vpop.permute.xlu0 %3103 }
 0x478   : > { %3191 = vst.msk [vmem:[#allocation5 + $0x38] sm:$0xff] %vm3183_vm4, %v3102_v23  ;;  %3192 = vst.msk [vmem:[#allocation5 + $0x40] sm:$0xff] %vm3183_vm4, %v3104_v6  ;;  %v3614_v23 = vld [vmem:[#allocation3 + $0xb1] sm:$0xff]  ;;  %v3615_v6 = vld [vmem:[#allocation3 + $0xc1] sm:$0xff] }
 0x479   : > { %3476 = vrot.lane.b32.xlu1 %v11075_v49, %s9757_s23  ;;  %3478 = vrot.lane.b32.xlu0 %v11103_v54, %s9757_s23 }
 0x47b   : > { %v3106_v12 = vpop.permute.xlu1 %3105  ;;  %v3108_v15 = vpop.permute.xlu0 %3107 }
 0x47c   : > { %3193 = vst.msk [vmem:[#allocation5 + $0x48] sm:$0xff] %vm3183_vm4, %v3106_v12  ;;  %3194 = vst.msk [vmem:[#allocation5 + $0x50] sm:$0xff] %vm3183_vm4, %v3108_v15  ;;  %v9722_v12 = vld [vmem:[%s14314_s2 + $0x10] sm:$0xff]  }
 0x47d   : > { %3480 = vrot.lane.b32.xlu1 %v11129_v5, %s9757_s23  ;;  %3482 = vrot.lane.b32.xlu0 %v11093_v32, %s9757_s23 }
 0x47e   : > { %9501 = vmatprep.subr.bf16.mxu1 %v9722_v12 }
 0x47f   : > { %v3110_v27 = vpop.permute.xlu1 %3109  ;;  %v3112_v33 = vpop.permute.xlu0 %3111  ;;  %9502 = vmatpush3.bf16.msra.mxu1 %v9722_v12 }
 0x480   : > { %3195 = vst.msk [vmem:[#allocation5 + $0x58] sm:$0xff] %vm3183_vm4, %v3110_v27  ;;  %3196 = vst.msk [vmem:[#allocation5 + $0x60] sm:$0xff] %vm3183_vm4, %v3112_v33  ;;  %v3616_v33 = vld [vmem:[#allocation3 + $0xc9] sm:$0xff] }
 0x481   : > { %3484 = vrot.lane.b32.xlu1 %v11115_v61, %s9757_s23  ;;  %3486 = vrot.lane.b32.xlu0 %v11143_v17, %s9757_s23 }
 0x483   : > { %v3114_v49 = vpop.permute.xlu1 %3113  ;;  %v3116_v54 = vpop.permute.xlu0 %3115 }
 0x484   : > { %3197 = vst.msk [vmem:[#allocation5 + $0x68] sm:$0xff] %vm3183_vm4, %v3114_v49  ;;  %3198 = vst.msk [vmem:[#allocation5 + $0x70] sm:$0xff] %vm3183_vm4, %v3116_v54  ;;  %v3617_v49 = vld [vmem:[#allocation3 + $0xd9] sm:$0xff] }
 0x485   : > { %3488 = vrot.lane.b32.xlu1 %v11169_v44, %s9757_s23  ;;  %3490 = vrot.lane.b32.xlu0 %v11133_v8, %s9757_s23  ;;  %v9723_v54 = vld [vmem:[%s14314_s2 + $0x8] sm:$0xff]  }
 0x486   : > { %9503 = vmatprep.subr.bf16.mxu1 %v9723_v54 }
 0x487   : > { %v3118_v32 = vpop.permute.xlu1 %3117  ;;  %v3120_v5 = vpop.permute.xlu0 %3119  ;;  %9504 = vmatpush3.bf16.msra.mxu1 %v9723_v54 }
 0x488   : > { %3199 = vst.msk [vmem:[#allocation5 + $0x78] sm:$0xff] %vm3183_vm4, %v3118_v32  ;;  %3200 = vst.msk [vmem:[#allocation5 + $0x80] sm:$0xff] %vm3183_vm4, %v3120_v5 }
 0x489   : > { %3492 = vrot.lane.b32.xlu1 %v11155_v21, %s9757_s23  ;;  %3494 = vrot.lane.b32.xlu0 %v11183_v7, %s9757_s23 }
 0x48b   : > { %v3122_v61 = vpop.permute.xlu1 %3121  ;;  %v3124_v17 = vpop.permute.xlu0 %3123 }
 0x48c   : > { %3201 = vst.msk [vmem:[#allocation5 + $0x88] sm:$0xff] %vm3183_vm4, %v3122_v61  ;;  %3202 = vst.msk [vmem:[#allocation5 + $0x90] sm:$0xff] %vm3183_vm4, %v3124_v17  ;;  %v3618_v61 = vld [vmem:[#allocation3 + $0xe1] sm:$0xff]  ;;  %v3619_v17 = vld [vmem:[#allocation3 + $0xf1] sm:$0xff] }
 0x48d   : > { %3496 = vrot.lane.b32.xlu1 %v11209_v38, %s9757_s23  ;;  %3498 = vrot.lane.b32.xlu0 %v11173_v26, %s9757_s23 }
 0x48f   : > { %v3126_v8 = vpop.permute.xlu1 %3125  ;;  %v3128_v44 = vpop.permute.xlu0 %3127 }
 0x490   : > { %3203 = vst.msk [vmem:[#allocation5 + $0x98] sm:$0xff] %vm3183_vm4, %v3126_v8  ;;  %3204 = vst.msk [vmem:[#allocation5 + $0xa0] sm:$0xff] %vm3183_vm4, %v3128_v44  ;;  %v9724_v8 = vld [vmem:[%s14314_s2] sm:$0xff]  }
 0x491   : > { %3500 = vrot.lane.b32.xlu1 %v11195_v48, %s9757_s23  ;;  %3502 = vrot.lane.b32.xlu0 %v11223_v2, %s9757_s23 }
 0x492   : > { %9505 = vmatprep.subr.bf16.mxu1 %v9724_v8 }
 0x493   : > { %v3130_v21 = vpop.permute.xlu1 %3129  ;;  %v3132_v7 = vpop.permute.xlu0 %3131  ;;  %9506 = vmatpush3.bf16.msra.mxu1 %v9724_v8 }
 0x494   : > { %3205 = vst.msk [vmem:[#allocation5 + $0xa8] sm:$0xff] %vm3183_vm4, %v3130_v21  ;;  %3206 = vst.msk [vmem:[#allocation5 + $0xb0] sm:$0xff] %vm3183_vm4, %v3132_v7  ;;  %v3796_v7 = vld [vmem:[#allocation3 + $0x32] sm:$0xff] }
 0x495   : > { %3504 = vrot.lane.b32.xlu1 %v11249_v28, %s9757_s23  ;;  %3506 = vrot.lane.b32.xlu0 %v11213_v57, %s9757_s23 }
 0x497   : > { %v3134_v26 = vpop.permute.xlu1 %3133  ;;  %v3136_v38 = vpop.permute.xlu0 %3135 }
 0x498   : > { %3207 = vst.msk [vmem:[#allocation5 + $0xb8] sm:$0xff] %vm3183_vm4, %v3134_v26  ;;  %3208 = vst.msk [vmem:[#allocation5 + $0xc0] sm:$0xff] %vm3183_vm4, %v3136_v38  ;;  %v3797_v26 = vld [vmem:[#allocation3 + $0x3a] sm:$0xff]  ;;  %v4283_v38 = vld [vmem:[%s9905_s27] sm:$0xff] }
 0x499   : > { %3508 = vrot.lane.b32.xlu1 %v11235_v20, %s9757_s23  ;;  %3510 = vrot.lane.b32.xlu0 %v11263_v0, %s9757_s23 }
 0x49b   : > { %v3138_v48 = vpop.permute.xlu1 %3137  ;;  %v3140_v2 = vpop.permute.xlu0 %3139 }
 0x49c   : > { %3209 = vst.msk [vmem:[#allocation5 + $0xc8] sm:$0xff] %vm3183_vm4, %v3138_v48  ;;  %3210 = vst.msk [vmem:[#allocation5 + $0xd0] sm:$0xff] %vm3183_vm4, %v3140_v2  ;;  %v4284_v48 = vld [vmem:[%s9905_s27 + $0x8] sm:$0xff] }
 0x49d   : > { %3512 = vrot.lane.b32.xlu1 %v11289_v9, %s9757_s23  ;;  %3514 = vrot.lane.b32.xlu0 %v11253_v31, %s9757_s23  ;;  %v4315_v2 = vpack.c.bf16 %v4284_v48, %v4283_v38  ;;  %v3813_v38 = vld [vmem:[#allocation3 + $0xfa] sm:$0xff]  ;;  %v3814_v48 = vld [vmem:[#allocation3 + $0x10a] sm:$0xff] }
 0x49f   : > { %v3142_v57 = vpop.permute.xlu1 %3141  ;;  %v3144_v28 = vpop.permute.xlu0 %3143  ;;  %9541 = vmatprep.mubr.msk.bf16.mxu0 %vm253_vm0, %v4315_v2  ;;  %v4299_v2 = vld [vmem:[%s9905_s27 + $0x80] sm:$0xff] }
 0x4a0   : > { %3211 = vst.msk [vmem:[#allocation5 + $0xd8] sm:$0xff] %vm3183_vm4, %v3142_v57  ;;  %3212 = vst.msk [vmem:[#allocation5 + $0xe0] sm:$0xff] %vm3183_vm4, %v3144_v28  ;;  %v4285_v57 = vld [vmem:[%s9905_s27 + $0x10] sm:$0xff]  ;;  %v4286_v28 = vld [vmem:[%s9905_s27 + $0x18] sm:$0xff] }
 0x4a1   : > { %3516 = vrot.lane.b32.xlu1 %v11275_v55, %s9757_s23  ;;  %3518 = vrot.lane.b32.xlu0 %v11303_v16, %s9757_s23 }
 0x4a3   : > { %v3146_v20 = vpop.permute.xlu1 %3145  ;;  %v3148_v0 = vpop.permute.xlu0 %3147 }
 0x4a4   : > { %3213 = vst.msk [vmem:[#allocation5 + $0xe8] sm:$0xff] %vm3183_vm4, %v3146_v20  ;;  %3214 = vst.msk [vmem:[#allocation5 + $0xf0] sm:$0xff] %vm3183_vm4, %v3148_v0 }
 0x4a5   : > { %3520 = vrot.lane.b32.xlu1 %v11327_v13, %s9757_s23  ;;  %3522 = vrot.lane.b32.xlu0 %v11293_v18, %s9757_s23  ;;  %v3440_v18 = vld [vmem:[#allocation3 + $0x198] sm:$0xff] }
 0x4a7   : > { %v3150_v31 = vpop.permute.xlu1 %3149  ;;  %v3281_v9 = vpop.permute.xlu0 %3280 }
 0x4a8   : > { %3215 = vst.msk [vmem:[#allocation5 + $0xf8] sm:$0xff] %vm3183_vm4, %v3150_v31  ;;  %v4316_v31 = vpack.c.bf16 %v4286_v28, %v4285_v57  ;;  %v4300_v57 = vld [vmem:[%s9905_s27 + $0x88] sm:$0xff] }
 0x4a9   : > { %3377 = vst.msk [vmem:[#allocation5] sm:$0xff] %vm3376_vm5, %v3281_v9  ;;  %3524 = vrot.lane.b32.xlu1 %v11314_v39, %s9757_s23  ;;  %3526 = vrot.lane.b32.xlu0 %v11335_v14, %s9757_s23  ;;  %v3441_v39 = vld [vmem:[#allocation3 + $0x1a0] sm:$0xff]  ;;  %v3798_v9 = vld [vmem:[#allocation3 + $0x4a] sm:$0xff]  ;;  %v4323_v28 = vpack.c.bf16 %v4300_v57, %v4299_v2 }
 0x4aa   : > { %9542 = vmatmul.mubr.msk.bf16.vlgmr.msra.gmra.mxu0 %vm253_vm0, %v4316_v31  ;;  %v4314_v2 = vld [vmem:[%s9905_s27 + $0xf8] sm:$0xff] }
 0x4ab   : > { %v3283_v55 = vpop.permute.xlu1 %3282  ;;  %v3285_v16 = vpop.permute.xlu0 %3284  ;;  %v3634_v57 = vld [vmem:[#allocation3 + $0x1a1] sm:$0xff] }
 0x4ac   : > { %3378 = vst.msk [vmem:[#allocation5 + $0x8] sm:$0xff] %vm3376_vm5, %v3283_v55  ;;  %3379 = vst.msk [vmem:[#allocation5 + $0x10] sm:$0xff] %vm3376_vm5, %v3285_v16  ;;  %v3799_v55 = vld [vmem:[#allocation3 + $0x52] sm:$0xff] }
 0x4ad   : > { %3528 = vrot.lane.b32.xlu1 %v11348_v47, %s9757_s23  ;;  %3530 = vrot.lane.b32.xlu0 %v11566_v30, %s9757_s23  ;;  %v3603_v47 = vld [vmem:[#allocation3 + $0x31] sm:$0xff] }
 0x4af   : > { %v3287_v13 = vpop.permute.xlu1 %3286  ;;  %v3289_v25 = vpop.permute.xlu0 %3288 }
 0x4b0   : > { %3380 = vst.msk [vmem:[#allocation5 + $0x18] sm:$0xff] %vm3376_vm5, %v3287_v13  ;;  %3381 = vst.msk [vmem:[#allocation5 + $0x20] sm:$0xff] %vm3376_vm5, %v3289_v25  ;;  %v3800_v13 = vld [vmem:[#allocation3 + $0x62] sm:$0xff]  ;;  %v3801_v25 = vld [vmem:[#allocation3 + $0x6a] sm:$0xff] }
 0x4b1   : > { %3532 = vrot.lane.b32.xlu1 %v11574_v45, %s9757_s23  ;;  %3534 = vrot.lane.b32.xlu0 %v3440_v18, %s9757_s23  ;;  %v3604_v45 = vld [vmem:[#allocation3 + $0x39] sm:$0xff] }
 0x4b3   : > { %v3291_v14 = vpop.permute.xlu1 %3290  ;;  %v3293_v51 = vpop.permute.xlu0 %3292 }
 0x4b4   : > { %3382 = vst.msk [vmem:[#allocation5 + $0x28] sm:$0xff] %vm3376_vm5, %v3291_v14  ;;  %3383 = vst.msk [vmem:[#allocation5 + $0x30] sm:$0xff] %vm3376_vm5, %v3293_v51  ;;  %v4288_v14 = vld [vmem:[%s9905_s27 + $0x28] sm:$0xff] }
 0x4b5   : > { %3536 = vrot.lane.b32.xlu1 %v3441_v39, %s9757_s23  ;;  %3667 = vrot.lane.b32.xlu0 %v3603_v47, %s9758_s25  ;;  %v4287_v39 = vld [vmem:[%s9905_s27 + $0x20] sm:$0xff]  ;;  %v4289_v47 = vld [vmem:[%s9905_s27 + $0x30] sm:$0xff] }
 0x4b6   : > { %v4317_v51 = vpack.c.bf16 %v4288_v14, %v4287_v39  ;;  %v3624_v39 = vld [vmem:[#allocation3 + $0x129] sm:$0xff]  ;;  %v3625_v14 = vld [vmem:[#allocation3 + $0x139] sm:$0xff] }
 0x4b7   : > { %v3295_v30 = vpop.permute.xlu1 %3294  ;;  %v3297_v40 = vpop.permute.xlu0 %3296 }
 0x4b8   : > { %3384 = vst.msk [vmem:[#allocation5 + $0x38] sm:$0xff] %vm3376_vm5, %v3295_v30  ;;  %3385 = vst.msk [vmem:[#allocation5 + $0x40] sm:$0xff] %vm3376_vm5, %v3297_v40  ;;  %v4290_v30 = vld [vmem:[%s9905_s27 + $0x38] sm:$0xff]  ;;  %9545 = vmatprep.mubr.msk.bf16.mxu0 %vm253_vm0, %v4317_v51 }
 0x4b9   : > { %3669 = vrot.lane.b32.xlu1 %v3604_v45, %s9758_s25  ;;  %3671 = vrot.lane.b32.xlu0 %v3605_v1, %s9758_s25  ;;  %v4318_v1 = vpack.c.bf16 %v4290_v30, %v4289_v47  ;;  %v3626_v30 = vld [vmem:[#allocation3 + $0x141] sm:$0xff] }
 0x4bb   : > { %v3299_v50 = vpop.permute.xlu1 %3298  ;;  %v3301_v37 = vpop.permute.xlu0 %3300  ;;  %9546 = vmatmul.mubr.msk.bf16.gmra.mxu0 %vm253_vm0, %v4318_v1 }
 0x4bc   : > { %3386 = vst.msk [vmem:[#allocation5 + $0x48] sm:$0xff] %vm3376_vm5, %v3299_v50  ;;  %3387 = vst.msk [vmem:[#allocation5 + $0x50] sm:$0xff] %vm3376_vm5, %v3301_v37 }
 0x4bd   : > { %3673 = vrot.lane.b32.xlu1 %v3606_v43, %s9758_s25  ;;  %3675 = vrot.lane.b32.xlu0 %v3607_v56, %s9758_s25  ;;  %v3804_v43 = vld [vmem:[#allocation3 + $0x92] sm:$0xff]  ;;  %v3805_v56 = vld [vmem:[#allocation3 + $0x9a] sm:$0xff] }
 0x4bf   : > { %v3303_v63 = vpop.permute.xlu1 %3302  ;;  %v3305_v35 = vpop.permute.xlu0 %3304 }
 0x4c0   : > { %3388 = vst.msk [vmem:[#allocation5 + $0x58] sm:$0xff] %vm3376_vm5, %v3303_v63  ;;  %3389 = vst.msk [vmem:[#allocation5 + $0x60] sm:$0xff] %vm3376_vm5, %v3305_v35  ;;  %v4291_v63 = vld [vmem:[%s9905_s27 + $0x40] sm:$0xff]  ;;  %v4292_v35 = vld [vmem:[%s9905_s27 + $0x48] sm:$0xff] }
 0x4c1   : > { %3677 = vrot.lane.b32.xlu1 %v3608_v36, %s9758_s25  ;;  %3679 = vrot.lane.b32.xlu0 %v3609_v60, %s9758_s25  ;;  %v4319_v36 = vpack.c.bf16 %v4292_v35, %v4291_v63  ;;  %v4293_v60 = vld [vmem:[%s9905_s27 + $0x50] sm:$0xff]  ;;  %v4306_v63 = vld [vmem:[%s9905_s27 + $0xb8] sm:$0xff] }
 0x4c3   : > { %v3307_v3 = vpop.permute.xlu1 %3306  ;;  %v3309_v41 = vpop.permute.xlu0 %3308  ;;  %9549 = vmatprep.mubr.msk.bf16.mxu0 %vm253_vm0, %v4319_v36 }
 0x4c4   : > { %3390 = vst.msk [vmem:[#allocation5 + $0x68] sm:$0xff] %vm3376_vm5, %v3307_v3  ;;  %3391 = vst.msk [vmem:[#allocation5 + $0x70] sm:$0xff] %vm3376_vm5, %v3309_v41  ;;  %v4294_v3 = vld [vmem:[%s9905_s27 + $0x58] sm:$0xff] }
 0x4c5   : > { %3681 = vrot.lane.b32.xlu1 %v3610_v24, %s9758_s25  ;;  %3683 = vrot.lane.b32.xlu0 %v3611_v19, %s9758_s25  ;;  %v4320_v19 = vpack.c.bf16 %v4294_v3, %v4293_v60  ;;  %v3819_v3 = vld [vmem:[#allocation3 + $0x142] sm:$0xff] }
 0x4c7   : > { %v3311_v4 = vpop.permute.xlu1 %3310  ;;  %v3313_v34 = vpop.permute.xlu0 %3312  ;;  %9550 = vmatmul.mubr.msk.bf16.gmra.mxu0 %vm253_vm0, %v4320_v19 }
 0x4c8   : > { %3392 = vst.msk [vmem:[#allocation5 + $0x78] sm:$0xff] %vm3376_vm5, %v3311_v4  ;;  %3393 = vst.msk [vmem:[#allocation5 + $0x80] sm:$0xff] %vm3376_vm5, %v3313_v34 }
 0x4c9   : > { %3685 = vrot.lane.b32.xlu1 %v3612_v53, %s9758_s25  ;;  %3687 = vrot.lane.b32.xlu0 %v3613_v29, %s9758_s25  ;;  %v3808_v53 = vld [vmem:[#allocation3 + $0xc2] sm:$0xff]  ;;  %v3809_v29 = vld [vmem:[#allocation3 + $0xca] sm:$0xff] }
 0x4cb   : > { %v3315_v59 = vpop.permute.xlu1 %3314  ;;  %v3317_v10 = vpop.permute.xlu0 %3316 }
 0x4cc   : > { %3394 = vst.msk [vmem:[#allocation5 + $0x88] sm:$0xff] %vm3376_vm5, %v3315_v59  ;;  %3395 = vst.msk [vmem:[#allocation5 + $0x90] sm:$0xff] %vm3376_vm5, %v3317_v10  ;;  %v4296_v59 = vld [vmem:[%s9905_s27 + $0x68] sm:$0xff] }
 0x4cd   : > { %3689 = vrot.lane.b32.xlu1 %v3614_v23, %s9758_s25  ;;  %3691 = vrot.lane.b32.xlu0 %v3615_v6, %s9758_s25  ;;  %v4321_v10 = vpack.c.bf16 %v4296_v59, %v4295_v42  ;;  %v4297_v23 = vld [vmem:[%s9905_s27 + $0x70] sm:$0xff]  ;;  %v4298_v6 = vld [vmem:[%s9905_s27 + $0x78] sm:$0xff] }
 0x4cf   : > { %v3319_v15 = vpop.permute.xlu1 %3318  ;;  %v3321_v27 = vpop.permute.xlu0 %3320  ;;  %9553 = vmatprep.mubr.msk.bf16.mxu0 %vm253_vm0, %v4321_v10  ;;  %v3821_v10 = vld [vmem:[#allocation3 + $0x15a] sm:$0xff] }
 0x4d0   : > { %3396 = vst.msk [vmem:[#allocation5 + $0x98] sm:$0xff] %vm3376_vm5, %v3319_v15  ;;  %3397 = vst.msk [vmem:[#allocation5 + $0xa0] sm:$0xff] %vm3376_vm5, %v3321_v27  ;;  %v4322_v27 = vpack.c.bf16 %v4298_v6, %v4297_v23  ;;  %v3822_v23 = vld [vmem:[#allocation3 + $0x16a] sm:$0xff] }
 0x4d1   : > { %3693 = vrot.lane.b32.xlu1 %v3616_v33, %s9758_s25  ;;  %3695 = vrot.lane.b32.xlu0 %v3617_v49, %s9758_s25  ;;  %v3810_v33 = vld [vmem:[#allocation3 + $0xda] sm:$0xff]  ;;  %v3811_v49 = vld [vmem:[#allocation3 + $0xe2] sm:$0xff]  ;;  %v4307_v6 = vld [vmem:[%s9905_s27 + $0xc0] sm:$0xff] }
 0x4d2   : > { %9554 = vmatmul.mubr.msk.bf16.gmra.mxu0 %vm253_vm0, %v4322_v27  ;;  %v4309_v27 = vld [vmem:[%s9905_s27 + $0xd0] sm:$0xff] }
 0x4d3   : > { %v3323_v32 = vpop.permute.xlu1 %3322  ;;  %v3325_v5 = vpop.permute.xlu0 %3324  ;;  %9557 = vmatprep.mubr.msk.bf16.mxu0 %vm253_vm0, %v4323_v28 }
 0x4d4   : > { %3398 = vst.msk [vmem:[#allocation5 + $0xa8] sm:$0xff] %vm3376_vm5, %v3323_v32  ;;  %3399 = vst.msk [vmem:[#allocation5 + $0xb0] sm:$0xff] %vm3376_vm5, %v3325_v5  ;;  %v3620_v5 = vld [vmem:[#allocation3 + $0xf9] sm:$0xff] }
 0x4d5   : > { %3697 = vrot.lane.b32.xlu1 %v3618_v61, %s9758_s25  ;;  %3699 = vrot.lane.b32.xlu0 %v3619_v17, %s9758_s25  ;;  %v3621_v61 = vld [vmem:[#allocation3 + $0x109] sm:$0xff] }
 0x4d7   : > { %v3327_v44 = vpop.permute.xlu1 %3326  ;;  %v3329_v21 = vpop.permute.xlu0 %3328 }
 0x4d8   : > { %3400 = vst.msk [vmem:[#allocation5 + $0xb8] sm:$0xff] %vm3376_vm5, %v3327_v44  ;;  %3401 = vst.msk [vmem:[#allocation5 + $0xc0] sm:$0xff] %vm3376_vm5, %v3329_v21  ;;  %v3622_v44 = vld [vmem:[#allocation3 + $0x111] sm:$0xff] }
 0x4d9   : > { %3860 = vrot.lane.b32.xlu1 %v3796_v7, %s9759_s19  ;;  %3862 = vrot.lane.b32.xlu0 %v3797_v26, %s9759_s19  ;;  %v3812_v21 = vld [vmem:[#allocation3 + $0xf2] sm:$0xff] }
 0x4db   : > { %v3331_v20 = vpop.permute.xlu1 %3330  ;;  %v3333_v0 = vpop.permute.xlu0 %3332 }
 0x4dc   : > { %3402 = vst.msk [vmem:[#allocation5 + $0xc8] sm:$0xff] %vm3376_vm5, %v3331_v20  ;;  %3403 = vst.msk [vmem:[#allocation5 + $0xd0] sm:$0xff] %vm3376_vm5, %v3333_v0  ;;  %v4301_v20 = vld [vmem:[%s9905_s27 + $0x90] sm:$0xff]  ;;  %v4302_v0 = vld [vmem:[%s9905_s27 + $0x98] sm:$0xff] }
 0x4dd   : > { %3864 = vrot.lane.b32.xlu1 %v3798_v9, %s9759_s19  ;;  %3866 = vrot.lane.b32.xlu0 %v3799_v55, %s9759_s19  ;;  %v4324_v55 = vpack.c.bf16 %v4302_v0, %v4301_v20 }
 0x4df   : > { %v3335_v16 = vpop.permute.xlu1 %3334  ;;  %v3337_v18 = vpop.permute.xlu0 %3336  ;;  %9558 = vmatmul.mubr.msk.bf16.gmra.mxu0 %vm253_vm0, %v4324_v55 }
 0x4e0   : > { %3404 = vst.msk [vmem:[#allocation5 + $0xd8] sm:$0xff] %vm3376_vm5, %v3335_v16  ;;  %3405 = vst.msk [vmem:[#allocation5 + $0xe0] sm:$0xff] %vm3376_vm5, %v3337_v18  ;;  %v3815_v16 = vld [vmem:[#allocation3 + $0x112] sm:$0xff]  ;;  %v3623_v18 = vld [vmem:[#allocation3 + $0x121] sm:$0xff] }
 0x4e1   : > { %3868 = vrot.lane.b32.xlu1 %v3800_v13, %s9759_s19  ;;  %3870 = vrot.lane.b32.xlu0 %v3801_v25, %s9759_s19 }
 0x4e3   : > { %v3339_v40 = vpop.permute.xlu1 %3338  ;;  %v3341_v45 = vpop.permute.xlu0 %3340 }
 0x4e4   : > { %3406 = vst.msk [vmem:[#allocation5 + $0xe8] sm:$0xff] %vm3376_vm5, %v3339_v40  ;;  %3407 = vst.msk [vmem:[#allocation5 + $0xf0] sm:$0xff] %vm3376_vm5, %v3341_v45  ;;  %v3816_v40 = vld [vmem:[#allocation3 + $0x122] sm:$0xff] }
 0x4e5   : > { %3872 = vrot.lane.b32.xlu1 %v3802_v62, %s9759_s19  ;;  %3874 = vrot.lane.b32.xlu0 %v3803_v11, %s9759_s19  ;;  %v3817_v62 = vld [vmem:[#allocation3 + $0x12a] sm:$0xff]  ;;  %v3818_v11 = vld [vmem:[#allocation3 + $0x13a] sm:$0xff] }
 0x4e7   : > { %v3343_v50 = vpop.permute.xlu1 %3342  ;;  %v3475_v37 = vpop.permute.xlu0 %3474 }
 0x4e8   : > { %3408 = vst.msk [vmem:[#allocation5 + $0xf8] sm:$0xff] %vm3376_vm5, %v3343_v50  ;;  %v4303_v50 = vld [vmem:[%s9905_s27 + $0xa0] sm:$0xff] }
 0x4e9   : > { %3571 = vst.msk [vmem:[#allocation5] sm:$0xff] %vm3570_vm7, %v3475_v37  ;;  %3876 = vrot.lane.b32.xlu1 %v3804_v43, %s9759_s19  ;;  %3878 = vrot.lane.b32.xlu0 %v3805_v56, %s9759_s19  ;;  %v4304_v37 = vld [vmem:[%s9905_s27 + $0xa8] sm:$0xff]  ;;  %v4305_v56 = vld [vmem:[%s9905_s27 + $0xb0] sm:$0xff] }
 0x4ea   : > { %v4325_v43 = vpack.c.bf16 %v4304_v37, %v4303_v50  ;;  %v4326_v60 = vpack.c.bf16 %v4306_v63, %v4305_v56 }
 0x4eb   : > { %v3477_v41 = vpop.permute.xlu1 %3476  ;;  %v3479_v24 = vpop.permute.xlu0 %3478 }
 0x4ec   : > { %3572 = vst.msk [vmem:[#allocation5 + $0x8] sm:$0xff] %vm3570_vm7, %v3477_v41  ;;  %3573 = vst.msk [vmem:[#allocation5 + $0x10] sm:$0xff] %vm3570_vm7, %v3479_v24  ;;  %9561 = vmatprep.mubr.msk.bf16.mxu0 %vm253_vm0, %v4325_v43  ;;  %v3627_v41 = vld [vmem:[#allocation3 + $0x151] sm:$0xff] }
 0x4ed   : > { %3880 = vrot.lane.b32.xlu1 %v3806_v22, %s9759_s19  ;;  %3882 = vrot.lane.b32.xlu0 %v3807_v58, %s9759_s19  ;;  %v3628_v22 = vld [vmem:[#allocation3 + $0x159] sm:$0xff]  ;;  %v3629_v58 = vld [vmem:[#allocation3 + $0x169] sm:$0xff] }
 0x4ee   : > { %9562 = vmatmul.mubr.msk.bf16.gmra.mxu0 %vm253_vm0, %v4326_v60 }
 0x4ef   : > { %v3481_v4 = vpop.permute.xlu1 %3480  ;;  %v3483_v34 = vpop.permute.xlu0 %3482 }
 0x4f0   : > { %3574 = vst.msk [vmem:[#allocation5 + $0x18] sm:$0xff] %vm3570_vm7, %v3481_v4  ;;  %3575 = vst.msk [vmem:[#allocation5 + $0x20] sm:$0xff] %vm3570_vm7, %v3483_v34 }
 0x4f1   : > { %3884 = vrot.lane.b32.xlu1 %v3808_v53, %s9759_s19  ;;  %3886 = vrot.lane.b32.xlu0 %v3809_v29, %s9759_s19  ;;  %v3630_v53 = vld [vmem:[#allocation3 + $0x171] sm:$0xff] }
 0x4f2   : > { %v3820_v29 = vld [vmem:[#allocation3 + $0x152] sm:$0xff] }
 0x4f3   : > { %v3485_v12 = vpop.permute.xlu1 %3484  ;;  %v3487_v15 = vpop.permute.xlu0 %3486 }
 0x4f4   : > { %3576 = vst.msk [vmem:[#allocation5 + $0x28] sm:$0xff] %vm3570_vm7, %v3485_v12  ;;  %3577 = vst.msk [vmem:[#allocation5 + $0x30] sm:$0xff] %vm3570_vm7, %v3487_v15  ;;  %v4308_v12 = vld [vmem:[%s9905_s27 + $0xc8] sm:$0xff] }
 0x4f5   : > { %3888 = vrot.lane.b32.xlu1 %v3810_v33, %s9759_s19  ;;  %3890 = vrot.lane.b32.xlu0 %v3811_v49, %s9759_s19  ;;  %v4327_v15 = vpack.c.bf16 %v4308_v12, %v4307_v6  ;;  %v4310_v33 = vld [vmem:[%s9905_s27 + $0xd8] sm:$0xff] }
 0x4f7   : > { %v3489_v54 = vpop.permute.xlu1 %3488  ;;  %v3491_v32 = vpop.permute.xlu0 %3490  ;;  %9565 = vmatprep.mubr.msk.bf16.mxu0 %vm253_vm0, %v4327_v15 }
 0x4f8   : > { %3578 = vst.msk [vmem:[#allocation5 + $0x38] sm:$0xff] %vm3570_vm7, %v3489_v54  ;;  %3579 = vst.msk [vmem:[#allocation5 + $0x40] sm:$0xff] %vm3570_vm7, %v3491_v32  ;;  %v4328_v32 = vpack.c.bf16 %v4310_v33, %v4309_v27 }
 0x4f9   : > { %3701 = vrot.lane.b32.xlu1 %v3620_v5, %s9758_s25  ;;  %3703 = vrot.lane.b32.xlu0 %v3621_v61, %s9758_s25  ;;  %v3823_v5 = vld [vmem:[#allocation3 + $0x172] sm:$0xff]  ;;  %v9736_v61 = vld [vmem:[#allocation3 + $0x181] sm:$0xff] }
 0x4fa   : > { %9566 = vmatmul.mubr.msk.bf16.gmra.mxu0 %vm253_vm0, %v4328_v32 }
 0x4fb   : > { %v3493_v17 = vpop.permute.xlu1 %3492  ;;  %v3495_v8 = vpop.permute.xlu0 %3494 }
 0x4fc   : > { %3580 = vst.msk [vmem:[#allocation5 + $0x48] sm:$0xff] %vm3570_vm7, %v3493_v17  ;;  %3581 = vst.msk [vmem:[#allocation5 + $0x50] sm:$0xff] %vm3570_vm7, %v3495_v8  ;;  %v3633_v17 = vld [vmem:[#allocation3 + $0x199] sm:$0xff] }
 0x4fd   : > { %3705 = vrot.lane.b32.xlu1 %v3622_v44, %s9758_s25  ;;  %3892 = vrot.lane.b32.xlu0 %v3812_v21, %s9759_s19  ;;  %v4311_v21 = vld [vmem:[%s9905_s27 + $0xe0] sm:$0xff] }
 0x4ff   : > { %v3497_v7 = vpop.permute.xlu1 %3496  ;;  %v3499_v26 = vpop.permute.xlu0 %3498 }
 0x500   : > { %3582 = vst.msk [vmem:[#allocation5 + $0x58] sm:$0xff] %vm3570_vm7, %v3497_v7  ;;  %3583 = vst.msk [vmem:[#allocation5 + $0x60] sm:$0xff] %vm3570_vm7, %v3499_v26  ;;  %v4312_v7 = vld [vmem:[%s9905_s27 + $0xe8] sm:$0xff]  ;;  %v4313_v26 = vld [vmem:[%s9905_s27 + $0xf0] sm:$0xff] }
 0x501   : > { %3894 = vrot.lane.b32.xlu1 %v3813_v38, %s9759_s19  ;;  %3896 = vrot.lane.b32.xlu0 %v3814_v48, %s9759_s19  ;;  %v9737_v38 = vld [vmem:[#allocation3 + $0x189] sm:$0xff]  ;;  %v4329_v48 = vpack.c.bf16 %v4312_v7, %v4311_v21  ;;  %v4330_v28 = vpack.c.bf16 %v4314_v2, %v4313_v26 }
 0x503   : > { %v3501_v31 = vpop.permute.xlu1 %3500  ;;  %v3503_v9 = vpop.permute.xlu0 %3502  ;;  %9569 = vmatprep.mubr.msk.bf16.mxu0 %vm253_vm0, %v4329_v48 }
 0x504   : > { %3584 = vst.msk [vmem:[#allocation5 + $0x68] sm:$0xff] %vm3570_vm7, %v3501_v31  ;;  %3585 = vst.msk [vmem:[#allocation5 + $0x70] sm:$0xff] %vm3570_vm7, %v3503_v9  ;;  %v3826_v31 = vld [vmem:[#allocation3 + $0x19a] sm:$0xff]  ;;  %9570 = vmatmul.mubr.msk.bf16.gmra.mxu0 %vm253_vm0, %v4330_v28  ;;  %vm3956_vm0 = vcmask 589312  }
 0x505   : > { %3898 = vrot.lane.b32.xlu1 %v3815_v16, %s9759_s19  ;;  %3707 = vrot.lane.b32.xlu0 %v3623_v18, %s9758_s25  ;;  %v3827_v16 = vld [vmem:[#allocation3 + $0x1a2] sm:$0xff] }
 0x507   : > { %v3505_v13 = vpop.permute.xlu1 %3504  ;;  %v3507_v25 = vpop.permute.xlu0 %3506 }
 0x508   : > { %3586 = vst.msk [vmem:[#allocation5 + $0x78] sm:$0xff] %vm3570_vm7, %v3505_v13  ;;  %3587 = vst.msk [vmem:[#allocation5 + $0x80] sm:$0xff] %vm3570_vm7, %v3507_v25 }
 0x509   : > { %3709 = vrot.lane.b32.xlu1 %v3624_v39, %s9758_s25  ;;  %3711 = vrot.lane.b32.xlu0 %v3625_v14, %s9758_s25 }
 0x50b   : > { %v3509_v51 = vpop.permute.xlu1 %3508  ;;  %v3511_v47 = vpop.permute.xlu0 %3510 }
 0x50c   : > { %3588 = vst.msk [vmem:[#allocation5 + $0x88] sm:$0xff] %vm3570_vm7, %v3509_v51  ;;  %3589 = vst.msk [vmem:[#allocation5 + $0x90] sm:$0xff] %vm3570_vm7, %v3511_v47 }
 0x50d   : > { %3713 = vrot.lane.b32.xlu1 %v3626_v30, %s9758_s25  ;;  %3900 = vrot.lane.b32.xlu0 %v3816_v40, %s9759_s19 }
 0x50f   : > { %v3513_v45 = vpop.permute.xlu1 %3512  ;;  %v3515_v1 = vpop.permute.xlu0 %3514 }
 0x510   : > { %3590 = vst.msk [vmem:[#allocation5 + $0x98] sm:$0xff] %vm3570_vm7, %v3513_v45  ;;  %3591 = vst.msk [vmem:[#allocation5 + $0xa0] sm:$0xff] %vm3570_vm7, %v3515_v1 }
 0x511   : > { %3902 = vrot.lane.b32.xlu1 %v3817_v62, %s9759_s19  ;;  %3904 = vrot.lane.b32.xlu0 %v3818_v11, %s9759_s19 }
 0x513   : > { %v3517_v35 = vpop.permute.xlu1 %3516  ;;  %v3519_v36 = vpop.permute.xlu0 %3518 }
 0x514   : > { %3592 = vst.msk [vmem:[#allocation5 + $0xa8] sm:$0xff] %vm3570_vm7, %v3517_v35  ;;  %3593 = vst.msk [vmem:[#allocation5 + $0xb0] sm:$0xff] %vm3570_vm7, %v3519_v36 }
 0x515   : > { %3906 = vrot.lane.b32.xlu1 %v3819_v3, %s9759_s19  ;;  %3715 = vrot.lane.b32.xlu0 %v3627_v41, %s9758_s25 }
 0x517   : > { %v3521_v24 = vpop.permute.xlu1 %3520  ;;  %v3523_v19 = vpop.permute.xlu0 %3522 }
 0x518   : > { %3594 = vst.msk [vmem:[#allocation5 + $0xb8] sm:$0xff] %vm3570_vm7, %v3521_v24  ;;  %3595 = vst.msk [vmem:[#allocation5 + $0xc0] sm:$0xff] %vm3570_vm7, %v3523_v19 }
 0x519   : > { %3717 = vrot.lane.b32.xlu1 %v3628_v22, %s9758_s25  ;;  %3719 = vrot.lane.b32.xlu0 %v3629_v58, %s9758_s25 }
 0x51b   : > { %v3525_v4 = vpop.permute.xlu1 %3524  ;;  %v3527_v34 = vpop.permute.xlu0 %3526 }
 0x51c   : > { %3596 = vst.msk [vmem:[#allocation5 + $0xc8] sm:$0xff] %vm3570_vm7, %v3525_v4  ;;  %3597 = vst.msk [vmem:[#allocation5 + $0xd0] sm:$0xff] %vm3570_vm7, %v3527_v34 }
 0x51d   : > { %3721 = vrot.lane.b32.xlu1 %v3630_v53, %s9758_s25  ;;  %3908 = vrot.lane.b32.xlu0 %v3820_v29, %s9759_s19 }
 0x51f   : > { %v3529_v42 = vpop.permute.xlu1 %3528  ;;  %v3531_v59 = vpop.permute.xlu0 %3530 }
 0x520   : > { %3598 = vst.msk [vmem:[#allocation5 + $0xd8] sm:$0xff] %vm3570_vm7, %v3529_v42  ;;  %3599 = vst.msk [vmem:[#allocation5 + $0xe0] sm:$0xff] %vm3570_vm7, %v3531_v59 }
 0x521   : > { %3910 = vrot.lane.b32.xlu1 %v3821_v10, %s9759_s19  ;;  %3912 = vrot.lane.b32.xlu0 %v3822_v23, %s9759_s19 }
 0x523   : > { %v3533_v49 = vpop.permute.xlu1 %3532  ;;  %v3535_v54 = vpop.permute.xlu0 %3534 }
 0x524   : > { %3600 = vst.msk [vmem:[#allocation5 + $0xe8] sm:$0xff] %vm3570_vm7, %v3533_v49  ;;  %3601 = vst.msk [vmem:[#allocation5 + $0xf0] sm:$0xff] %vm3570_vm7, %v3535_v54 }
 0x525   : > { %3914 = vrot.lane.b32.xlu1 %v3823_v5, %s9759_s19  ;;  %3723 = vrot.lane.b32.xlu0 %v9736_v61, %s9758_s25 }
 0x527   : > { %v3537_v8 = vpop.permute.xlu1 %3536  ;;  %v3668_v44 = vpop.permute.xlu0 %3667 }
 0x528   : > { %3602 = vst.msk [vmem:[#allocation5 + $0xf8] sm:$0xff] %vm3570_vm7, %v3537_v8 }
 0x529   : > { %3764 = vst.msk [vmem:[#allocation5] sm:$0xff] %vm3763_vm8, %v3668_v44  ;;  %3725 = vrot.lane.b32.xlu1 %v9737_v38, %s9758_s25  ;;  %3727 = vrot.lane.b32.xlu0 %v3633_v17, %s9758_s25 }
 0x52b   : > { %v3670_v20 = vpop.permute.xlu1 %3669  ;;  %v3672_v0 = vpop.permute.xlu0 %3671 }
 0x52c   : > { %3765 = vst.msk [vmem:[#allocation5 + $0x8] sm:$0xff] %vm3763_vm8, %v3670_v20  ;;  %3766 = vst.msk [vmem:[#allocation5 + $0x10] sm:$0xff] %vm3763_vm8, %v3672_v0 }
 0x52d   : > { %3729 = vrot.lane.b32.xlu1 %v3634_v57, %s9758_s25  ;;  %3916 = vrot.lane.b32.xlu0 %v11760_v52, %s9759_s19 }
 0x52f   : > { %v3674_v9 = vpop.permute.xlu1 %3673  ;;  %v3676_v55 = vpop.permute.xlu0 %3675 }
 0x530   : > { %3767 = vst.msk [vmem:[#allocation5 + $0x18] sm:$0xff] %vm3763_vm8, %v3674_v9  ;;  %3768 = vst.msk [vmem:[#allocation5 + $0x20] sm:$0xff] %vm3763_vm8, %v3676_v55 }
 0x531   : > { %3918 = vrot.lane.b32.xlu1 %v11768_v46, %s9759_s19  ;;  %3920 = vrot.lane.b32.xlu0 %v3826_v31, %s9759_s19 }
 0x533   : > { %v3678_v18 = vpop.permute.xlu1 %3677  ;;  %v3680_v13 = vpop.permute.xlu0 %3679 }
 0x534   : > { %3769 = vst.msk [vmem:[#allocation5 + $0x28] sm:$0xff] %vm3763_vm8, %v3678_v18  ;;  %3770 = vst.msk [vmem:[#allocation5 + $0x30] sm:$0xff] %vm3763_vm8, %v3680_v13 }
 0x535   : > { %3922 = vrot.lane.b32.xlu1 %v3827_v16, %s9759_s19 }
 0x537   : > { %v3682_v52 = vpop.permute.xlu1 %3681  ;;  %v3684_v25 = vpop.permute.xlu0 %3683 }
 0x538   : > { %3771 = vst.msk [vmem:[#allocation5 + $0x38] sm:$0xff] %vm3763_vm8, %v3682_v52  ;;  %3772 = vst.msk [vmem:[#allocation5 + $0x40] sm:$0xff] %vm3763_vm8, %v3684_v25 }
 0x53b   : > { %v3686_v39 = vpop.permute.xlu1 %3685  ;;  %v3688_v14 = vpop.permute.xlu0 %3687 }
 0x53c   : > { %3773 = vst.msk [vmem:[#allocation5 + $0x48] sm:$0xff] %vm3763_vm8, %v3686_v39  ;;  %3774 = vst.msk [vmem:[#allocation5 + $0x50] sm:$0xff] %vm3763_vm8, %v3688_v14 }
 0x53f   : > { %v3690_v46 = vpop.permute.xlu1 %3689  ;;  %v3692_v51 = vpop.permute.xlu0 %3691 }
 0x540   : > { %3775 = vst.msk [vmem:[#allocation5 + $0x58] sm:$0xff] %vm3763_vm8, %v3690_v46  ;;  %3776 = vst.msk [vmem:[#allocation5 + $0x60] sm:$0xff] %vm3763_vm8, %v3692_v51 }
 0x543   : > { %v3694_v47 = vpop.permute.xlu1 %3693  ;;  %v3696_v30 = vpop.permute.xlu0 %3695 }
 0x544   : > { %3777 = vst.msk [vmem:[#allocation5 + $0x68] sm:$0xff] %vm3763_vm8, %v3694_v47  ;;  %3778 = vst.msk [vmem:[#allocation5 + $0x70] sm:$0xff] %vm3763_vm8, %v3696_v30 }
 0x547   : > { %v3698_v40 = vpop.permute.xlu1 %3697  ;;  %v3700_v45 = vpop.permute.xlu0 %3699 }
 0x548   : > { %3779 = vst.msk [vmem:[#allocation5 + $0x78] sm:$0xff] %vm3763_vm8, %v3698_v40  ;;  %3780 = vst.msk [vmem:[#allocation5 + $0x80] sm:$0xff] %vm3763_vm8, %v3700_v45 }
 0x54b   : > { %v3861_v1 = vpop.permute.xlu1 %3860  ;;  %v3863_v62 = vpop.permute.xlu0 %3862 }
 0x54c   : > { %3957 = vst.msk [vmem:[#allocation5] sm:$0xff] %vm3956_vm0, %v3861_v1  ;;  %3958 = vst.msk [vmem:[#allocation5 + $0x8] sm:$0xff] %vm3956_vm0, %v3863_v62 }
 0x54f   : > { %v3865_v11 = vpop.permute.xlu1 %3864  ;;  %v3867_v50 = vpop.permute.xlu0 %3866 }
 0x550   : > { %3959 = vst.msk [vmem:[#allocation5 + $0x10] sm:$0xff] %vm3956_vm0, %v3865_v11  ;;  %3960 = vst.msk [vmem:[#allocation5 + $0x18] sm:$0xff] %vm3956_vm0, %v3867_v50 }
 0x553   : > { %v3869_v37 = vpop.permute.xlu1 %3868  ;;  %v3871_v43 = vpop.permute.xlu0 %3870  ;;  %v3989_v56 = vld [vmem:[#allocation5] sm:$0xff]  ;;  %v3990_v63 = vld [vmem:[#allocation5 + $0x8] sm:$0xff] }
 0x554   : > { %3961 = vst.msk [vmem:[#allocation5 + $0x20] sm:$0xff] %vm3956_vm0, %v3869_v37  ;;  %3962 = vst.msk [vmem:[#allocation5 + $0x28] sm:$0xff] %vm3956_vm0, %v3871_v43  ;;  %v4021_v35 = vpack.c.bf16 %v3990_v63, %v3989_v56 }
 0x556   : > { %9507 = vmatprep.mubr.msk.bf16.mxu1 %vm4069_vm9, %v4021_v35 }
 0x557   : > { %v3873_v36 = vpop.permute.xlu1 %3872  ;;  %v3875_v60 = vpop.permute.xlu0 %3874  ;;  %v3991_v3 = vld [vmem:[#allocation5 + $0x10] sm:$0xff]  ;;  %v3992_v41 = vld [vmem:[#allocation5 + $0x18] sm:$0xff] }
 0x558   : > { %3963 = vst.msk [vmem:[#allocation5 + $0x30] sm:$0xff] %vm3956_vm0, %v3873_v36  ;;  %3964 = vst.msk [vmem:[#allocation5 + $0x38] sm:$0xff] %vm3956_vm0, %v3875_v60  ;;  %v4022_v24 = vpack.c.bf16 %v3992_v41, %v3991_v3 }
 0x55a   : > { %9508 = vmatmul.mubr.msk.bf16.vlgmr.msra.gmra.mxu1 %vm4069_vm9, %v4022_v24 }
 0x55b   : > { %v3877_v19 = vpop.permute.xlu1 %3876  ;;  %v3879_v22 = vpop.permute.xlu0 %3878  ;;  %v3993_v58 = vld [vmem:[#allocation5 + $0x20] sm:$0xff]  ;;  %v3994_v4 = vld [vmem:[#allocation5 + $0x28] sm:$0xff] }
 0x55c   : > { %3965 = vst.msk [vmem:[#allocation5 + $0x40] sm:$0xff] %vm3956_vm0, %v3877_v19  ;;  %3966 = vst.msk [vmem:[#allocation5 + $0x48] sm:$0xff] %vm3956_vm0, %v3879_v22  ;;  %v4023_v34 = vpack.c.bf16 %v3994_v4, %v3993_v58 }
 0x55e   : > { %9511 = vmatprep.mubr.msk.bf16.mxu1 %vm4069_vm9, %v4023_v34 }
 0x55f   : > { %v3881_v53 = vpop.permute.xlu1 %3880  ;;  %v3883_v29 = vpop.permute.xlu0 %3882  ;;  %v3995_v42 = vld [vmem:[#allocation5 + $0x30] sm:$0xff]  ;;  %v3996_v59 = vld [vmem:[#allocation5 + $0x38] sm:$0xff] }
 0x560   : > { %3967 = vst.msk [vmem:[#allocation5 + $0x50] sm:$0xff] %vm3956_vm0, %v3881_v53  ;;  %3968 = vst.msk [vmem:[#allocation5 + $0x58] sm:$0xff] %vm3956_vm0, %v3883_v29  ;;  %v4024_v10 = vpack.c.bf16 %v3996_v59, %v3995_v42 }
 0x562   : > { %9512 = vmatmul.mubr.msk.bf16.gmra.mxu1 %vm4069_vm9, %v4024_v10 }
 0x563   : > { %v3885_v23 = vpop.permute.xlu1 %3884  ;;  %v3887_v6 = vpop.permute.xlu0 %3886  ;;  %v3997_v12 = vld [vmem:[#allocation5 + $0x40] sm:$0xff]  ;;  %v3998_v15 = vld [vmem:[#allocation5 + $0x48] sm:$0xff] }
 0x564   : > { %3969 = vst.msk [vmem:[#allocation5 + $0x60] sm:$0xff] %vm3956_vm0, %v3885_v23  ;;  %3970 = vst.msk [vmem:[#allocation5 + $0x68] sm:$0xff] %vm3956_vm0, %v3887_v6  ;;  %v4025_v27 = vpack.c.bf16 %v3998_v15, %v3997_v12  ;;  %v4751_v15 = vld [vmem:[#allocation3 + $0x1] sm:$0xff] }
 0x565   : > { %4815 = vrot.lane.b32.xlu0 %v4751_v15, %s9749_s29 }
 0x566   : > { %9515 = vmatprep.mubr.msk.bf16.mxu1 %vm4069_vm9, %v4025_v27 }
 0x567   : > { %v3889_v33 = vpop.permute.xlu1 %3888  ;;  %v3891_v49 = vpop.permute.xlu0 %3890  ;;  %v3999_v54 = vld [vmem:[#allocation5 + $0x50] sm:$0xff]  ;;  %v4000_v32 = vld [vmem:[#allocation5 + $0x58] sm:$0xff] }
 0x568   : > { %3971 = vst.msk [vmem:[#allocation5 + $0x70] sm:$0xff] %vm3956_vm0, %v3889_v33  ;;  %3972 = vst.msk [vmem:[#allocation5 + $0x78] sm:$0xff] %vm3956_vm0, %v3891_v49  ;;  %v4026_v5 = vpack.c.bf16 %v4000_v32, %v3999_v54  ;;  %v4752_v54 = vld [vmem:[#allocation3 + $0x9] sm:$0xff] }
 0x569   : > { %4817 = vrot.lane.b32.xlu1 %v4752_v54, %s9749_s29 }
 0x56a   : > { %9516 = vmatmul.mubr.msk.bf16.gmra.mxu1 %vm4069_vm9, %v4026_v5  ;;  %v9543_v5 = vpop.f32.mrf.mxu0 }
 0x56b   : > { %v3702_v61 = vpop.permute.xlu1 %3701  ;;  %v3704_v17 = vpop.permute.xlu0 %3703  ;;  %v4001_v8 = vld [vmem:[#allocation5 + $0x60] sm:$0xff]  ;;  %v4002_v44 = vld [vmem:[#allocation5 + $0x68] sm:$0xff] }
 0x56c   : > { %3781 = vst.msk [vmem:[#allocation5 + $0x88] sm:$0xff] %vm3763_vm8, %v3702_v61  ;;  %3782 = vst.msk [vmem:[#allocation5 + $0x90] sm:$0xff] %vm3763_vm8, %v3704_v17  ;;  %v4027_v21 = vpack.c.bf16 %v4002_v44, %v4001_v8  ;;  %v4422_v61 = vpop.f32.mrf.mxu0 }
 0x56e   : > { %9519 = vmatprep.mubr.msk.bf16.mxu1 %vm4069_vm9, %v4027_v21  ;;  %v9544_v17 = vpop.f32.mrf.mxu0 }
 0x56f   : > { %v3706_v7 = vpop.permute.xlu1 %3705  ;;  %v3893_v26 = vpop.permute.xlu0 %3892  ;;  %v4003_v38 = vld [vmem:[#allocation5 + $0x70] sm:$0xff]  ;;  %v4004_v48 = vld [vmem:[#allocation5 + $0x78] sm:$0xff] }
 0x570   : > { %3783 = vst.msk [vmem:[#allocation5 + $0x98] sm:$0xff] %vm3763_vm8, %v3706_v7  ;;  %v4028_v2 = vpack.c.bf16 %v4004_v48, %v4003_v38  ;;  %v4425_v8 = vpop.f32.mrf.mxu0  ;;  %v12144_v38 = vld [vmem:[%s14316_s4 + $0x2] ss:$0 sm:$0xff]  ;;  %v4687_v48 = vld [vmem:[#allocation3] sm:$0xff] }
 0x571   : > { %3973 = vst.msk [vmem:[#allocation5 + $0x80] sm:$0xff] %vm3956_vm0, %v3893_v26 }
 0x572   : > { %9520 = vmatmul.mubr.msk.bf16.gmra.mxu1 %vm4069_vm9, %v4028_v2  ;;  %v12149_v2 = vld [vmem:[%s14316_s4 + $0x1] ss:$0 sm:$0xff]  ;;  %4719 = vst.msk [vmem:[#allocation5] sm:$0xff] %vm299_vm11, %v4687_v48 }
 0x573   : > { %v3895_v57 = vpop.permute.xlu1 %3894  ;;  %v3897_v28 = vpop.permute.xlu0 %3896 }
 0x574   : > { %3974 = vst.msk [vmem:[#allocation5 + $0x88] sm:$0xff] %vm3956_vm0, %v3895_v57  ;;  %3975 = vst.msk [vmem:[#allocation5 + $0x90] sm:$0xff] %vm3956_vm0, %v3897_v28  ;;  %v4431_v28 = vadd.f32 %v9543_v5, %v12144_v38 }
 0x577   : > { %v3899_v20 = vpop.permute.xlu1 %3898  ;;  %v3708_v0 = vpop.permute.xlu0 %3707 }
 0x578   : > { %3976 = vst.msk [vmem:[#allocation5 + $0x98] sm:$0xff] %vm3956_vm0, %v3899_v20  ;;  %v4005_v55 = vld [vmem:[#allocation5 + $0x80] sm:$0xff] }
 0x579   : > { %3784 = vst.msk [vmem:[#allocation5 + $0xa0] sm:$0xff] %vm3763_vm8, %v3708_v0 }
 0x57b   : > { %v3710_v31 = vpop.permute.xlu1 %3709  ;;  %v3712_v9 = vpop.permute.xlu0 %3711  ;;  %v4006_v16 = vld [vmem:[#allocation5 + $0x88] sm:$0xff]  ;;  %v4007_v25 = vld [vmem:[#allocation5 + $0x90] sm:$0xff] }
 0x57c   : > { %3785 = vst.msk [vmem:[#allocation5 + $0xa8] sm:$0xff] %vm3763_vm8, %v3710_v31  ;;  %3786 = vst.msk [vmem:[#allocation5 + $0xb0] sm:$0xff] %vm3763_vm8, %v3712_v9  ;;  %v4029_v18 = vpack.c.bf16 %v4006_v16, %v4005_v55  ;;  %v9547_v44 = vpop.f32.mrf.mxu0  ;;  %v4423_v31 = vadd.f32 %v12144_v38, %v4422_v61  ;;  %v4688_v9 = vld [vmem:[#allocation3 + $0x8] sm:$0xff] }
 0x57d   : > { %4720 = vst.msk [vmem:[#allocation5 + $0x8] sm:$0xff] %vm299_vm11, %v4688_v9 }
 0x57e   : > { %9523 = vmatprep.mubr.msk.bf16.mxu1 %vm4069_vm9, %v4029_v18  ;;  %v4438_v21 = vpop.f32.mrf.mxu0 }
 0x57f   : > { %v3714_v13 = vpop.permute.xlu1 %3713  ;;  %v3901_v52 = vpop.permute.xlu0 %3900  ;;  %v4008_v39 = vld [vmem:[#allocation5 + $0x98] sm:$0xff] }
 0x580   : > { %3787 = vst.msk [vmem:[#allocation5 + $0xb8] sm:$0xff] %vm3763_vm8, %v3714_v13  ;;  %v4030_v14 = vpack.c.bf16 %v4008_v39, %v4007_v25  ;;  %v9548_v7 = vpop.f32.mrf.mxu0 }
 0x581   : > { %3977 = vst.msk [vmem:[#allocation5 + $0xa0] sm:$0xff] %vm3956_vm0, %v3901_v52  ;;  %v4434_v52 = vadd.f32 %v9544_v17, %v12144_v38 }
 0x582   : > { %9524 = vmatmul.mubr.msk.bf16.gmra.mxu1 %vm4069_vm9, %v4030_v14  ;;  %v4441_v26 = vpop.f32.mrf.mxu0 }
 0x583   : > { %v3903_v46 = vpop.permute.xlu1 %3902  ;;  %v3905_v51 = vpop.permute.xlu0 %3904 }
 0x584   : > { %3978 = vst.msk [vmem:[#allocation5 + $0xa8] sm:$0xff] %vm3956_vm0, %v3903_v46  ;;  %3979 = vst.msk [vmem:[#allocation5 + $0xb0] sm:$0xff] %vm3956_vm0, %v3905_v51 }
 0x587   : > { %v3907_v47 = vpop.permute.xlu1 %3906  ;;  %v3716_v30 = vpop.permute.xlu0 %3715 }
 0x588   : > { %3980 = vst.msk [vmem:[#allocation5 + $0xb8] sm:$0xff] %vm3956_vm0, %v3907_v47  ;;  %v4009_v1 = vld [vmem:[#allocation5 + $0xa0] sm:$0xff]  ;;  %v9551_v57 = vpop.f32.mrf.mxu0  ;;  %v4426_v47 = vadd.f32 %v12144_v38, %v4425_v8 }
 0x589   : > { %3788 = vst.msk [vmem:[#allocation5 + $0xc0] sm:$0xff] %vm3763_vm8, %v3716_v30 }
 0x58a   : > { %v12155_v16 = vpop.f32.mrf.mxu0 }
 0x58b   : > { %v3718_v40 = vpop.permute.xlu1 %3717  ;;  %v3720_v45 = vpop.permute.xlu0 %3719  ;;  %v4010_v62 = vld [vmem:[#allocation5 + $0xa8] sm:$0xff]  ;;  %v4011_v43 = vld [vmem:[#allocation5 + $0xb0] sm:$0xff]  ;;  %v4455_v5 = vadd.f32 %v12144_v38, %v12155_v16 }
 0x58c   : > { %3789 = vst.msk [vmem:[#allocation5 + $0xc8] sm:$0xff] %vm3763_vm8, %v3718_v40  ;;  %3790 = vst.msk [vmem:[#allocation5 + $0xd0] sm:$0xff] %vm3763_vm8, %v3720_v45  ;;  %v4031_v11 = vpack.c.bf16 %v4010_v62, %v4009_v1  ;;  %v9552_v40 = vpop.f32.mrf.mxu0 }
 0x58e   : > { %9527 = vmatprep.mubr.msk.bf16.mxu1 %vm4069_vm9, %v4031_v11  ;;  %v4447_v11 = vadd.f32 %v9547_v44, %v12144_v38 }
 0x58f   : > { %v3722_v50 = vpop.permute.xlu1 %3721  ;;  %v3909_v37 = vpop.permute.xlu0 %3908  ;;  %v4012_v56 = vld [vmem:[#allocation5 + $0xb8] sm:$0xff] }
 0x590   : > { %3791 = vst.msk [vmem:[#allocation5 + $0xd8] sm:$0xff] %vm3763_vm8, %v3722_v50  ;;  %v4032_v63 = vpack.c.bf16 %v4012_v56, %v4011_v43 }
 0x591   : > { %3981 = vst.msk [vmem:[#allocation5 + $0xc0] sm:$0xff] %vm3956_vm0, %v3909_v37 }
 0x592   : > { %9528 = vmatmul.mubr.msk.bf16.gmra.mxu1 %vm4069_vm9, %v4032_v63 }
 0x593   : > { %v3911_v35 = vpop.permute.xlu1 %3910  ;;  %v3913_v36 = vpop.permute.xlu0 %3912 }
 0x594   : > { %3982 = vst.msk [vmem:[#allocation5 + $0xc8] sm:$0xff] %vm3956_vm0, %v3911_v35  ;;  %3983 = vst.msk [vmem:[#allocation5 + $0xd0] sm:$0xff] %vm3956_vm0, %v3913_v36  ;;  %v4439_v35 = vadd.f32 %v12144_v38, %v4438_v21 }
 0x597   : > { %v3915_v60 = vpop.permute.xlu1 %3914  ;;  %v3724_v3 = vpop.permute.xlu0 %3723 }
 0x598   : > { %3984 = vst.msk [vmem:[#allocation5 + $0xd8] sm:$0xff] %vm3956_vm0, %v3915_v60  ;;  %v4013_v19 = vld [vmem:[#allocation5 + $0xc0] sm:$0xff]  ;;  %v4457_v60 = vpop.f32.mrf.mxu0 }
 0x599   : > { %3792 = vst.msk [vmem:[#allocation5 + $0xe0] sm:$0xff] %vm3763_vm8, %v3724_v3  ;;  %v4458_v9 = vadd.f32 %v12144_v38, %v4457_v60 }
 0x59b   : > { %v3726_v41 = vpop.permute.xlu1 %3725  ;;  %v3728_v24 = vpop.permute.xlu0 %3727  ;;  %v4014_v22 = vld [vmem:[#allocation5 + $0xc8] sm:$0xff]  ;;  %v4015_v53 = vld [vmem:[#allocation5 + $0xd0] sm:$0xff] }
 0x59c   : > { %3793 = vst.msk [vmem:[#allocation5 + $0xe8] sm:$0xff] %vm3763_vm8, %v3726_v41  ;;  %3794 = vst.msk [vmem:[#allocation5 + $0xf0] sm:$0xff] %vm3763_vm8, %v3728_v24  ;;  %v4033_v58 = vpack.c.bf16 %v4014_v22, %v4013_v19  ;;  %v4450_v19 = vadd.f32 %v9548_v7, %v12144_v38  ;;  %v4466_v7 = vadd.f32 %v9552_v40, %v12144_v38 }
 0x59e   : > { %9531 = vmatprep.mubr.msk.bf16.mxu1 %vm4069_vm9, %v4033_v58 }
 0x59f   : > { %v3730_v4 = vpop.permute.xlu1 %3729  ;;  %v3917_v34 = vpop.permute.xlu0 %3916  ;;  %v4016_v29 = vld [vmem:[#allocation5 + $0xd8] sm:$0xff] }
 0x5a0   : > { %3795 = vst.msk [vmem:[#allocation5 + $0xf8] sm:$0xff] %vm3763_vm8, %v3730_v4  ;;  %v4034_v42 = vpack.c.bf16 %v4016_v29, %v4015_v53  ;;  %v4442_v53 = vadd.f32 %v12144_v38, %v4441_v26 }
 0x5a1   : > { %3985 = vst.msk [vmem:[#allocation5 + $0xe0] sm:$0xff] %vm3956_vm0, %v3917_v34 }
 0x5a2   : > { %9532 = vmatmul.mubr.msk.bf16.gmra.mxu1 %vm4069_vm9, %v4034_v42  ;;  %v9555_v42 = vpop.f32.mrf.mxu0 }
 0x5a3   : > { %v3919_v59 = vpop.permute.xlu1 %3918  ;;  %v3921_v10 = vpop.permute.xlu0 %3920 }
 0x5a4   : > { %3986 = vst.msk [vmem:[#allocation5 + $0xe8] sm:$0xff] %vm3956_vm0, %v3919_v59  ;;  %3987 = vst.msk [vmem:[#allocation5 + $0xf0] sm:$0xff] %vm3956_vm0, %v3921_v10  ;;  %v4470_v17 = vpop.f32.mrf.mxu0 }
 0x5a7   : > { %v3923_v23 = vpop.permute.xlu1 %3922 }
 0x5a8   : > { %3988 = vst.msk [vmem:[#allocation5 + $0xf8] sm:$0xff] %vm3956_vm0, %v3923_v23  ;;  %v4017_v6 = vld [vmem:[#allocation5 + $0xe0] sm:$0xff] }
 0x5ab   : > { %v4018_v12 = vld [vmem:[#allocation5 + $0xe8] sm:$0xff]  ;;  %v4019_v33 = vld [vmem:[#allocation5 + $0xf0] sm:$0xff] }
 0x5ac   : > { %v4035_v27 = vpack.c.bf16 %v4018_v12, %v4017_v6  ;;  %v4463_v12 = vadd.f32 %v9551_v57, %v12144_v38 }
 0x5ae   : > { %9535 = vmatprep.mubr.msk.bf16.mxu1 %vm4069_vm9, %v4035_v27 }
 0x5af   : > { %v4020_v49 = vld [vmem:[#allocation5 + $0xf8] sm:$0xff] }
 0x5b0   : > { %v4036_v32 = vpack.c.bf16 %v4020_v49, %v4019_v33 }
 0x5b2   : > { %9536 = vmatmul.mubr.msk.bf16.gmra.mxu1 %vm4069_vm9, %v4036_v32 }
 0x5d7   : > { %v4816_v39 = vpop.permute.xlu0 %4815 }
 0x5d8   : > { %4911 = vst.msk [vmem:[#allocation5] sm:$0xff] %vm2604_vm1, %v4816_v39 }
 0x5db   : > { %v4818_v37 = vpop.permute.xlu1 %4817 }
 0x5dc   : > { %4912 = vst.msk [vmem:[#allocation5 + $0x8] sm:$0xff] %vm2604_vm1, %v4818_v37 }
 0x61a   : > { %v9509_v20 = vpop.f32.mrf.mxu1 }
 0x61b   : > { %v4165_v0 = vadd.f32 %v9509_v20, %v12149_v2 }
 0x61c   : > { %v4156_v55 = vpop.f32.mrf.mxu1 }
 0x61d   : > { %v4551_v18 = vadd.f32 %v4431_v28, %v4165_v0  ;;  %v4157_v13 = vadd.f32 %v12149_v2, %v4156_v55 }
 0x61e   : > { %v9510_v25 = vpop.f32.mrf.mxu1 }
 0x61f   : > { %v4583_v14 = vmax.f32 %v4551_v18, 0.0  ;;  %v4549_v46 = vadd.f32 %v4423_v31, %v4157_v13  ;;  %v4168_v51 = vadd.f32 %v9510_v25, %v12149_v2  ;;  %v9556_v18 = vpop.f32.mrf.mxu0 }
 0x620   : > { %v4159_v30 = vpop.f32.mrf.mxu1 }
 0x621   : > { %4615 = vst.msk [vmem:[#allocation4 + $0x10] sm:$0xff] %vm299_vm11, %v4583_v14  ;;  %4647 = vst.msk [vmem:[#allocation3 + $0x31] sm:$0xff] %vm299_vm11, %v4583_v14  ;;  %v4581_v45 = vmax.f32 %v4549_v46, 0.0  ;;  %v4552_v1 = vadd.f32 %v4434_v52, %v4168_v51  ;;  %v4160_v62 = vadd.f32 %v12149_v2, %v4159_v30  ;;  %v4479_v14 = vadd.f32 %v9555_v42, %v12144_v38 }
 0x622   : > { %v9513_v50 = vpop.f32.mrf.mxu1 }
 0x623   : > { %4613 = vst.msk [vmem:[#allocation4] sm:$0xff] %vm299_vm11, %v4581_v45  ;;  %4645 = vst.msk [vmem:[#allocation3 + $0x19] sm:$0xff] %vm299_vm11, %v4581_v45  ;;  %v4584_v43 = vmax.f32 %v4552_v1, 0.0  ;;  %v4550_v56 = vadd.f32 %v4426_v47, %v4160_v62  ;;  %v4181_v63 = vadd.f32 %v9513_v50, %v12149_v2  ;;  %v4471_v62 = vadd.f32 %v12144_v38, %v4470_v17  ;;  %v4473_v50 = vpop.f32.mrf.mxu0 }
 0x624   : > { %v4172_v36 = vpop.f32.mrf.mxu1 }
 0x625   : > { %4616 = vst.msk [vmem:[#allocation4 + $0x18] sm:$0xff] %vm299_vm11, %v4584_v43  ;;  %4648 = vst.msk [vmem:[#allocation3 + $0x39] sm:$0xff] %vm299_vm11, %v4584_v43  ;;  %v4582_v3 = vmax.f32 %v4550_v56, 0.0  ;;  %v4555_v41 = vadd.f32 %v4447_v11, %v4181_v63  ;;  %v4173_v24 = vadd.f32 %v12149_v2, %v4172_v36  ;;  %v4482_v63 = vadd.f32 %v9556_v18, %v12144_v38 }
 0x626   : > { %v9514_v22 = vpop.f32.mrf.mxu1 }
 0x627   : > { %4614 = vst.msk [vmem:[#allocation4 + $0x8] sm:$0xff] %vm299_vm11, %v4582_v3  ;;  %4646 = vst.msk [vmem:[#allocation3 + $0x21] sm:$0xff] %vm299_vm11, %v4582_v3  ;;  %v4587_v58 = vmax.f32 %v4555_v41, 0.0  ;;  %v4553_v4 = vadd.f32 %v4439_v35, %v4173_v24  ;;  %v4184_v34 = vadd.f32 %v9514_v22, %v12149_v2  ;;  %v4474_v22 = vadd.f32 %v12144_v38, %v4473_v50 }
 0x628   : > { %v4175_v29 = vpop.f32.mrf.mxu1  ;;  %v12180_v59 = vld [vmem:[#allocation3 + $0x30] sm:$0xff] }
 0x629   : > { %4619 = vst.msk [vmem:[#allocation4 + $0x30] sm:$0xff] %vm299_vm11, %v4587_v58  ;;  %4651 = vst.msk [vmem:[#allocation3 + $0x61] sm:$0xff] %vm299_vm11, %v4587_v58  ;;  %v4585_v10 = vmax.f32 %v4553_v4, 0.0  ;;  %v4556_v23 = vadd.f32 %v4450_v19, %v4184_v34  ;;  %v4176_v6 = vadd.f32 %v12149_v2, %v4175_v29  ;;  %v12206_v28 = vld [vmem:[#allocation3 + $0x31] sm:$0xff]  ;;  %v9559_v34 = vpop.f32.mrf.mxu0 }
 0x62a   : > { %4723 = vst.msk [vmem:[#allocation5 + $0x20] sm:$0xff] %vm299_vm11, %v12180_v59  ;;  %v9517_v15 = vpop.f32.mrf.mxu1  ;;  %v4753_v27 = vld [vmem:[#allocation3 + $0x19] sm:$0xff] }
 0x62b   : > { %v12188_v33 = vld [vmem:[#allocation3 + $0x18] sm:$0xff]  ;;  %4617 = vst.msk [vmem:[#allocation4 + $0x20] sm:$0xff] %vm299_vm11, %v4585_v10  ;;  %4649 = vst.msk [vmem:[#allocation3 + $0x49] sm:$0xff] %vm299_vm11, %v4585_v10  ;;  %v4588_v49 = vmax.f32 %v4556_v23, 0.0  ;;  %v4554_v54 = vadd.f32 %v4442_v53, %v4176_v6  ;;  %v4197_v32 = vadd.f32 %v9517_v15, %v12149_v2  ;;  %4819 = vrot.lane.b32.xlu0 %v4753_v27, %s9749_s29 }
 0x62c   : > { %4721 = vst.msk [vmem:[#allocation5 + $0x10] sm:$0xff] %vm299_vm11, %v12188_v33  ;;  %v4188_v61 = vpop.f32.mrf.mxu1  ;;  %v12202_v26 = vld [vmem:[#allocation3 + $0x38] sm:$0xff] }
 0x62d   : > { %4620 = vst.msk [vmem:[#allocation4 + $0x38] sm:$0xff] %vm299_vm11, %v4588_v49  ;;  %4652 = vst.msk [vmem:[#allocation3 + $0x69] sm:$0xff] %vm299_vm11, %v4588_v49  ;;  %v4586_v8 = vmax.f32 %v4554_v54, 0.0  ;;  %v4559_v44 = vadd.f32 %v4463_v12, %v4197_v32  ;;  %v4189_v21 = vadd.f32 %v12149_v2, %v4188_v61  ;;  %v12230_v51 = vld [vmem:[#allocation3 + $0x39] sm:$0xff]  ;;  %v4486_v49 = vpop.f32.mrf.mxu0 }
 0x62e   : > { %v9518_v48 = vpop.f32.mrf.mxu1  ;;  %v12204_v57 = vld [vmem:[#allocation3 + $0x21] sm:$0xff]  ;;  %4724 = vst.msk [vmem:[#allocation5 + $0x28] sm:$0xff] %vm299_vm11, %v12202_v26 }
 0x62f   : > { %4618 = vst.msk [vmem:[#allocation4 + $0x28] sm:$0xff] %vm299_vm11, %v4586_v8  ;;  %4650 = vst.msk [vmem:[#allocation3 + $0x51] sm:$0xff] %vm299_vm11, %v4586_v8  ;;  %v4591_v20 = vmax.f32 %v4559_v44, 0.0  ;;  %v4557_v0 = vadd.f32 %v4455_v5, %v4189_v21  ;;  %v4200_v31 = vadd.f32 %v9518_v48, %v12149_v2  ;;  %4821 = vrot.lane.b32.xlu1 %v12204_v57, %s9749_s29  ;;  %4823 = vrot.lane.b32.xlu0 %v12206_v28, %s9749_s29  ;;  %v12218_v55 = vld [vmem:[#allocation3 + $0x20] sm:$0xff]  ;;  %v9560_v8 = vpop.f32.mrf.mxu0 }
 0x630   : > { %v4191_v16 = vpop.f32.mrf.mxu1  ;;  %4722 = vst.msk [vmem:[#allocation5 + $0x18] sm:$0xff] %vm299_vm11, %v12218_v55  ;;  %v12222_v13 = vld [vmem:[#allocation3 + $0x60] sm:$0xff]  ;;  %v4495_v21 = vadd.f32 %v9559_v34, %v12144_v38 }
 0x631   : > { %4623 = vst.msk [vmem:[#allocation4 + $0x50] sm:$0xff] %vm299_vm11, %v4591_v20  ;;  %4655 = vst.msk [vmem:[#allocation3 + $0x91] sm:$0xff] %vm299_vm11, %v4591_v20  ;;  %v4589_v52 = vmax.f32 %v4557_v0, 0.0  ;;  %v4560_v25 = vadd.f32 %v4466_v7, %v4200_v31  ;;  %v4192_v39 = vadd.f32 %v12149_v2, %v4191_v16  ;;  %v4759_v3 = vld [vmem:[#allocation3 + $0x61] sm:$0xff]  ;;  %v4489_v18 = vpop.f32.mrf.mxu0 }
 0x632   : > { %4727 = vst.msk [vmem:[#allocation5 + $0x40] sm:$0xff] %vm299_vm11, %v12222_v13  ;;  %v9521_v46 = vpop.f32.mrf.mxu1  ;;  %v4757_v47 = vld [vmem:[#allocation3 + $0x49] sm:$0xff] }
 0x633   : > { %v12232_v30 = vld [vmem:[#allocation3 + $0x48] sm:$0xff]  ;;  %4621 = vst.msk [vmem:[#allocation4 + $0x40] sm:$0xff] %vm299_vm11, %v4589_v52  ;;  %4653 = vst.msk [vmem:[#allocation3 + $0x79] sm:$0xff] %vm299_vm11, %v4589_v52  ;;  %v4592_v40 = vmax.f32 %v4560_v25, 0.0  ;;  %v4558_v45 = vadd.f32 %v4458_v9, %v4192_v39  ;;  %v4213_v1 = vadd.f32 %v9521_v46, %v12149_v2  ;;  %4825 = vrot.lane.b32.xlu1 %v12230_v51, %s9749_s29  ;;  %4827 = vrot.lane.b32.xlu0 %v4757_v47, %s9749_s29 }
 0x634   : > { %4725 = vst.msk [vmem:[#allocation5 + $0x30] sm:$0xff] %vm299_vm11, %v12232_v30  ;;  %v4204_v11 = vpop.f32.mrf.mxu1  ;;  %v12247_v35 = vld [vmem:[#allocation3 + $0x68] sm:$0xff]  ;;  %v4487_v9 = vadd.f32 %v12144_v38, %v4486_v49  ;;  %v4498_v39 = vadd.f32 %v9560_v8, %v12144_v38 }
 0x635   : > { %4624 = vst.msk [vmem:[#allocation4 + $0x58] sm:$0xff] %vm299_vm11, %v4592_v40  ;;  %4656 = vst.msk [vmem:[#allocation3 + $0x99] sm:$0xff] %vm299_vm11, %v4592_v40  ;;  %v4590_v37 = vmax.f32 %v4558_v45, 0.0  ;;  %v4563_v43 = vadd.f32 %v4479_v14, %v4213_v1  ;;  %v4205_v56 = vadd.f32 %v12149_v2, %v4204_v11  ;;  %v4760_v23 = vld [vmem:[#allocation3 + $0x69] sm:$0xff]  ;;  %v4490_v11 = vadd.f32 %v12144_v38, %v4489_v18 }
 0x636   : > { %v9522_v36 = vpop.f32.mrf.mxu1  ;;  %v4758_v60 = vld [vmem:[#allocation3 + $0x51] sm:$0xff]  ;;  %4728 = vst.msk [vmem:[#allocation5 + $0x48] sm:$0xff] %vm299_vm11, %v12247_v35 }
 0x637   : > { %4622 = vst.msk [vmem:[#allocation4 + $0x48] sm:$0xff] %vm299_vm11, %v4590_v37  ;;  %4654 = vst.msk [vmem:[#allocation3 + $0x81] sm:$0xff] %vm299_vm11, %v4590_v37  ;;  %v4595_v41 = vmax.f32 %v4563_v43, 0.0  ;;  %v4561_v24 = vadd.f32 %v4471_v62, %v4205_v56  ;;  %v4216_v19 = vadd.f32 %v9522_v36, %v12149_v2  ;;  %4829 = vrot.lane.b32.xlu1 %v4758_v60, %s9749_s29  ;;  %4831 = vrot.lane.b32.xlu0 %v4759_v3, %s9749_s29  ;;  %v12257_v58 = vld [vmem:[#allocation3 + $0x50] sm:$0xff]  ;;  %v9563_v43 = vpop.f32.mrf.mxu0 }
 0x638   : > { %v4207_v4 = vpop.f32.mrf.mxu1  ;;  %4726 = vst.msk [vmem:[#allocation5 + $0x38] sm:$0xff] %vm299_vm11, %v12257_v58  ;;  %v12261_v53 = vld [vmem:[#allocation3 + $0x90] sm:$0xff]  ;;  %v4511_v34 = vadd.f32 %v9563_v43, %v12144_v38 }
 0x639   : > { %4627 = vst.msk [vmem:[#allocation4 + $0x70] sm:$0xff] %vm299_vm11, %v4595_v41  ;;  %4659 = vst.msk [vmem:[#allocation3 + $0xc1] sm:$0xff] %vm299_vm11, %v4595_v41  ;;  %v4593_v29 = vmax.f32 %v4561_v24, 0.0  ;;  %v4564_v42 = vadd.f32 %v4482_v63, %v4216_v19  ;;  %v4208_v10 = vadd.f32 %v12149_v2, %v4207_v4  ;;  %v4763_v61 = vld [vmem:[#allocation3 + $0x91] sm:$0xff]  ;;  %v4502_v24 = vpop.f32.mrf.mxu0 }
 0x63a   : > { %4731 = vst.msk [vmem:[#allocation5 + $0x60] sm:$0xff] %vm299_vm11, %v12261_v53  ;;  %v4761_v6 = vld [vmem:[#allocation3 + $0x79] sm:$0xff] }
 0x63b   : > { %v12268_v12 = vld [vmem:[#allocation3 + $0x78] sm:$0xff]  ;;  %4625 = vst.msk [vmem:[#allocation4 + $0x60] sm:$0xff] %vm299_vm11, %v4593_v29  ;;  %4657 = vst.msk [vmem:[#allocation3 + $0xa9] sm:$0xff] %vm299_vm11, %v4593_v29  ;;  %v4596_v15 = vmax.f32 %v4564_v42, 0.0  ;;  %v4562_v27 = vadd.f32 %v4474_v22, %v4208_v10  ;;  %4833 = vrot.lane.b32.xlu1 %v4760_v23, %s9749_s29  ;;  %4835 = vrot.lane.b32.xlu0 %v4761_v6, %s9749_s29  ;;  %v9564_v22 = vpop.f32.mrf.mxu0  ;;  %v4503_v6 = vadd.f32 %v12144_v38, %v4502_v24 }
 0x63c   : > { %4729 = vst.msk [vmem:[#allocation5 + $0x50] sm:$0xff] %vm299_vm11, %v12268_v12  ;;  %v12278_v32 = vld [vmem:[#allocation3 + $0x98] sm:$0xff] }
 0x63d   : > { %4628 = vst.msk [vmem:[#allocation4 + $0x78] sm:$0xff] %vm299_vm11, %v4596_v15  ;;  %4660 = vst.msk [vmem:[#allocation3 + $0xc9] sm:$0xff] %vm299_vm11, %v4596_v15  ;;  %v4594_v54 = vmax.f32 %v4562_v27, 0.0  ;;  %v4764_v48 = vld [vmem:[#allocation3 + $0x99] sm:$0xff]  ;;  %v4505_v27 = vpop.f32.mrf.mxu0 }
 0x63e   : > { %v4762_v5 = vld [vmem:[#allocation3 + $0x81] sm:$0xff]  ;;  %4732 = vst.msk [vmem:[#allocation5 + $0x68] sm:$0xff] %vm299_vm11, %v12278_v32 }
 0x63f   : > { %4626 = vst.msk [vmem:[#allocation4 + $0x68] sm:$0xff] %vm299_vm11, %v4594_v54  ;;  %4658 = vst.msk [vmem:[#allocation3 + $0xb1] sm:$0xff] %vm299_vm11, %v4594_v54  ;;  %4837 = vrot.lane.b32.xlu1 %v4762_v5, %s9749_s29  ;;  %4839 = vrot.lane.b32.xlu0 %v4763_v61, %s9749_s29  ;;  %v12286_v17 = vld [vmem:[#allocation3 + $0x80] sm:$0xff]  ;;  %v4514_v5 = vadd.f32 %v9564_v22, %v12144_v38 }
 0x640   : > { %4730 = vst.msk [vmem:[#allocation5 + $0x58] sm:$0xff] %vm299_vm11, %v12286_v17  ;;  %v12290_v44 = vld [vmem:[#allocation3 + $0xc0] sm:$0xff] }
 0x641   : > { %4735 = vst.msk [vmem:[#allocation5 + $0x80] sm:$0xff] %vm299_vm11, %v12290_v44  ;;  %v4767_v40 = vld [vmem:[#allocation3 + $0xc1] sm:$0xff] }
 0x642   : > { %v9525_v7 = vpop.f32.mrf.mxu1  ;;  %v4765_v20 = vld [vmem:[#allocation3 + $0xa9] sm:$0xff] }
 0x643   : > { %v12295_v0 = vld [vmem:[#allocation3 + $0xa8] sm:$0xff]  ;;  %v4229_v31 = vadd.f32 %v9525_v7, %v12149_v2  ;;  %4841 = vrot.lane.b32.xlu1 %v4764_v48, %s9749_s29  ;;  %4843 = vrot.lane.b32.xlu0 %v4765_v20, %s9749_s29 }
 0x644   : > { %4733 = vst.msk [vmem:[#allocation5 + $0x70] sm:$0xff] %vm299_vm11, %v12295_v0  ;;  %v4220_v16 = vpop.f32.mrf.mxu1  ;;  %v12305_v14 = vld [vmem:[#allocation3 + $0xc8] sm:$0xff] }
 0x645   : > { %v4567_v52 = vadd.f32 %v4495_v21, %v4229_v31  ;;  %v4221_v25 = vadd.f32 %v12149_v2, %v4220_v16  ;;  %4736 = vst.msk [vmem:[#allocation5 + $0x88] sm:$0xff] %vm299_vm11, %v12305_v14  ;;  %v4768_v60 = vld [vmem:[#allocation3 + $0xc9] sm:$0xff] }
 0x646   : > { %v9526_v46 = vpop.f32.mrf.mxu1  ;;  %v4766_v47 = vld [vmem:[#allocation3 + $0xb1] sm:$0xff] }
 0x647   : > { %v4599_v45 = vmax.f32 %v4567_v52, 0.0  ;;  %v4565_v1 = vadd.f32 %v4487_v9, %v4221_v25  ;;  %v4232_v62 = vadd.f32 %v9526_v46, %v12149_v2  ;;  %4845 = vrot.lane.b32.xlu1 %v4766_v47, %s9749_s29  ;;  %4847 = vrot.lane.b32.xlu0 %v4767_v40, %s9749_s29  ;;  %v12313_v50 = vld [vmem:[#allocation3 + $0xb0] sm:$0xff]  ;;  %v4506_v9 = vadd.f32 %v12144_v38, %v4505_v27  ;;  %v9567_v52 = vpop.f32.mrf.mxu0 }
 0x648   : > { %v4223_v37 = vpop.f32.mrf.mxu1  ;;  %4734 = vst.msk [vmem:[#allocation5 + $0x78] sm:$0xff] %vm299_vm11, %v12313_v50  ;;  %v4527_v43 = vadd.f32 %v9567_v52, %v12144_v38 }
 0x649   : > { %4631 = vst.msk [vmem:[#allocation4 + $0x90] sm:$0xff] %vm299_vm11, %v4599_v45  ;;  %4663 = vst.msk [vmem:[#allocation3 + $0xf1] sm:$0xff] %vm299_vm11, %v4599_v45  ;;  %v4597_v56 = vmax.f32 %v4565_v1, 0.0  ;;  %v4568_v63 = vadd.f32 %v4498_v39, %v4232_v62  ;;  %v4224_v36 = vadd.f32 %v12149_v2, %v4223_v37  ;;  %v4518_v1 = vpop.f32.mrf.mxu0 }
 0x64b   : > { %4629 = vst.msk [vmem:[#allocation4 + $0x80] sm:$0xff] %vm299_vm11, %v4597_v56  ;;  %4661 = vst.msk [vmem:[#allocation3 + $0xd9] sm:$0xff] %vm299_vm11, %v4597_v56  ;;  %v4600_v3 = vmax.f32 %v4568_v63, 0.0  ;;  %v4566_v41 = vadd.f32 %v4490_v11, %v4224_v36  ;;  %4849 = vrot.lane.b32.xlu1 %v4768_v60, %s9749_s29  ;;  %v9568_v11 = vpop.f32.mrf.mxu0 }
 0x64d   : > { %4632 = vst.msk [vmem:[#allocation4 + $0x98] sm:$0xff] %vm299_vm11, %v4600_v3  ;;  %4664 = vst.msk [vmem:[#allocation3 + $0xf9] sm:$0xff] %vm299_vm11, %v4600_v3  ;;  %v4598_v19 = vmax.f32 %v4566_v41, 0.0  ;;  %v4519_v3 = vadd.f32 %v12144_v38, %v4518_v1  ;;  %v4521_v24 = vpop.f32.mrf.mxu0 }
 0x64f   : > { %4630 = vst.msk [vmem:[#allocation4 + $0x88] sm:$0xff] %vm299_vm11, %v4598_v19  ;;  %4662 = vst.msk [vmem:[#allocation3 + $0xe1] sm:$0xff] %vm299_vm11, %v4598_v19 }
 0x650   : > { %v12327_v4 = vld [vmem:[#allocation3 + $0xf0] sm:$0xff] }
 0x651   : > { %4739 = vst.msk [vmem:[#allocation5 + $0xa0] sm:$0xff] %vm299_vm11, %v12327_v4  ;;  %v4771_v7 = vld [vmem:[#allocation3 + $0xf1] sm:$0xff] }
 0x652   : > { %v9529_v29 = vpop.f32.mrf.mxu1  ;;  %v4769_v42 = vld [vmem:[#allocation3 + $0xd9] sm:$0xff] }
 0x653   : > { %v12332_v10 = vld [vmem:[#allocation3 + $0xd8] sm:$0xff]  ;;  %v4245_v23 = vadd.f32 %v9529_v29, %v12149_v2  ;;  %4851 = vrot.lane.b32.xlu0 %v4769_v42, %s9749_s29 }
 0x654   : > { %4737 = vst.msk [vmem:[#allocation5 + $0x90] sm:$0xff] %vm299_vm11, %v12332_v10  ;;  %v4236_v15 = vpop.f32.mrf.mxu1  ;;  %v12341_v61 = vld [vmem:[#allocation3 + $0xf8] sm:$0xff] }
 0x655   : > { %v4571_v49 = vadd.f32 %v4511_v34, %v4245_v23  ;;  %v4237_v54 = vadd.f32 %v12149_v2, %v4236_v15  ;;  %4740 = vst.msk [vmem:[#allocation5 + $0xa8] sm:$0xff] %vm299_vm11, %v12341_v61  ;;  %v4772_v47 = vld [vmem:[#allocation3 + $0xf9] sm:$0xff]  ;;  %v4530_v34 = vadd.f32 %v9568_v11, %v12144_v38 }
 0x656   : > { %v9530_v8 = vpop.f32.mrf.mxu1  ;;  %v4770_v21 = vld [vmem:[#allocation3 + $0xe1] sm:$0xff] }
 0x657   : > { %v4603_v48 = vmax.f32 %v4571_v49, 0.0  ;;  %v4569_v20 = vadd.f32 %v4503_v6, %v4237_v54  ;;  %v4248_v31 = vadd.f32 %v9530_v8, %v12149_v2  ;;  %4853 = vrot.lane.b32.xlu1 %v4770_v21, %s9749_s29  ;;  %4855 = vrot.lane.b32.xlu0 %v4771_v7, %s9749_s29  ;;  %v12349_v16 = vld [vmem:[#allocation3 + $0xe0] sm:$0xff]  ;;  %v4522_v54 = vadd.f32 %v12144_v38, %v4521_v24 }
 0x658   : > { %v4239_v18 = vpop.f32.mrf.mxu1  ;;  %4738 = vst.msk [vmem:[#allocation5 + $0x98] sm:$0xff] %vm299_vm11, %v12349_v16 }
 0x659   : > { %4635 = vst.msk [vmem:[#allocation4 + $0xb0] sm:$0xff] %vm299_vm11, %v4603_v48  ;;  %4667 = vst.msk [vmem:[#allocation3 + $0x121] sm:$0xff] %vm299_vm11, %v4603_v48  ;;  %v4601_v25 = vmax.f32 %v4569_v20, 0.0  ;;  %v4572_v39 = vadd.f32 %v4514_v5, %v4248_v31  ;;  %v4240_v46 = vadd.f32 %v12149_v2, %v4239_v18  ;;  %v9571_v31 = vpop.f32.mrf.mxu0 }
 0x65b   : > { %4633 = vst.msk [vmem:[#allocation4 + $0xa0] sm:$0xff] %vm299_vm11, %v4601_v25  ;;  %4665 = vst.msk [vmem:[#allocation3 + $0x109] sm:$0xff] %vm299_vm11, %v4601_v25  ;;  %v4604_v40 = vmax.f32 %v4572_v39, 0.0  ;;  %v4570_v45 = vadd.f32 %v4506_v9, %v4240_v46  ;;  %4857 = vrot.lane.b32.xlu1 %v4772_v47, %s9749_s29  ;;  %v4534_v25 = vpop.f32.mrf.mxu0  ;;  %v4543_v46 = vadd.f32 %v9571_v31, %v12144_v38  ;;  %v4943_v31 = vld [vmem:[#allocation3 + $0x2] sm:$0xff] }
 0x65d   : > { %4636 = vst.msk [vmem:[#allocation4 + $0xb8] sm:$0xff] %vm299_vm11, %v4604_v40  ;;  %4668 = vst.msk [vmem:[#allocation3 + $0x129] sm:$0xff] %vm299_vm11, %v4604_v40  ;;  %v4602_v62 = vmax.f32 %v4570_v45, 0.0  ;;  %v9572_v47 = vpop.f32.mrf.mxu0 }
 0x65f   : > { %4634 = vst.msk [vmem:[#allocation4 + $0xa8] sm:$0xff] %vm299_vm11, %v4602_v62  ;;  %4666 = vst.msk [vmem:[#allocation3 + $0x111] sm:$0xff] %vm299_vm11, %v4602_v62 }
 0x660   : > { %v12363_v37 = vld [vmem:[#allocation3 + $0x120] sm:$0xff] }
 0x661   : > { %4743 = vst.msk [vmem:[#allocation5 + $0xc0] sm:$0xff] %vm299_vm11, %v12363_v37  ;;  %v4775_v6 = vld [vmem:[#allocation3 + $0x121] sm:$0xff] }
 0x662   : > { %v9533_v56 = vpop.f32.mrf.mxu1  ;;  %v4773_v63 = vld [vmem:[#allocation3 + $0x109] sm:$0xff] }
 0x663   : > { %v12368_v36 = vld [vmem:[#allocation3 + $0x108] sm:$0xff]  ;;  %v4261_v60 = vadd.f32 %v9533_v56, %v12149_v2  ;;  %4859 = vrot.lane.b32.xlu0 %v4773_v63, %s9749_s29 }
 0x664   : > { %4741 = vst.msk [vmem:[#allocation5 + $0xb0] sm:$0xff] %vm299_vm11, %v12368_v36  ;;  %v4252_v41 = vpop.f32.mrf.mxu1  ;;  %v12377_v29 = vld [vmem:[#allocation3 + $0x128] sm:$0xff] }
 0x665   : > { %v4575_v19 = vadd.f32 %v4527_v43, %v4261_v60  ;;  %v4253_v22 = vadd.f32 %v12149_v2, %v4252_v41  ;;  %4744 = vst.msk [vmem:[#allocation5 + $0xc8] sm:$0xff] %vm299_vm11, %v12377_v29  ;;  %v4776_v20 = vld [vmem:[#allocation3 + $0x129] sm:$0xff]  ;;  %v4535_v43 = vadd.f32 %v12144_v38, %v4534_v25  ;;  %v12446_v25 = vld [vmem:[#allocation3 + $0x1a] sm:$0xff] }
 0x666   : > { %v9534_v42 = vpop.f32.mrf.mxu1  ;;  %v4774_v23 = vld [vmem:[#allocation3 + $0x111] sm:$0xff] }
 0x667   : > { %v4607_v15 = vmax.f32 %v4575_v19, 0.0  ;;  %v4573_v27 = vadd.f32 %v4519_v3, %v4253_v22  ;;  %v4264_v49 = vadd.f32 %v9534_v42, %v12149_v2  ;;  %4861 = vrot.lane.b32.xlu1 %v4774_v23, %s9749_s29  ;;  %4863 = vrot.lane.b32.xlu0 %v4775_v6, %s9749_s29  ;;  %v12385_v5 = vld [vmem:[#allocation3 + $0x110] sm:$0xff]  ;;  %v4537_v3 = vpop.f32.mrf.mxu0  ;;  %v4546_v22 = vadd.f32 %v9572_v47, %v12144_v38 }
 0x668   : > { %v4255_v8 = vpop.f32.mrf.mxu1  ;;  %4742 = vst.msk [vmem:[#allocation5 + $0xb8] sm:$0xff] %vm299_vm11, %v12385_v5  ;;  %v12453_v47 = vld [vmem:[#allocation3 + $0x32] sm:$0xff] }
 0x669   : > { %4639 = vst.msk [vmem:[#allocation4 + $0xd0] sm:$0xff] %vm299_vm11, %v4607_v15  ;;  %4671 = vst.msk [vmem:[#allocation3 + $0x151] sm:$0xff] %vm299_vm11, %v4607_v15  ;;  %v4605_v21 = vmax.f32 %v4573_v27, 0.0  ;;  %v4576_v7 = vadd.f32 %v4530_v34, %v4264_v49  ;;  %v4256_v48 = vadd.f32 %v12149_v2, %v4255_v8  ;;  %v4538_v27 = vadd.f32 %v12144_v38, %v4537_v3  ;;  %v12484_v3 = vld [vmem:[#allocation3 + $0x82] sm:$0xff] }
 0x66b   : > { %4637 = vst.msk [vmem:[#allocation4 + $0xc0] sm:$0xff] %vm299_vm11, %v4605_v21  ;;  %4669 = vst.msk [vmem:[#allocation3 + $0x139] sm:$0xff] %vm299_vm11, %v4605_v21  ;;  %v4608_v9 = vmax.f32 %v4576_v7, 0.0  ;;  %v4574_v18 = vadd.f32 %v4522_v54, %v4256_v48  ;;  %4865 = vrot.lane.b32.xlu1 %v4776_v20, %s9749_s29 }
 0x66d   : > { %4640 = vst.msk [vmem:[#allocation4 + $0xd8] sm:$0xff] %vm299_vm11, %v4608_v9  ;;  %4672 = vst.msk [vmem:[#allocation3 + $0x159] sm:$0xff] %vm299_vm11, %v4608_v9  ;;  %v4606_v52 = vmax.f32 %v4574_v18, 0.0 }
 0x66f   : > { %4638 = vst.msk [vmem:[#allocation4 + $0xc8] sm:$0xff] %vm299_vm11, %v4606_v52  ;;  %4670 = vst.msk [vmem:[#allocation3 + $0x141] sm:$0xff] %vm299_vm11, %v4606_v52  ;;  %v4944_v52 = vld [vmem:[#allocation3 + $0xa] sm:$0xff] }
 0x670   : > { %v12399_v39 = vld [vmem:[#allocation3 + $0x150] sm:$0xff] }
 0x671   : > { %4747 = vst.msk [vmem:[#allocation5 + $0xe0] sm:$0xff] %vm299_vm11, %v12399_v39  ;;  %v4779_v19 = vld [vmem:[#allocation3 + $0x151] sm:$0xff] }
 0x672   : > { %v9537_v40 = vpop.f32.mrf.mxu1  ;;  %v4777_v45 = vld [vmem:[#allocation3 + $0x139] sm:$0xff] }
 0x673   : > { %v12404_v1 = vld [vmem:[#allocation3 + $0x138] sm:$0xff]  ;;  %v4277_v62 = vadd.f32 %v9537_v40, %v12149_v2  ;;  %4867 = vrot.lane.b32.xlu0 %v4777_v45, %s9749_s29  ;;  %v12461_v45 = vld [vmem:[#allocation3 + $0x4a] sm:$0xff] }
 0x674   : > { %4745 = vst.msk [vmem:[#allocation5 + $0xd0] sm:$0xff] %vm299_vm11, %v12404_v1  ;;  %v4268_v11 = vpop.f32.mrf.mxu1  ;;  %v12412_v60 = vld [vmem:[#allocation3 + $0x158] sm:$0xff] }
 0x675   : > { %v4579_v56 = vadd.f32 %v4543_v46, %v4277_v62  ;;  %v4269_v63 = vadd.f32 %v12149_v2, %v4268_v11  ;;  %4748 = vst.msk [vmem:[#allocation5 + $0xe8] sm:$0xff] %vm299_vm11, %v12412_v60  ;;  %v4780_v21 = vld [vmem:[#allocation3 + $0x159] sm:$0xff]  ;;  %v12451_v46 = vld [vmem:[#allocation3 + $0x22] sm:$0xff] }
 0x676   : > { %v9538_v41 = vpop.f32.mrf.mxu1  ;;  %v4778_v24 = vld [vmem:[#allocation3 + $0x141] sm:$0xff]  ;;  %v12467_v62 = vld [vmem:[#allocation3 + $0x52] sm:$0xff] }
 0x677   : > { %v4611_v34 = vmax.f32 %v4579_v56, 0.0  ;;  %v4577_v42 = vadd.f32 %v4535_v43, %v4269_v63  ;;  %v4280_v23 = vadd.f32 %v9538_v41, %v12149_v2  ;;  %4869 = vrot.lane.b32.xlu1 %v4778_v24, %s9749_s29  ;;  %4871 = vrot.lane.b32.xlu0 %v4779_v19, %s9749_s29  ;;  %v12420_v6 = vld [vmem:[#allocation3 + $0x140] sm:$0xff]  ;;  %v12475_v43 = vld [vmem:[#allocation3 + $0x6a] sm:$0xff]  ;;  %v12486_v41 = vld [vmem:[#allocation3 + $0x92] sm:$0xff] }
 0x678   : > { %v4271_v15 = vpop.f32.mrf.mxu1  ;;  %4746 = vst.msk [vmem:[#allocation5 + $0xd8] sm:$0xff] %vm299_vm11, %v12420_v6  ;;  %v12459_v40 = vld [vmem:[#allocation3 + $0x3a] sm:$0xff]  ;;  %v12469_v11 = vld [vmem:[#allocation3 + $0x62] sm:$0xff] }
 0x679   : > { %4643 = vst.msk [vmem:[#allocation4 + $0xf0] sm:$0xff] %vm299_vm11, %v4611_v34  ;;  %4675 = vst.msk [vmem:[#allocation3 + $0x181] sm:$0xff] %vm299_vm11, %v4611_v34  ;;  %v4609_v49 = vmax.f32 %v4577_v42, 0.0  ;;  %v4580_v54 = vadd.f32 %v4546_v22, %v4280_v23  ;;  %v4272_v8 = vadd.f32 %v12149_v2, %v4271_v15  ;;  %v12477_v56 = vld [vmem:[#allocation3 + $0x7a] sm:$0xff]  ;;  %v12496_v34 = vld [vmem:[#allocation3 + $0xaa] sm:$0xff] }
 0x67a   : > { %v12494_v22 = vld [vmem:[#allocation3 + $0x9a] sm:$0xff]  ;;  %v12504_v15 = vld [vmem:[#allocation3 + $0xb2] sm:$0xff] }
 0x67b   : > { %4641 = vst.msk [vmem:[#allocation4 + $0xe0] sm:$0xff] %vm299_vm11, %v4609_v49  ;;  %4673 = vst.msk [vmem:[#allocation3 + $0x169] sm:$0xff] %vm299_vm11, %v4609_v49  ;;  %v4612_v7 = vmax.f32 %v4580_v54, 0.0  ;;  %v4578_v48 = vadd.f32 %v4538_v27, %v4272_v8  ;;  %4873 = vrot.lane.b32.xlu1 %v4780_v21, %s9749_s29  ;;  %v12506_v27 = vld [vmem:[#allocation3 + $0xc2] sm:$0xff]  ;;  %v12514_v8 = vld [vmem:[#allocation3 + $0xca] sm:$0xff] }
 0x67c   : > { %v4961_v21 = vld [vmem:[#allocation3 + $0xda] sm:$0xff] }
 0x67d   : > { %4644 = vst.msk [vmem:[#allocation4 + $0xf8] sm:$0xff] %vm299_vm11, %v4612_v7  ;;  %4676 = vst.msk [vmem:[#allocation3 + $0x189] sm:$0xff] %vm299_vm11, %v4612_v7  ;;  %v4610_v20 = vmax.f32 %v4578_v48, 0.0 }
 0x67f   : > { %4642 = vst.msk [vmem:[#allocation4 + $0xe8] sm:$0xff] %vm299_vm11, %v4610_v20  ;;  %4674 = vst.msk [vmem:[#allocation3 + $0x171] sm:$0xff] %vm299_vm11, %v4610_v20  ;;  %v4962_v20 = vld [vmem:[#allocation3 + $0xe2] sm:$0xff] }
 0x682   : > { %v4781_v38 = vld [vmem:[#allocation3 + $0x169] sm:$0xff] }
 0x683   : > { %v12435_v2 = vld [vmem:[#allocation3 + $0x168] sm:$0xff]  ;;  %4875 = vrot.lane.b32.xlu0 %v4781_v38, %s9749_s29  ;;  %v4963_v38 = vld [vmem:[#allocation3 + $0xf2] sm:$0xff] }
 0x684   : > { %4749 = vst.msk [vmem:[#allocation5 + $0xf0] sm:$0xff] %vm299_vm11, %v12435_v2 }
 0x686   : > { %v4782_v9 = vld [vmem:[#allocation3 + $0x171] sm:$0xff] }
 0x687   : > { %4877 = vrot.lane.b32.xlu1 %v4782_v9, %s9749_s29  ;;  %5007 = vrot.lane.b32.xlu0 %v4943_v31, %s9751_s7  ;;  %v12442_v18 = vld [vmem:[#allocation3 + $0x170] sm:$0xff] }
 0x688   : > { %4750 = vst.msk [vmem:[#allocation5 + $0xf8] sm:$0xff] %vm299_vm11, %v12442_v18 }
 0x68b   : > { %5009 = vrot.lane.b32.xlu1 %v4944_v52, %s9751_s7  ;;  %5011 = vrot.lane.b32.xlu0 %v12446_v25, %s9751_s7  ;;  %v4964_v52 = vld [vmem:[#allocation3 + $0xfa] sm:$0xff] }
 0x68f   : > { %5013 = vrot.lane.b32.xlu1 %v12451_v46, %s9751_s7  ;;  %5015 = vrot.lane.b32.xlu0 %v12453_v47, %s9751_s7 }
 0x693   : > { %5017 = vrot.lane.b32.xlu1 %v12459_v40, %s9751_s7  ;;  %5019 = vrot.lane.b32.xlu0 %v12461_v45, %s9751_s7 }
 0x697   : > { %5021 = vrot.lane.b32.xlu1 %v12467_v62, %s9751_s7  ;;  %5023 = vrot.lane.b32.xlu0 %v12469_v11, %s9751_s7 }
 0x69b   : > { %5025 = vrot.lane.b32.xlu1 %v12475_v43, %s9751_s7  ;;  %5027 = vrot.lane.b32.xlu0 %v12477_v56, %s9751_s7 }
 0x69d   : > { %v4820_v63 = vpop.permute.xlu0 %4819 }
 0x69e   : > { %4913 = vst.msk [vmem:[#allocation5 + $0x10] sm:$0xff] %vm2604_vm1, %v4820_v63  ;;  %v4965_v63 = vld [vmem:[#allocation3 + $0x10a] sm:$0xff] }
 0x69f   : > { %5029 = vrot.lane.b32.xlu1 %v12484_v3, %s9751_s7  ;;  %5031 = vrot.lane.b32.xlu0 %v12486_v41, %s9751_s7 }
 0x6a1   : > { %v4822_v24 = vpop.permute.xlu1 %4821  ;;  %v4824_v19 = vpop.permute.xlu0 %4823 }
 0x6a2   : > { %4914 = vst.msk [vmem:[#allocation5 + $0x18] sm:$0xff] %vm2604_vm1, %v4822_v24  ;;  %4915 = vst.msk [vmem:[#allocation5 + $0x20] sm:$0xff] %vm2604_vm1, %v4824_v19 }
 0x6a3   : > { %5033 = vrot.lane.b32.xlu1 %v12494_v22, %s9751_s7  ;;  %5035 = vrot.lane.b32.xlu0 %v12496_v34, %s9751_s7 }
 0x6a5   : > { %v4826_v42 = vpop.permute.xlu1 %4825  ;;  %v4828_v23 = vpop.permute.xlu0 %4827 }
 0x6a6   : > { %4916 = vst.msk [vmem:[#allocation5 + $0x28] sm:$0xff] %vm2604_vm1, %v4826_v42  ;;  %4917 = vst.msk [vmem:[#allocation5 + $0x30] sm:$0xff] %vm2604_vm1, %v4828_v23  ;;  %v4966_v42 = vld [vmem:[#allocation3 + $0x112] sm:$0xff]  ;;  %v4967_v23 = vld [vmem:[#allocation3 + $0x122] sm:$0xff] }
 0x6a7   : > { %5037 = vrot.lane.b32.xlu1 %v12504_v15, %s9751_s7  ;;  %5039 = vrot.lane.b32.xlu0 %v12506_v27, %s9751_s7 }
 0x6a9   : > { %v4830_v49 = vpop.permute.xlu1 %4829  ;;  %v4832_v54 = vpop.permute.xlu0 %4831 }
 0x6aa   : > { %4918 = vst.msk [vmem:[#allocation5 + $0x38] sm:$0xff] %vm2604_vm1, %v4830_v49  ;;  %4919 = vst.msk [vmem:[#allocation5 + $0x40] sm:$0xff] %vm2604_vm1, %v4832_v54 }
 0x6ab   : > { %5041 = vrot.lane.b32.xlu1 %v12514_v8, %s9751_s7  ;;  %5043 = vrot.lane.b32.xlu0 %v4961_v21, %s9751_s7  ;;  %v4968_v21 = vld [vmem:[#allocation3 + $0x12a] sm:$0xff] }
 0x6ad   : > { %v4834_v7 = vpop.permute.xlu1 %4833  ;;  %v4836_v48 = vpop.permute.xlu0 %4835 }
 0x6ae   : > { %4920 = vst.msk [vmem:[#allocation5 + $0x48] sm:$0xff] %vm2604_vm1, %v4834_v7  ;;  %4921 = vst.msk [vmem:[#allocation5 + $0x50] sm:$0xff] %vm2604_vm1, %v4836_v48  ;;  %v4969_v7 = vld [vmem:[#allocation3 + $0x13a] sm:$0xff] }
 0x6af   : > { %5045 = vrot.lane.b32.xlu1 %v4962_v20, %s9751_s7  ;;  %5047 = vrot.lane.b32.xlu0 %v4963_v38, %s9751_s7  ;;  %v4970_v20 = vld [vmem:[#allocation3 + $0x142] sm:$0xff]  ;;  %v4971_v38 = vld [vmem:[#allocation3 + $0x152] sm:$0xff] }
 0x6b1   : > { %v4838_v31 = vpop.permute.xlu1 %4837  ;;  %v4840_v9 = vpop.permute.xlu0 %4839 }
 0x6b2   : > { %4922 = vst.msk [vmem:[#allocation5 + $0x58] sm:$0xff] %vm2604_vm1, %v4838_v31  ;;  %4923 = vst.msk [vmem:[#allocation5 + $0x60] sm:$0xff] %vm2604_vm1, %v4840_v9  ;;  %v4972_v31 = vld [vmem:[#allocation3 + $0x15a] sm:$0xff]  ;;  %v4973_v9 = vld [vmem:[#allocation3 + $0x16a] sm:$0xff] }
 0x6b3   : > { %5049 = vrot.lane.b32.xlu1 %v4964_v52, %s9751_s7  ;;  %5051 = vrot.lane.b32.xlu0 %v4965_v63, %s9751_s7  ;;  %v4974_v63 = vld [vmem:[#allocation3 + $0x172] sm:$0xff] }
 0x6b5   : > { %v4842_v24 = vpop.permute.xlu1 %4841  ;;  %v4844_v19 = vpop.permute.xlu0 %4843 }
 0x6b6   : > { %4924 = vst.msk [vmem:[#allocation5 + $0x68] sm:$0xff] %vm2604_vm1, %v4842_v24  ;;  %4925 = vst.msk [vmem:[#allocation5 + $0x70] sm:$0xff] %vm2604_vm1, %v4844_v19 }
 0x6b7   : > { %5053 = vrot.lane.b32.xlu1 %v4966_v42, %s9751_s7  ;;  %5055 = vrot.lane.b32.xlu0 %v4967_v23, %s9751_s7 }
 0x6b9   : > { %v4846_v49 = vpop.permute.xlu1 %4845  ;;  %v4848_v54 = vpop.permute.xlu0 %4847 }
 0x6ba   : > { %4926 = vst.msk [vmem:[#allocation5 + $0x78] sm:$0xff] %vm2604_vm1, %v4846_v49  ;;  %4927 = vst.msk [vmem:[#allocation5 + $0x80] sm:$0xff] %vm2604_vm1, %v4848_v54 }
 0x6bb   : > { %5057 = vrot.lane.b32.xlu1 %v4968_v21, %s9751_s7  ;;  %5059 = vrot.lane.b32.xlu0 %v4969_v7, %s9751_s7 }
 0x6bd   : > { %v4850_v48 = vpop.permute.xlu1 %4849 }
 0x6be   : > { %4928 = vst.msk [vmem:[#allocation5 + $0x88] sm:$0xff] %vm2604_vm1, %v4850_v48  ;;  %v9725_v48 = vld [vmem:[%s14314_s2 + $0x44] ss:$0 sps:$4 sm:$0xff]  }
 0x6bf   : > { %5061 = vrot.lane.b32.xlu1 %v4970_v20, %s9751_s7  ;;  %5063 = vrot.lane.b32.xlu0 %v4971_v38, %s9751_s7  ;;  %v6416_v20 = vsel %vm4118_vm6, %v9725_v48, 0 }
 0x6c0   : > { %9694 = vmatprep.subr.msk.bf16.mxu1 %vm4118_vm6, %v9725_v48  ;;  %v5903_v48 = vld [vmem:[#allocation3 + $0x31] sm:$0xff] }
 0x6c1   : > { %9574 = vmatpush3.bf16.msra.mxu1 %v6416_v20 }
 0x6c3   : > { %5065 = vrot.lane.b32.xlu1 %v4972_v31, %s9751_s7  ;;  %5067 = vrot.lane.b32.xlu0 %v4973_v9, %s9751_s7  ;;  %v9726_v9 = vld [vmem:[%s14314_s2 + $0x3c] sm:$0xff]  }
 0x6c4   : > { %9575 = vmatprep.subr.bf16.mxu1 %v9726_v9 }
 0x6c5   : > { %v4852_v52 = vpop.permute.xlu0 %4851  ;;  %9576 = vmatpush3.bf16.msra.mxu1 %v9726_v9 }
 0x6c6   : > { %4929 = vst.msk [vmem:[#allocation5 + $0x90] sm:$0xff] %vm2604_vm1, %v4852_v52 }
 0x6c7   : > { %5069 = vrot.lane.b32.xlu1 %v4974_v63, %s9751_s7  ;;  %5199 = vrot.lane.b32.xlu0 %v12188_v33, %s9753_s9 }
 0x6c9   : > { %v4854_v24 = vpop.permute.xlu1 %4853  ;;  %v4856_v19 = vpop.permute.xlu0 %4855 }
 0x6ca   : > { %4930 = vst.msk [vmem:[#allocation5 + $0x98] sm:$0xff] %vm2604_vm1, %v4854_v24  ;;  %4931 = vst.msk [vmem:[#allocation5 + $0xa0] sm:$0xff] %vm2604_vm1, %v4856_v19 }
 0x6cb   : > { %5201 = vrot.lane.b32.xlu1 %v12218_v55, %s9753_s9  ;;  %5203 = vrot.lane.b32.xlu0 %v12180_v59, %s9753_s9 }
 0x6cd   : > { %v4858_v42 = vpop.permute.xlu1 %4857 }
 0x6ce   : > { %4932 = vst.msk [vmem:[#allocation5 + $0xa8] sm:$0xff] %vm2604_vm1, %v4858_v42  ;;  %v5327_v42 = vld [vmem:[#allocation3 + $0x19] sm:$0xff] }
 0x6cf   : > { %5205 = vrot.lane.b32.xlu1 %v12202_v26, %s9753_s9  ;;  %5207 = vrot.lane.b32.xlu0 %v12232_v30, %s9753_s9 }
 0x6d3   : > { %5209 = vrot.lane.b32.xlu1 %v12257_v58, %s9753_s9  ;;  %5211 = vrot.lane.b32.xlu0 %v12222_v13, %s9753_s9 }
 0x6d5   : > { %v4860_v33 = vpop.permute.xlu0 %4859 }
 0x6d6   : > { %4933 = vst.msk [vmem:[#allocation5 + $0xb0] sm:$0xff] %vm2604_vm1, %v4860_v33 }
 0x6d7   : > { %5213 = vrot.lane.b32.xlu1 %v12247_v35, %s9753_s9  ;;  %5215 = vrot.lane.b32.xlu0 %v12268_v12, %s9753_s9 }
 0x6d9   : > { %v4862_v55 = vpop.permute.xlu1 %4861  ;;  %v4864_v23 = vpop.permute.xlu0 %4863 }
 0x6da   : > { %4934 = vst.msk [vmem:[#allocation5 + $0xb8] sm:$0xff] %vm2604_vm1, %v4862_v55  ;;  %4935 = vst.msk [vmem:[#allocation5 + $0xc0] sm:$0xff] %vm2604_vm1, %v4864_v23 }
 0x6db   : > { %5217 = vrot.lane.b32.xlu1 %v12286_v17, %s9753_s9  ;;  %5219 = vrot.lane.b32.xlu0 %v12261_v53, %s9753_s9 }
 0x6dd   : > { %v4866_v49 = vpop.permute.xlu1 %4865 }
 0x6de   : > { %4936 = vst.msk [vmem:[#allocation5 + $0xc8] sm:$0xff] %vm2604_vm1, %v4866_v49 }
 0x6df   : > { %5221 = vrot.lane.b32.xlu1 %v12278_v32, %s9753_s9  ;;  %5223 = vrot.lane.b32.xlu0 %v12295_v0, %s9753_s9 }
 0x6e3   : > { %5225 = vrot.lane.b32.xlu1 %v12313_v50, %s9753_s9  ;;  %5227 = vrot.lane.b32.xlu0 %v12290_v44, %s9753_s9 }
 0x6e5   : > { %v4868_v54 = vpop.permute.xlu0 %4867 }
 0x6e6   : > { %4937 = vst.msk [vmem:[#allocation5 + $0xd0] sm:$0xff] %vm2604_vm1, %v4868_v54 }
 0x6e7   : > { %5229 = vrot.lane.b32.xlu1 %v12305_v14, %s9753_s9  ;;  %5231 = vrot.lane.b32.xlu0 %v12332_v10, %s9753_s9 }
 0x6e9   : > { %v4870_v21 = vpop.permute.xlu1 %4869  ;;  %v4872_v7 = vpop.permute.xlu0 %4871 }
 0x6ea   : > { %4938 = vst.msk [vmem:[#allocation5 + $0xd8] sm:$0xff] %vm2604_vm1, %v4870_v21  ;;  %4939 = vst.msk [vmem:[#allocation5 + $0xe0] sm:$0xff] %vm2604_vm1, %v4872_v7 }
 0x6eb   : > { %5233 = vrot.lane.b32.xlu1 %v12349_v16, %s9753_s9  ;;  %5235 = vrot.lane.b32.xlu0 %v12327_v4, %s9753_s9 }
 0x6ed   : > { %v4874_v38 = vpop.permute.xlu1 %4873 }
 0x6ee   : > { %4940 = vst.msk [vmem:[#allocation5 + $0xe8] sm:$0xff] %vm2604_vm1, %v4874_v38  ;;  %v5905_v38 = vld [vmem:[#allocation3 + $0x49] sm:$0xff] }
 0x6ef   : > { %5237 = vrot.lane.b32.xlu1 %v12341_v61, %s9753_s9  ;;  %5239 = vrot.lane.b32.xlu0 %v12368_v36, %s9753_s9 }
 0x6f3   : > { %5241 = vrot.lane.b32.xlu1 %v12385_v5, %s9753_s9  ;;  %5243 = vrot.lane.b32.xlu0 %v12363_v37, %s9753_s9 }
 0x6f5   : > { %v4876_v31 = vpop.permute.xlu0 %4875 }
 0x6f6   : > { %4941 = vst.msk [vmem:[#allocation5 + $0xf0] sm:$0xff] %vm2604_vm1, %v4876_v31 }
 0x6f7   : > { %5245 = vrot.lane.b32.xlu1 %v12377_v29, %s9753_s9  ;;  %5247 = vrot.lane.b32.xlu0 %v12404_v1, %s9753_s9 }
 0x6f9   : > { %v4878_v52 = vpop.permute.xlu1 %4877  ;;  %v5008_v63 = vpop.permute.xlu0 %5007 }
 0x6fa   : > { %4942 = vst.msk [vmem:[#allocation5 + $0xf8] sm:$0xff] %vm2604_vm1, %v4878_v52 }
 0x6fb   : > { %5103 = vst.msk [vmem:[#allocation5] sm:$0xff] %vm2797_vm2, %v5008_v63  ;;  %5249 = vrot.lane.b32.xlu1 %v12420_v6, %s9753_s9  ;;  %5251 = vrot.lane.b32.xlu0 %v12399_v39, %s9753_s9  ;;  %v5165_v6 = vld [vmem:[#allocation3 + $0x180] sm:$0xff] }
 0x6fc   : > { %v9727_v39 = vld [vmem:[%s14314_s2 + $0x34] sm:$0xff]  }
 0x6fd   : > { %v5010_v37 = vpop.permute.xlu1 %5009  ;;  %v5012_v29 = vpop.permute.xlu0 %5011  ;;  %9577 = vmatprep.subr.bf16.mxu1 %v9727_v39 }
 0x6fe   : > { %5104 = vst.msk [vmem:[#allocation5 + $0x8] sm:$0xff] %vm2797_vm2, %v5010_v37  ;;  %5105 = vst.msk [vmem:[#allocation5 + $0x10] sm:$0xff] %vm2797_vm2, %v5012_v29  ;;  %9578 = vmatpush3.bf16.msra.mxu1 %v9727_v39  ;;  %v5334_v39 = vld [vmem:[#allocation3 + $0x69] sm:$0xff] }
 0x6ff   : > { %5253 = vrot.lane.b32.xlu1 %v12412_v60, %s9753_s9  ;;  %5255 = vrot.lane.b32.xlu0 %v12435_v2, %s9753_s9  ;;  %v5166_v2 = vld [vmem:[#allocation3 + $0x188] sm:$0xff] }
 0x701   : > { %v5014_v1 = vpop.permute.xlu1 %5013  ;;  %v5016_v24 = vpop.permute.xlu0 %5015 }
 0x702   : > { %5106 = vst.msk [vmem:[#allocation5 + $0x18] sm:$0xff] %vm2797_vm2, %v5014_v1  ;;  %5107 = vst.msk [vmem:[#allocation5 + $0x20] sm:$0xff] %vm2797_vm2, %v5016_v24 }
 0x703   : > { %5257 = vrot.lane.b32.xlu1 %v12442_v18, %s9753_s9  ;;  %5259 = vrot.lane.b32.xlu0 %v5165_v6, %s9753_s9 }
 0x705   : > { %v5018_v60 = vpop.permute.xlu1 %5017  ;;  %v5020_v19 = vpop.permute.xlu0 %5019 }
 0x706   : > { %5108 = vst.msk [vmem:[#allocation5 + $0x28] sm:$0xff] %vm2797_vm2, %v5018_v60  ;;  %5109 = vst.msk [vmem:[#allocation5 + $0x30] sm:$0xff] %vm2797_vm2, %v5020_v19 }
 0x707   : > { %5261 = vrot.lane.b32.xlu1 %v5166_v2, %s9753_s9  ;;  %5391 = vrot.lane.b32.xlu0 %v5327_v42, %s9755_s15 }
 0x709   : > { %v5022_v18 = vpop.permute.xlu1 %5021  ;;  %v5024_v33 = vpop.permute.xlu0 %5023 }
 0x70a   : > { %5110 = vst.msk [vmem:[#allocation5 + $0x38] sm:$0xff] %vm2797_vm2, %v5022_v18  ;;  %5111 = vst.msk [vmem:[#allocation5 + $0x40] sm:$0xff] %vm2797_vm2, %v5024_v33 }
 0x70b   : > { %5393 = vrot.lane.b32.xlu1 %v12204_v57, %s9755_s15  ;;  %5395 = vrot.lane.b32.xlu0 %v12206_v28, %s9755_s15  ;;  %v9728_v57 = vld [vmem:[%s14314_s2 + $0x2c] sm:$0xff]  }
 0x70c   : > { %9579 = vmatprep.subr.bf16.mxu1 %v9728_v57 }
 0x70d   : > { %v5026_v55 = vpop.permute.xlu1 %5025  ;;  %v5028_v23 = vpop.permute.xlu0 %5027  ;;  %9580 = vmatpush3.bf16.msra.mxu1 %v9728_v57 }
 0x70e   : > { %5112 = vst.msk [vmem:[#allocation5 + $0x48] sm:$0xff] %vm2797_vm2, %v5026_v55  ;;  %5113 = vst.msk [vmem:[#allocation5 + $0x50] sm:$0xff] %vm2797_vm2, %v5028_v23 }
 0x70f   : > { %5397 = vrot.lane.b32.xlu1 %v12230_v51, %s9755_s15  ;;  %5583 = vrot.lane.b32.xlu0 %v12446_v25, %s9756_s20 }
 0x711   : > { %v5030_v49 = vpop.permute.xlu1 %5029  ;;  %v5032_v54 = vpop.permute.xlu0 %5031 }
 0x712   : > { %5114 = vst.msk [vmem:[#allocation5 + $0x58] sm:$0xff] %vm2797_vm2, %v5030_v49  ;;  %5115 = vst.msk [vmem:[#allocation5 + $0x60] sm:$0xff] %vm2797_vm2, %v5032_v54 }
 0x713   : > { %5585 = vrot.lane.b32.xlu1 %v12451_v46, %s9756_s20  ;;  %5587 = vrot.lane.b32.xlu0 %v12453_v47, %s9756_s20 }
 0x715   : > { %v5034_v28 = vpop.permute.xlu1 %5033  ;;  %v5036_v51 = vpop.permute.xlu0 %5035 }
 0x716   : > { %5116 = vst.msk [vmem:[#allocation5 + $0x68] sm:$0xff] %vm2797_vm2, %v5034_v28  ;;  %5117 = vst.msk [vmem:[#allocation5 + $0x70] sm:$0xff] %vm2797_vm2, %v5036_v51 }
 0x717   : > { %5589 = vrot.lane.b32.xlu1 %v12459_v40, %s9756_s20  ;;  %5775 = vrot.lane.b32.xlu0 %v12180_v59, %s9757_s23  ;;  %v9729_v59 = vld [vmem:[%s14314_s2 + $0x24] sm:$0xff]  }
 0x718   : > { %9581 = vmatprep.subr.bf16.mxu1 %v9729_v59 }
 0x719   : > { %v5038_v25 = vpop.permute.xlu1 %5037  ;;  %v5040_v21 = vpop.permute.xlu0 %5039  ;;  %9582 = vmatpush3.bf16.msra.mxu1 %v9729_v59 }
 0x71a   : > { %5118 = vst.msk [vmem:[#allocation5 + $0x78] sm:$0xff] %vm2797_vm2, %v5038_v25  ;;  %5119 = vst.msk [vmem:[#allocation5 + $0x80] sm:$0xff] %vm2797_vm2, %v5040_v21 }
 0x71b   : > { %5777 = vrot.lane.b32.xlu1 %v12202_v26, %s9757_s23  ;;  %5779 = vrot.lane.b32.xlu0 %v12232_v30, %s9757_s23  ;;  %v5904_v30 = vld [vmem:[#allocation3 + $0x39] sm:$0xff] }
 0x71d   : > { %v5042_v46 = vpop.permute.xlu1 %5041  ;;  %v5044_v7 = vpop.permute.xlu0 %5043 }
 0x71e   : > { %5120 = vst.msk [vmem:[#allocation5 + $0x88] sm:$0xff] %vm2797_vm2, %v5042_v46  ;;  %5121 = vst.msk [vmem:[#allocation5 + $0x90] sm:$0xff] %vm2797_vm2, %v5044_v7  ;;  %v5338_v46 = vld [vmem:[#allocation3 + $0x99] sm:$0xff] }
 0x71f   : > { %5781 = vrot.lane.b32.xlu1 %v12257_v58, %s9757_s23  ;;  %5967 = vrot.lane.b32.xlu0 %v5903_v48, %s9758_s25  ;;  %v5906_v58 = vld [vmem:[#allocation3 + $0x51] sm:$0xff] }
 0x721   : > { %v5046_v26 = vpop.permute.xlu1 %5045  ;;  %v5048_v20 = vpop.permute.xlu0 %5047 }
 0x722   : > { %5122 = vst.msk [vmem:[#allocation5 + $0x98] sm:$0xff] %vm2797_vm2, %v5046_v26  ;;  %5123 = vst.msk [vmem:[#allocation5 + $0xa0] sm:$0xff] %vm2797_vm2, %v5048_v20 }
 0x723   : > { %5969 = vrot.lane.b32.xlu1 %v5904_v30, %s9758_s25  ;;  %5971 = vrot.lane.b32.xlu0 %v5905_v38, %s9758_s25 }
 0x725   : > { %v5050_v31 = vpop.permute.xlu1 %5049  ;;  %v5052_v9 = vpop.permute.xlu0 %5051 }
 0x726   : > { %5124 = vst.msk [vmem:[#allocation5 + $0xa8] sm:$0xff] %vm2797_vm2, %v5050_v31  ;;  %5125 = vst.msk [vmem:[#allocation5 + $0xb0] sm:$0xff] %vm2797_vm2, %v5052_v9 }
 0x727   : > { %5973 = vrot.lane.b32.xlu1 %v5906_v58, %s9758_s25  ;;  %6159 = vrot.lane.b32.xlu0 %v12453_v47, %s9759_s19 }
 0x729   : > { %v5054_v52 = vpop.permute.xlu1 %5053  ;;  %v5056_v63 = vpop.permute.xlu0 %5055 }
 0x72a   : > { %5126 = vst.msk [vmem:[#allocation5 + $0xb8] sm:$0xff] %vm2797_vm2, %v5054_v52  ;;  %5127 = vst.msk [vmem:[#allocation5 + $0xc0] sm:$0xff] %vm2797_vm2, %v5056_v63 }
 0x72b   : > { %6161 = vrot.lane.b32.xlu1 %v12459_v40, %s9759_s19  ;;  %6163 = vrot.lane.b32.xlu0 %v12461_v45, %s9759_s19  ;;  %v5333_v40 = vld [vmem:[#allocation3 + $0x61] sm:$0xff] }
 0x72d   : > { %v5058_v37 = vpop.permute.xlu1 %5057  ;;  %v5060_v29 = vpop.permute.xlu0 %5059 }
 0x72e   : > { %5128 = vst.msk [vmem:[#allocation5 + $0xc8] sm:$0xff] %vm2797_vm2, %v5058_v37  ;;  %5129 = vst.msk [vmem:[#allocation5 + $0xd0] sm:$0xff] %vm2797_vm2, %v5060_v29 }
 0x72f   : > { %6165 = vrot.lane.b32.xlu1 %v12467_v62, %s9759_s19  ;;  %5399 = vrot.lane.b32.xlu0 %v5905_v38, %s9755_s15 }
 0x731   : > { %v5062_v47 = vpop.permute.xlu1 %5061  ;;  %v5064_v1 = vpop.permute.xlu0 %5063 }
 0x732   : > { %5130 = vst.msk [vmem:[#allocation5 + $0xd8] sm:$0xff] %vm2797_vm2, %v5062_v47  ;;  %5131 = vst.msk [vmem:[#allocation5 + $0xe0] sm:$0xff] %vm2797_vm2, %v5064_v1  ;;  %v5342_v1 = vld [vmem:[#allocation3 + $0xc9] sm:$0xff] }
 0x733   : > { %5401 = vrot.lane.b32.xlu1 %v5906_v58, %s9755_s15  ;;  %5403 = vrot.lane.b32.xlu0 %v5333_v40, %s9755_s15 }
 0x735   : > { %v5066_v24 = vpop.permute.xlu1 %5065  ;;  %v5068_v6 = vpop.permute.xlu0 %5067 }
 0x736   : > { %5132 = vst.msk [vmem:[#allocation5 + $0xe8] sm:$0xff] %vm2797_vm2, %v5066_v24  ;;  %5133 = vst.msk [vmem:[#allocation5 + $0xf0] sm:$0xff] %vm2797_vm2, %v5068_v6 }
 0x737   : > { %5405 = vrot.lane.b32.xlu1 %v5334_v39, %s9755_s15  ;;  %5591 = vrot.lane.b32.xlu0 %v12461_v45, %s9756_s20 }
 0x739   : > { %v5070_v60 = vpop.permute.xlu1 %5069  ;;  %v5200_v19 = vpop.permute.xlu0 %5199 }
 0x73a   : > { %5134 = vst.msk [vmem:[#allocation5 + $0xf8] sm:$0xff] %vm2797_vm2, %v5070_v60 }
 0x73b   : > { %5295 = vst.msk [vmem:[#allocation5] sm:$0xff] %vm2990_vm3, %v5200_v19  ;;  %5593 = vrot.lane.b32.xlu1 %v12467_v62, %s9756_s20  ;;  %5595 = vrot.lane.b32.xlu0 %v12469_v11, %s9756_s20 }
 0x73d   : > { %v5202_v2 = vpop.permute.xlu1 %5201  ;;  %v5204_v42 = vpop.permute.xlu0 %5203 }
 0x73e   : > { %5296 = vst.msk [vmem:[#allocation5 + $0x8] sm:$0xff] %vm2990_vm3, %v5202_v2  ;;  %5297 = vst.msk [vmem:[#allocation5 + $0x10] sm:$0xff] %vm2990_vm3, %v5204_v42  ;;  %v6107_v2 = vld [vmem:[#allocation3 + $0xc2] sm:$0xff] }
 0x73f   : > { %5597 = vrot.lane.b32.xlu1 %v12475_v43, %s9756_s20  ;;  %5783 = vrot.lane.b32.xlu0 %v12222_v13, %s9757_s23 }
 0x741   : > { %v5206_v45 = vpop.permute.xlu1 %5205  ;;  %v5208_v18 = vpop.permute.xlu0 %5207 }
 0x742   : > { %5298 = vst.msk [vmem:[#allocation5 + $0x18] sm:$0xff] %vm2990_vm3, %v5206_v45  ;;  %5299 = vst.msk [vmem:[#allocation5 + $0x20] sm:$0xff] %vm2990_vm3, %v5208_v18  ;;  %v6108_v18 = vld [vmem:[#allocation3 + $0xca] sm:$0xff] }
 0x743   : > { %5785 = vrot.lane.b32.xlu1 %v12247_v35, %s9757_s23  ;;  %5787 = vrot.lane.b32.xlu0 %v12268_v12, %s9757_s23  ;;  %v5909_v35 = vld [vmem:[#allocation3 + $0x79] sm:$0xff] }
 0x745   : > { %v5210_v62 = vpop.permute.xlu1 %5209  ;;  %v5212_v33 = vpop.permute.xlu0 %5211 }
 0x746   : > { %5300 = vst.msk [vmem:[#allocation5 + $0x28] sm:$0xff] %vm2990_vm3, %v5210_v62  ;;  %5301 = vst.msk [vmem:[#allocation5 + $0x30] sm:$0xff] %vm2990_vm3, %v5212_v33  ;;  %v6109_v62 = vld [vmem:[#allocation3 + $0xda] sm:$0xff] }
 0x747   : > { %5789 = vrot.lane.b32.xlu1 %v12286_v17, %s9757_s23  ;;  %5975 = vrot.lane.b32.xlu0 %v5333_v40, %s9758_s25  ;;  %v5910_v17 = vld [vmem:[#allocation3 + $0x81] sm:$0xff] }
 0x749   : > { %v5214_v13 = vpop.permute.xlu1 %5213  ;;  %v5216_v55 = vpop.permute.xlu0 %5215 }
 0x74a   : > { %5302 = vst.msk [vmem:[#allocation5 + $0x38] sm:$0xff] %vm2990_vm3, %v5214_v13  ;;  %5303 = vst.msk [vmem:[#allocation5 + $0x40] sm:$0xff] %vm2990_vm3, %v5216_v55 }
 0x74b   : > { %5977 = vrot.lane.b32.xlu1 %v5334_v39, %s9758_s25  ;;  %5979 = vrot.lane.b32.xlu0 %v5909_v35, %s9758_s25 }
 0x74d   : > { %v5218_v12 = vpop.permute.xlu1 %5217  ;;  %v5220_v23 = vpop.permute.xlu0 %5219 }
 0x74e   : > { %5304 = vst.msk [vmem:[#allocation5 + $0x48] sm:$0xff] %vm2990_vm3, %v5218_v12  ;;  %5305 = vst.msk [vmem:[#allocation5 + $0x50] sm:$0xff] %vm2990_vm3, %v5220_v23  ;;  %v6110_v12 = vld [vmem:[#allocation3 + $0xe2] sm:$0xff] }
 0x74f   : > { %5981 = vrot.lane.b32.xlu1 %v5910_v17, %s9758_s25  ;;  %6167 = vrot.lane.b32.xlu0 %v12469_v11, %s9759_s19 }
 0x751   : > { %v5222_v49 = vpop.permute.xlu1 %5221  ;;  %v5224_v54 = vpop.permute.xlu0 %5223 }
 0x752   : > { %5306 = vst.msk [vmem:[#allocation5 + $0x58] sm:$0xff] %vm2990_vm3, %v5222_v49  ;;  %5307 = vst.msk [vmem:[#allocation5 + $0x60] sm:$0xff] %vm2990_vm3, %v5224_v54 }
 0x753   : > { %6169 = vrot.lane.b32.xlu1 %v12475_v43, %s9759_s19  ;;  %6171 = vrot.lane.b32.xlu0 %v12477_v56, %s9759_s19  ;;  %v5337_v43 = vld [vmem:[#allocation3 + $0x91] sm:$0xff] }
 0x755   : > { %v5226_v57 = vpop.permute.xlu1 %5225  ;;  %v5228_v28 = vpop.permute.xlu0 %5227 }
 0x756   : > { %5308 = vst.msk [vmem:[#allocation5 + $0x68] sm:$0xff] %vm2990_vm3, %v5226_v57  ;;  %5309 = vst.msk [vmem:[#allocation5 + $0x70] sm:$0xff] %vm2990_vm3, %v5228_v28  ;;  %v5345_v28 = vld [vmem:[#allocation3 + $0xf1] sm:$0xff] }
 0x757   : > { %6173 = vrot.lane.b32.xlu1 %v12484_v3, %s9759_s19  ;;  %5407 = vrot.lane.b32.xlu0 %v5909_v35, %s9755_s15 }
 0x759   : > { %v5230_v11 = vpop.permute.xlu1 %5229  ;;  %v5232_v51 = vpop.permute.xlu0 %5231 }
 0x75a   : > { %5310 = vst.msk [vmem:[#allocation5 + $0x78] sm:$0xff] %vm2990_vm3, %v5230_v11  ;;  %5311 = vst.msk [vmem:[#allocation5 + $0x80] sm:$0xff] %vm2990_vm3, %v5232_v51 }
 0x75b   : > { %5409 = vrot.lane.b32.xlu1 %v5910_v17, %s9755_s15  ;;  %5411 = vrot.lane.b32.xlu0 %v5337_v43, %s9755_s15 }
 0x75d   : > { %v5234_v25 = vpop.permute.xlu1 %5233  ;;  %v5236_v21 = vpop.permute.xlu0 %5235 }
 0x75e   : > { %5312 = vst.msk [vmem:[#allocation5 + $0x88] sm:$0xff] %vm2990_vm3, %v5234_v25  ;;  %5313 = vst.msk [vmem:[#allocation5 + $0x90] sm:$0xff] %vm2990_vm3, %v5236_v21  ;;  %v5346_v25 = vld [vmem:[#allocation3 + $0xf9] sm:$0xff] }
 0x75f   : > { %5413 = vrot.lane.b32.xlu1 %v5338_v46, %s9755_s15  ;;  %5599 = vrot.lane.b32.xlu0 %v12477_v56, %s9756_s20 }
 0x761   : > { %v5238_v7 = vpop.permute.xlu1 %5237  ;;  %v5240_v48 = vpop.permute.xlu0 %5239 }
 0x762   : > { %5314 = vst.msk [vmem:[#allocation5 + $0x98] sm:$0xff] %vm2990_vm3, %v5238_v7  ;;  %5315 = vst.msk [vmem:[#allocation5 + $0xa0] sm:$0xff] %vm2990_vm3, %v5240_v48  ;;  %v5537_v7 = vld [vmem:[#allocation3 + $0xf2] sm:$0xff] }
 0x763   : > { %5601 = vrot.lane.b32.xlu1 %v12484_v3, %s9756_s20  ;;  %5603 = vrot.lane.b32.xlu0 %v12486_v41, %s9756_s20 }
 0x765   : > { %v5242_v59 = vpop.permute.xlu1 %5241  ;;  %v5244_v26 = vpop.permute.xlu0 %5243 }
 0x766   : > { %5316 = vst.msk [vmem:[#allocation5 + $0xa8] sm:$0xff] %vm2990_vm3, %v5242_v59  ;;  %5317 = vst.msk [vmem:[#allocation5 + $0xb0] sm:$0xff] %vm2990_vm3, %v5244_v26  ;;  %v5538_v26 = vld [vmem:[#allocation3 + $0xfa] sm:$0xff] }
 0x767   : > { %5605 = vrot.lane.b32.xlu1 %v12494_v22, %s9756_s20  ;;  %5791 = vrot.lane.b32.xlu0 %v12261_v53, %s9757_s23 }
 0x769   : > { %v5246_v56 = vpop.permute.xlu1 %5245  ;;  %v5248_v20 = vpop.permute.xlu0 %5247 }
 0x76a   : > { %5318 = vst.msk [vmem:[#allocation5 + $0xb8] sm:$0xff] %vm2990_vm3, %v5246_v56  ;;  %5319 = vst.msk [vmem:[#allocation5 + $0xc0] sm:$0xff] %vm2990_vm3, %v5248_v20 }
 0x76b   : > { %5793 = vrot.lane.b32.xlu1 %v12278_v32, %s9757_s23  ;;  %5795 = vrot.lane.b32.xlu0 %v12295_v0, %s9757_s23  ;;  %v5913_v32 = vld [vmem:[#allocation3 + $0xa9] sm:$0xff] }
 0x76d   : > { %v5250_v3 = vpop.permute.xlu1 %5249  ;;  %v5252_v30 = vpop.permute.xlu0 %5251 }
 0x76e   : > { %5320 = vst.msk [vmem:[#allocation5 + $0xc8] sm:$0xff] %vm2990_vm3, %v5250_v3  ;;  %5321 = vst.msk [vmem:[#allocation5 + $0xd0] sm:$0xff] %vm2990_vm3, %v5252_v30 }
 0x76f   : > { %5797 = vrot.lane.b32.xlu1 %v12313_v50, %s9757_s23  ;;  %5983 = vrot.lane.b32.xlu0 %v5337_v43, %s9758_s25  ;;  %v5914_v50 = vld [vmem:[#allocation3 + $0xb1] sm:$0xff] }
 0x771   : > { %v5254_v53 = vpop.permute.xlu1 %5253  ;;  %v5256_v38 = vpop.permute.xlu0 %5255 }
 0x772   : > { %5322 = vst.msk [vmem:[#allocation5 + $0xd8] sm:$0xff] %vm2990_vm3, %v5254_v53  ;;  %5323 = vst.msk [vmem:[#allocation5 + $0xe0] sm:$0xff] %vm2990_vm3, %v5256_v38 }
 0x773   : > { %5985 = vrot.lane.b32.xlu1 %v5338_v46, %s9758_s25  ;;  %5987 = vrot.lane.b32.xlu0 %v5913_v32, %s9758_s25 }
 0x775   : > { %v5258_v0 = vpop.permute.xlu1 %5257  ;;  %v5260_v31 = vpop.permute.xlu0 %5259 }
 0x776   : > { %5324 = vst.msk [vmem:[#allocation5 + $0xe8] sm:$0xff] %vm2990_vm3, %v5258_v0  ;;  %5325 = vst.msk [vmem:[#allocation5 + $0xf0] sm:$0xff] %vm2990_vm3, %v5260_v31  ;;  %v6113_v31 = vld [vmem:[#allocation3 + $0x10a] sm:$0xff] }
 0x777   : > { %5989 = vrot.lane.b32.xlu1 %v5914_v50, %s9758_s25  ;;  %6175 = vrot.lane.b32.xlu0 %v12486_v41, %s9759_s19 }
 0x779   : > { %v5262_v9 = vpop.permute.xlu1 %5261  ;;  %v5392_v58 = vpop.permute.xlu0 %5391 }
 0x77a   : > { %5326 = vst.msk [vmem:[#allocation5 + $0xf8] sm:$0xff] %vm2990_vm3, %v5262_v9 }
 0x77b   : > { %5487 = vst.msk [vmem:[#allocation5] sm:$0xff] %vm3183_vm4, %v5392_v58  ;;  %6177 = vrot.lane.b32.xlu1 %v12494_v22, %s9759_s19  ;;  %6179 = vrot.lane.b32.xlu0 %v12496_v34, %s9759_s19  ;;  %v5341_v22 = vld [vmem:[#allocation3 + $0xc1] sm:$0xff] }
 0x77d   : > { %v5394_v52 = vpop.permute.xlu1 %5393  ;;  %v5396_v63 = vpop.permute.xlu0 %5395 }
 0x77e   : > { %5488 = vst.msk [vmem:[#allocation5 + $0x8] sm:$0xff] %vm3183_vm4, %v5394_v52  ;;  %5489 = vst.msk [vmem:[#allocation5 + $0x10] sm:$0xff] %vm3183_vm4, %v5396_v63  ;;  %v6114_v63 = vld [vmem:[#allocation3 + $0x112] sm:$0xff] }
 0x77f   : > { %6181 = vrot.lane.b32.xlu1 %v12504_v15, %s9759_s19  ;;  %5415 = vrot.lane.b32.xlu0 %v5913_v32, %s9755_s15 }
 0x781   : > { %v5398_v41 = vpop.permute.xlu1 %5397  ;;  %v5584_v37 = vpop.permute.xlu0 %5583 }
 0x782   : > { %5490 = vst.msk [vmem:[#allocation5 + $0x18] sm:$0xff] %vm3183_vm4, %v5398_v41 }
 0x783   : > { %5679 = vst.msk [vmem:[#allocation5] sm:$0xff] %vm3376_vm5, %v5584_v37  ;;  %5417 = vrot.lane.b32.xlu1 %v5914_v50, %s9755_s15  ;;  %5419 = vrot.lane.b32.xlu0 %v5341_v22, %s9755_s15 }
 0x785   : > { %v5586_v29 = vpop.permute.xlu1 %5585  ;;  %v5588_v47 = vpop.permute.xlu0 %5587 }
 0x786   : > { %5680 = vst.msk [vmem:[#allocation5 + $0x8] sm:$0xff] %vm3376_vm5, %v5586_v29  ;;  %5681 = vst.msk [vmem:[#allocation5 + $0x10] sm:$0xff] %vm3376_vm5, %v5588_v47 }
 0x787   : > { %5421 = vrot.lane.b32.xlu1 %v5342_v1, %s9755_s15  ;;  %5607 = vrot.lane.b32.xlu0 %v12496_v34, %s9756_s20 }
 0x789   : > { %v5590_v40 = vpop.permute.xlu1 %5589  ;;  %v5776_v24 = vpop.permute.xlu0 %5775 }
 0x78a   : > { %5682 = vst.msk [vmem:[#allocation5 + $0x18] sm:$0xff] %vm3376_vm5, %v5590_v40 }
 0x78b   : > { %5871 = vst.msk [vmem:[#allocation5] sm:$0xff] %vm3570_vm7, %v5776_v24  ;;  %5609 = vrot.lane.b32.xlu1 %v12504_v15, %s9756_s20  ;;  %5611 = vrot.lane.b32.xlu0 %v12506_v27, %s9756_s20 }
 0x78d   : > { %v5778_v6 = vpop.permute.xlu1 %5777  ;;  %v5780_v39 = vpop.permute.xlu0 %5779 }
 0x78e   : > { %5872 = vst.msk [vmem:[#allocation5 + $0x8] sm:$0xff] %vm3570_vm7, %v5778_v6  ;;  %5873 = vst.msk [vmem:[#allocation5 + $0x10] sm:$0xff] %vm3570_vm7, %v5780_v39  ;;  %v5350_v39 = vld [vmem:[#allocation3 + $0x129] sm:$0xff] }
 0x78f   : > { %5613 = vrot.lane.b32.xlu1 %v12514_v8, %s9756_s20  ;;  %5799 = vrot.lane.b32.xlu0 %v12290_v44, %s9757_s23 }
 0x791   : > { %v5782_v34 = vpop.permute.xlu1 %5781  ;;  %v5968_v60 = vpop.permute.xlu0 %5967 }
 0x792   : > { %5874 = vst.msk [vmem:[#allocation5 + $0x18] sm:$0xff] %vm3570_vm7, %v5782_v34 }
 0x793   : > { %6063 = vst.msk [vmem:[#allocation5] sm:$0xff] %vm3763_vm8, %v5968_v60  ;;  %5801 = vrot.lane.b32.xlu1 %v12305_v14, %s9757_s23  ;;  %5803 = vrot.lane.b32.xlu0 %v12332_v10, %s9757_s23  ;;  %v5917_v14 = vld [vmem:[#allocation3 + $0xd9] sm:$0xff] }
 0x795   : > { %v5970_v15 = vpop.permute.xlu1 %5969  ;;  %v5972_v27 = vpop.permute.xlu0 %5971 }
 0x796   : > { %6064 = vst.msk [vmem:[#allocation5 + $0x8] sm:$0xff] %vm3763_vm8, %v5970_v15  ;;  %6065 = vst.msk [vmem:[#allocation5 + $0x10] sm:$0xff] %vm3763_vm8, %v5972_v27  ;;  %v5541_v15 = vld [vmem:[#allocation3 + $0x122] sm:$0xff] }
 0x797   : > { %5805 = vrot.lane.b32.xlu1 %v12349_v16, %s9757_s23  ;;  %5991 = vrot.lane.b32.xlu0 %v5341_v22, %s9758_s25  ;;  %v5918_v16 = vld [vmem:[#allocation3 + $0xe1] sm:$0xff] }
 0x799   : > { %v5974_v44 = vpop.permute.xlu1 %5973  ;;  %v6160_v8 = vpop.permute.xlu0 %6159 }
 0x79a   : > { %6066 = vst.msk [vmem:[#allocation5 + $0x18] sm:$0xff] %vm3763_vm8, %v5974_v44 }
 0x79b   : > { %6255 = vst.msk [vmem:[#allocation5] sm:$0xff] %vm3956_vm0, %v6160_v8  ;;  %5993 = vrot.lane.b32.xlu1 %v5342_v1, %s9758_s25  ;;  %5995 = vrot.lane.b32.xlu0 %v5917_v14, %s9758_s25  ;;  %v5349_v1 = vld [vmem:[#allocation3 + $0x121] sm:$0xff]  ;;  %v5542_v8 = vld [vmem:[#allocation3 + $0x12a] sm:$0xff] }
 0x79d   : > { %v6162_v10 = vpop.permute.xlu1 %6161  ;;  %v6164_v19 = vpop.permute.xlu0 %6163 }
 0x79e   : > { %6256 = vst.msk [vmem:[#allocation5 + $0x8] sm:$0xff] %vm3956_vm0, %v6162_v10  ;;  %6257 = vst.msk [vmem:[#allocation5 + $0x10] sm:$0xff] %vm3956_vm0, %v6164_v19 }
 0x79f   : > { %5997 = vrot.lane.b32.xlu1 %v5918_v16, %s9758_s25  ;;  %6183 = vrot.lane.b32.xlu0 %v6107_v2, %s9759_s19  ;;  %v5733_v2 = vld [vmem:[#allocation3 + $0x138] sm:$0xff] }
 0x7a1   : > { %v6166_v42 = vpop.permute.xlu1 %6165  ;;  %v5400_v45 = vpop.permute.xlu0 %5399 }
 0x7a2   : > { %6258 = vst.msk [vmem:[#allocation5 + $0x18] sm:$0xff] %vm3956_vm0, %v6166_v42  ;;  %v6287_v55 = vld [vmem:[#allocation5] sm:$0xff] }
 0x7a3   : > { %5491 = vst.msk [vmem:[#allocation5 + $0x20] sm:$0xff] %vm3183_vm4, %v5400_v45  ;;  %6185 = vrot.lane.b32.xlu1 %v6108_v18, %s9759_s19  ;;  %6187 = vrot.lane.b32.xlu0 %v6109_v62, %s9759_s19  ;;  %v5734_v18 = vld [vmem:[#allocation3 + $0x140] sm:$0xff] }
 0x7a5   : > { %v5402_v33 = vpop.permute.xlu1 %5401  ;;  %v5404_v13 = vpop.permute.xlu0 %5403  ;;  %v6288_v35 = vld [vmem:[#allocation5 + $0x8] sm:$0xff]  ;;  %v6289_v54 = vld [vmem:[#allocation5 + $0x10] sm:$0xff] }
 0x7a6   : > { %5492 = vst.msk [vmem:[#allocation5 + $0x28] sm:$0xff] %vm3183_vm4, %v5402_v33  ;;  %5493 = vst.msk [vmem:[#allocation5 + $0x30] sm:$0xff] %vm3183_vm4, %v5404_v13  ;;  %v6319_v23 = vpack.c.bf16 %v6288_v35, %v6287_v55  ;;  %v5925_v13 = vld [vmem:[#allocation3 + $0x139] sm:$0xff] }
 0x7a7   : > { %6189 = vrot.lane.b32.xlu1 %v6110_v12, %s9759_s19  ;;  %5423 = vrot.lane.b32.xlu0 %v5917_v14, %s9755_s15  ;;  %v5731_v14 = vld [vmem:[#allocation3 + $0x120] sm:$0xff] }
 0x7a8   : > { %9583 = vmatprep.mubr.msk.bf16.mxu1 %vm4069_vm9, %v6319_v23 }
 0x7a9   : > { %v5406_v17 = vpop.permute.xlu1 %5405  ;;  %v5592_v49 = vpop.permute.xlu0 %5591  ;;  %v6290_v57 = vld [vmem:[#allocation5 + $0x18] sm:$0xff] }
 0x7aa   : > { %5494 = vst.msk [vmem:[#allocation5 + $0x38] sm:$0xff] %vm3183_vm4, %v5406_v17  ;;  %v6320_v11 = vpack.c.bf16 %v6290_v57, %v6289_v54 }
 0x7ab   : > { %5683 = vst.msk [vmem:[#allocation5 + $0x20] sm:$0xff] %vm3376_vm5, %v5592_v49  ;;  %5425 = vrot.lane.b32.xlu1 %v5918_v16, %s9755_s15  ;;  %5427 = vrot.lane.b32.xlu0 %v5345_v28, %s9755_s15  ;;  %v5732_v16 = vld [vmem:[#allocation3 + $0x128] sm:$0xff]  ;;  %v6117_v49 = vld [vmem:[#allocation3 + $0x13a] sm:$0xff] }
 0x7ac   : > { %9584 = vmatmul.mubr.msk.bf16.vlgmr.msra.gmra.mxu1 %vm4069_vm9, %v6320_v11 }
 0x7ad   : > { %v5594_v51 = vpop.permute.xlu1 %5593  ;;  %v5596_v43 = vpop.permute.xlu0 %5595 }
 0x7ae   : > { %5684 = vst.msk [vmem:[#allocation5 + $0x28] sm:$0xff] %vm3376_vm5, %v5594_v51  ;;  %5685 = vst.msk [vmem:[#allocation5 + $0x30] sm:$0xff] %vm3376_vm5, %v5596_v43  ;;  %v6118_v51 = vld [vmem:[#allocation3 + $0x142] sm:$0xff] }
 0x7af   : > { %5429 = vrot.lane.b32.xlu1 %v5346_v25, %s9755_s15  ;;  %5615 = vrot.lane.b32.xlu0 %v6109_v62, %s9756_s20 }
 0x7b1   : > { %v5598_v21 = vpop.permute.xlu1 %5597  ;;  %v5784_v46 = vpop.permute.xlu0 %5783 }
 0x7b2   : > { %5686 = vst.msk [vmem:[#allocation5 + $0x38] sm:$0xff] %vm3376_vm5, %v5598_v21 }
 0x7b3   : > { %5875 = vst.msk [vmem:[#allocation5 + $0x20] sm:$0xff] %vm3570_vm7, %v5784_v46  ;;  %5617 = vrot.lane.b32.xlu1 %v6110_v12, %s9756_s20  ;;  %5619 = vrot.lane.b32.xlu0 %v5537_v7, %s9756_s20  ;;  %v5926_v12 = vld [vmem:[#allocation3 + $0x141] sm:$0xff] }
 0x7b5   : > { %v5786_v48 = vpop.permute.xlu1 %5785  ;;  %v5788_v59 = vpop.permute.xlu0 %5787 }
 0x7b6   : > { %5876 = vst.msk [vmem:[#allocation5 + $0x28] sm:$0xff] %vm3570_vm7, %v5786_v48  ;;  %5877 = vst.msk [vmem:[#allocation5 + $0x30] sm:$0xff] %vm3570_vm7, %v5788_v59  ;;  %v5353_v48 = vld [vmem:[#allocation3 + $0x151] sm:$0xff] }
 0x7b7   : > { %5621 = vrot.lane.b32.xlu1 %v5538_v26, %s9756_s20  ;;  %5807 = vrot.lane.b32.xlu0 %v12327_v4, %s9757_s23 }
 0x7b9   : > { %v5790_v56 = vpop.permute.xlu1 %5789  ;;  %v5976_v20 = vpop.permute.xlu0 %5975 }
 0x7ba   : > { %5878 = vst.msk [vmem:[#allocation5 + $0x38] sm:$0xff] %vm3570_vm7, %v5790_v56 }
 0x7bb   : > { %6067 = vst.msk [vmem:[#allocation5 + $0x20] sm:$0xff] %vm3763_vm8, %v5976_v20  ;;  %5809 = vrot.lane.b32.xlu1 %v12341_v61, %s9757_s23  ;;  %5811 = vrot.lane.b32.xlu0 %v12368_v36, %s9757_s23  ;;  %v5921_v61 = vld [vmem:[#allocation3 + $0x109] sm:$0xff]  ;;  %v5354_v20 = vld [vmem:[#allocation3 + $0x159] sm:$0xff] }
 0x7bd   : > { %v5978_v3 = vpop.permute.xlu1 %5977  ;;  %v5980_v30 = vpop.permute.xlu0 %5979 }
 0x7be   : > { %6068 = vst.msk [vmem:[#allocation5 + $0x28] sm:$0xff] %vm3763_vm8, %v5978_v3  ;;  %6069 = vst.msk [vmem:[#allocation5 + $0x30] sm:$0xff] %vm3763_vm8, %v5980_v30 }
 0x7bf   : > { %5813 = vrot.lane.b32.xlu1 %v12385_v5, %s9757_s23  ;;  %5999 = vrot.lane.b32.xlu0 %v5345_v28, %s9758_s25  ;;  %v5922_v5 = vld [vmem:[#allocation3 + $0x111] sm:$0xff] }
 0x7c1   : > { %v5982_v4 = vpop.permute.xlu1 %5981  ;;  %v6168_v53 = vpop.permute.xlu0 %6167 }
 0x7c2   : > { %6070 = vst.msk [vmem:[#allocation5 + $0x38] sm:$0xff] %vm3763_vm8, %v5982_v4  ;;  %v5545_v4 = vld [vmem:[#allocation3 + $0x152] sm:$0xff] }
 0x7c3   : > { %6259 = vst.msk [vmem:[#allocation5 + $0x20] sm:$0xff] %vm3956_vm0, %v6168_v53  ;;  %6001 = vrot.lane.b32.xlu1 %v5346_v25, %s9758_s25  ;;  %6003 = vrot.lane.b32.xlu0 %v5921_v61, %s9758_s25 }
 0x7c5   : > { %v6170_v36 = vpop.permute.xlu1 %6169  ;;  %v6172_v38 = vpop.permute.xlu0 %6171 }
 0x7c6   : > { %6260 = vst.msk [vmem:[#allocation5 + $0x28] sm:$0xff] %vm3956_vm0, %v6170_v36  ;;  %6261 = vst.msk [vmem:[#allocation5 + $0x30] sm:$0xff] %vm3956_vm0, %v6172_v38  ;;  %v5546_v36 = vld [vmem:[#allocation3 + $0x15a] sm:$0xff]  ;;  %v5735_v38 = vld [vmem:[#allocation3 + $0x150] sm:$0xff] }
 0x7c7   : > { %6005 = vrot.lane.b32.xlu1 %v5922_v5, %s9758_s25  ;;  %6191 = vrot.lane.b32.xlu0 %v5537_v7, %s9759_s19 }
 0x7c9   : > { %v6174_v32 = vpop.permute.xlu1 %6173  ;;  %v5408_v0 = vpop.permute.xlu0 %5407 }
 0x7ca   : > { %6262 = vst.msk [vmem:[#allocation5 + $0x38] sm:$0xff] %vm3956_vm0, %v6174_v32  ;;  %v6291_v58 = vld [vmem:[#allocation5 + $0x20] sm:$0xff] }
 0x7cb   : > { %5495 = vst.msk [vmem:[#allocation5 + $0x40] sm:$0xff] %vm3183_vm4, %v5408_v0  ;;  %6193 = vrot.lane.b32.xlu1 %v5538_v26, %s9759_s19  ;;  %6195 = vrot.lane.b32.xlu0 %v6113_v31, %s9759_s19  ;;  %v5736_v0 = vld [vmem:[#allocation3 + $0x158] sm:$0xff] }
 0x7cd   : > { %v5410_v50 = vpop.permute.xlu1 %5409  ;;  %v5412_v9 = vpop.permute.xlu0 %5411  ;;  %v6292_v52 = vld [vmem:[#allocation5 + $0x28] sm:$0xff]  ;;  %v6293_v29 = vld [vmem:[#allocation5 + $0x30] sm:$0xff] }
 0x7ce   : > { %5496 = vst.msk [vmem:[#allocation5 + $0x48] sm:$0xff] %vm3183_vm4, %v5410_v50  ;;  %5497 = vst.msk [vmem:[#allocation5 + $0x50] sm:$0xff] %vm3183_vm4, %v5412_v9  ;;  %v6321_v41 = vpack.c.bf16 %v6292_v52, %v6291_v58  ;;  %v5738_v58 = vld [vmem:[#allocation3 + $0x170] sm:$0xff] }
 0x7cf   : > { %6197 = vrot.lane.b32.xlu1 %v6114_v63, %s9759_s19  ;;  %5431 = vrot.lane.b32.xlu0 %v5921_v61, %s9755_s15 }
 0x7d0   : > { %9587 = vmatprep.mubr.msk.bf16.mxu1 %vm4069_vm9, %v6321_v41  ;;  %v5929_v41 = vld [vmem:[#allocation3 + $0x169] sm:$0xff] }
 0x7d1   : > { %v5414_v37 = vpop.permute.xlu1 %5413  ;;  %v5600_v22 = vpop.permute.xlu0 %5599  ;;  %v6294_v47 = vld [vmem:[#allocation5 + $0x38] sm:$0xff] }
 0x7d2   : > { %5498 = vst.msk [vmem:[#allocation5 + $0x58] sm:$0xff] %vm3183_vm4, %v5414_v37  ;;  %v6322_v40 = vpack.c.bf16 %v6294_v47, %v6293_v29  ;;  %v5930_v29 = vld [vmem:[#allocation3 + $0x171] sm:$0xff] }
 0x7d3   : > { %5687 = vst.msk [vmem:[#allocation5 + $0x40] sm:$0xff] %vm3376_vm5, %v5600_v22  ;;  %5433 = vrot.lane.b32.xlu1 %v5922_v5, %s9755_s15  ;;  %5435 = vrot.lane.b32.xlu0 %v5349_v1, %s9755_s15 }
 0x7d4   : > { %9588 = vmatmul.mubr.msk.bf16.gmra.mxu1 %vm4069_vm9, %v6322_v40  ;;  %v6121_v40 = vld [vmem:[#allocation3 + $0x16a] sm:$0xff] }
 0x7d5   : > { %v5602_v24 = vpop.permute.xlu1 %5601  ;;  %v5604_v6 = vpop.permute.xlu0 %5603 }
 0x7d6   : > { %5688 = vst.msk [vmem:[#allocation5 + $0x48] sm:$0xff] %vm3376_vm5, %v5602_v24  ;;  %5689 = vst.msk [vmem:[#allocation5 + $0x50] sm:$0xff] %vm3376_vm5, %v5604_v6 }
 0x7d7   : > { %5437 = vrot.lane.b32.xlu1 %v5350_v39, %s9755_s15  ;;  %5623 = vrot.lane.b32.xlu0 %v6113_v31, %s9756_s20  ;;  %v5737_v31 = vld [vmem:[#allocation3 + $0x168] sm:$0xff] }
 0x7d9   : > { %v5606_v34 = vpop.permute.xlu1 %5605  ;;  %v5792_v60 = vpop.permute.xlu0 %5791 }
 0x7da   : > { %5690 = vst.msk [vmem:[#allocation5 + $0x58] sm:$0xff] %vm3376_vm5, %v5606_v34 }
 0x7db   : > { %5879 = vst.msk [vmem:[#allocation5 + $0x40] sm:$0xff] %vm3570_vm7, %v5792_v60  ;;  %5625 = vrot.lane.b32.xlu1 %v6114_v63, %s9756_s20  ;;  %5627 = vrot.lane.b32.xlu0 %v5541_v15, %s9756_s20  ;;  %v6122_v60 = vld [vmem:[#allocation3 + $0x172] sm:$0xff] }
 0x7dd   : > { %v5794_v27 = vpop.permute.xlu1 %5793  ;;  %v5796_v44 = vpop.permute.xlu0 %5795 }
 0x7de   : > { %5880 = vst.msk [vmem:[#allocation5 + $0x48] sm:$0xff] %vm3570_vm7, %v5794_v27  ;;  %5881 = vst.msk [vmem:[#allocation5 + $0x50] sm:$0xff] %vm3570_vm7, %v5796_v44 }
 0x7df   : > { %5629 = vrot.lane.b32.xlu1 %v5542_v8, %s9756_s20  ;;  %5815 = vrot.lane.b32.xlu0 %v5731_v14, %s9757_s23 }
 0x7e1   : > { %v5798_v10 = vpop.permute.xlu1 %5797  ;;  %v5984_v19 = vpop.permute.xlu0 %5983 }
 0x7e2   : > { %5882 = vst.msk [vmem:[#allocation5 + $0x58] sm:$0xff] %vm3570_vm7, %v5798_v10  ;;  %v5357_v10 = vld [vmem:[#allocation3 + $0x181] sm:$0xff] }
 0x7e3   : > { %6071 = vst.msk [vmem:[#allocation5 + $0x40] sm:$0xff] %vm3763_vm8, %v5984_v19  ;;  %5817 = vrot.lane.b32.xlu1 %v5732_v16, %s9757_s23  ;;  %5819 = vrot.lane.b32.xlu0 %v5733_v2, %s9757_s23 }
 0x7e5   : > { %v5986_v42 = vpop.permute.xlu1 %5985  ;;  %v5988_v45 = vpop.permute.xlu0 %5987 }
 0x7e6   : > { %6072 = vst.msk [vmem:[#allocation5 + $0x48] sm:$0xff] %vm3763_vm8, %v5986_v42  ;;  %6073 = vst.msk [vmem:[#allocation5 + $0x50] sm:$0xff] %vm3763_vm8, %v5988_v45  ;;  %v5358_v42 = vld [vmem:[#allocation3 + $0x189] sm:$0xff] }
 0x7e7   : > { %5821 = vrot.lane.b32.xlu1 %v5734_v18, %s9757_s23  ;;  %6007 = vrot.lane.b32.xlu0 %v5349_v1, %s9758_s25 }
 0x7e9   : > { %v5990_v62 = vpop.permute.xlu1 %5989  ;;  %v6176_v33 = vpop.permute.xlu0 %6175 }
 0x7ea   : > { %6074 = vst.msk [vmem:[#allocation5 + $0x58] sm:$0xff] %vm3763_vm8, %v5990_v62  ;;  %v5549_v62 = vld [vmem:[#allocation3 + $0x182] sm:$0xff] }
 0x7eb   : > { %6263 = vst.msk [vmem:[#allocation5 + $0x40] sm:$0xff] %vm3956_vm0, %v6176_v33  ;;  %6009 = vrot.lane.b32.xlu1 %v5350_v39, %s9758_s25  ;;  %6011 = vrot.lane.b32.xlu0 %v5925_v13, %s9758_s25 }
 0x7ed   : > { %v6178_v55 = vpop.permute.xlu1 %6177  ;;  %v6180_v35 = vpop.permute.xlu0 %6179 }
 0x7ee   : > { %6264 = vst.msk [vmem:[#allocation5 + $0x48] sm:$0xff] %vm3956_vm0, %v6178_v55  ;;  %6265 = vst.msk [vmem:[#allocation5 + $0x50] sm:$0xff] %vm3956_vm0, %v6180_v35  ;;  %v5550_v55 = vld [vmem:[#allocation3 + $0x18a] sm:$0xff]  ;;  %v5739_v35 = vld [vmem:[#allocation3 + $0x180] sm:$0xff] }
 0x7ef   : > { %6013 = vrot.lane.b32.xlu1 %v5926_v12, %s9758_s25  ;;  %6199 = vrot.lane.b32.xlu0 %v5541_v15, %s9759_s19 }
 0x7f1   : > { %v6182_v23 = vpop.permute.xlu1 %6181  ;;  %v5416_v17 = vpop.permute.xlu0 %5415 }
 0x7f2   : > { %6266 = vst.msk [vmem:[#allocation5 + $0x58] sm:$0xff] %vm3956_vm0, %v6182_v23  ;;  %v6295_v28 = vld [vmem:[#allocation5 + $0x40] sm:$0xff] }
 0x7f3   : > { %5499 = vst.msk [vmem:[#allocation5 + $0x60] sm:$0xff] %vm3183_vm4, %v5416_v17  ;;  %6201 = vrot.lane.b32.xlu1 %v5542_v8, %s9759_s19  ;;  %6203 = vrot.lane.b32.xlu0 %v6117_v49, %s9759_s19 }
 0x7f5   : > { %v5418_v54 = vpop.permute.xlu1 %5417  ;;  %v5420_v57 = vpop.permute.xlu0 %5419  ;;  %v6296_v11 = vld [vmem:[#allocation5 + $0x48] sm:$0xff]  ;;  %v6297_v46 = vld [vmem:[#allocation5 + $0x50] sm:$0xff] }
 0x7f6   : > { %5500 = vst.msk [vmem:[#allocation5 + $0x68] sm:$0xff] %vm3183_vm4, %v5418_v54  ;;  %5501 = vst.msk [vmem:[#allocation5 + $0x70] sm:$0xff] %vm3183_vm4, %v5420_v57  ;;  %v6323_v43 = vpack.c.bf16 %v6296_v11, %v6295_v28  ;;  %v5742_v54 = vld [vmem:[#allocation3 + $0x1a0] sm:$0xff] }
 0x7f7   : > { %6205 = vrot.lane.b32.xlu1 %v6118_v51, %s9759_s19  ;;  %5439 = vrot.lane.b32.xlu0 %v5925_v13, %s9755_s15  ;;  %v5933_v11 = vld [vmem:[#allocation3 + $0x199] sm:$0xff] }
 0x7f8   : > { %9591 = vmatprep.mubr.msk.bf16.mxu1 %vm4069_vm9, %v6323_v43 }
 0x7f9   : > { %v5422_v25 = vpop.permute.xlu1 %5421  ;;  %v5608_v21 = vpop.permute.xlu0 %5607  ;;  %v6298_v7 = vld [vmem:[#allocation5 + $0x58] sm:$0xff] }
 0x7fa   : > { %5502 = vst.msk [vmem:[#allocation5 + $0x78] sm:$0xff] %vm3183_vm4, %v5422_v25  ;;  %v6324_v59 = vpack.c.bf16 %v6298_v7, %v6297_v46  ;;  %v5934_v25 = vld [vmem:[#allocation3 + $0x1a1] sm:$0xff] }
 0x7fb   : > { %5691 = vst.msk [vmem:[#allocation5 + $0x60] sm:$0xff] %vm3376_vm5, %v5608_v21  ;;  %5441 = vrot.lane.b32.xlu1 %v5926_v12, %s9755_s15  ;;  %5443 = vrot.lane.b32.xlu0 %v5353_v48, %s9755_s15  ;;  %v5741_v12 = vld [vmem:[#allocation3 + $0x198] sm:$0xff] }
 0x7fc   : > { %9592 = vmatmul.mubr.msk.bf16.gmra.mxu1 %vm4069_vm9, %v6324_v59  ;;  %v6125_v7 = vld [vmem:[#allocation3 + $0x19a] sm:$0xff] }
 0x7fd   : > { %v5610_v26 = vpop.permute.xlu1 %5609  ;;  %v5612_v56 = vpop.permute.xlu0 %5611 }
 0x7fe   : > { %5692 = vst.msk [vmem:[#allocation5 + $0x68] sm:$0xff] %vm3376_vm5, %v5610_v26  ;;  %5693 = vst.msk [vmem:[#allocation5 + $0x70] sm:$0xff] %vm3376_vm5, %v5612_v56  ;;  %v6126_v26 = vld [vmem:[#allocation3 + $0x1a2] sm:$0xff] }
 0x7ff   : > { %5445 = vrot.lane.b32.xlu1 %v5354_v20, %s9755_s15  ;;  %5631 = vrot.lane.b32.xlu0 %v6117_v49, %s9756_s20  ;;  %v5740_v49 = vld [vmem:[#allocation3 + $0x188] sm:$0xff] }
 0x800   : > { %v6717_v56 = vld [vmem:[#allocation3 + $0x1] sm:$0xff] }
 0x801   : > { %v5614_v3 = vpop.permute.xlu1 %5613  ;;  %v5800_v30 = vpop.permute.xlu0 %5799 }
 0x802   : > { %5694 = vst.msk [vmem:[#allocation5 + $0x78] sm:$0xff] %vm3376_vm5, %v5614_v3 }
 0x803   : > { %5883 = vst.msk [vmem:[#allocation5 + $0x60] sm:$0xff] %vm3570_vm7, %v5800_v30  ;;  %5633 = vrot.lane.b32.xlu1 %v6118_v51, %s9756_s20  ;;  %5635 = vrot.lane.b32.xlu0 %v5545_v4, %s9756_s20 }
 0x805   : > { %v5802_v53 = vpop.permute.xlu1 %5801  ;;  %v5804_v61 = vpop.permute.xlu0 %5803 }
 0x806   : > { %5884 = vst.msk [vmem:[#allocation5 + $0x68] sm:$0xff] %vm3570_vm7, %v5802_v53  ;;  %5885 = vst.msk [vmem:[#allocation5 + $0x70] sm:$0xff] %vm3570_vm7, %v5804_v61  ;;  %v6718_v61 = vld [vmem:[#allocation3 + $0x9] sm:$0xff] }
 0x807   : > { %5637 = vrot.lane.b32.xlu1 %v5546_v36, %s9756_s20  ;;  %5823 = vrot.lane.b32.xlu0 %v5735_v38, %s9757_s23 }
 0x809   : > { %v5806_v5 = vpop.permute.xlu1 %5805  ;;  %v5992_v32 = vpop.permute.xlu0 %5991 }
 0x80a   : > { %5886 = vst.msk [vmem:[#allocation5 + $0x78] sm:$0xff] %vm3570_vm7, %v5806_v5 }
 0x80b   : > { %6075 = vst.msk [vmem:[#allocation5 + $0x60] sm:$0xff] %vm3763_vm8, %v5992_v32  ;;  %5825 = vrot.lane.b32.xlu1 %v5736_v0, %s9757_s23  ;;  %5827 = vrot.lane.b32.xlu0 %v5737_v31, %s9757_s23 }
 0x80d   : > { %v5994_v50 = vpop.permute.xlu1 %5993  ;;  %v5996_v9 = vpop.permute.xlu0 %5995 }
 0x80e   : > { %6076 = vst.msk [vmem:[#allocation5 + $0x68] sm:$0xff] %vm3763_vm8, %v5994_v50  ;;  %6077 = vst.msk [vmem:[#allocation5 + $0x70] sm:$0xff] %vm3763_vm8, %v5996_v9 }
 0x80f   : > { %5829 = vrot.lane.b32.xlu1 %v5738_v58, %s9757_s23  ;;  %6015 = vrot.lane.b32.xlu0 %v5353_v48, %s9758_s25 }
 0x811   : > { %v5998_v52 = vpop.permute.xlu1 %5997  ;;  %v6184_v63 = vpop.permute.xlu0 %6183 }
 0x812   : > { %6078 = vst.msk [vmem:[#allocation5 + $0x78] sm:$0xff] %vm3763_vm8, %v5998_v52 }
 0x813   : > { %6267 = vst.msk [vmem:[#allocation5 + $0x60] sm:$0xff] %vm3956_vm0, %v6184_v63  ;;  %6017 = vrot.lane.b32.xlu1 %v5354_v20, %s9758_s25  ;;  %6019 = vrot.lane.b32.xlu0 %v5929_v41, %s9758_s25 }
 0x815   : > { %v6186_v37 = vpop.permute.xlu1 %6185  ;;  %v6188_v22 = vpop.permute.xlu0 %6187 }
 0x816   : > { %6268 = vst.msk [vmem:[#allocation5 + $0x68] sm:$0xff] %vm3956_vm0, %v6186_v37  ;;  %6269 = vst.msk [vmem:[#allocation5 + $0x70] sm:$0xff] %vm3956_vm0, %v6188_v22 }
 0x817   : > { %6021 = vrot.lane.b32.xlu1 %v5930_v29, %s9758_s25  ;;  %6207 = vrot.lane.b32.xlu0 %v5545_v4, %s9759_s19 }
 0x819   : > { %v6190_v47 = vpop.permute.xlu1 %6189  ;;  %v5424_v1 = vpop.permute.xlu0 %5423 }
 0x81a   : > { %6270 = vst.msk [vmem:[#allocation5 + $0x78] sm:$0xff] %vm3956_vm0, %v6190_v47  ;;  %v6299_v39 = vld [vmem:[#allocation5 + $0x60] sm:$0xff] }
 0x81b   : > { %5503 = vst.msk [vmem:[#allocation5 + $0x80] sm:$0xff] %vm3183_vm4, %v5424_v1  ;;  %6209 = vrot.lane.b32.xlu1 %v5546_v36, %s9759_s19  ;;  %6211 = vrot.lane.b32.xlu0 %v6121_v40, %s9759_s19 }
 0x81d   : > { %v5426_v24 = vpop.permute.xlu1 %5425  ;;  %v5428_v6 = vpop.permute.xlu0 %5427  ;;  %v6300_v34 = vld [vmem:[#allocation5 + $0x68] sm:$0xff]  ;;  %v6301_v8 = vld [vmem:[#allocation5 + $0x70] sm:$0xff] }
 0x81e   : > { %5504 = vst.msk [vmem:[#allocation5 + $0x88] sm:$0xff] %vm3183_vm4, %v5426_v24  ;;  %5505 = vst.msk [vmem:[#allocation5 + $0x90] sm:$0xff] %vm3183_vm4, %v5428_v6  ;;  %v6325_v15 = vpack.c.bf16 %v6300_v34, %v6299_v39  ;;  %v13045_v34 = vld [vmem:[%s14316_s4 + $0x3] ss:$0 sm:$0xff] }
 0x81f   : > { %6213 = vrot.lane.b32.xlu1 %v6122_v60, %s9759_s19  ;;  %5447 = vrot.lane.b32.xlu0 %v5929_v41, %s9755_s15 }
 0x820   : > { %9595 = vmatprep.mubr.msk.bf16.mxu1 %vm4069_vm9, %v6325_v15 }
 0x821   : > { %v5430_v27 = vpop.permute.xlu1 %5429  ;;  %v5616_v44 = vpop.permute.xlu0 %5615  ;;  %v6302_v14 = vld [vmem:[#allocation5 + $0x78] sm:$0xff] }
 0x822   : > { %5506 = vst.msk [vmem:[#allocation5 + $0x98] sm:$0xff] %vm3183_vm4, %v5430_v27  ;;  %v6326_v19 = vpack.c.bf16 %v6302_v14, %v6301_v8 }
 0x823   : > { %5695 = vst.msk [vmem:[#allocation5 + $0x80] sm:$0xff] %vm3376_vm5, %v5616_v44  ;;  %5449 = vrot.lane.b32.xlu1 %v5930_v29, %s9755_s15  ;;  %5451 = vrot.lane.b32.xlu0 %v5357_v10, %s9755_s15 }
 0x824   : > { %9596 = vmatmul.mubr.msk.bf16.gmra.mxu1 %vm4069_vm9, %v6326_v19 }
 0x825   : > { %v5618_v16 = vpop.permute.xlu1 %5617  ;;  %v5620_v2 = vpop.permute.xlu0 %5619 }
 0x826   : > { %5696 = vst.msk [vmem:[#allocation5 + $0x88] sm:$0xff] %vm3376_vm5, %v5618_v16  ;;  %5697 = vst.msk [vmem:[#allocation5 + $0x90] sm:$0xff] %vm3376_vm5, %v5620_v2 }
 0x827   : > { %5453 = vrot.lane.b32.xlu1 %v5358_v42, %s9755_s15  ;;  %5639 = vrot.lane.b32.xlu0 %v6121_v40, %s9756_s20 }
 0x829   : > { %v5622_v45 = vpop.permute.xlu1 %5621  ;;  %v5808_v18 = vpop.permute.xlu0 %5807 }
 0x82a   : > { %5698 = vst.msk [vmem:[#allocation5 + $0x98] sm:$0xff] %vm3376_vm5, %v5622_v45  ;;  %v6654_v45 = vld [vmem:[#allocation3 + $0x8] sm:$0xff] }
 0x82b   : > { %5887 = vst.msk [vmem:[#allocation5 + $0x80] sm:$0xff] %vm3570_vm7, %v5808_v18  ;;  %5641 = vrot.lane.b32.xlu1 %v6122_v60, %s9756_s20  ;;  %5643 = vrot.lane.b32.xlu0 %v5549_v62, %s9756_s20 }
 0x82c   : > { %6686 = vst.msk [vmem:[#allocation5 + $0x8] sm:$0xff] %vm299_vm11, %v6654_v45 }
 0x82d   : > { %v5810_v33 = vpop.permute.xlu1 %5809  ;;  %v5812_v13 = vpop.permute.xlu0 %5811 }
 0x82e   : > { %5888 = vst.msk [vmem:[#allocation5 + $0x88] sm:$0xff] %vm3570_vm7, %v5810_v33  ;;  %5889 = vst.msk [vmem:[#allocation5 + $0x90] sm:$0xff] %vm3570_vm7, %v5812_v13 }
 0x82f   : > { %5645 = vrot.lane.b32.xlu1 %v5550_v55, %s9756_s20  ;;  %5831 = vrot.lane.b32.xlu0 %v5739_v35, %s9757_s23 }
 0x831   : > { %v5814_v23 = vpop.permute.xlu1 %5813  ;;  %v6000_v17 = vpop.permute.xlu0 %5999 }
 0x832   : > { %5890 = vst.msk [vmem:[#allocation5 + $0x98] sm:$0xff] %vm3570_vm7, %v5814_v23 }
 0x833   : > { %6079 = vst.msk [vmem:[#allocation5 + $0x80] sm:$0xff] %vm3763_vm8, %v6000_v17  ;;  %5833 = vrot.lane.b32.xlu1 %v5740_v49, %s9757_s23  ;;  %5835 = vrot.lane.b32.xlu0 %v5741_v12, %s9757_s23 }
 0x835   : > { %v6002_v57 = vpop.permute.xlu1 %6001  ;;  %v6004_v28 = vpop.permute.xlu0 %6003 }
 0x836   : > { %6080 = vst.msk [vmem:[#allocation5 + $0x88] sm:$0xff] %vm3763_vm8, %v6002_v57  ;;  %6081 = vst.msk [vmem:[#allocation5 + $0x90] sm:$0xff] %vm3763_vm8, %v6004_v28 }
 0x837   : > { %5837 = vrot.lane.b32.xlu1 %v5742_v54, %s9757_s23  ;;  %6023 = vrot.lane.b32.xlu0 %v5357_v10, %s9758_s25  ;;  %v6653_v10 = vld [vmem:[#allocation3] sm:$0xff] }
 0x838   : > { %6685 = vst.msk [vmem:[#allocation5] sm:$0xff] %vm299_vm11, %v6653_v10 }
 0x839   : > { %v6006_v51 = vpop.permute.xlu1 %6005  ;;  %v6192_v43 = vpop.permute.xlu0 %6191 }
 0x83a   : > { %6082 = vst.msk [vmem:[#allocation5 + $0x98] sm:$0xff] %vm3763_vm8, %v6006_v51 }
 0x83b   : > { %6271 = vst.msk [vmem:[#allocation5 + $0x80] sm:$0xff] %vm3956_vm0, %v6192_v43  ;;  %6025 = vrot.lane.b32.xlu1 %v5358_v42, %s9758_s25  ;;  %6027 = vrot.lane.b32.xlu0 %v5933_v11, %s9758_s25 }
 0x83d   : > { %v6194_v21 = vpop.permute.xlu1 %6193  ;;  %v6196_v46 = vpop.permute.xlu0 %6195 }
 0x83e   : > { %6272 = vst.msk [vmem:[#allocation5 + $0x88] sm:$0xff] %vm3956_vm0, %v6194_v21  ;;  %6273 = vst.msk [vmem:[#allocation5 + $0x90] sm:$0xff] %vm3956_vm0, %v6196_v46 }
 0x83f   : > { %6029 = vrot.lane.b32.xlu1 %v5934_v25, %s9758_s25  ;;  %6215 = vrot.lane.b32.xlu0 %v5549_v62, %s9759_s19 }
 0x841   : > { %v6198_v48 = vpop.permute.xlu1 %6197  ;;  %v5432_v59 = vpop.permute.xlu0 %5431 }
 0x842   : > { %6274 = vst.msk [vmem:[#allocation5 + $0x98] sm:$0xff] %vm3956_vm0, %v6198_v48  ;;  %v6303_v30 = vld [vmem:[#allocation5 + $0x80] sm:$0xff] }
 0x843   : > { %5507 = vst.msk [vmem:[#allocation5 + $0xa0] sm:$0xff] %vm3183_vm4, %v5432_v59  ;;  %6217 = vrot.lane.b32.xlu1 %v5550_v55, %s9759_s19  ;;  %6219 = vrot.lane.b32.xlu0 %v6125_v7, %s9759_s19  ;;  %v6909_v7 = vld [vmem:[#allocation3 + $0x2] sm:$0xff] }
 0x845   : > { %v5434_v20 = vpop.permute.xlu1 %5433  ;;  %v5436_v3 = vpop.permute.xlu0 %5435  ;;  %v6304_v4 = vld [vmem:[#allocation5 + $0x88] sm:$0xff]  ;;  %v6305_v5 = vld [vmem:[#allocation5 + $0x90] sm:$0xff] }
 0x846   : > { %5508 = vst.msk [vmem:[#allocation5 + $0xa8] sm:$0xff] %vm3183_vm4, %v5434_v20  ;;  %5509 = vst.msk [vmem:[#allocation5 + $0xb0] sm:$0xff] %vm3183_vm4, %v5436_v3  ;;  %v6327_v53 = vpack.c.bf16 %v6304_v4, %v6303_v30  ;;  %v6910_v3 = vld [vmem:[#allocation3 + $0xa] sm:$0xff] }
 0x847   : > { %6221 = vrot.lane.b32.xlu1 %v6126_v26, %s9759_s19  ;;  %6781 = vrot.lane.b32.xlu0 %v6717_v56, %s9749_s29 }
 0x848   : > { %9599 = vmatprep.mubr.msk.bf16.mxu1 %vm4069_vm9, %v6327_v53 }
 0x849   : > { %v5438_v36 = vpop.permute.xlu1 %5437  ;;  %v5624_v38 = vpop.permute.xlu0 %5623  ;;  %v6306_v32 = vld [vmem:[#allocation5 + $0x98] sm:$0xff] }
 0x84a   : > { %5510 = vst.msk [vmem:[#allocation5 + $0xb8] sm:$0xff] %vm3183_vm4, %v5438_v36  ;;  %v6328_v0 = vpack.c.bf16 %v6306_v32, %v6305_v5 }
 0x84b   : > { %5699 = vst.msk [vmem:[#allocation5 + $0xa0] sm:$0xff] %vm3376_vm5, %v5624_v38  ;;  %6783 = vrot.lane.b32.xlu1 %v6718_v61, %s9749_s29 }
 0x84c   : > { %9600 = vmatmul.mubr.msk.bf16.gmra.mxu1 %vm4069_vm9, %v6328_v0 }
 0x84d   : > { %v5626_v31 = vpop.permute.xlu1 %5625  ;;  %v5628_v50 = vpop.permute.xlu0 %5627 }
 0x84e   : > { %5700 = vst.msk [vmem:[#allocation5 + $0xa8] sm:$0xff] %vm3376_vm5, %v5626_v31  ;;  %5701 = vst.msk [vmem:[#allocation5 + $0xb0] sm:$0xff] %vm3376_vm5, %v5628_v50 }
 0x851   : > { %v5630_v9 = vpop.permute.xlu1 %5629  ;;  %v5816_v58 = vpop.permute.xlu0 %5815 }
 0x852   : > { %5702 = vst.msk [vmem:[#allocation5 + $0xb8] sm:$0xff] %vm3376_vm5, %v5630_v9 }
 0x853   : > { %5891 = vst.msk [vmem:[#allocation5 + $0xa0] sm:$0xff] %vm3570_vm7, %v5816_v58 }
 0x855   : > { %v5818_v52 = vpop.permute.xlu1 %5817  ;;  %v5820_v63 = vpop.permute.xlu0 %5819 }
 0x856   : > { %5892 = vst.msk [vmem:[#allocation5 + $0xa8] sm:$0xff] %vm3570_vm7, %v5818_v52  ;;  %5893 = vst.msk [vmem:[#allocation5 + $0xb0] sm:$0xff] %vm3570_vm7, %v5820_v63 }
 0x859   : > { %v5822_v41 = vpop.permute.xlu1 %5821  ;;  %v6008_v37 = vpop.permute.xlu0 %6007 }
 0x85a   : > { %5894 = vst.msk [vmem:[#allocation5 + $0xb8] sm:$0xff] %vm3570_vm7, %v5822_v41 }
 0x85b   : > { %6083 = vst.msk [vmem:[#allocation5 + $0xa0] sm:$0xff] %vm3763_vm8, %v6008_v37 }
 0x85d   : > { %v6010_v22 = vpop.permute.xlu1 %6009  ;;  %v6012_v29 = vpop.permute.xlu0 %6011 }
 0x85e   : > { %6084 = vst.msk [vmem:[#allocation5 + $0xa8] sm:$0xff] %vm3763_vm8, %v6010_v22  ;;  %6085 = vst.msk [vmem:[#allocation5 + $0xb0] sm:$0xff] %vm3763_vm8, %v6012_v29 }
 0x861   : > { %v6014_v47 = vpop.permute.xlu1 %6013  ;;  %v6200_v1 = vpop.permute.xlu0 %6199 }
 0x862   : > { %6086 = vst.msk [vmem:[#allocation5 + $0xb8] sm:$0xff] %vm3763_vm8, %v6014_v47 }
 0x863   : > { %6275 = vst.msk [vmem:[#allocation5 + $0xa0] sm:$0xff] %vm3956_vm0, %v6200_v1 }
 0x865   : > { %v6202_v40 = vpop.permute.xlu1 %6201  ;;  %v6204_v24 = vpop.permute.xlu0 %6203 }
 0x866   : > { %6276 = vst.msk [vmem:[#allocation5 + $0xa8] sm:$0xff] %vm3956_vm0, %v6202_v40  ;;  %6277 = vst.msk [vmem:[#allocation5 + $0xb0] sm:$0xff] %vm3956_vm0, %v6204_v24 }
 0x869   : > { %v6206_v6 = vpop.permute.xlu1 %6205  ;;  %v5440_v39 = vpop.permute.xlu0 %5439 }
 0x86a   : > { %6278 = vst.msk [vmem:[#allocation5 + $0xb8] sm:$0xff] %vm3956_vm0, %v6206_v6  ;;  %v6307_v8 = vld [vmem:[#allocation5 + $0xa0] sm:$0xff] }
 0x86b   : > { %5511 = vst.msk [vmem:[#allocation5 + $0xc0] sm:$0xff] %vm3183_vm4, %v5440_v39 }
 0x86c   : > { %v9585_v60 = vpop.f32.mrf.mxu1 }
 0x86d   : > { %v6461_v15 = vadd.f32 %v9585_v60, %v13045_v34  ;;  %v5442_v27 = vpop.permute.xlu1 %5441  ;;  %v5444_v44 = vpop.permute.xlu0 %5443  ;;  %v6308_v14 = vld [vmem:[#allocation5 + $0xa8] sm:$0xff]  ;;  %v6309_v35 = vld [vmem:[#allocation5 + $0xb0] sm:$0xff] }
 0x86e   : > { %5512 = vst.msk [vmem:[#allocation5 + $0xc8] sm:$0xff] %vm3183_vm4, %v5442_v27  ;;  %5513 = vst.msk [vmem:[#allocation5 + $0xd0] sm:$0xff] %vm3183_vm4, %v5444_v44  ;;  %v6452_v19 = vpop.f32.mrf.mxu1  ;;  %v6329_v16 = vpack.c.bf16 %v6308_v14, %v6307_v8 }
 0x86f   : > { %v6581_v2 = vmax.f32 %v6461_v15, 0.0  ;;  %v6453_v42 = vadd.f32 %v13045_v34, %v6452_v19 }
 0x870   : > { %v9586_v18 = vpop.f32.mrf.mxu1  ;;  %9603 = vmatprep.mubr.msk.bf16.mxu1 %vm4069_vm9, %v6329_v16 }
 0x871   : > { %6613 = vst.msk [vmem:[#allocation3 + $0x31] sm:$0xff] %vm299_vm11, %v6581_v2  ;;  %v6579_v62 = vmax.f32 %v6453_v42, 0.0  ;;  %v6464_v33 = vadd.f32 %v9586_v18, %v13045_v34  ;;  %v5446_v13 = vpop.permute.xlu1 %5445  ;;  %v5632_v55 = vpop.permute.xlu0 %5631  ;;  %v6310_v12 = vld [vmem:[#allocation5 + $0xb8] sm:$0xff] }
 0x872   : > { %5514 = vst.msk [vmem:[#allocation5 + $0xd8] sm:$0xff] %vm3183_vm4, %v5446_v13  ;;  %v6455_v23 = vpop.f32.mrf.mxu1  ;;  %v6330_v17 = vpack.c.bf16 %v6310_v12, %v6309_v35 }
 0x873   : > { %5703 = vst.msk [vmem:[#allocation5 + $0xc0] sm:$0xff] %vm3376_vm5, %v5632_v55  ;;  %v6582_v49 = vmax.f32 %v6464_v33, 0.0  ;;  %v6456_v54 = vadd.f32 %v13045_v34, %v6455_v23  ;;  %v9730_v23 = vld [vmem:[%s14314_s2 + $0x68] ss:$0 sps:$4 sm:$0xff]  }
 0x874   : > { %6611 = vst.msk [vmem:[#allocation3 + $0x19] sm:$0xff] %vm299_vm11, %v6579_v62  ;;  %9604 = vmatmul.mubr.msk.bf16.gmra.mxu1 %vm4069_vm9, %v6330_v17  ;;  %9695 = vmatprep.subr.msk.bf16.mxu0 %vm4118_vm6, %v9730_v23 }
 0x875   : > { %6614 = vst.msk [vmem:[#allocation3 + $0x39] sm:$0xff] %vm299_vm11, %v6582_v49  ;;  %v6580_v57 = vmax.f32 %v6456_v54, 0.0  ;;  %v5634_v28 = vpop.permute.xlu1 %5633  ;;  %v5636_v11 = vpop.permute.xlu0 %5635 }
 0x876   : > { %5704 = vst.msk [vmem:[#allocation5 + $0xc8] sm:$0xff] %vm3376_vm5, %v5634_v28  ;;  %5705 = vst.msk [vmem:[#allocation5 + $0xd0] sm:$0xff] %vm3376_vm5, %v5636_v11  ;;  %v9731_v11 = vld [vmem:[%s14314_s2 + $0x60] sm:$0xff]  }
 0x877   : > { %6612 = vst.msk [vmem:[#allocation3 + $0x21] sm:$0xff] %vm299_vm11, %v6580_v57  ;;  %v8382_v57 = vsel %vm4118_vm6, %v9730_v23, 0 }
 0x878   : > { %v13065_v51 = vld [vmem:[#allocation3 + $0x30] sm:$0xff]  ;;  %9616 = vmatpush3.bf16.msra.mxu0 %v8382_v57 }
 0x879   : > { %v5638_v43 = vpop.permute.xlu1 %5637  ;;  %v5824_v25 = vpop.permute.xlu0 %5823  ;;  %6689 = vst.msk [vmem:[#allocation5 + $0x20] sm:$0xff] %vm299_vm11, %v13065_v51  ;;  %v13102_v58 = vld [vmem:[#allocation3 + $0x31] sm:$0xff]  ;;  %9617 = vmatprep.subr.bf16.mxu0 %v9731_v11 }
 0x87a   : > { %5706 = vst.msk [vmem:[#allocation5 + $0xd8] sm:$0xff] %vm3376_vm5, %v5638_v43 }
 0x87b   : > { %5895 = vst.msk [vmem:[#allocation5 + $0xc0] sm:$0xff] %vm3570_vm7, %v5824_v25  ;;  %v6719_v21 = vld [vmem:[#allocation3 + $0x19] sm:$0xff] }
 0x87c   : > { %v7101_v46 = vld [vmem:[#allocation3 + $0x18] sm:$0xff]  ;;  %6785 = vrot.lane.b32.xlu0 %v6719_v21, %s9749_s29  ;;  %9618 = vmatpush3.bf16.msra.mxu0 %v9731_v11 }
 0x87d   : > { %6687 = vst.msk [vmem:[#allocation5 + $0x10] sm:$0xff] %vm299_vm11, %v7101_v46  ;;  %v13073_v48 = vld [vmem:[#allocation3 + $0x38] sm:$0xff]  ;;  %v5826_v59 = vpop.permute.xlu1 %5825  ;;  %v5828_v26 = vpop.permute.xlu0 %5827 }
 0x87e   : > { %6690 = vst.msk [vmem:[#allocation5 + $0x28] sm:$0xff] %vm299_vm11, %v13073_v48  ;;  %v6720_v56 = vld [vmem:[#allocation3 + $0x21] sm:$0xff]  ;;  %v13110_v1 = vld [vmem:[#allocation3 + $0x39] sm:$0xff] }
 0x87f   : > { %5896 = vst.msk [vmem:[#allocation5 + $0xc8] sm:$0xff] %vm3570_vm7, %v5826_v59  ;;  %5897 = vst.msk [vmem:[#allocation5 + $0xd0] sm:$0xff] %vm3570_vm7, %v5828_v26  ;;  %6787 = vrot.lane.b32.xlu1 %v6720_v56, %s9749_s29  ;;  %v7102_v20 = vld [vmem:[#allocation3 + $0x20] sm:$0xff]  ;;  %v13121_v19 = vld [vmem:[#allocation3 + $0x32] sm:$0xff] }
 0x880   : > { %6973 = vrot.lane.b32.xlu0 %v6909_v7, %s9751_s7  ;;  %6688 = vst.msk [vmem:[#allocation5 + $0x18] sm:$0xff] %vm299_vm11, %v7102_v20  ;;  %v6911_v53 = vld [vmem:[#allocation3 + $0x1a] sm:$0xff]  ;;  %v6912_v38 = vld [vmem:[#allocation3 + $0x22] sm:$0xff] }
 0x881   : > { %v5830_v30 = vpop.permute.xlu1 %5829  ;;  %v6016_v4 = vpop.permute.xlu0 %6015  ;;  %v13132_v33 = vld [vmem:[#allocation3 + $0x3a] sm:$0xff] }
 0x882   : > { %5898 = vst.msk [vmem:[#allocation5 + $0xd8] sm:$0xff] %vm3570_vm7, %v5830_v30  ;;  %v9733_v59 = vld [vmem:[%s14314_s2 + $0x50] sm:$0xff]  }
 0x883   : > { %6087 = vst.msk [vmem:[#allocation5 + $0xc0] sm:$0xff] %vm3763_vm8, %v6016_v4  ;;  %6975 = vrot.lane.b32.xlu1 %v6910_v3, %s9751_s7  ;;  %v9734_v4 = vld [vmem:[%s14314_s2 + $0x48] sm:$0xff]  }
 0x884   : > { %6977 = vrot.lane.b32.xlu0 %v6911_v53, %s9751_s7 }
 0x885   : > { %v6018_v61 = vpop.permute.xlu1 %6017  ;;  %v6020_v36 = vpop.permute.xlu0 %6019 }
 0x886   : > { %6088 = vst.msk [vmem:[#allocation5 + $0xc8] sm:$0xff] %vm3763_vm8, %v6018_v61  ;;  %6089 = vst.msk [vmem:[#allocation5 + $0xd0] sm:$0xff] %vm3763_vm8, %v6020_v36 }
 0x887   : > { %6979 = vrot.lane.b32.xlu1 %v6912_v38, %s9751_s7 }
 0x888   : > { %7165 = vrot.lane.b32.xlu0 %v7101_v46, %s9753_s9 }
 0x889   : > { %v6022_v5 = vpop.permute.xlu1 %6021  ;;  %v6208_v32 = vpop.permute.xlu0 %6207 }
 0x88a   : > { %6090 = vst.msk [vmem:[#allocation5 + $0xd8] sm:$0xff] %vm3763_vm8, %v6022_v5 }
 0x88b   : > { %6279 = vst.msk [vmem:[#allocation5 + $0xc0] sm:$0xff] %vm3956_vm0, %v6208_v32  ;;  %7167 = vrot.lane.b32.xlu1 %v7102_v20, %s9753_s9 }
 0x88c   : > { %7169 = vrot.lane.b32.xlu0 %v13065_v51, %s9753_s9 }
 0x88d   : > { %v6210_v0 = vpop.permute.xlu1 %6209  ;;  %v6212_v31 = vpop.permute.xlu0 %6211 }
 0x88e   : > { %6280 = vst.msk [vmem:[#allocation5 + $0xc8] sm:$0xff] %vm3956_vm0, %v6210_v0  ;;  %6281 = vst.msk [vmem:[#allocation5 + $0xd0] sm:$0xff] %vm3956_vm0, %v6212_v31 }
 0x88f   : > { %7171 = vrot.lane.b32.xlu1 %v13073_v48, %s9753_s9 }
 0x890   : > { %7357 = vrot.lane.b32.xlu0 %v6719_v21, %s9755_s15  ;;  %v9732_v21 = vld [vmem:[%s14314_s2 + $0x58] sm:$0xff]  }
 0x891   : > { %v6214_v50 = vpop.permute.xlu1 %6213  ;;  %v5448_v9 = vpop.permute.xlu0 %5447  ;;  %9619 = vmatprep.subr.bf16.mxu0 %v9732_v21 }
 0x892   : > { %6282 = vst.msk [vmem:[#allocation5 + $0xd8] sm:$0xff] %vm3956_vm0, %v6214_v50  ;;  %v6311_v22 = vld [vmem:[#allocation5 + $0xc0] sm:$0xff]  ;;  %9620 = vmatpush3.bf16.msra.mxu0 %v9732_v21 }
 0x893   : > { %5515 = vst.msk [vmem:[#allocation5 + $0xe0] sm:$0xff] %vm3183_vm4, %v5448_v9  ;;  %7359 = vrot.lane.b32.xlu1 %v6720_v56, %s9755_s15  ;;  %9621 = vmatprep.subr.bf16.mxu0 %v9733_v59 }
 0x894   : > { %7361 = vrot.lane.b32.xlu0 %v13102_v58, %s9755_s15  ;;  %v9589_v52 = vpop.f32.mrf.mxu1 }
 0x895   : > { %v6477_v63 = vadd.f32 %v9589_v52, %v13045_v34  ;;  %v5450_v41 = vpop.permute.xlu1 %5449  ;;  %v5452_v37 = vpop.permute.xlu0 %5451  ;;  %v6312_v29 = vld [vmem:[#allocation5 + $0xc8] sm:$0xff]  ;;  %v6313_v8 = vld [vmem:[#allocation5 + $0xd0] sm:$0xff] }
 0x896   : > { %5516 = vst.msk [vmem:[#allocation5 + $0xe8] sm:$0xff] %vm3183_vm4, %v5450_v41  ;;  %5517 = vst.msk [vmem:[#allocation5 + $0xf0] sm:$0xff] %vm3183_vm4, %v5452_v37  ;;  %v6468_v47 = vpop.f32.mrf.mxu1  ;;  %v6331_v40 = vpack.c.bf16 %v6312_v29, %v6311_v22  ;;  %9622 = vmatpush3.bf16.msra.mxu0 %v9733_v59 }
 0x897   : > { %v6585_v24 = vmax.f32 %v6477_v63, 0.0  ;;  %v6469_v6 = vadd.f32 %v13045_v34, %v6468_v47  ;;  %7363 = vrot.lane.b32.xlu1 %v13110_v1, %s9755_s15  ;;  %9623 = vmatprep.subr.bf16.mxu0 %v9734_v4 }
 0x898   : > { %7549 = vrot.lane.b32.xlu0 %v6911_v53, %s9756_s20  ;;  %v9590_v39 = vpop.f32.mrf.mxu1  ;;  %9607 = vmatprep.mubr.msk.bf16.mxu1 %vm4069_vm9, %v6331_v40 }
 0x899   : > { %6617 = vst.msk [vmem:[#allocation3 + $0x61] sm:$0xff] %vm299_vm11, %v6585_v24  ;;  %v6583_v60 = vmax.f32 %v6469_v6, 0.0  ;;  %v6480_v15 = vadd.f32 %v9590_v39, %v13045_v34  ;;  %v5454_v27 = vpop.permute.xlu1 %5453  ;;  %v5640_v44 = vpop.permute.xlu0 %5639  ;;  %v6314_v14 = vld [vmem:[#allocation5 + $0xd8] sm:$0xff] }
 0x89a   : > { %5518 = vst.msk [vmem:[#allocation5 + $0xf8] sm:$0xff] %vm3183_vm4, %v5454_v27  ;;  %v6471_v10 = vpop.f32.mrf.mxu1  ;;  %v6332_v16 = vpack.c.bf16 %v6314_v14, %v6313_v8  ;;  %9624 = vmatpush3.bf16.msra.mxu0 %v9734_v4 }
 0x89b   : > { %5707 = vst.msk [vmem:[#allocation5 + $0xe0] sm:$0xff] %vm3376_vm5, %v5640_v44  ;;  %v6586_v2 = vmax.f32 %v6480_v15, 0.0  ;;  %v6472_v42 = vadd.f32 %v13045_v34, %v6471_v10  ;;  %7551 = vrot.lane.b32.xlu1 %v6912_v38, %s9756_s20 }
 0x89c   : > { %6615 = vst.msk [vmem:[#allocation3 + $0x49] sm:$0xff] %vm299_vm11, %v6583_v60  ;;  %7553 = vrot.lane.b32.xlu0 %v13121_v19, %s9756_s20  ;;  %9608 = vmatmul.mubr.msk.bf16.gmra.mxu1 %vm4069_vm9, %v6332_v16 }
 0x89d   : > { %6618 = vst.msk [vmem:[#allocation3 + $0x69] sm:$0xff] %vm299_vm11, %v6586_v2  ;;  %v6584_v45 = vmax.f32 %v6472_v42, 0.0  ;;  %v5642_v18 = vpop.permute.xlu1 %5641  ;;  %v5644_v62 = vpop.permute.xlu0 %5643 }
 0x89e   : > { %5708 = vst.msk [vmem:[#allocation5 + $0xe8] sm:$0xff] %vm3376_vm5, %v5642_v18  ;;  %5709 = vst.msk [vmem:[#allocation5 + $0xf0] sm:$0xff] %vm3376_vm5, %v5644_v62 }
 0x89f   : > { %6616 = vst.msk [vmem:[#allocation3 + $0x51] sm:$0xff] %vm299_vm11, %v6584_v45  ;;  %7555 = vrot.lane.b32.xlu1 %v13132_v33, %s9756_s20 }
 0x8a0   : > { %7741 = vrot.lane.b32.xlu0 %v13065_v51, %s9757_s23  ;;  %v13139_v13 = vld [vmem:[#allocation3 + $0x60] sm:$0xff] }
 0x8a1   : > { %v5646_v55 = vpop.permute.xlu1 %5645  ;;  %v5832_v35 = vpop.permute.xlu0 %5831  ;;  %6693 = vst.msk [vmem:[#allocation5 + $0x40] sm:$0xff] %vm299_vm11, %v13139_v13  ;;  %v7299_v44 = vld [vmem:[#allocation3 + $0x61] sm:$0xff] }
 0x8a2   : > { %5710 = vst.msk [vmem:[#allocation5 + $0xf8] sm:$0xff] %vm3376_vm5, %v5646_v55 }
 0x8a3   : > { %5899 = vst.msk [vmem:[#allocation5 + $0xe0] sm:$0xff] %vm3570_vm7, %v5832_v35  ;;  %v13145_v12 = vld [vmem:[#allocation3 + $0x48] sm:$0xff]  ;;  %7743 = vrot.lane.b32.xlu1 %v13073_v48, %s9757_s23 }
 0x8a4   : > { %7745 = vrot.lane.b32.xlu0 %v13145_v12, %s9757_s23  ;;  %6691 = vst.msk [vmem:[#allocation5 + $0x30] sm:$0xff] %vm299_vm11, %v13145_v12  ;;  %v13156_v17 = vld [vmem:[#allocation3 + $0x68] sm:$0xff] }
 0x8a5   : > { %v5834_v49 = vpop.permute.xlu1 %5833  ;;  %v5836_v54 = vpop.permute.xlu0 %5835  ;;  %6694 = vst.msk [vmem:[#allocation5 + $0x48] sm:$0xff] %vm299_vm11, %v13156_v17  ;;  %v13177_v25 = vld [vmem:[#allocation3 + $0x49] sm:$0xff] }
 0x8a6   : > { %5900 = vst.msk [vmem:[#allocation5 + $0xe8] sm:$0xff] %vm3570_vm7, %v5834_v49  ;;  %5901 = vst.msk [vmem:[#allocation5 + $0xf0] sm:$0xff] %vm3570_vm7, %v5836_v54  ;;  %v13164_v28 = vld [vmem:[#allocation3 + $0x50] sm:$0xff]  ;;  %v13266_v14 = vld [vmem:[#allocation3 + $0x62] sm:$0xff] }
 0x8a7   : > { %7747 = vrot.lane.b32.xlu1 %v13164_v28, %s9757_s23  ;;  %6692 = vst.msk [vmem:[#allocation5 + $0x38] sm:$0xff] %vm299_vm11, %v13164_v28  ;;  %v13188_v48 = vld [vmem:[#allocation3 + $0x51] sm:$0xff]  ;;  %v7300_v8 = vld [vmem:[#allocation3 + $0x69] sm:$0xff] }
 0x8a8   : > { %7933 = vrot.lane.b32.xlu0 %v13102_v58, %s9758_s25  ;;  %v8063_v30 = vld [vmem:[#allocation3 + $0x4a] sm:$0xff]  ;;  %v8064_v36 = vld [vmem:[#allocation3 + $0x52] sm:$0xff] }
 0x8a9   : > { %v5838_v51 = vpop.permute.xlu1 %5837  ;;  %v6024_v43 = vpop.permute.xlu0 %6023  ;;  %v13271_v10 = vld [vmem:[#allocation3 + $0x6a] sm:$0xff] }
 0x8aa   : > { %5902 = vst.msk [vmem:[#allocation5 + $0xf8] sm:$0xff] %vm3570_vm7, %v5838_v51 }
 0x8ab   : > { %6091 = vst.msk [vmem:[#allocation5 + $0xe0] sm:$0xff] %vm3763_vm8, %v6024_v43  ;;  %7935 = vrot.lane.b32.xlu1 %v13110_v1, %s9758_s25 }
 0x8ac   : > { %7937 = vrot.lane.b32.xlu0 %v13177_v25, %s9758_s25 }
 0x8ad   : > { %v6026_v46 = vpop.permute.xlu1 %6025  ;;  %v6028_v7 = vpop.permute.xlu0 %6027 }
 0x8ae   : > { %6092 = vst.msk [vmem:[#allocation5 + $0xe8] sm:$0xff] %vm3763_vm8, %v6026_v46  ;;  %6093 = vst.msk [vmem:[#allocation5 + $0xf0] sm:$0xff] %vm3763_vm8, %v6028_v7 }
 0x8af   : > { %7939 = vrot.lane.b32.xlu1 %v13188_v48, %s9758_s25 }
 0x8b0   : > { %8125 = vrot.lane.b32.xlu0 %v13121_v19, %s9759_s19 }
 0x8b1   : > { %v6030_v26 = vpop.permute.xlu1 %6029  ;;  %v6216_v56 = vpop.permute.xlu0 %6215 }
 0x8b2   : > { %6094 = vst.msk [vmem:[#allocation5 + $0xf8] sm:$0xff] %vm3763_vm8, %v6030_v26 }
 0x8b3   : > { %6283 = vst.msk [vmem:[#allocation5 + $0xe0] sm:$0xff] %vm3956_vm0, %v6216_v56  ;;  %8127 = vrot.lane.b32.xlu1 %v13132_v33, %s9759_s19 }
 0x8b4   : > { %6789 = vrot.lane.b32.xlu0 %v13102_v58, %s9749_s29 }
 0x8b5   : > { %v6218_v20 = vpop.permute.xlu1 %6217  ;;  %v6220_v3 = vpop.permute.xlu0 %6219 }
 0x8b6   : > { %6284 = vst.msk [vmem:[#allocation5 + $0xe8] sm:$0xff] %vm3956_vm0, %v6218_v20  ;;  %6285 = vst.msk [vmem:[#allocation5 + $0xf0] sm:$0xff] %vm3956_vm0, %v6220_v3 }
 0x8b7   : > { %6791 = vrot.lane.b32.xlu1 %v13110_v1, %s9749_s29 }
 0x8b8   : > { %8129 = vrot.lane.b32.xlu0 %v8063_v30, %s9759_s19 }
 0x8b9   : > { %v6222_v53 = vpop.permute.xlu1 %6221  ;;  %v6782_v61 = vpop.permute.xlu0 %6781 }
 0x8ba   : > { %6286 = vst.msk [vmem:[#allocation5 + $0xf8] sm:$0xff] %vm3956_vm0, %v6222_v53  ;;  %v6315_v32 = vld [vmem:[#allocation5 + $0xe0] sm:$0xff] }
 0x8bb   : > { %6877 = vst.msk [vmem:[#allocation5] sm:$0xff] %vm2604_vm1, %v6782_v61  ;;  %8131 = vrot.lane.b32.xlu1 %v8064_v36, %s9759_s19 }
 0x8bc   : > { %6793 = vrot.lane.b32.xlu0 %v13177_v25, %s9749_s29  ;;  %v9593_v38 = vpop.f32.mrf.mxu1 }
 0x8bd   : > { %v6493_v5 = vadd.f32 %v9593_v38, %v13045_v34  ;;  %v6316_v0 = vld [vmem:[#allocation5 + $0xe8] sm:$0xff]  ;;  %v6784_v31 = vpop.permute.xlu1 %6783  ;;  %v6317_v63 = vld [vmem:[#allocation5 + $0xf0] sm:$0xff] }
 0x8be   : > { %v6484_v50 = vpop.f32.mrf.mxu1  ;;  %v6333_v9 = vpack.c.bf16 %v6316_v0, %v6315_v32  ;;  %6878 = vst.msk [vmem:[#allocation5 + $0x8] sm:$0xff] %vm2604_vm1, %v6784_v31 }
 0x8bf   : > { %v6589_v58 = vmax.f32 %v6493_v5, 0.0  ;;  %v6485_v52 = vadd.f32 %v13045_v34, %v6484_v50  ;;  %6795 = vrot.lane.b32.xlu1 %v13188_v48, %s9749_s29 }
 0x8c0   : > { %6981 = vrot.lane.b32.xlu0 %v13121_v19, %s9751_s7  ;;  %v9594_v41 = vpop.f32.mrf.mxu1  ;;  %9611 = vmatprep.mubr.msk.bf16.mxu1 %vm4069_vm9, %v6333_v9 }
 0x8c1   : > { %6621 = vst.msk [vmem:[#allocation3 + $0x91] sm:$0xff] %vm299_vm11, %v6589_v58  ;;  %v6587_v37 = vmax.f32 %v6485_v52, 0.0  ;;  %v6496_v22 = vadd.f32 %v9594_v41, %v13045_v34  ;;  %v6318_v29 = vld [vmem:[#allocation5 + $0xf8] sm:$0xff] }
 0x8c2   : > { %v6487_v47 = vpop.f32.mrf.mxu1  ;;  %v6334_v1 = vpack.c.bf16 %v6318_v29, %v6317_v63 }
 0x8c3   : > { %6619 = vst.msk [vmem:[#allocation3 + $0x79] sm:$0xff] %vm299_vm11, %v6587_v37  ;;  %v6590_v40 = vmax.f32 %v6496_v22, 0.0  ;;  %v6488_v24 = vadd.f32 %v13045_v34, %v6487_v47  ;;  %6983 = vrot.lane.b32.xlu1 %v13132_v33, %s9751_s7 }
 0x8c4   : > { %6985 = vrot.lane.b32.xlu0 %v8063_v30, %s9751_s7  ;;  %9612 = vmatmul.mubr.msk.bf16.gmra.mxu1 %vm4069_vm9, %v6334_v1 }
 0x8c5   : > { %6622 = vst.msk [vmem:[#allocation3 + $0x99] sm:$0xff] %vm299_vm11, %v6590_v40  ;;  %v6588_v6 = vmax.f32 %v6488_v24, 0.0 }
 0x8c7   : > { %6620 = vst.msk [vmem:[#allocation3 + $0x81] sm:$0xff] %vm299_vm11, %v6588_v6  ;;  %6987 = vrot.lane.b32.xlu1 %v8064_v36, %s9751_s7 }
 0x8c8   : > { %7173 = vrot.lane.b32.xlu0 %v13145_v12, %s9753_s9  ;;  %v13237_v39 = vld [vmem:[#allocation3 + $0x90] sm:$0xff] }
 0x8c9   : > { %6697 = vst.msk [vmem:[#allocation5 + $0x60] sm:$0xff] %vm299_vm11, %v13237_v39  ;;  %v13376_v22 = vld [vmem:[#allocation3 + $0x91] sm:$0xff] }
 0x8ca   : > { %v13241_v60 = vld [vmem:[#allocation3 + $0x78] sm:$0xff] }
 0x8cb   : > { %7175 = vrot.lane.b32.xlu1 %v13164_v28, %s9753_s9  ;;  %6695 = vst.msk [vmem:[#allocation5 + $0x50] sm:$0xff] %vm299_vm11, %v13241_v60  ;;  %v13288_v55 = vld [vmem:[#allocation3 + $0x79] sm:$0xff] }
 0x8cc   : > { %7177 = vrot.lane.b32.xlu0 %v13139_v13, %s9753_s9  ;;  %v13249_v15 = vld [vmem:[#allocation3 + $0x98] sm:$0xff] }
 0x8cd   : > { %6698 = vst.msk [vmem:[#allocation5 + $0x68] sm:$0xff] %vm299_vm11, %v13249_v15  ;;  %v13387_v6 = vld [vmem:[#allocation3 + $0x99] sm:$0xff] }
 0x8ce   : > { %v13253_v27 = vld [vmem:[#allocation3 + $0x80] sm:$0xff] }
 0x8cf   : > { %7179 = vrot.lane.b32.xlu1 %v13156_v17, %s9753_s9  ;;  %6696 = vst.msk [vmem:[#allocation5 + $0x58] sm:$0xff] %vm299_vm11, %v13253_v27  ;;  %v13297_v49 = vld [vmem:[#allocation3 + $0x81] sm:$0xff] }
 0x8d0   : > { %7365 = vrot.lane.b32.xlu0 %v13177_v25, %s9755_s15  ;;  %v13323_v21 = vld [vmem:[#allocation3 + $0x7a] sm:$0xff]  ;;  %v13334_v59 = vld [vmem:[#allocation3 + $0x82] sm:$0xff] }
 0x8d3   : > { %7367 = vrot.lane.b32.xlu1 %v13188_v48, %s9755_s15 }
 0x8d4   : > { %7369 = vrot.lane.b32.xlu0 %v7299_v44, %s9755_s15 }
 0x8d7   : > { %7371 = vrot.lane.b32.xlu1 %v7300_v8, %s9755_s15 }
 0x8d8   : > { %7557 = vrot.lane.b32.xlu0 %v8063_v30, %s9756_s20 }
 0x8db   : > { %7559 = vrot.lane.b32.xlu1 %v8064_v36, %s9756_s20 }
 0x8dc   : > { %7561 = vrot.lane.b32.xlu0 %v13266_v14, %s9756_s20 }
 0x8df   : > { %7563 = vrot.lane.b32.xlu1 %v13271_v10, %s9756_s20 }
 0x8e0   : > { %7749 = vrot.lane.b32.xlu0 %v13139_v13, %s9757_s23 }
 0x8e3   : > { %7751 = vrot.lane.b32.xlu1 %v13156_v17, %s9757_s23 }
 0x8e4   : > { %7753 = vrot.lane.b32.xlu0 %v13241_v60, %s9757_s23  ;;  %v9597_v19 = vpop.f32.mrf.mxu1 }
 0x8e5   : > { %v6509_v16 = vadd.f32 %v9597_v19, %v13045_v34 }
 0x8e6   : > { %v6500_v2 = vpop.f32.mrf.mxu1 }
 0x8e7   : > { %v6593_v42 = vmax.f32 %v6509_v16, 0.0  ;;  %v6501_v45 = vadd.f32 %v13045_v34, %v6500_v2  ;;  %7755 = vrot.lane.b32.xlu1 %v13253_v27, %s9757_s23  ;;  %v13416_v2 = vld [vmem:[#allocation3 + $0x9a] sm:$0xff] }
 0x8e8   : > { %7941 = vrot.lane.b32.xlu0 %v7299_v44, %s9758_s25  ;;  %v9598_v18 = vpop.f32.mrf.mxu1 }
 0x8e9   : > { %6625 = vst.msk [vmem:[#allocation3 + $0xc1] sm:$0xff] %vm299_vm11, %v6593_v42  ;;  %v6591_v62 = vmax.f32 %v6501_v45, 0.0  ;;  %v6512_v33 = vadd.f32 %v9598_v18, %v13045_v34 }
 0x8ea   : > { %v6503_v13 = vpop.f32.mrf.mxu1 }
 0x8eb   : > { %6623 = vst.msk [vmem:[#allocation3 + $0xa9] sm:$0xff] %vm299_vm11, %v6591_v62  ;;  %v6594_v35 = vmax.f32 %v6512_v33, 0.0  ;;  %v6504_v12 = vadd.f32 %v13045_v34, %v6503_v13  ;;  %7943 = vrot.lane.b32.xlu1 %v7300_v8, %s9758_s25 }
 0x8ec   : > { %7945 = vrot.lane.b32.xlu0 %v13288_v55, %s9758_s25 }
 0x8ed   : > { %6626 = vst.msk [vmem:[#allocation3 + $0xc9] sm:$0xff] %vm299_vm11, %v6594_v35  ;;  %v6592_v23 = vmax.f32 %v6504_v12, 0.0 }
 0x8ee   : > { %v6786_v17 = vpop.permute.xlu0 %6785 }
 0x8ef   : > { %6879 = vst.msk [vmem:[#allocation5 + $0x10] sm:$0xff] %vm2604_vm1, %v6786_v17  ;;  %7947 = vrot.lane.b32.xlu1 %v13297_v49, %s9758_s25 }
 0x8f0   : > { %6624 = vst.msk [vmem:[#allocation3 + $0xb1] sm:$0xff] %vm299_vm11, %v6592_v23  ;;  %8133 = vrot.lane.b32.xlu0 %v13266_v14, %s9759_s19  ;;  %v13304_v54 = vld [vmem:[#allocation3 + $0xc0] sm:$0xff] }
 0x8f1   : > { %v6788_v57 = vpop.permute.xlu1 %6787  ;;  %6701 = vst.msk [vmem:[#allocation5 + $0x80] sm:$0xff] %vm299_vm11, %v13304_v54 }
 0x8f2   : > { %v6974_v28 = vpop.permute.xlu0 %6973  ;;  %6880 = vst.msk [vmem:[#allocation5 + $0x18] sm:$0xff] %vm2604_vm1, %v6788_v57  ;;  %v13310_v11 = vld [vmem:[#allocation3 + $0xa8] sm:$0xff] }
 0x8f3   : > { %7069 = vst.msk [vmem:[#allocation5] sm:$0xff] %vm2797_vm2, %v6974_v28  ;;  %8135 = vrot.lane.b32.xlu1 %v13271_v10, %s9759_s19 }
 0x8f4   : > { %6797 = vrot.lane.b32.xlu0 %v7299_v44, %s9749_s29  ;;  %6699 = vst.msk [vmem:[#allocation5 + $0x70] sm:$0xff] %vm299_vm11, %v13310_v11  ;;  %v13317_v51 = vld [vmem:[#allocation3 + $0xc8] sm:$0xff] }
 0x8f5   : > { %v6976_v43 = vpop.permute.xlu1 %6975  ;;  %6702 = vst.msk [vmem:[#allocation5 + $0x88] sm:$0xff] %vm299_vm11, %v13317_v51 }
 0x8f6   : > { %v6978_v25 = vpop.permute.xlu0 %6977  ;;  %7070 = vst.msk [vmem:[#allocation5 + $0x8] sm:$0xff] %vm2797_vm2, %v6976_v43 }
 0x8f7   : > { %7071 = vst.msk [vmem:[#allocation5 + $0x10] sm:$0xff] %vm2797_vm2, %v6978_v25  ;;  %v13325_v46 = vld [vmem:[#allocation3 + $0xb0] sm:$0xff]  ;;  %6799 = vrot.lane.b32.xlu1 %v7300_v8, %s9749_s29 }
 0x8f8   : > { %8137 = vrot.lane.b32.xlu0 %v13323_v21, %s9759_s19  ;;  %6700 = vst.msk [vmem:[#allocation5 + $0x78] sm:$0xff] %vm299_vm11, %v13325_v46  ;;  %v13400_v8 = vld [vmem:[#allocation3 + $0x92] sm:$0xff] }
 0x8f9   : > { %v6980_v7 = vpop.permute.xlu1 %6979  ;;  %v13448_v17 = vld [vmem:[#allocation3 + $0xb1] sm:$0xff] }
 0x8fa   : > { %v7166_v48 = vpop.permute.xlu0 %7165  ;;  %7072 = vst.msk [vmem:[#allocation5 + $0x18] sm:$0xff] %vm2797_vm2, %v6980_v7 }
 0x8fb   : > { %7261 = vst.msk [vmem:[#allocation5] sm:$0xff] %vm2990_vm3, %v7166_v48  ;;  %8139 = vrot.lane.b32.xlu1 %v13334_v59, %s9759_s19 }
 0x8fc   : > { %6801 = vrot.lane.b32.xlu0 %v13288_v55, %s9749_s29 }
 0x8fd   : > { %v7168_v26 = vpop.permute.xlu1 %7167 }
 0x8fe   : > { %v7170_v56 = vpop.permute.xlu0 %7169  ;;  %7262 = vst.msk [vmem:[#allocation5 + $0x8] sm:$0xff] %vm2990_vm3, %v7168_v26 }
 0x8ff   : > { %7263 = vst.msk [vmem:[#allocation5 + $0x10] sm:$0xff] %vm2990_vm3, %v7170_v56  ;;  %6803 = vrot.lane.b32.xlu1 %v13297_v49, %s9749_s29  ;;  %v13464_v56 = vld [vmem:[#allocation3 + $0xaa] sm:$0xff] }
 0x900   : > { %6989 = vrot.lane.b32.xlu0 %v13266_v14, %s9751_s7 }
 0x901   : > { %v7172_v20 = vpop.permute.xlu1 %7171 }
 0x902   : > { %v7358_v3 = vpop.permute.xlu0 %7357  ;;  %7264 = vst.msk [vmem:[#allocation5 + $0x18] sm:$0xff] %vm2990_vm3, %v7172_v20 }
 0x903   : > { %7453 = vst.msk [vmem:[#allocation5] sm:$0xff] %vm3183_vm4, %v7358_v3  ;;  %6991 = vrot.lane.b32.xlu1 %v13271_v10, %s9751_s7 }
 0x904   : > { %6993 = vrot.lane.b32.xlu0 %v13323_v21, %s9751_s7 }
 0x905   : > { %v7360_v30 = vpop.permute.xlu1 %7359 }
 0x906   : > { %v7362_v4 = vpop.permute.xlu0 %7361  ;;  %7454 = vst.msk [vmem:[#allocation5 + $0x8] sm:$0xff] %vm3183_vm4, %v7360_v30 }
 0x907   : > { %7455 = vst.msk [vmem:[#allocation5 + $0x10] sm:$0xff] %vm3183_vm4, %v7362_v4  ;;  %6995 = vrot.lane.b32.xlu1 %v13334_v59, %s9751_s7 }
 0x908   : > { %7181 = vrot.lane.b32.xlu0 %v13241_v60, %s9753_s9 }
 0x909   : > { %v7364_v53 = vpop.permute.xlu1 %7363 }
 0x90a   : > { %v7550_v61 = vpop.permute.xlu0 %7549  ;;  %7456 = vst.msk [vmem:[#allocation5 + $0x18] sm:$0xff] %vm3183_vm4, %v7364_v53 }
 0x90b   : > { %7645 = vst.msk [vmem:[#allocation5] sm:$0xff] %vm3376_vm5, %v7550_v61  ;;  %7183 = vrot.lane.b32.xlu1 %v13253_v27, %s9753_s9 }
 0x90c   : > { %7185 = vrot.lane.b32.xlu0 %v13237_v39, %s9753_s9  ;;  %v9601_v36 = vpop.f32.mrf.mxu1 }
 0x90d   : > { %v6525_v38 = vadd.f32 %v9601_v36, %v13045_v34  ;;  %v7552_v5 = vpop.permute.xlu1 %7551 }
 0x90e   : > { %v7554_v32 = vpop.permute.xlu0 %7553  ;;  %7646 = vst.msk [vmem:[#allocation5 + $0x8] sm:$0xff] %vm3376_vm5, %v7552_v5  ;;  %v6516_v0 = vpop.f32.mrf.mxu1 }
 0x90f   : > { %7647 = vst.msk [vmem:[#allocation5 + $0x10] sm:$0xff] %vm3376_vm5, %v7554_v32  ;;  %v6597_v31 = vmax.f32 %v6525_v38, 0.0  ;;  %v6517_v50 = vadd.f32 %v13045_v34, %v6516_v0  ;;  %7187 = vrot.lane.b32.xlu1 %v13249_v15, %s9753_s9  ;;  %v13476_v32 = vld [vmem:[#allocation3 + $0xb2] sm:$0xff] }
 0x910   : > { %7373 = vrot.lane.b32.xlu0 %v13288_v55, %s9755_s15  ;;  %v9602_v9 = vpop.f32.mrf.mxu1 }
 0x911   : > { %6629 = vst.msk [vmem:[#allocation3 + $0xf1] sm:$0xff] %vm299_vm11, %v6597_v31  ;;  %v6595_v58 = vmax.f32 %v6517_v50, 0.0  ;;  %v6528_v52 = vadd.f32 %v9602_v9, %v13045_v34  ;;  %v7556_v63 = vpop.permute.xlu1 %7555 }
 0x912   : > { %v7742_v41 = vpop.permute.xlu0 %7741  ;;  %7648 = vst.msk [vmem:[#allocation5 + $0x18] sm:$0xff] %vm3376_vm5, %v7556_v63  ;;  %v6519_v37 = vpop.f32.mrf.mxu1 }
 0x913   : > { %7837 = vst.msk [vmem:[#allocation5] sm:$0xff] %vm3570_vm7, %v7742_v41  ;;  %v6598_v29 = vmax.f32 %v6528_v52, 0.0  ;;  %v6520_v47 = vadd.f32 %v13045_v34, %v6519_v37  ;;  %7375 = vrot.lane.b32.xlu1 %v13297_v49, %s9755_s15 }
 0x914   : > { %6627 = vst.msk [vmem:[#allocation3 + $0xd9] sm:$0xff] %vm299_vm11, %v6595_v58  ;;  %7377 = vrot.lane.b32.xlu0 %v13376_v22, %s9755_s15 }
 0x915   : > { %6630 = vst.msk [vmem:[#allocation3 + $0xf9] sm:$0xff] %vm299_vm11, %v6598_v29  ;;  %v6596_v1 = vmax.f32 %v6520_v47, 0.0  ;;  %v7744_v40 = vpop.permute.xlu1 %7743 }
 0x916   : > { %v7746_v24 = vpop.permute.xlu0 %7745  ;;  %7838 = vst.msk [vmem:[#allocation5 + $0x8] sm:$0xff] %vm3570_vm7, %v7744_v40 }
 0x917   : > { %7839 = vst.msk [vmem:[#allocation5 + $0x10] sm:$0xff] %vm3570_vm7, %v7746_v24  ;;  %7379 = vrot.lane.b32.xlu1 %v13387_v6, %s9755_s15 }
 0x918   : > { %6628 = vst.msk [vmem:[#allocation3 + $0xe1] sm:$0xff] %vm299_vm11, %v6596_v1  ;;  %7565 = vrot.lane.b32.xlu0 %v13323_v21, %s9756_s20  ;;  %v13394_v60 = vld [vmem:[#allocation3 + $0xf0] sm:$0xff] }
 0x919   : > { %v7748_v27 = vpop.permute.xlu1 %7747  ;;  %6705 = vst.msk [vmem:[#allocation5 + $0xa0] sm:$0xff] %vm299_vm11, %v13394_v60 }
 0x91a   : > { %v7934_v44 = vpop.permute.xlu0 %7933  ;;  %7840 = vst.msk [vmem:[#allocation5 + $0x18] sm:$0xff] %vm3570_vm7, %v7748_v27 }
 0x91b   : > { %8029 = vst.msk [vmem:[#allocation5] sm:$0xff] %vm3763_vm8, %v7934_v44  ;;  %v13402_v14 = vld [vmem:[#allocation3 + $0xd8] sm:$0xff]  ;;  %7567 = vrot.lane.b32.xlu1 %v13334_v59, %s9756_s20 }
 0x91c   : > { %7569 = vrot.lane.b32.xlu0 %v13400_v8, %s9756_s20  ;;  %6703 = vst.msk [vmem:[#allocation5 + $0x90] sm:$0xff] %vm299_vm11, %v13402_v14  ;;  %v13410_v10 = vld [vmem:[#allocation3 + $0xf8] sm:$0xff] }
 0x91d   : > { %v7936_v19 = vpop.permute.xlu1 %7935  ;;  %6706 = vst.msk [vmem:[#allocation5 + $0xa8] sm:$0xff] %vm299_vm11, %v13410_v10 }
 0x91e   : > { %v7938_v16 = vpop.permute.xlu0 %7937  ;;  %8030 = vst.msk [vmem:[#allocation5 + $0x8] sm:$0xff] %vm3763_vm8, %v7936_v19  ;;  %v13542_v19 = vld [vmem:[#allocation3 + $0xc9] sm:$0xff] }
 0x91f   : > { %8031 = vst.msk [vmem:[#allocation5 + $0x10] sm:$0xff] %vm3763_vm8, %v7938_v16  ;;  %v13418_v42 = vld [vmem:[#allocation3 + $0xe0] sm:$0xff]  ;;  %7571 = vrot.lane.b32.xlu1 %v13416_v2, %s9756_s20 }
 0x920   : > { %7757 = vrot.lane.b32.xlu0 %v13237_v39, %s9757_s23  ;;  %6704 = vst.msk [vmem:[#allocation5 + $0x98] sm:$0xff] %vm299_vm11, %v13418_v42 }
 0x921   : > { %v7940_v45 = vpop.permute.xlu1 %7939 }
 0x922   : > { %v8126_v18 = vpop.permute.xlu0 %8125  ;;  %8032 = vst.msk [vmem:[#allocation5 + $0x18] sm:$0xff] %vm3763_vm8, %v7940_v45  ;;  %v13550_v45 = vld [vmem:[#allocation3 + $0xc2] sm:$0xff] }
 0x923   : > { %8221 = vst.msk [vmem:[#allocation5] sm:$0xff] %vm3956_vm0, %v8126_v18  ;;  %7759 = vrot.lane.b32.xlu1 %v13249_v15, %s9757_s23  ;;  %v13440_v15 = vld [vmem:[#allocation3 + $0xa9] sm:$0xff] }
 0x924   : > { %7761 = vrot.lane.b32.xlu0 %v13310_v11, %s9757_s23 }
 0x925   : > { %v8128_v62 = vpop.permute.xlu1 %8127 }
 0x926   : > { %v6790_v33 = vpop.permute.xlu0 %6789  ;;  %8222 = vst.msk [vmem:[#allocation5 + $0x8] sm:$0xff] %vm3956_vm0, %v8128_v62  ;;  %v13559_v62 = vld [vmem:[%s14316_s4 + $0x3] ss:$0 sm:$0xff] }
 0x927   : > { %6881 = vst.msk [vmem:[#allocation5 + $0x20] sm:$0xff] %vm2604_vm1, %v6790_v33  ;;  %7763 = vrot.lane.b32.xlu1 %v13325_v46, %s9757_s23 }
 0x928   : > { %7949 = vrot.lane.b32.xlu0 %v13376_v22, %s9758_s25 }
 0x929   : > { %v6792_v39 = vpop.permute.xlu1 %6791 }
 0x92a   : > { %v8130_v13 = vpop.permute.xlu0 %8129  ;;  %6882 = vst.msk [vmem:[#allocation5 + $0x28] sm:$0xff] %vm2604_vm1, %v6792_v39  ;;  %v8253_v12 = vld [vmem:[#allocation5] sm:$0xff] }
 0x92b   : > { %8223 = vst.msk [vmem:[#allocation5 + $0x10] sm:$0xff] %vm3956_vm0, %v8130_v13  ;;  %7951 = vrot.lane.b32.xlu1 %v13387_v6, %s9758_s25 }
 0x92c   : > { %7953 = vrot.lane.b32.xlu0 %v13440_v15, %s9758_s25 }
 0x92d   : > { %v8132_v55 = vpop.permute.xlu1 %8131  ;;  %v8254_v23 = vld [vmem:[#allocation5 + $0x8] sm:$0xff] }
 0x92e   : > { %v6794_v35 = vpop.permute.xlu0 %6793  ;;  %8224 = vst.msk [vmem:[#allocation5 + $0x18] sm:$0xff] %vm3956_vm0, %v8132_v55  ;;  %v8285_v49 = vpack.c.bf16 %v8254_v23, %v8253_v12  ;;  %v13564_v55 = vld [vmem:[#allocation3 + $0xca] sm:$0xff] }
 0x92f   : > { %6883 = vst.msk [vmem:[#allocation5 + $0x30] sm:$0xff] %vm2604_vm1, %v6794_v35  ;;  %7955 = vrot.lane.b32.xlu1 %v13448_v17, %s9758_s25 }
 0x930   : > { %8141 = vrot.lane.b32.xlu0 %v13400_v8, %s9759_s19  ;;  %9625 = vmatprep.mubr.msk.bf16.mxu0 %vm4069_vm9, %v8285_v49 }
 0x931   : > { %v6796_v57 = vpop.permute.xlu1 %6795 }
 0x932   : > { %v6982_v28 = vpop.permute.xlu0 %6981  ;;  %6884 = vst.msk [vmem:[#allocation5 + $0x38] sm:$0xff] %vm2604_vm1, %v6796_v57  ;;  %v8255_v48 = vld [vmem:[#allocation5 + $0x10] sm:$0xff] }
 0x933   : > { %7073 = vst.msk [vmem:[#allocation5 + $0x20] sm:$0xff] %vm2797_vm2, %v6982_v28  ;;  %8143 = vrot.lane.b32.xlu1 %v13416_v2, %s9759_s19 }
 0x934   : > { %6805 = vrot.lane.b32.xlu0 %v13376_v22, %s9749_s29  ;;  %v9605_v43 = vpop.f32.mrf.mxu1 }
 0x935   : > { %v6541_v25 = vadd.f32 %v9605_v43, %v13045_v34  ;;  %v6984_v21 = vpop.permute.xlu1 %6983  ;;  %v8256_v59 = vld [vmem:[#allocation5 + $0x18] sm:$0xff] }
 0x936   : > { %v6986_v7 = vpop.permute.xlu0 %6985  ;;  %7074 = vst.msk [vmem:[#allocation5 + $0x28] sm:$0xff] %vm2797_vm2, %v6984_v21  ;;  %v6532_v26 = vpop.f32.mrf.mxu1  ;;  %v8286_v20 = vpack.c.bf16 %v8256_v59, %v8255_v48 }
 0x937   : > { %7075 = vst.msk [vmem:[#allocation5 + $0x30] sm:$0xff] %vm2797_vm2, %v6986_v7  ;;  %v6601_v3 = vmax.f32 %v6541_v25, 0.0  ;;  %v6533_v30 = vadd.f32 %v13045_v34, %v6532_v26  ;;  %6807 = vrot.lane.b32.xlu1 %v13387_v6, %s9749_s29 }
 0x938   : > { %8145 = vrot.lane.b32.xlu0 %v13464_v56, %s9759_s19  ;;  %v9606_v4 = vpop.f32.mrf.mxu1  ;;  %9626 = vmatmul.mubr.msk.bf16.vlgmr.msra.gmra.mxu0 %vm4069_vm9, %v8286_v20 }
 0x939   : > { %6633 = vst.msk [vmem:[#allocation3 + $0x121] sm:$0xff] %vm299_vm11, %v6601_v3  ;;  %v6599_v53 = vmax.f32 %v6533_v30, 0.0  ;;  %v6544_v61 = vadd.f32 %v9606_v4, %v13045_v34  ;;  %v6988_v36 = vpop.permute.xlu1 %6987 }
 0x93a   : > { %v7174_v38 = vpop.permute.xlu0 %7173  ;;  %7076 = vst.msk [vmem:[#allocation5 + $0x38] sm:$0xff] %vm2797_vm2, %v6988_v36  ;;  %v6535_v5 = vpop.f32.mrf.mxu1  ;;  %v13611_v36 = vld [vmem:[#allocation3 + $0xe1] sm:$0xff] }
 0x93b   : > { %7265 = vst.msk [vmem:[#allocation5 + $0x20] sm:$0xff] %vm2990_vm3, %v7174_v38  ;;  %v6602_v0 = vmax.f32 %v6544_v61, 0.0  ;;  %v6536_v31 = vadd.f32 %v13045_v34, %v6535_v5  ;;  %8147 = vrot.lane.b32.xlu1 %v13476_v32, %s9759_s19 }
 0x93c   : > { %6631 = vst.msk [vmem:[#allocation3 + $0x109] sm:$0xff] %vm299_vm11, %v6599_v53  ;;  %6809 = vrot.lane.b32.xlu0 %v13440_v15, %s9749_s29 }
 0x93d   : > { %6634 = vst.msk [vmem:[#allocation3 + $0x129] sm:$0xff] %vm299_vm11, %v6602_v0  ;;  %v6600_v50 = vmax.f32 %v6536_v31, 0.0  ;;  %v7176_v9 = vpop.permute.xlu1 %7175 }
 0x93e   : > { %v7178_v58 = vpop.permute.xlu0 %7177  ;;  %7266 = vst.msk [vmem:[#allocation5 + $0x28] sm:$0xff] %vm2990_vm3, %v7176_v9 }
 0x93f   : > { %7267 = vst.msk [vmem:[#allocation5 + $0x30] sm:$0xff] %vm2990_vm3, %v7178_v58  ;;  %6811 = vrot.lane.b32.xlu1 %v13448_v17, %s9749_s29 }
 0x940   : > { %6632 = vst.msk [vmem:[#allocation3 + $0x111] sm:$0xff] %vm299_vm11, %v6600_v50  ;;  %6997 = vrot.lane.b32.xlu0 %v13400_v8, %s9751_s7  ;;  %v13492_v34 = vld [vmem:[#allocation3 + $0x120] sm:$0xff] }
 0x941   : > { %v7180_v52 = vpop.permute.xlu1 %7179  ;;  %6709 = vst.msk [vmem:[#allocation5 + $0xc0] sm:$0xff] %vm299_vm11, %v13492_v34 }
 0x942   : > { %v7366_v63 = vpop.permute.xlu0 %7365  ;;  %7268 = vst.msk [vmem:[#allocation5 + $0x38] sm:$0xff] %vm2990_vm3, %v7180_v52  ;;  %v13630_v52 = vld [vmem:[#allocation3 + $0xda] sm:$0xff] }
 0x943   : > { %7457 = vst.msk [vmem:[#allocation5 + $0x20] sm:$0xff] %vm3183_vm4, %v7366_v63  ;;  %v13498_v41 = vld [vmem:[#allocation3 + $0x108] sm:$0xff]  ;;  %6999 = vrot.lane.b32.xlu1 %v13416_v2, %s9751_s7 }
 0x944   : > { %7001 = vrot.lane.b32.xlu0 %v13464_v56, %s9751_s7  ;;  %6707 = vst.msk [vmem:[#allocation5 + $0xb0] sm:$0xff] %vm299_vm11, %v13498_v41  ;;  %v13506_v37 = vld [vmem:[#allocation3 + $0x128] sm:$0xff] }
 0x945   : > { %v7368_v22 = vpop.permute.xlu1 %7367  ;;  %6710 = vst.msk [vmem:[#allocation5 + $0xc8] sm:$0xff] %vm299_vm11, %v13506_v37 }
 0x946   : > { %v7370_v29 = vpop.permute.xlu0 %7369  ;;  %7458 = vst.msk [vmem:[#allocation5 + $0x28] sm:$0xff] %vm3183_vm4, %v7368_v22 }
 0x947   : > { %7459 = vst.msk [vmem:[#allocation5 + $0x30] sm:$0xff] %vm3183_vm4, %v7370_v29  ;;  %v13512_v47 = vld [vmem:[#allocation3 + $0x110] sm:$0xff]  ;;  %7003 = vrot.lane.b32.xlu1 %v13476_v32, %s9751_s7 }
 0x948   : > { %7189 = vrot.lane.b32.xlu0 %v13310_v11, %s9753_s9  ;;  %6708 = vst.msk [vmem:[#allocation5 + $0xb8] sm:$0xff] %vm299_vm11, %v13512_v47 }
 0x949   : > { %v7372_v1 = vpop.permute.xlu1 %7371 }
 0x94a   : > { %v7558_v40 = vpop.permute.xlu0 %7557  ;;  %7460 = vst.msk [vmem:[#allocation5 + $0x38] sm:$0xff] %vm3183_vm4, %v7372_v1  ;;  %v13639_v1 = vld [vmem:[#allocation3 + $0xe2] sm:$0xff] }
 0x94b   : > { %7649 = vst.msk [vmem:[#allocation5 + $0x20] sm:$0xff] %vm3376_vm5, %v7558_v40  ;;  %7191 = vrot.lane.b32.xlu1 %v13325_v46, %s9753_s9  ;;  %v13534_v46 = vld [vmem:[#allocation3 + $0xc1] sm:$0xff] }
 0x94c   : > { %7193 = vrot.lane.b32.xlu0 %v13304_v54, %s9753_s9 }
 0x94d   : > { %v7560_v24 = vpop.permute.xlu1 %7559 }
 0x94e   : > { %v7562_v6 = vpop.permute.xlu0 %7561  ;;  %7650 = vst.msk [vmem:[#allocation5 + $0x28] sm:$0xff] %vm3376_vm5, %v7560_v24 }
 0x94f   : > { %7651 = vst.msk [vmem:[#allocation5 + $0x30] sm:$0xff] %vm3376_vm5, %v7562_v6  ;;  %7195 = vrot.lane.b32.xlu1 %v13317_v51, %s9753_s9 }
 0x950   : > { %7381 = vrot.lane.b32.xlu0 %v13440_v15, %s9755_s15 }
 0x951   : > { %v7564_v11 = vpop.permute.xlu1 %7563 }
 0x952   : > { %v7750_v27 = vpop.permute.xlu0 %7749  ;;  %7652 = vst.msk [vmem:[#allocation5 + $0x38] sm:$0xff] %vm3376_vm5, %v7564_v11 }
 0x953   : > { %7841 = vst.msk [vmem:[#allocation5 + $0x20] sm:$0xff] %vm3570_vm7, %v7750_v27  ;;  %7383 = vrot.lane.b32.xlu1 %v13448_v17, %s9755_s15 }
 0x954   : > { %7385 = vrot.lane.b32.xlu0 %v13534_v46, %s9755_s15 }
 0x955   : > { %v7752_v44 = vpop.permute.xlu1 %7751 }
 0x956   : > { %v7754_v8 = vpop.permute.xlu0 %7753  ;;  %7842 = vst.msk [vmem:[#allocation5 + $0x28] sm:$0xff] %vm3570_vm7, %v7752_v44 }
 0x957   : > { %7843 = vst.msk [vmem:[#allocation5 + $0x30] sm:$0xff] %vm3570_vm7, %v7754_v8  ;;  %7387 = vrot.lane.b32.xlu1 %v13542_v19, %s9755_s15 }
 0x958   : > { %7573 = vrot.lane.b32.xlu0 %v13464_v56, %s9756_s20  ;;  %v13595_v56 = vld [vmem:[#allocation3 + $0xd9] sm:$0xff] }
 0x959   : > { %v7756_v16 = vpop.permute.xlu1 %7755 }
 0x95a   : > { %v7942_v2 = vpop.permute.xlu0 %7941  ;;  %7844 = vst.msk [vmem:[#allocation5 + $0x38] sm:$0xff] %vm3570_vm7, %v7756_v16 }
 0x95b   : > { %8033 = vst.msk [vmem:[#allocation5 + $0x20] sm:$0xff] %vm3763_vm8, %v7942_v2  ;;  %7575 = vrot.lane.b32.xlu1 %v13476_v32, %s9756_s20 }
 0x95c   : > { %7577 = vrot.lane.b32.xlu0 %v13550_v45, %s9756_s20  ;;  %v9609_v18 = vpop.f32.mrf.mxu1 }
 0x95d   : > { %v6557_v33 = vadd.f32 %v13559_v62, %v9609_v18  ;;  %v7944_v39 = vpop.permute.xlu1 %7943 }
 0x95e   : > { %v7946_v13 = vpop.permute.xlu0 %7945  ;;  %8034 = vst.msk [vmem:[#allocation5 + $0x28] sm:$0xff] %vm3763_vm8, %v7944_v39  ;;  %v6548_v15 = vpop.f32.mrf.mxu1 }
 0x95f   : > { %8035 = vst.msk [vmem:[#allocation5 + $0x30] sm:$0xff] %vm3763_vm8, %v7946_v13  ;;  %v6605_v35 = vmax.f32 %v6557_v33, 0.0  ;;  %v6549_v12 = vadd.f32 %v13559_v62, %v6548_v15  ;;  %7579 = vrot.lane.b32.xlu1 %v13564_v55, %s9756_s20 }
 0x960   : > { %7765 = vrot.lane.b32.xlu0 %v13304_v54, %s9757_s23  ;;  %v9610_v23 = vpop.f32.mrf.mxu1 }
 0x961   : > { %6637 = vst.msk [vmem:[#allocation3 + $0x151] sm:$0xff] %vm299_vm11, %v6605_v35  ;;  %v6603_v17 = vmax.f32 %v6549_v12, 0.0  ;;  %v6560_v49 = vadd.f32 %v13559_v62, %v9610_v23  ;;  %v7948_v57 = vpop.permute.xlu1 %7947 }
 0x962   : > { %v8134_v28 = vpop.permute.xlu0 %8133  ;;  %8036 = vst.msk [vmem:[#allocation5 + $0x38] sm:$0xff] %vm3763_vm8, %v7948_v57  ;;  %v6551_v43 = vpop.f32.mrf.mxu1 }
 0x963   : > { %8225 = vst.msk [vmem:[#allocation5 + $0x20] sm:$0xff] %vm3956_vm0, %v8134_v28  ;;  %v6606_v25 = vmax.f32 %v6560_v49, 0.0  ;;  %v6552_v21 = vadd.f32 %v13559_v62, %v6551_v43  ;;  %7767 = vrot.lane.b32.xlu1 %v13317_v51, %s9757_s23  ;;  %v13694_v43 = vld [vmem:[#allocation3 + $0xf9] sm:$0xff] }
 0x964   : > { %6635 = vst.msk [vmem:[#allocation3 + $0x139] sm:$0xff] %vm299_vm11, %v6603_v17  ;;  %7769 = vrot.lane.b32.xlu0 %v13402_v14, %s9757_s23 }
 0x965   : > { %6638 = vst.msk [vmem:[#allocation3 + $0x159] sm:$0xff] %vm299_vm11, %v6606_v25  ;;  %v6604_v54 = vmax.f32 %v6552_v21, 0.0  ;;  %v8136_v7 = vpop.permute.xlu1 %8135 }
 0x966   : > { %v6798_v48 = vpop.permute.xlu0 %6797  ;;  %8226 = vst.msk [vmem:[#allocation5 + $0x28] sm:$0xff] %vm3956_vm0, %v8136_v7  ;;  %v13706_v7 = vld [vmem:[#allocation3 + $0xf2] sm:$0xff] }
 0x967   : > { %6885 = vst.msk [vmem:[#allocation5 + $0x40] sm:$0xff] %vm2604_vm1, %v6798_v48  ;;  %7771 = vrot.lane.b32.xlu1 %v13418_v42, %s9757_s23 }
 0x968   : > { %6636 = vst.msk [vmem:[#allocation3 + $0x141] sm:$0xff] %vm299_vm11, %v6604_v54  ;;  %7957 = vrot.lane.b32.xlu0 %v13534_v46, %s9758_s25  ;;  %v13589_v51 = vld [vmem:[#allocation3 + $0x150] sm:$0xff] }
 0x969   : > { %v6800_v59 = vpop.permute.xlu1 %6799  ;;  %6713 = vst.msk [vmem:[#allocation5 + $0xe0] sm:$0xff] %vm299_vm11, %v13589_v51 }
 0x96a   : > { %v8138_v26 = vpop.permute.xlu0 %8137  ;;  %6886 = vst.msk [vmem:[#allocation5 + $0x48] sm:$0xff] %vm2604_vm1, %v6800_v59  ;;  %v8257_v53 = vld [vmem:[#allocation5 + $0x20] sm:$0xff] }
 0x96b   : > { %8227 = vst.msk [vmem:[#allocation5 + $0x30] sm:$0xff] %vm3956_vm0, %v8138_v26  ;;  %v13597_v20 = vld [vmem:[#allocation3 + $0x138] sm:$0xff]  ;;  %7959 = vrot.lane.b32.xlu1 %v13542_v19, %s9758_s25 }
 0x96c   : > { %7961 = vrot.lane.b32.xlu0 %v13595_v56, %s9758_s25  ;;  %6711 = vst.msk [vmem:[#allocation5 + $0xd0] sm:$0xff] %vm299_vm11, %v13597_v20  ;;  %v13605_v3 = vld [vmem:[#allocation3 + $0x158] sm:$0xff] }
 0x96d   : > { %v8140_v30 = vpop.permute.xlu1 %8139  ;;  %v8258_v61 = vld [vmem:[#allocation5 + $0x28] sm:$0xff]  ;;  %6714 = vst.msk [vmem:[#allocation5 + $0xe8] sm:$0xff] %vm299_vm11, %v13605_v3 }
 0x96e   : > { %v6802_v4 = vpop.permute.xlu0 %6801  ;;  %8228 = vst.msk [vmem:[#allocation5 + $0x38] sm:$0xff] %vm3956_vm0, %v8140_v30  ;;  %v8287_v38 = vpack.c.bf16 %v8258_v61, %v8257_v53  ;;  %v13714_v26 = vld [vmem:[#allocation3 + $0xfa] sm:$0xff] }
 0x96f   : > { %6887 = vst.msk [vmem:[#allocation5 + $0x50] sm:$0xff] %vm2604_vm1, %v6802_v4  ;;  %v13613_v5 = vld [vmem:[#allocation3 + $0x140] sm:$0xff]  ;;  %7963 = vrot.lane.b32.xlu1 %v13611_v36, %s9758_s25 }
 0x970   : > { %8149 = vrot.lane.b32.xlu0 %v13550_v45, %s9759_s19  ;;  %6712 = vst.msk [vmem:[#allocation5 + $0xd8] sm:$0xff] %vm299_vm11, %v13613_v5  ;;  %9629 = vmatprep.mubr.msk.bf16.mxu0 %vm4069_vm9, %v8287_v38 }
 0x971   : > { %v6804_v32 = vpop.permute.xlu1 %6803 }
 0x972   : > { %v6990_v0 = vpop.permute.xlu0 %6989  ;;  %6888 = vst.msk [vmem:[#allocation5 + $0x58] sm:$0xff] %vm2604_vm1, %v6804_v32  ;;  %v8259_v9 = vld [vmem:[#allocation5 + $0x30] sm:$0xff] }
 0x973   : > { %7077 = vst.msk [vmem:[#allocation5 + $0x40] sm:$0xff] %vm2797_vm2, %v6990_v0  ;;  %8151 = vrot.lane.b32.xlu1 %v13564_v55, %s9759_s19 }
 0x974   : > { %6813 = vrot.lane.b32.xlu0 %v13534_v46, %s9749_s29 }
 0x975   : > { %v6992_v31 = vpop.permute.xlu1 %6991  ;;  %v8260_v58 = vld [vmem:[#allocation5 + $0x38] sm:$0xff] }
 0x976   : > { %v6994_v50 = vpop.permute.xlu0 %6993  ;;  %7078 = vst.msk [vmem:[#allocation5 + $0x48] sm:$0xff] %vm2797_vm2, %v6992_v31  ;;  %v8288_v63 = vpack.c.bf16 %v8260_v58, %v8259_v9  ;;  %v13741_v31 = vld [vmem:[#allocation3 + $0x111] sm:$0xff] }
 0x977   : > { %7079 = vst.msk [vmem:[#allocation5 + $0x50] sm:$0xff] %vm2797_vm2, %v6994_v50  ;;  %6815 = vrot.lane.b32.xlu1 %v13542_v19, %s9749_s29 }
 0x978   : > { %8153 = vrot.lane.b32.xlu0 %v13630_v52, %s9759_s19  ;;  %9630 = vmatmul.mubr.msk.bf16.gmra.mxu0 %vm4069_vm9, %v8288_v63 }
 0x979   : > { %v6996_v22 = vpop.permute.xlu1 %6995 }
 0x97a   : > { %v7182_v29 = vpop.permute.xlu0 %7181  ;;  %7080 = vst.msk [vmem:[#allocation5 + $0x58] sm:$0xff] %vm2797_vm2, %v6996_v22 }
 0x97b   : > { %7269 = vst.msk [vmem:[#allocation5 + $0x40] sm:$0xff] %vm2990_vm3, %v7182_v29  ;;  %8155 = vrot.lane.b32.xlu1 %v13639_v1, %s9759_s19 }
 0x97c   : > { %6817 = vrot.lane.b32.xlu0 %v13595_v56, %s9749_s29 }
 0x97d   : > { %v7184_v40 = vpop.permute.xlu1 %7183 }
 0x97e   : > { %v7186_v24 = vpop.permute.xlu0 %7185  ;;  %7270 = vst.msk [vmem:[#allocation5 + $0x48] sm:$0xff] %vm2990_vm3, %v7184_v40 }
 0x97f   : > { %7271 = vst.msk [vmem:[#allocation5 + $0x50] sm:$0xff] %vm2990_vm3, %v7186_v24  ;;  %6819 = vrot.lane.b32.xlu1 %v13611_v36, %s9749_s29 }
 0x980   : > { %7005 = vrot.lane.b32.xlu0 %v13550_v45, %s9751_s7 }
 0x981   : > { %v7188_v6 = vpop.permute.xlu1 %7187 }
 0x982   : > { %v7374_v11 = vpop.permute.xlu0 %7373  ;;  %7272 = vst.msk [vmem:[#allocation5 + $0x58] sm:$0xff] %vm2990_vm3, %v7188_v6 }
 0x983   : > { %7461 = vst.msk [vmem:[#allocation5 + $0x40] sm:$0xff] %vm3183_vm4, %v7374_v11  ;;  %7007 = vrot.lane.b32.xlu1 %v13564_v55, %s9751_s7  ;;  %v8080_v11 = vld [vmem:[#allocation3 + $0x112] sm:$0xff] }
 0x984   : > { %7009 = vrot.lane.b32.xlu0 %v13630_v52, %s9751_s7  ;;  %v9613_v27 = vpop.f32.mrf.mxu1 }
 0x985   : > { %v7376_v46 = vpop.permute.xlu1 %7375  ;;  %v6573_v8 = vadd.f32 %v13559_v62, %v9613_v27 }
 0x986   : > { %v7378_v44 = vpop.permute.xlu0 %7377  ;;  %7462 = vst.msk [vmem:[#allocation5 + $0x48] sm:$0xff] %vm3183_vm4, %v7376_v46  ;;  %v6564_v19 = vpop.f32.mrf.mxu1 }
 0x987   : > { %7463 = vst.msk [vmem:[#allocation5 + $0x50] sm:$0xff] %vm3183_vm4, %v7378_v44  ;;  %7011 = vrot.lane.b32.xlu1 %v13639_v1, %s9751_s7  ;;  %v6609_v16 = vmax.f32 %v6573_v8, 0.0  ;;  %v6565_v2 = vadd.f32 %v13559_v62, %v6564_v19 }
 0x988   : > { %7197 = vrot.lane.b32.xlu0 %v13402_v14, %s9753_s9  ;;  %v9614_v45 = vpop.f32.mrf.mxu1 }
 0x989   : > { %v7380_v18 = vpop.permute.xlu1 %7379  ;;  %6641 = vst.msk [vmem:[#allocation3 + $0x181] sm:$0xff] %vm299_vm11, %v6609_v16  ;;  %v6607_v39 = vmax.f32 %v6565_v2, 0.0  ;;  %v6576_v13 = vadd.f32 %v13559_v62, %v9614_v45 }
 0x98a   : > { %v7566_v33 = vpop.permute.xlu0 %7565  ;;  %7464 = vst.msk [vmem:[#allocation5 + $0x58] sm:$0xff] %vm3183_vm4, %v7380_v18  ;;  %v6567_v15 = vpop.f32.mrf.mxu1 }
 0x98b   : > { %7653 = vst.msk [vmem:[#allocation5 + $0x40] sm:$0xff] %vm3376_vm5, %v7566_v33  ;;  %7199 = vrot.lane.b32.xlu1 %v13418_v42, %s9753_s9  ;;  %v6610_v14 = vmax.f32 %v6576_v13, 0.0  ;;  %v6568_v55 = vadd.f32 %v13559_v62, %v6567_v15  ;;  %v7311_v62 = vld [vmem:[#allocation3 + $0xf1] sm:$0xff] }
 0x98c   : > { %7201 = vrot.lane.b32.xlu0 %v13394_v60, %s9753_s9  ;;  %6639 = vst.msk [vmem:[#allocation3 + $0x169] sm:$0xff] %vm299_vm11, %v6607_v39 }
 0x98d   : > { %v7568_v35 = vpop.permute.xlu1 %7567  ;;  %6642 = vst.msk [vmem:[#allocation3 + $0x189] sm:$0xff] %vm299_vm11, %v6610_v14  ;;  %v6608_v23 = vmax.f32 %v6568_v55, 0.0  ;;  %v7316_v14 = vld [vmem:[#allocation3 + $0x129] sm:$0xff] }
 0x98e   : > { %v7570_v12 = vpop.permute.xlu0 %7569  ;;  %7654 = vst.msk [vmem:[#allocation5 + $0x48] sm:$0xff] %vm3376_vm5, %v7568_v35 }
 0x98f   : > { %7655 = vst.msk [vmem:[#allocation5 + $0x50] sm:$0xff] %vm3376_vm5, %v7570_v12  ;;  %7203 = vrot.lane.b32.xlu1 %v13410_v10, %s9753_s9  ;;  %v13803_v12 = vld [vmem:[#allocation3 + $0x122] sm:$0xff] }
 0x990   : > { %7389 = vrot.lane.b32.xlu0 %v13595_v56, %s9755_s15  ;;  %6640 = vst.msk [vmem:[#allocation3 + $0x171] sm:$0xff] %vm299_vm11, %v6608_v23 }
 0x991   : > { %v7572_v42 = vpop.permute.xlu1 %7571 }
 0x992   : > { %v7758_v17 = vpop.permute.xlu0 %7757  ;;  %7656 = vst.msk [vmem:[#allocation5 + $0x58] sm:$0xff] %vm3376_vm5, %v7572_v42 }
 0x993   : > { %7845 = vst.msk [vmem:[#allocation5 + $0x40] sm:$0xff] %vm3570_vm7, %v7758_v17  ;;  %v13685_v49 = vld [vmem:[#allocation3 + $0x168] sm:$0xff]  ;;  %7391 = vrot.lane.b32.xlu1 %v13611_v36, %s9755_s15 }
 0x994   : > { %7393 = vrot.lane.b32.xlu0 %v7311_v62, %s9755_s15  ;;  %6715 = vst.msk [vmem:[#allocation5 + $0xf0] sm:$0xff] %vm299_vm11, %v13685_v49  ;;  %v13810_v17 = vld [vmem:[#allocation3 + $0x12a] sm:$0xff] }
 0x995   : > { %v7760_v57 = vpop.permute.xlu1 %7759 }
 0x996   : > { %v7762_v28 = vpop.permute.xlu0 %7761  ;;  %7846 = vst.msk [vmem:[#allocation5 + $0x48] sm:$0xff] %vm3570_vm7, %v7760_v57 }
 0x997   : > { %7847 = vst.msk [vmem:[#allocation5 + $0x50] sm:$0xff] %vm3570_vm7, %v7762_v28  ;;  %v13696_v25 = vld [vmem:[#allocation3 + $0x170] sm:$0xff]  ;;  %7395 = vrot.lane.b32.xlu1 %v13694_v43, %s9755_s15 }
 0x998   : > { %7581 = vrot.lane.b32.xlu0 %v13630_v52, %s9756_s20  ;;  %6716 = vst.msk [vmem:[#allocation5 + $0xf8] sm:$0xff] %vm299_vm11, %v13696_v25 }
 0x999   : > { %v7764_v21 = vpop.permute.xlu1 %7763 }
 0x99a   : > { %v7950_v54 = vpop.permute.xlu0 %7949  ;;  %7848 = vst.msk [vmem:[#allocation5 + $0x58] sm:$0xff] %vm3570_vm7, %v7764_v21 }
 0x99b   : > { %8037 = vst.msk [vmem:[#allocation5 + $0x40] sm:$0xff] %vm3763_vm8, %v7950_v54  ;;  %7583 = vrot.lane.b32.xlu1 %v13639_v1, %s9756_s20  ;;  %v8079_v1 = vld [vmem:[#allocation3 + $0x10a] sm:$0xff] }
 0x99c   : > { %7585 = vrot.lane.b32.xlu0 %v13706_v7, %s9756_s20 }
 0x99d   : > { %v7952_v48 = vpop.permute.xlu1 %7951 }
 0x99e   : > { %v7954_v59 = vpop.permute.xlu0 %7953  ;;  %8038 = vst.msk [vmem:[#allocation5 + $0x48] sm:$0xff] %vm3763_vm8, %v7952_v48 }
 0x99f   : > { %8039 = vst.msk [vmem:[#allocation5 + $0x50] sm:$0xff] %vm3763_vm8, %v7954_v59  ;;  %7587 = vrot.lane.b32.xlu1 %v13714_v26, %s9756_s20 }
 0x9a0   : > { %7773 = vrot.lane.b32.xlu0 %v13394_v60, %s9757_s23 }
 0x9a1   : > { %v7956_v56 = vpop.permute.xlu1 %7955 }
 0x9a2   : > { %v8142_v30 = vpop.permute.xlu0 %8141  ;;  %8040 = vst.msk [vmem:[#allocation5 + $0x58] sm:$0xff] %vm3763_vm8, %v7956_v56 }
 0x9a3   : > { %8229 = vst.msk [vmem:[#allocation5 + $0x40] sm:$0xff] %vm3956_vm0, %v8142_v30  ;;  %7775 = vrot.lane.b32.xlu1 %v13410_v10, %s9757_s23  ;;  %v13733_v10 = vld [vmem:[#allocation3 + $0x109] sm:$0xff] }
 0x9a4   : > { %7777 = vrot.lane.b32.xlu0 %v13498_v41, %s9757_s23 }
 0x9a5   : > { %v8144_v4 = vpop.permute.xlu1 %8143 }
 0x9a6   : > { %v6806_v53 = vpop.permute.xlu0 %6805  ;;  %8230 = vst.msk [vmem:[#allocation5 + $0x48] sm:$0xff] %vm3956_vm0, %v8144_v4 }
 0x9a7   : > { %6889 = vst.msk [vmem:[#allocation5 + $0x60] sm:$0xff] %vm2604_vm1, %v6806_v53  ;;  %7779 = vrot.lane.b32.xlu1 %v13512_v47, %s9757_s23 }
 0x9a8   : > { %7965 = vrot.lane.b32.xlu0 %v7311_v62, %s9758_s25 }
 0x9a9   : > { %v6808_v60 = vpop.permute.xlu1 %6807 }
 0x9aa   : > { %v8146_v61 = vpop.permute.xlu0 %8145  ;;  %6890 = vst.msk [vmem:[#allocation5 + $0x68] sm:$0xff] %vm2604_vm1, %v6808_v60  ;;  %v8261_v32 = vld [vmem:[#allocation5 + $0x40] sm:$0xff] }
 0x9ab   : > { %8231 = vst.msk [vmem:[#allocation5 + $0x50] sm:$0xff] %vm3956_vm0, %v8146_v61  ;;  %7967 = vrot.lane.b32.xlu1 %v13694_v43, %s9758_s25 }
 0x9ac   : > { %7969 = vrot.lane.b32.xlu0 %v13733_v10, %s9758_s25 }
 0x9ad   : > { %v8148_v36 = vpop.permute.xlu1 %8147  ;;  %v8262_v0 = vld [vmem:[#allocation5 + $0x48] sm:$0xff] }
 0x9ae   : > { %v6810_v38 = vpop.permute.xlu0 %6809  ;;  %8232 = vst.msk [vmem:[#allocation5 + $0x58] sm:$0xff] %vm3956_vm0, %v8148_v36  ;;  %v8289_v50 = vpack.c.bf16 %v8262_v0, %v8261_v32  ;;  %v8083_v36 = vld [vmem:[#allocation3 + $0x13a] sm:$0xff] }
 0x9af   : > { %6891 = vst.msk [vmem:[#allocation5 + $0x70] sm:$0xff] %vm2604_vm1, %v6810_v38  ;;  %7971 = vrot.lane.b32.xlu1 %v13741_v31, %s9758_s25 }
 0x9b0   : > { %8157 = vrot.lane.b32.xlu0 %v13706_v7, %s9759_s19  ;;  %9633 = vmatprep.mubr.msk.bf16.mxu0 %vm4069_vm9, %v8289_v50 }
 0x9b1   : > { %v6812_v9 = vpop.permute.xlu1 %6811 }
 0x9b2   : > { %v6998_v58 = vpop.permute.xlu0 %6997  ;;  %6892 = vst.msk [vmem:[#allocation5 + $0x78] sm:$0xff] %vm2604_vm1, %v6812_v9  ;;  %v8263_v22 = vld [vmem:[#allocation5 + $0x50] sm:$0xff] }
 0x9b3   : > { %7081 = vst.msk [vmem:[#allocation5 + $0x60] sm:$0xff] %vm2797_vm2, %v6998_v58  ;;  %8159 = vrot.lane.b32.xlu1 %v13714_v26, %s9759_s19 }
 0x9b4   : > { %6821 = vrot.lane.b32.xlu0 %v7311_v62, %s9749_s29 }
 0x9b5   : > { %v7000_v52 = vpop.permute.xlu1 %6999  ;;  %v8264_v29 = vld [vmem:[#allocation5 + $0x58] sm:$0xff] }
 0x9b6   : > { %v7002_v63 = vpop.permute.xlu0 %7001  ;;  %7082 = vst.msk [vmem:[#allocation5 + $0x68] sm:$0xff] %vm2797_vm2, %v7000_v52  ;;  %v8290_v40 = vpack.c.bf16 %v8264_v29, %v8263_v22 }
 0x9b7   : > { %7083 = vst.msk [vmem:[#allocation5 + $0x70] sm:$0xff] %vm2797_vm2, %v7002_v63  ;;  %6823 = vrot.lane.b32.xlu1 %v13694_v43, %s9749_s29 }
 0x9b8   : > { %8161 = vrot.lane.b32.xlu0 %v8079_v1, %s9759_s19  ;;  %9634 = vmatmul.mubr.msk.bf16.gmra.mxu0 %vm4069_vm9, %v8290_v40 }
 0x9b9   : > { %v7004_v24 = vpop.permute.xlu1 %7003 }
 0x9ba   : > { %v7190_v6 = vpop.permute.xlu0 %7189  ;;  %7084 = vst.msk [vmem:[#allocation5 + $0x78] sm:$0xff] %vm2797_vm2, %v7004_v24 }
 0x9bb   : > { %7273 = vst.msk [vmem:[#allocation5 + $0x60] sm:$0xff] %vm2990_vm3, %v7190_v6  ;;  %8163 = vrot.lane.b32.xlu1 %v8080_v11, %s9759_s19 }
 0x9bc   : > { %6825 = vrot.lane.b32.xlu0 %v13733_v10, %s9749_s29 }
 0x9bd   : > { %v7192_v27 = vpop.permute.xlu1 %7191 }
 0x9be   : > { %v7194_v46 = vpop.permute.xlu0 %7193  ;;  %7274 = vst.msk [vmem:[#allocation5 + $0x68] sm:$0xff] %vm2990_vm3, %v7192_v27 }
 0x9bf   : > { %7275 = vst.msk [vmem:[#allocation5 + $0x70] sm:$0xff] %vm2990_vm3, %v7194_v46  ;;  %6827 = vrot.lane.b32.xlu1 %v13741_v31, %s9749_s29  ;;  %v7320_v46 = vld [vmem:[#allocation3 + $0x159] sm:$0xff] }
 0x9c0   : > { %7013 = vrot.lane.b32.xlu0 %v13706_v7, %s9751_s7 }
 0x9c1   : > { %v7196_v44 = vpop.permute.xlu1 %7195 }
 0x9c2   : > { %v7382_v8 = vpop.permute.xlu0 %7381  ;;  %7276 = vst.msk [vmem:[#allocation5 + $0x78] sm:$0xff] %vm2990_vm3, %v7196_v44 }
 0x9c3   : > { %7465 = vst.msk [vmem:[#allocation5 + $0x60] sm:$0xff] %vm3183_vm4, %v7382_v8  ;;  %7015 = vrot.lane.b32.xlu1 %v13714_v26, %s9751_s7  ;;  %v13836_v26 = vld [vmem:[#allocation3 + $0x141] sm:$0xff] }
 0x9c4   : > { %7017 = vrot.lane.b32.xlu0 %v8079_v1, %s9751_s7 }
 0x9c5   : > { %v7384_v19 = vpop.permute.xlu1 %7383 }
 0x9c6   : > { %v7386_v16 = vpop.permute.xlu0 %7385  ;;  %7466 = vst.msk [vmem:[#allocation5 + $0x68] sm:$0xff] %vm3183_vm4, %v7384_v19  ;;  %v13897_v19 = vld [vmem:[#allocation3 + $0x152] sm:$0xff] }
 0x9c7   : > { %7467 = vst.msk [vmem:[#allocation5 + $0x70] sm:$0xff] %vm3183_vm4, %v7386_v16  ;;  %7019 = vrot.lane.b32.xlu1 %v8080_v11, %s9751_s7 }
 0x9c8   : > { %7205 = vrot.lane.b32.xlu0 %v13498_v41, %s9753_s9 }
 0x9c9   : > { %v7388_v2 = vpop.permute.xlu1 %7387 }
 0x9ca   : > { %v7574_v45 = vpop.permute.xlu0 %7573  ;;  %7468 = vst.msk [vmem:[#allocation5 + $0x78] sm:$0xff] %vm3183_vm4, %v7388_v2 }
 0x9cb   : > { %7657 = vst.msk [vmem:[#allocation5 + $0x60] sm:$0xff] %vm3376_vm5, %v7574_v45  ;;  %7207 = vrot.lane.b32.xlu1 %v13512_v47, %s9753_s9  ;;  %v7315_v47 = vld [vmem:[#allocation3 + $0x121] sm:$0xff] }
 0x9cc   : > { %7209 = vrot.lane.b32.xlu0 %v13492_v34, %s9753_s9  ;;  %v13904_v45 = vld [vmem:[#allocation3 + $0x15a] sm:$0xff] }
 0x9cd   : > { %v7576_v18 = vpop.permute.xlu1 %7575 }
 0x9ce   : > { %v7578_v33 = vpop.permute.xlu0 %7577  ;;  %7658 = vst.msk [vmem:[#allocation5 + $0x68] sm:$0xff] %vm3376_vm5, %v7576_v18 }
 0x9cf   : > { %7659 = vst.msk [vmem:[#allocation5 + $0x70] sm:$0xff] %vm3376_vm5, %v7578_v33  ;;  %7211 = vrot.lane.b32.xlu1 %v13506_v37, %s9753_s9 }
 0x9d0   : > { %7397 = vrot.lane.b32.xlu0 %v13733_v10, %s9755_s15 }
 0x9d1   : > { %v7580_v41 = vpop.permute.xlu1 %7579 }
 0x9d2   : > { %v7766_v39 = vpop.permute.xlu0 %7765  ;;  %7660 = vst.msk [vmem:[#allocation5 + $0x78] sm:$0xff] %vm3376_vm5, %v7580_v41 }
 0x9d3   : > { %7849 = vst.msk [vmem:[#allocation5 + $0x60] sm:$0xff] %vm3570_vm7, %v7766_v39  ;;  %7399 = vrot.lane.b32.xlu1 %v13741_v31, %s9755_s15  ;;  %v8084_v31 = vld [vmem:[#allocation3 + $0x142] sm:$0xff] }
 0x9d4   : > { %7401 = vrot.lane.b32.xlu0 %v7315_v47, %s9755_s15 }
 0x9d5   : > { %v7768_v13 = vpop.permute.xlu1 %7767 }
 0x9d6   : > { %v7770_v15 = vpop.permute.xlu0 %7769  ;;  %7850 = vst.msk [vmem:[#allocation5 + $0x68] sm:$0xff] %vm3570_vm7, %v7768_v13 }
 0x9d7   : > { %7851 = vst.msk [vmem:[#allocation5 + $0x70] sm:$0xff] %vm3570_vm7, %v7770_v15  ;;  %7403 = vrot.lane.b32.xlu1 %v7316_v14, %s9755_s15 }
 0x9d8   : > { %7589 = vrot.lane.b32.xlu0 %v8079_v1, %s9756_s20 }
 0x9d9   : > { %v7772_v55 = vpop.permute.xlu1 %7771 }
 0x9da   : > { %v7958_v35 = vpop.permute.xlu0 %7957  ;;  %7852 = vst.msk [vmem:[#allocation5 + $0x78] sm:$0xff] %vm3570_vm7, %v7772_v55 }
 0x9db   : > { %8041 = vst.msk [vmem:[#allocation5 + $0x60] sm:$0xff] %vm3763_vm8, %v7958_v35  ;;  %7591 = vrot.lane.b32.xlu1 %v8080_v11, %s9756_s20  ;;  %v13930_v35 = vld [vmem:[#allocation3 + $0x171] sm:$0xff] }
 0x9dc   : > { %7593 = vrot.lane.b32.xlu0 %v13803_v12, %s9756_s20 }
 0x9dd   : > { %v7960_v23 = vpop.permute.xlu1 %7959 }
 0x9de   : > { %v7962_v42 = vpop.permute.xlu0 %7961  ;;  %8042 = vst.msk [vmem:[#allocation5 + $0x68] sm:$0xff] %vm3763_vm8, %v7960_v23 }
 0x9df   : > { %8043 = vst.msk [vmem:[#allocation5 + $0x70] sm:$0xff] %vm3763_vm8, %v7962_v42  ;;  %7595 = vrot.lane.b32.xlu1 %v13810_v17, %s9756_s20 }
 0x9e0   : > { %7781 = vrot.lane.b32.xlu0 %v13492_v34, %s9757_s23 }
 0x9e1   : > { %v7964_v62 = vpop.permute.xlu1 %7963 }
 0x9e2   : > { %v8150_v57 = vpop.permute.xlu0 %8149  ;;  %8044 = vst.msk [vmem:[#allocation5 + $0x78] sm:$0xff] %vm3763_vm8, %v7964_v62 }
 0x9e3   : > { %8233 = vst.msk [vmem:[#allocation5 + $0x60] sm:$0xff] %vm3956_vm0, %v8150_v57  ;;  %7783 = vrot.lane.b32.xlu1 %v13506_v37, %s9757_s23  ;;  %v13829_v37 = vld [vmem:[#allocation3 + $0x139] sm:$0xff] }
 0x9e4   : > { %7785 = vrot.lane.b32.xlu0 %v13597_v20, %s9757_s23 }
 0x9e5   : > { %v8152_v28 = vpop.permute.xlu1 %8151 }
 0x9e6   : > { %v6814_v43 = vpop.permute.xlu0 %6813  ;;  %8234 = vst.msk [vmem:[#allocation5 + $0x68] sm:$0xff] %vm3956_vm0, %v8152_v28 }
 0x9e7   : > { %6893 = vst.msk [vmem:[#allocation5 + $0x80] sm:$0xff] %vm2604_vm1, %v6814_v43  ;;  %7787 = vrot.lane.b32.xlu1 %v13613_v5, %s9757_s23  ;;  %v8087_v43 = vld [vmem:[#allocation3 + $0x16a] sm:$0xff] }
 0x9e8   : > { %7973 = vrot.lane.b32.xlu0 %v7315_v47, %s9758_s25 }
 0x9e9   : > { %v6816_v34 = vpop.permute.xlu1 %6815 }
 0x9ea   : > { %v8154_v21 = vpop.permute.xlu0 %8153  ;;  %6894 = vst.msk [vmem:[#allocation5 + $0x88] sm:$0xff] %vm2604_vm1, %v6816_v34  ;;  %v8265_v48 = vld [vmem:[#allocation5 + $0x60] sm:$0xff] }
 0x9eb   : > { %8235 = vst.msk [vmem:[#allocation5 + $0x70] sm:$0xff] %vm3956_vm0, %v8154_v21  ;;  %7975 = vrot.lane.b32.xlu1 %v7316_v14, %s9758_s25 }
 0x9ec   : > { %7977 = vrot.lane.b32.xlu0 %v13829_v37, %s9758_s25 }
 0x9ed   : > { %v8156_v54 = vpop.permute.xlu1 %8155  ;;  %v8266_v59 = vld [vmem:[#allocation5 + $0x68] sm:$0xff] }
 0x9ee   : > { %v6818_v7 = vpop.permute.xlu0 %6817  ;;  %8236 = vst.msk [vmem:[#allocation5 + $0x78] sm:$0xff] %vm3956_vm0, %v8156_v54  ;;  %v8291_v56 = vpack.c.bf16 %v8266_v59, %v8265_v48  ;;  %v8088_v54 = vld [vmem:[#allocation3 + $0x172] sm:$0xff] }
 0x9ef   : > { %6895 = vst.msk [vmem:[#allocation5 + $0x90] sm:$0xff] %vm2604_vm1, %v6818_v7  ;;  %7979 = vrot.lane.b32.xlu1 %v13836_v26, %s9758_s25 }
 0x9f0   : > { %8165 = vrot.lane.b32.xlu0 %v13803_v12, %s9759_s19  ;;  %9637 = vmatprep.mubr.msk.bf16.mxu0 %vm4069_vm9, %v8291_v56 }
 0x9f1   : > { %v6820_v30 = vpop.permute.xlu1 %6819 }
 0x9f2   : > { %v7006_v4 = vpop.permute.xlu0 %7005  ;;  %6896 = vst.msk [vmem:[#allocation5 + $0x98] sm:$0xff] %vm2604_vm1, %v6820_v30  ;;  %v8267_v61 = vld [vmem:[#allocation5 + $0x70] sm:$0xff] }
 0x9f3   : > { %7085 = vst.msk [vmem:[#allocation5 + $0x80] sm:$0xff] %vm2797_vm2, %v7006_v4  ;;  %8167 = vrot.lane.b32.xlu1 %v13810_v17, %s9759_s19 }
 0x9f4   : > { %6829 = vrot.lane.b32.xlu0 %v7315_v47, %s9749_s29 }
 0x9f5   : > { %v7008_v53 = vpop.permute.xlu1 %7007  ;;  %v8268_v10 = vld [vmem:[#allocation5 + $0x78] sm:$0xff] }
 0x9f6   : > { %v7010_v60 = vpop.permute.xlu0 %7009  ;;  %7086 = vst.msk [vmem:[#allocation5 + $0x88] sm:$0xff] %vm2797_vm2, %v7008_v53  ;;  %v8292_v38 = vpack.c.bf16 %v8268_v10, %v8267_v61 }
 0x9f7   : > { %7087 = vst.msk [vmem:[#allocation5 + $0x90] sm:$0xff] %vm2797_vm2, %v7010_v60  ;;  %6831 = vrot.lane.b32.xlu1 %v7316_v14, %s9749_s29  ;;  %v7131_v60 = vld [vmem:[#allocation3 + $0x180] sm:$0xff] }
 0x9f8   : > { %8169 = vrot.lane.b32.xlu0 %v8083_v36, %s9759_s19  ;;  %9638 = vmatmul.mubr.msk.bf16.gmra.mxu0 %vm4069_vm9, %v8292_v38 }
 0x9f9   : > { %v7012_v32 = vpop.permute.xlu1 %7011 }
 0x9fa   : > { %v7198_v0 = vpop.permute.xlu0 %7197  ;;  %7088 = vst.msk [vmem:[#allocation5 + $0x98] sm:$0xff] %vm2797_vm2, %v7012_v32 }
 0x9fb   : > { %7277 = vst.msk [vmem:[#allocation5 + $0x80] sm:$0xff] %vm2990_vm3, %v7198_v0  ;;  %8171 = vrot.lane.b32.xlu1 %v8084_v31, %s9759_s19 }
 0x9fc   : > { %6833 = vrot.lane.b32.xlu0 %v13829_v37, %s9749_s29 }
 0x9fd   : > { %v7200_v50 = vpop.permute.xlu1 %7199 }
 0x9fe   : > { %v7202_v9 = vpop.permute.xlu0 %7201  ;;  %7278 = vst.msk [vmem:[#allocation5 + $0x88] sm:$0xff] %vm2990_vm3, %v7200_v50 }
 0x9ff   : > { %7279 = vst.msk [vmem:[#allocation5 + $0x90] sm:$0xff] %vm2990_vm3, %v7202_v9  ;;  %6835 = vrot.lane.b32.xlu1 %v13836_v26, %s9749_s29 }
 0xa00   : > { %7021 = vrot.lane.b32.xlu0 %v13803_v12, %s9751_s7 }
 0xa01   : > { %v7204_v58 = vpop.permute.xlu1 %7203 }
 0xa02   : > { %v7390_v52 = vpop.permute.xlu0 %7389  ;;  %7280 = vst.msk [vmem:[#allocation5 + $0x98] sm:$0xff] %vm2990_vm3, %v7204_v58  ;;  %v7515_v58 = vld [vmem:[#allocation3 + $0x182] sm:$0xff] }
 0xa03   : > { %7469 = vst.msk [vmem:[#allocation5 + $0x80] sm:$0xff] %vm3183_vm4, %v7390_v52  ;;  %7023 = vrot.lane.b32.xlu1 %v13810_v17, %s9751_s7  ;;  %v9627_v52 = vpop.f32.mrf.mxu0 }
 0xa04   : > { %7025 = vrot.lane.b32.xlu0 %v8083_v36, %s9751_s7 }
 0xa05   : > { %v7392_v63 = vpop.permute.xlu1 %7391 }
 0xa06   : > { %v7394_v22 = vpop.permute.xlu0 %7393  ;;  %7470 = vst.msk [vmem:[#allocation5 + $0x88] sm:$0xff] %vm3183_vm4, %v7392_v63 }
 0xa07   : > { %7471 = vst.msk [vmem:[#allocation5 + $0x90] sm:$0xff] %vm3183_vm4, %v7394_v22  ;;  %7027 = vrot.lane.b32.xlu1 %v8084_v31, %s9751_s7 }
 0xa08   : > { %7213 = vrot.lane.b32.xlu0 %v13597_v20, %s9753_s9 }
 0xa09   : > { %v7396_v29 = vpop.permute.xlu1 %7395 }
 0xa0a   : > { %v7582_v1 = vpop.permute.xlu0 %7581  ;;  %7472 = vst.msk [vmem:[#allocation5 + $0x98] sm:$0xff] %vm3183_vm4, %v7396_v29  ;;  %v7516_v29 = vld [vmem:[#allocation3 + $0x18a] sm:$0xff] }
 0xa0b   : > { %7661 = vst.msk [vmem:[#allocation5 + $0x80] sm:$0xff] %vm3376_vm5, %v7582_v1  ;;  %7215 = vrot.lane.b32.xlu1 %v13613_v5, %s9753_s9  ;;  %v7319_v5 = vld [vmem:[#allocation3 + $0x151] sm:$0xff]  ;;  %v8418_v1 = vpop.f32.mrf.mxu0 }
 0xa0c   : > { %7217 = vrot.lane.b32.xlu0 %v13589_v51, %s9753_s9 }
 0xa0d   : > { %v7584_v40 = vpop.permute.xlu1 %7583 }
 0xa0e   : > { %v7586_v24 = vpop.permute.xlu0 %7585  ;;  %7662 = vst.msk [vmem:[#allocation5 + $0x88] sm:$0xff] %vm3376_vm5, %v7584_v40  ;;  %v7707_v40 = vld [vmem:[#allocation3 + $0x198] sm:$0xff] }
 0xa0f   : > { %7663 = vst.msk [vmem:[#allocation5 + $0x90] sm:$0xff] %vm3376_vm5, %v7586_v24  ;;  %7219 = vrot.lane.b32.xlu1 %v13605_v3, %s9753_s9 }
 0xa10   : > { %7405 = vrot.lane.b32.xlu0 %v13829_v37, %s9755_s15 }
 0xa11   : > { %v7588_v20 = vpop.permute.xlu1 %7587 }
 0xa12   : > { %v7774_v6 = vpop.permute.xlu0 %7773  ;;  %7664 = vst.msk [vmem:[#allocation5 + $0x98] sm:$0xff] %vm3376_vm5, %v7588_v20 }
 0xa13   : > { %7853 = vst.msk [vmem:[#allocation5 + $0x80] sm:$0xff] %vm3570_vm7, %v7774_v6  ;;  %7407 = vrot.lane.b32.xlu1 %v13836_v26, %s9755_s15  ;;  %v9628_v6 = vpop.f32.mrf.mxu0 }
 0xa14   : > { %7409 = vrot.lane.b32.xlu0 %v7319_v5, %s9755_s15 }
 0xa15   : > { %v7776_v11 = vpop.permute.xlu1 %7775 }
 0xa16   : > { %v7778_v27 = vpop.permute.xlu0 %7777  ;;  %7854 = vst.msk [vmem:[#allocation5 + $0x88] sm:$0xff] %vm3570_vm7, %v7776_v11 }
 0xa17   : > { %7855 = vst.msk [vmem:[#allocation5 + $0x90] sm:$0xff] %vm3570_vm7, %v7778_v27  ;;  %7411 = vrot.lane.b32.xlu1 %v7320_v46, %s9755_s15 }
 0xa18   : > { %7597 = vrot.lane.b32.xlu0 %v8083_v36, %s9756_s20  ;;  %v7132_v36 = vld [vmem:[#allocation3 + $0x188] sm:$0xff] }
 0xa19   : > { %v7780_v44 = vpop.permute.xlu1 %7779 }
 0xa1a   : > { %v7966_v8 = vpop.permute.xlu0 %7965  ;;  %7856 = vst.msk [vmem:[#allocation5 + $0x98] sm:$0xff] %vm3570_vm7, %v7780_v44  ;;  %v7899_v44 = vld [vmem:[#allocation3 + $0x199] sm:$0xff] }
 0xa1b   : > { %8045 = vst.msk [vmem:[#allocation5 + $0x80] sm:$0xff] %vm3763_vm8, %v7966_v8  ;;  %7599 = vrot.lane.b32.xlu1 %v8084_v31, %s9756_s20  ;;  %v7324_v31 = vld [vmem:[#allocation3 + $0x189] sm:$0xff] }
 0xa1c   : > { %7601 = vrot.lane.b32.xlu0 %v13897_v19, %s9756_s20 }
 0xa1d   : > { %v7968_v16 = vpop.permute.xlu1 %7967 }
 0xa1e   : > { %v7970_v2 = vpop.permute.xlu0 %7969  ;;  %8046 = vst.msk [vmem:[#allocation5 + $0x88] sm:$0xff] %vm3763_vm8, %v7968_v16 }
 0xa1f   : > { %8047 = vst.msk [vmem:[#allocation5 + $0x90] sm:$0xff] %vm3763_vm8, %v7970_v2  ;;  %7603 = vrot.lane.b32.xlu1 %v13904_v45, %s9756_s20  ;;  %v14010_v2 = vld [vmem:[%s14316_s4 + $0x4] ss:$0 sm:$0xff] }
 0xa20   : > { %7789 = vrot.lane.b32.xlu0 %v13589_v51, %s9757_s23 }
 0xa21   : > { %v7972_v18 = vpop.permute.xlu1 %7971 }
 0xa22   : > { %v8158_v33 = vpop.permute.xlu0 %8157  ;;  %8048 = vst.msk [vmem:[#allocation5 + $0x98] sm:$0xff] %vm3763_vm8, %v7972_v18  ;;  %v8419_v18 = vadd.f32 %v14010_v2, %v8418_v1 }
 0xa23   : > { %8237 = vst.msk [vmem:[#allocation5 + $0x80] sm:$0xff] %vm3956_vm0, %v8158_v33  ;;  %7791 = vrot.lane.b32.xlu1 %v13605_v3, %s9757_s23  ;;  %v13923_v3 = vld [vmem:[#allocation3 + $0x169] sm:$0xff] }
 0xa24   : > { %7793 = vrot.lane.b32.xlu0 %v13685_v49, %s9757_s23 }
 0xa25   : > { %v8160_v41 = vpop.permute.xlu1 %8159 }
 0xa26   : > { %v6822_v39 = vpop.permute.xlu0 %6821  ;;  %8238 = vst.msk [vmem:[#allocation5 + $0x88] sm:$0xff] %vm3956_vm0, %v8160_v41 }
 0xa27   : > { %6897 = vst.msk [vmem:[#allocation5 + $0xa0] sm:$0xff] %vm2604_vm1, %v6822_v39  ;;  %7795 = vrot.lane.b32.xlu1 %v13696_v25, %s9757_s23 }
 0xa28   : > { %7981 = vrot.lane.b32.xlu0 %v7319_v5, %s9758_s25 }
 0xa29   : > { %v6824_v51 = vpop.permute.xlu1 %6823 }
 0xa2a   : > { %v8162_v47 = vpop.permute.xlu0 %8161  ;;  %6898 = vst.msk [vmem:[#allocation5 + $0xa8] sm:$0xff] %vm2604_vm1, %v6824_v51  ;;  %v8269_v14 = vld [vmem:[#allocation5 + $0x80] sm:$0xff] }
 0xa2b   : > { %8239 = vst.msk [vmem:[#allocation5 + $0x90] sm:$0xff] %vm3956_vm0, %v8162_v47  ;;  %7983 = vrot.lane.b32.xlu1 %v7320_v46, %s9758_s25 }
 0xa2c   : > { %7985 = vrot.lane.b32.xlu0 %v13923_v3, %s9758_s25 }
 0xa2d   : > { %v8164_v13 = vpop.permute.xlu1 %8163  ;;  %v8270_v55 = vld [vmem:[#allocation5 + $0x88] sm:$0xff] }
 0xa2e   : > { %v6826_v15 = vpop.permute.xlu0 %6825  ;;  %8240 = vst.msk [vmem:[#allocation5 + $0x98] sm:$0xff] %vm3956_vm0, %v8164_v13  ;;  %v8293_v12 = vpack.c.bf16 %v8270_v55, %v8269_v14  ;;  %v8427_v13 = vadd.f32 %v9627_v52, %v14010_v2  ;;  %v8091_v14 = vld [vmem:[#allocation3 + $0x19a] sm:$0xff] }
 0xa2f   : > { %6899 = vst.msk [vmem:[#allocation5 + $0xb0] sm:$0xff] %vm2604_vm1, %v6826_v15  ;;  %7987 = vrot.lane.b32.xlu1 %v13930_v35, %s9758_s25  ;;  %v8545_v15 = vld [vmem:[#allocation4] sm:$0xff]  ;;  %v8550_v52 = vld [vmem:[#allocation4 + $0x28] sm:$0xff] }
 0xa30   : > { %8173 = vrot.lane.b32.xlu0 %v13897_v19, %s9759_s19  ;;  %9641 = vmatprep.mubr.msk.bf16.mxu0 %vm4069_vm9, %v8293_v12  ;;  %v8577_v55 = vadd.f32 %v8545_v15, %v8419_v18 }
 0xa31   : > { %v6828_v23 = vpop.permute.xlu1 %6827 }
 0xa32   : > { %v7014_v42 = vpop.permute.xlu0 %7013  ;;  %6900 = vst.msk [vmem:[#allocation5 + $0xb8] sm:$0xff] %vm2604_vm1, %v6828_v23  ;;  %v8271_v57 = vld [vmem:[#allocation5 + $0x90] sm:$0xff] }
 0xa33   : > { %7089 = vst.msk [vmem:[#allocation5 + $0xa0] sm:$0xff] %vm2797_vm2, %v7014_v42  ;;  %8175 = vrot.lane.b32.xlu1 %v13904_v45, %s9759_s19 }
 0xa34   : > { %6837 = vrot.lane.b32.xlu0 %v7319_v5, %s9749_s29  ;;  %v7708_v5 = vld [vmem:[#allocation3 + $0x1a0] sm:$0xff] }
 0xa35   : > { %v7016_v17 = vpop.permute.xlu1 %7015  ;;  %v8272_v28 = vld [vmem:[#allocation5 + $0x98] sm:$0xff] }
 0xa36   : > { %v7018_v62 = vpop.permute.xlu0 %7017  ;;  %7090 = vst.msk [vmem:[#allocation5 + $0xa8] sm:$0xff] %vm2797_vm2, %v7016_v17  ;;  %v8294_v34 = vpack.c.bf16 %v8272_v28, %v8271_v57  ;;  %v8547_v17 = vld [vmem:[#allocation4 + $0x10] sm:$0xff]  ;;  %v8546_v57 = vld [vmem:[#allocation4 + $0x8] sm:$0xff] }
 0xa37   : > { %7091 = vst.msk [vmem:[#allocation5 + $0xb0] sm:$0xff] %vm2797_vm2, %v7018_v62  ;;  %6839 = vrot.lane.b32.xlu1 %v7320_v46, %s9749_s29  ;;  %v8421_v46 = vpop.f32.mrf.mxu0  ;;  %v8579_v62 = vadd.f32 %v8547_v17, %v8427_v13  ;;  %v8092_v28 = vld [vmem:[#allocation3 + $0x1a2] sm:$0xff] }
 0xa38   : > { %8177 = vrot.lane.b32.xlu0 %v8087_v43, %s9759_s19  ;;  %9642 = vmatmul.mubr.msk.bf16.gmra.mxu0 %vm4069_vm9, %v8294_v34  ;;  %v8430_v34 = vadd.f32 %v9628_v6, %v14010_v2 }
 0xa39   : > { %v7020_v21 = vpop.permute.xlu1 %7019  ;;  %v9631_v16 = vpop.f32.mrf.mxu0 }
 0xa3a   : > { %v7206_v37 = vpop.permute.xlu0 %7205  ;;  %7092 = vst.msk [vmem:[#allocation5 + $0xb8] sm:$0xff] %vm2797_vm2, %v7020_v21 }
 0xa3b   : > { %7281 = vst.msk [vmem:[#allocation5 + $0xa0] sm:$0xff] %vm2990_vm3, %v7206_v37  ;;  %8179 = vrot.lane.b32.xlu1 %v8088_v54, %s9759_s19  ;;  %v8434_v47 = vpop.f32.mrf.mxu0 }
 0xa3c   : > { %6841 = vrot.lane.b32.xlu0 %v13923_v3, %s9749_s29  ;;  %v8435_v37 = vadd.f32 %v14010_v2, %v8434_v47 }
 0xa3d   : > { %v7208_v7 = vpop.permute.xlu1 %7207  ;;  %v9632_v42 = vpop.f32.mrf.mxu0 }
 0xa3e   : > { %v7210_v48 = vpop.permute.xlu0 %7209  ;;  %7282 = vst.msk [vmem:[#allocation5 + $0xa8] sm:$0xff] %vm2990_vm3, %v7208_v7 }
 0xa3f   : > { %7283 = vst.msk [vmem:[#allocation5 + $0xb0] sm:$0xff] %vm2990_vm3, %v7210_v48  ;;  %6843 = vrot.lane.b32.xlu1 %v13930_v35, %s9749_s29 }
 0xa40   : > { %7029 = vrot.lane.b32.xlu0 %v13897_v19, %s9751_s7 }
 0xa41   : > { %v7212_v59 = vpop.permute.xlu1 %7211 }
 0xa42   : > { %v7398_v26 = vpop.permute.xlu0 %7397  ;;  %7284 = vst.msk [vmem:[#allocation5 + $0xb8] sm:$0xff] %vm2990_vm3, %v7212_v59 }
 0xa43   : > { %7473 = vst.msk [vmem:[#allocation5 + $0xa0] sm:$0xff] %vm3183_vm4, %v7398_v26  ;;  %7031 = vrot.lane.b32.xlu1 %v13904_v45, %s9751_s7  ;;  %v7900_v45 = vld [vmem:[#allocation3 + $0x1a1] sm:$0xff]  ;;  %v8437_v26 = vpop.f32.mrf.mxu0 }
 0xa44   : > { %7033 = vrot.lane.b32.xlu0 %v8087_v43, %s9751_s7 }
 0xa45   : > { %v7400_v56 = vpop.permute.xlu1 %7399 }
 0xa46   : > { %v7402_v30 = vpop.permute.xlu0 %7401  ;;  %7474 = vst.msk [vmem:[#allocation5 + $0xa8] sm:$0xff] %vm3183_vm4, %v7400_v56 }
 0xa47   : > { %7475 = vst.msk [vmem:[#allocation5 + $0xb0] sm:$0xff] %vm3183_vm4, %v7402_v30  ;;  %7035 = vrot.lane.b32.xlu1 %v8088_v54, %s9751_s7  ;;  %v8611_v30 = vmax.f32 %v8579_v62, 0.0 }
 0xa48   : > { %7221 = vrot.lane.b32.xlu0 %v13685_v49, %s9753_s9 }
 0xa49   : > { %v7404_v4 = vpop.permute.xlu1 %7403 }
 0xa4a   : > { %v7590_v53 = vpop.permute.xlu0 %7589  ;;  %7476 = vst.msk [vmem:[#allocation5 + $0xb8] sm:$0xff] %vm3183_vm4, %v7404_v4  ;;  %v8548_v4 = vld [vmem:[#allocation4 + $0x18] sm:$0xff] }
 0xa4b   : > { %7665 = vst.msk [vmem:[#allocation5 + $0xa0] sm:$0xff] %vm3376_vm5, %v7590_v53  ;;  %7223 = vrot.lane.b32.xlu1 %v13696_v25, %s9753_s9  ;;  %v7323_v25 = vld [vmem:[#allocation3 + $0x181] sm:$0xff]  ;;  %v8443_v53 = vadd.f32 %v9631_v16, %v14010_v2 }
 0xa4c   : > { %7225 = vrot.lane.b32.xlu0 %v7131_v60, %s9753_s9 }
 0xa4d   : > { %v7592_v61 = vpop.permute.xlu1 %7591 }
 0xa4e   : > { %v7594_v10 = vpop.permute.xlu0 %7593  ;;  %7666 = vst.msk [vmem:[#allocation5 + $0xa8] sm:$0xff] %vm3376_vm5, %v7592_v61 }
 0xa4f   : > { %7667 = vst.msk [vmem:[#allocation5 + $0xb0] sm:$0xff] %vm3376_vm5, %v7594_v10  ;;  %7227 = vrot.lane.b32.xlu1 %v7132_v36, %s9753_s9  ;;  %v8580_v10 = vadd.f32 %v8548_v4, %v8430_v34 }
 0xa50   : > { %7413 = vrot.lane.b32.xlu0 %v13923_v3, %s9755_s15 }
 0xa51   : > { %v7596_v49 = vpop.permute.xlu1 %7595 }
 0xa52   : > { %v7782_v38 = vpop.permute.xlu0 %7781  ;;  %7668 = vst.msk [vmem:[#allocation5 + $0xb8] sm:$0xff] %vm3376_vm5, %v7596_v49 }
 0xa53   : > { %7857 = vst.msk [vmem:[#allocation5 + $0xa0] sm:$0xff] %vm3570_vm7, %v7782_v38  ;;  %7415 = vrot.lane.b32.xlu1 %v13930_v35, %s9755_s15  ;;  %v8422_v35 = vadd.f32 %v14010_v2, %v8421_v46  ;;  %v8438_v38 = vadd.f32 %v14010_v2, %v8437_v26  ;;  %v8553_v46 = vld [vmem:[#allocation4 + $0x40] sm:$0xff] }
 0xa54   : > { %7417 = vrot.lane.b32.xlu0 %v7323_v25, %s9755_s15 }
 0xa55   : > { %v7784_v32 = vpop.permute.xlu1 %7783  ;;  %v8578_v21 = vadd.f32 %v8546_v57, %v8422_v35  ;;  %v8582_v1 = vadd.f32 %v8550_v52, %v8438_v38 }
 0xa56   : > { %v7786_v0 = vpop.permute.xlu0 %7785  ;;  %7858 = vst.msk [vmem:[#allocation5 + $0xa8] sm:$0xff] %vm3570_vm7, %v7784_v32 }
 0xa57   : > { %7859 = vst.msk [vmem:[#allocation5 + $0xb0] sm:$0xff] %vm3570_vm7, %v7786_v0  ;;  %7419 = vrot.lane.b32.xlu1 %v7324_v31, %s9755_s15 }
 0xa58   : > { %7605 = vrot.lane.b32.xlu0 %v8087_v43, %s9756_s20  ;;  %v8609_v43 = vmax.f32 %v8577_v55, 0.0  ;;  %v8556_v55 = vld [vmem:[#allocation4 + $0x58] sm:$0xff] }
 0xa59   : > { %v7788_v50 = vpop.permute.xlu1 %7787 }
 0xa5a   : > { %v7974_v9 = vpop.permute.xlu0 %7973  ;;  %7860 = vst.msk [vmem:[#allocation5 + $0xb8] sm:$0xff] %vm3570_vm7, %v7788_v50  ;;  %v9735_v50 = vld [vmem:[%s14315_s3] sm:$0xff]  }
 0xa5b   : > { %8049 = vst.msk [vmem:[#allocation5 + $0xa0] sm:$0xff] %vm3763_vm8, %v7974_v9  ;;  %7607 = vrot.lane.b32.xlu1 %v8088_v54, %s9756_s20  ;;  %9657 = vmatprep.subr.bf16.mxu1 %v9735_v50 }
 0xa5c   : > { %7609 = vrot.lane.b32.xlu0 %v7515_v58, %s9756_s20  ;;  %9658 = vmatpush3.bf16.msra.mxu1 %v9735_v50 }
 0xa5d   : > { %v7976_v63 = vpop.permute.xlu1 %7975 }
 0xa5e   : > { %v7978_v22 = vpop.permute.xlu0 %7977  ;;  %8050 = vst.msk [vmem:[#allocation5 + $0xa8] sm:$0xff] %vm3763_vm8, %v7976_v63 }
 0xa5f   : > { %8051 = vst.msk [vmem:[#allocation5 + $0xb0] sm:$0xff] %vm3763_vm8, %v7978_v22  ;;  %7611 = vrot.lane.b32.xlu1 %v7516_v29, %s9756_s20  ;;  %v8612_v22 = vmax.f32 %v8580_v10, 0.0 }
 0xa60   : > { %7797 = vrot.lane.b32.xlu0 %v7131_v60, %s9757_s23  ;;  %v8549_v60 = vld [vmem:[#allocation4 + $0x20] sm:$0xff] }
 0xa61   : > { %v7980_v24 = vpop.permute.xlu1 %7979  ;;  %v8581_v49 = vadd.f32 %v8549_v60, %v8435_v37 }
 0xa62   : > { %v8166_v20 = vpop.permute.xlu0 %8165  ;;  %8052 = vst.msk [vmem:[#allocation5 + $0xb8] sm:$0xff] %vm3763_vm8, %v7980_v24 }
 0xa63   : > { %8241 = vst.msk [vmem:[#allocation5 + $0xa0] sm:$0xff] %vm3956_vm0, %v8166_v20  ;;  %7799 = vrot.lane.b32.xlu1 %v7132_v36, %s9757_s23  ;;  %v8610_v36 = vmax.f32 %v8578_v21, 0.0 }
 0xa64   : > { %7801 = vrot.lane.b32.xlu0 %v7707_v40, %s9757_s23 }
 0xa65   : > { %v8168_v11 = vpop.permute.xlu1 %8167 }
 0xa66   : > { %v6830_v27 = vpop.permute.xlu0 %6829  ;;  %8242 = vst.msk [vmem:[#allocation5 + $0xa8] sm:$0xff] %vm3956_vm0, %v8168_v11 }
 0xa67   : > { %6901 = vst.msk [vmem:[#allocation5 + $0xc0] sm:$0xff] %vm2604_vm1, %v6830_v27  ;;  %7803 = vrot.lane.b32.xlu1 %v7708_v5, %s9757_s23  ;;  %v8552_v5 = vld [vmem:[#allocation4 + $0x38] sm:$0xff] }
 0xa68   : > { %7989 = vrot.lane.b32.xlu0 %v7323_v25, %s9758_s25 }
 0xa69   : > { %v6832_v8 = vpop.permute.xlu1 %6831 }
 0xa6a   : > { %v8170_v19 = vpop.permute.xlu0 %8169  ;;  %6902 = vst.msk [vmem:[#allocation5 + $0xc8] sm:$0xff] %vm2604_vm1, %v6832_v8  ;;  %v8273_v39 = vld [vmem:[#allocation5 + $0xa0] sm:$0xff] }
 0xa6b   : > { %8243 = vst.msk [vmem:[#allocation5 + $0xb0] sm:$0xff] %vm3956_vm0, %v8170_v19  ;;  %7991 = vrot.lane.b32.xlu1 %v7324_v31, %s9758_s25  ;;  %v8551_v31 = vld [vmem:[#allocation4 + $0x30] sm:$0xff] }
 0xa6c   : > { %7993 = vrot.lane.b32.xlu0 %v7899_v44, %s9758_s25  ;;  %v8583_v9 = vadd.f32 %v8551_v31, %v8443_v53  ;;  %v8614_v44 = vmax.f32 %v8582_v1, 0.0 }
 0xa6d   : > { %v8172_v33 = vpop.permute.xlu1 %8171  ;;  %v8274_v51 = vld [vmem:[#allocation5 + $0xa8] sm:$0xff] }
 0xa6e   : > { %v6834_v41 = vpop.permute.xlu0 %6833  ;;  %8244 = vst.msk [vmem:[#allocation5 + $0xb8] sm:$0xff] %vm3956_vm0, %v8172_v33  ;;  %v8295_v3 = vpack.c.bf16 %v8274_v51, %v8273_v39  ;;  %v8615_v11 = vmax.f32 %v8583_v9, 0.0  ;;  %v8554_v39 = vld [vmem:[#allocation4 + $0x48] sm:$0xff] }
 0xa6f   : > { %6903 = vst.msk [vmem:[#allocation5 + $0xd0] sm:$0xff] %vm2604_vm1, %v6834_v41  ;;  %7995 = vrot.lane.b32.xlu1 %v7900_v45, %s9758_s25  ;;  %v8555_v41 = vld [vmem:[#allocation4 + $0x50] sm:$0xff] }
 0xa70   : > { %8181 = vrot.lane.b32.xlu0 %v7515_v58, %s9759_s19  ;;  %9645 = vmatprep.mubr.msk.bf16.mxu0 %vm4069_vm9, %v8295_v3  ;;  %v8446_v58 = vadd.f32 %v9632_v42, %v14010_v2 }
 0xa71   : > { %v6836_v12 = vpop.permute.xlu1 %6835 }
 0xa72   : > { %v7022_v23 = vpop.permute.xlu0 %7021  ;;  %6904 = vst.msk [vmem:[#allocation5 + $0xd8] sm:$0xff] %vm2604_vm1, %v6836_v12  ;;  %v8275_v48 = vld [vmem:[#allocation5 + $0xb0] sm:$0xff]  ;;  %v8584_v27 = vadd.f32 %v8552_v5, %v8446_v58 }
 0xa73   : > { %7093 = vst.msk [vmem:[#allocation5 + $0xc0] sm:$0xff] %vm2797_vm2, %v7022_v23  ;;  %8183 = vrot.lane.b32.xlu1 %v7516_v29, %s9759_s19  ;;  %v8613_v29 = vmax.f32 %v8581_v49, 0.0 }
 0xa74   : > { %8185 = vrot.lane.b32.xlu0 %v8091_v14, %s9759_s19  ;;  %v8616_v33 = vmax.f32 %v8584_v27, 0.0  ;;  %v8559_v27 = vld [vmem:[#allocation4 + $0x70] sm:$0xff] }
 0xa75   : > { %v7024_v54 = vpop.permute.xlu1 %7023  ;;  %v8276_v59 = vld [vmem:[#allocation5 + $0xb8] sm:$0xff] }
 0xa76   : > { %v7026_v7 = vpop.permute.xlu0 %7025  ;;  %7094 = vst.msk [vmem:[#allocation5 + $0xc8] sm:$0xff] %vm2797_vm2, %v7024_v54  ;;  %v8296_v56 = vpack.c.bf16 %v8276_v59, %v8275_v48 }
 0xa77   : > { %7095 = vst.msk [vmem:[#allocation5 + $0xd0] sm:$0xff] %vm2797_vm2, %v7026_v7  ;;  %8187 = vrot.lane.b32.xlu1 %v8092_v28, %s9759_s19 }
 0xa78   : > { %8673 = vrot.lane.b32.xlu0 %v8609_v43, %s9749_s29  ;;  %v9635_v61 = vpop.f32.mrf.mxu0  ;;  %9646 = vmatmul.mubr.msk.bf16.gmra.mxu0 %vm4069_vm9, %v8296_v56 }
 0xa79   : > { %v7028_v25 = vpop.permute.xlu1 %7027  ;;  %v8459_v8 = vadd.f32 %v9635_v61, %v14010_v2 }
 0xa7a   : > { %v7214_v32 = vpop.permute.xlu0 %7213  ;;  %7096 = vst.msk [vmem:[#allocation5 + $0xd8] sm:$0xff] %vm2797_vm2, %v7028_v25  ;;  %v8450_v0 = vpop.f32.mrf.mxu0 }
 0xa7b   : > { %7285 = vst.msk [vmem:[#allocation5 + $0xc0] sm:$0xff] %vm2990_vm3, %v7214_v32  ;;  %8675 = vrot.lane.b32.xlu1 %v8610_v36, %s9749_s29  ;;  %v8451_v40 = vadd.f32 %v14010_v2, %v8450_v0  ;;  %v8587_v51 = vadd.f32 %v8555_v41, %v8459_v8 }
 0xa7c   : > { %8677 = vrot.lane.b32.xlu0 %v8611_v30, %s9749_s29  ;;  %v9636_v63 = vpop.f32.mrf.mxu0 }
 0xa7d   : > { %v7216_v24 = vpop.permute.xlu1 %7215  ;;  %v8585_v19 = vadd.f32 %v8553_v46, %v8451_v40  ;;  %v8462_v3 = vadd.f32 %v9636_v63, %v14010_v2  ;;  %v8619_v35 = vmax.f32 %v8587_v51, 0.0 }
 0xa7e   : > { %v7218_v20 = vpop.permute.xlu0 %7217  ;;  %7286 = vst.msk [vmem:[#allocation5 + $0xc8] sm:$0xff] %vm2990_vm3, %v7216_v24  ;;  %v8453_v6 = vpop.f32.mrf.mxu0  ;;  %v8557_v24 = vld [vmem:[#allocation4 + $0x60] sm:$0xff] }
 0xa7f   : > { %7287 = vst.msk [vmem:[#allocation5 + $0xd0] sm:$0xff] %vm2990_vm3, %v7218_v20  ;;  %8679 = vrot.lane.b32.xlu1 %v8612_v22, %s9749_s29  ;;  %v8454_v16 = vadd.f32 %v14010_v2, %v8453_v6  ;;  %v8617_v47 = vmax.f32 %v8585_v19, 0.0  ;;  %v8588_v12 = vadd.f32 %v8556_v55, %v8462_v3 }
 0xa80   : > { %8681 = vrot.lane.b32.xlu0 %v8613_v29, %s9749_s29 }
 0xa81   : > { %v7220_v45 = vpop.permute.xlu1 %7219  ;;  %v8586_v13 = vadd.f32 %v8554_v39, %v8454_v16  ;;  %v8620_v62 = vmax.f32 %v8588_v12, 0.0  ;;  %v8560_v39 = vld [vmem:[#allocation4 + $0x78] sm:$0xff] }
 0xa82   : > { %v7406_v18 = vpop.permute.xlu0 %7405  ;;  %7288 = vst.msk [vmem:[#allocation5 + $0xd8] sm:$0xff] %vm2990_vm3, %v7220_v45  ;;  %v8558_v45 = vld [vmem:[#allocation4 + $0x68] sm:$0xff] }
 0xa83   : > { %7477 = vst.msk [vmem:[#allocation5 + $0xc0] sm:$0xff] %vm3183_vm4, %v7406_v18  ;;  %8683 = vrot.lane.b32.xlu1 %v8614_v44, %s9749_s29  ;;  %v8618_v23 = vmax.f32 %v8586_v13, 0.0 }
 0xa84   : > { %8685 = vrot.lane.b32.xlu0 %v8615_v11, %s9749_s29 }
 0xa85   : > { %v7408_v15 = vpop.permute.xlu1 %7407 }
 0xa86   : > { %v7410_v14 = vpop.permute.xlu0 %7409  ;;  %7478 = vst.msk [vmem:[#allocation5 + $0xc8] sm:$0xff] %vm3183_vm4, %v7408_v15 }
 0xa87   : > { %7479 = vst.msk [vmem:[#allocation5 + $0xd0] sm:$0xff] %vm3183_vm4, %v7410_v14  ;;  %8687 = vrot.lane.b32.xlu1 %v8616_v33, %s9749_s29 }
 0xa88   : > { %8689 = vrot.lane.b32.xlu0 %v8617_v47, %s9749_s29 }
 0xa89   : > { %v7412_v42 = vpop.permute.xlu1 %7411 }
 0xa8a   : > { %v7598_v17 = vpop.permute.xlu0 %7597  ;;  %7480 = vst.msk [vmem:[#allocation5 + $0xd8] sm:$0xff] %vm3183_vm4, %v7412_v42 }
 0xa8b   : > { %7669 = vst.msk [vmem:[#allocation5 + $0xc0] sm:$0xff] %vm3376_vm5, %v7598_v17  ;;  %8691 = vrot.lane.b32.xlu1 %v8618_v23, %s9749_s29 }
 0xa8c   : > { %8693 = vrot.lane.b32.xlu0 %v8619_v35, %s9749_s29 }
 0xa8d   : > { %v7600_v57 = vpop.permute.xlu1 %7599 }
 0xa8e   : > { %v7602_v28 = vpop.permute.xlu0 %7601  ;;  %7670 = vst.msk [vmem:[#allocation5 + $0xc8] sm:$0xff] %vm3376_vm5, %v7600_v57 }
 0xa8f   : > { %7671 = vst.msk [vmem:[#allocation5 + $0xd0] sm:$0xff] %vm3376_vm5, %v7602_v28  ;;  %8695 = vrot.lane.b32.xlu1 %v8620_v62, %s9749_s29 }
 0xa91   : > { %v7604_v43 = vpop.permute.xlu1 %7603 }
 0xa92   : > { %v7790_v34 = vpop.permute.xlu0 %7789  ;;  %7672 = vst.msk [vmem:[#allocation5 + $0xd8] sm:$0xff] %vm3376_vm5, %v7604_v43 }
 0xa93   : > { %7861 = vst.msk [vmem:[#allocation5 + $0xc0] sm:$0xff] %vm3570_vm7, %v7790_v34 }
 0xa95   : > { %v7792_v21 = vpop.permute.xlu1 %7791 }
 0xa96   : > { %v7794_v37 = vpop.permute.xlu0 %7793  ;;  %7862 = vst.msk [vmem:[#allocation5 + $0xc8] sm:$0xff] %vm3570_vm7, %v7792_v21 }
 0xa97   : > { %7863 = vst.msk [vmem:[#allocation5 + $0xd0] sm:$0xff] %vm3570_vm7, %v7794_v37 }
 0xa99   : > { %v7796_v54 = vpop.permute.xlu1 %7795 }
 0xa9a   : > { %v7982_v7 = vpop.permute.xlu0 %7981  ;;  %7864 = vst.msk [vmem:[#allocation5 + $0xd8] sm:$0xff] %vm3570_vm7, %v7796_v54 }
 0xa9b   : > { %8053 = vst.msk [vmem:[#allocation5 + $0xc0] sm:$0xff] %vm3763_vm8, %v7982_v7 }
 0xa9d   : > { %v7984_v48 = vpop.permute.xlu1 %7983 }
 0xa9e   : > { %v7986_v59 = vpop.permute.xlu0 %7985  ;;  %8054 = vst.msk [vmem:[#allocation5 + $0xc8] sm:$0xff] %vm3763_vm8, %v7984_v48 }
 0xa9f   : > { %8055 = vst.msk [vmem:[#allocation5 + $0xd0] sm:$0xff] %vm3763_vm8, %v7986_v59 }
 0xaa1   : > { %v7988_v26 = vpop.permute.xlu1 %7987 }
 0xaa2   : > { %v8174_v56 = vpop.permute.xlu0 %8173  ;;  %8056 = vst.msk [vmem:[#allocation5 + $0xd8] sm:$0xff] %vm3763_vm8, %v7988_v26 }
 0xaa3   : > { %8245 = vst.msk [vmem:[#allocation5 + $0xc0] sm:$0xff] %vm3956_vm0, %v8174_v56 }
 0xaa5   : > { %v8176_v30 = vpop.permute.xlu1 %8175 }
 0xaa6   : > { %v6838_v4 = vpop.permute.xlu0 %6837  ;;  %8246 = vst.msk [vmem:[#allocation5 + $0xc8] sm:$0xff] %vm3956_vm0, %v8176_v30 }
 0xaa7   : > { %6905 = vst.msk [vmem:[#allocation5 + $0xe0] sm:$0xff] %vm2604_vm1, %v6838_v4 }
 0xaa9   : > { %v6840_v53 = vpop.permute.xlu1 %6839 }
 0xaaa   : > { %v8178_v60 = vpop.permute.xlu0 %8177  ;;  %6906 = vst.msk [vmem:[#allocation5 + $0xe8] sm:$0xff] %vm2604_vm1, %v6840_v53  ;;  %v8277_v36 = vld [vmem:[#allocation5 + $0xc0] sm:$0xff] }
 0xaab   : > { %8247 = vst.msk [vmem:[#allocation5 + $0xd0] sm:$0xff] %vm3956_vm0, %v8178_v60 }
 0xaad   : > { %v8180_v61 = vpop.permute.xlu1 %8179  ;;  %v8278_v49 = vld [vmem:[#allocation5 + $0xc8] sm:$0xff] }
 0xaae   : > { %v6842_v10 = vpop.permute.xlu0 %6841  ;;  %8248 = vst.msk [vmem:[#allocation5 + $0xd8] sm:$0xff] %vm3956_vm0, %v8180_v61  ;;  %v8297_v38 = vpack.c.bf16 %v8278_v49, %v8277_v36 }
 0xaaf   : > { %6907 = vst.msk [vmem:[#allocation5 + $0xf0] sm:$0xff] %vm2604_vm1, %v6842_v10 }
 0xab0   : > { %9649 = vmatprep.mubr.msk.bf16.mxu0 %vm4069_vm9, %v8297_v38 }
 0xab1   : > { %v6844_v25 = vpop.permute.xlu1 %6843 }
 0xab2   : > { %v7030_v32 = vpop.permute.xlu0 %7029  ;;  %6908 = vst.msk [vmem:[#allocation5 + $0xf8] sm:$0xff] %vm2604_vm1, %v6844_v25  ;;  %v8279_v50 = vld [vmem:[#allocation5 + $0xd0] sm:$0xff] }
 0xab3   : > { %7097 = vst.msk [vmem:[#allocation5 + $0xe0] sm:$0xff] %vm2797_vm2, %v7030_v32 }
 0xab5   : > { %v7032_v0 = vpop.permute.xlu1 %7031  ;;  %v8280_v9 = vld [vmem:[#allocation5 + $0xd8] sm:$0xff] }
 0xab6   : > { %v7034_v31 = vpop.permute.xlu0 %7033  ;;  %7098 = vst.msk [vmem:[#allocation5 + $0xe8] sm:$0xff] %vm2797_vm2, %v7032_v0  ;;  %v8298_v58 = vpack.c.bf16 %v8280_v9, %v8279_v50 }
 0xab7   : > { %7099 = vst.msk [vmem:[#allocation5 + $0xf0] sm:$0xff] %vm2797_vm2, %v7034_v31 }
 0xab8   : > { %v9639_v52 = vpop.f32.mrf.mxu0  ;;  %9650 = vmatmul.mubr.msk.bf16.gmra.mxu0 %vm4069_vm9, %v8298_v58 }
 0xab9   : > { %v7036_v63 = vpop.permute.xlu1 %7035  ;;  %v8475_v1 = vadd.f32 %v9639_v52, %v14010_v2 }
 0xaba   : > { %v7222_v22 = vpop.permute.xlu0 %7221  ;;  %7100 = vst.msk [vmem:[#allocation5 + $0xf8] sm:$0xff] %vm2797_vm2, %v7036_v63  ;;  %v8466_v29 = vpop.f32.mrf.mxu0 }
 0xabb   : > { %7289 = vst.msk [vmem:[#allocation5 + $0xe0] sm:$0xff] %vm2990_vm3, %v7222_v22  ;;  %v8467_v40 = vadd.f32 %v14010_v2, %v8466_v29  ;;  %v8591_v44 = vadd.f32 %v8559_v27, %v8475_v1 }
 0xabc   : > { %v9640_v20 = vpop.f32.mrf.mxu0 }
 0xabd   : > { %v8589_v6 = vadd.f32 %v8557_v24, %v8467_v40  ;;  %v7224_v5 = vpop.permute.xlu1 %7223  ;;  %v8478_v19 = vadd.f32 %v9640_v20, %v14010_v2  ;;  %v8623_v51 = vmax.f32 %v8591_v44, 0.0  ;;  %v8561_v20 = vld [vmem:[#allocation4 + $0x80] sm:$0xff] }
 0xabe   : > { %v7226_v11 = vpop.permute.xlu0 %7225  ;;  %7290 = vst.msk [vmem:[#allocation5 + $0xe8] sm:$0xff] %vm2990_vm3, %v7224_v5  ;;  %v8469_v46 = vpop.f32.mrf.mxu0 }
 0xabf   : > { %7291 = vst.msk [vmem:[#allocation5 + $0xf0] sm:$0xff] %vm2990_vm3, %v7226_v11  ;;  %v8621_v8 = vmax.f32 %v8589_v6, 0.0  ;;  %v8470_v16 = vadd.f32 %v14010_v2, %v8469_v46  ;;  %v8592_v47 = vadd.f32 %v8560_v39, %v8478_v19  ;;  %v8562_v39 = vld [vmem:[#allocation4 + $0x88] sm:$0xff] }
 0xac1   : > { %v8590_v18 = vadd.f32 %v8558_v45, %v8470_v16  ;;  %v7228_v33 = vpop.permute.xlu1 %7227  ;;  %8697 = vrot.lane.b32.xlu0 %v8621_v8, %s9749_s29  ;;  %v8624_v14 = vmax.f32 %v8592_v47, 0.0  ;;  %v8563_v8 = vld [vmem:[#allocation4 + $0x90] sm:$0xff] }
 0xac2   : > { %v7414_v41 = vpop.permute.xlu0 %7413  ;;  %7292 = vst.msk [vmem:[#allocation5 + $0xf8] sm:$0xff] %vm2990_vm3, %v7228_v33 }
 0xac3   : > { %7481 = vst.msk [vmem:[#allocation5 + $0xe0] sm:$0xff] %vm3183_vm4, %v7414_v41  ;;  %v8622_v3 = vmax.f32 %v8590_v18, 0.0 }
 0xac5   : > { %v7416_v13 = vpop.permute.xlu1 %7415  ;;  %8699 = vrot.lane.b32.xlu1 %v8622_v3, %s9749_s29  ;;  %8701 = vrot.lane.b32.xlu0 %v8623_v51, %s9749_s29 }
 0xac6   : > { %v7418_v15 = vpop.permute.xlu0 %7417  ;;  %7482 = vst.msk [vmem:[#allocation5 + $0xe8] sm:$0xff] %vm3183_vm4, %v7416_v13 }
 0xac7   : > { %7483 = vst.msk [vmem:[#allocation5 + $0xf0] sm:$0xff] %vm3183_vm4, %v7418_v15  ;;  %v8564_v15 = vld [vmem:[#allocation4 + $0x98] sm:$0xff] }
 0xac9   : > { %v7420_v55 = vpop.permute.xlu1 %7419  ;;  %8703 = vrot.lane.b32.xlu1 %v8624_v14, %s9749_s29 }
 0xaca   : > { %v7606_v35 = vpop.permute.xlu0 %7605  ;;  %7484 = vst.msk [vmem:[#allocation5 + $0xf8] sm:$0xff] %vm3183_vm4, %v7420_v55 }
 0xacb   : > { %7673 = vst.msk [vmem:[#allocation5 + $0xe0] sm:$0xff] %vm3376_vm5, %v7606_v35 }
 0xacd   : > { %v7608_v12 = vpop.permute.xlu1 %7607 }
 0xace   : > { %v7610_v23 = vpop.permute.xlu0 %7609  ;;  %7674 = vst.msk [vmem:[#allocation5 + $0xe8] sm:$0xff] %vm3376_vm5, %v7608_v12 }
 0xacf   : > { %7675 = vst.msk [vmem:[#allocation5 + $0xf0] sm:$0xff] %vm3376_vm5, %v7610_v23 }
 0xad1   : > { %v7612_v42 = vpop.permute.xlu1 %7611 }
 0xad2   : > { %v7798_v17 = vpop.permute.xlu0 %7797  ;;  %7676 = vst.msk [vmem:[#allocation5 + $0xf8] sm:$0xff] %vm3376_vm5, %v7612_v42 }
 0xad3   : > { %7865 = vst.msk [vmem:[#allocation5 + $0xe0] sm:$0xff] %vm3570_vm7, %v7798_v17 }
 0xad5   : > { %v7800_v62 = vpop.permute.xlu1 %7799 }
 0xad6   : > { %v7802_v57 = vpop.permute.xlu0 %7801  ;;  %7866 = vst.msk [vmem:[#allocation5 + $0xe8] sm:$0xff] %vm3570_vm7, %v7800_v62 }
 0xad7   : > { %7867 = vst.msk [vmem:[#allocation5 + $0xf0] sm:$0xff] %vm3570_vm7, %v7802_v57 }
 0xad9   : > { %v7804_v28 = vpop.permute.xlu1 %7803 }
 0xada   : > { %v7990_v43 = vpop.permute.xlu0 %7989  ;;  %7868 = vst.msk [vmem:[#allocation5 + $0xf8] sm:$0xff] %vm3570_vm7, %v7804_v28 }
 0xadb   : > { %8057 = vst.msk [vmem:[#allocation5 + $0xe0] sm:$0xff] %vm3763_vm8, %v7990_v43 }
 0xadd   : > { %v7992_v34 = vpop.permute.xlu1 %7991 }
 0xade   : > { %v7994_v21 = vpop.permute.xlu0 %7993  ;;  %8058 = vst.msk [vmem:[#allocation5 + $0xe8] sm:$0xff] %vm3763_vm8, %v7992_v34 }
 0xadf   : > { %8059 = vst.msk [vmem:[#allocation5 + $0xf0] sm:$0xff] %vm3763_vm8, %v7994_v21 }
 0xae1   : > { %v7996_v37 = vpop.permute.xlu1 %7995 }
 0xae2   : > { %v8182_v54 = vpop.permute.xlu0 %8181  ;;  %8060 = vst.msk [vmem:[#allocation5 + $0xf8] sm:$0xff] %vm3763_vm8, %v7996_v37 }
 0xae3   : > { %8249 = vst.msk [vmem:[#allocation5 + $0xe0] sm:$0xff] %vm3956_vm0, %v8182_v54 }
 0xae5   : > { %v8184_v7 = vpop.permute.xlu1 %8183 }
 0xae6   : > { %v8186_v48 = vpop.permute.xlu0 %8185  ;;  %8250 = vst.msk [vmem:[#allocation5 + $0xe8] sm:$0xff] %vm3956_vm0, %v8184_v7 }
 0xae7   : > { %8251 = vst.msk [vmem:[#allocation5 + $0xf0] sm:$0xff] %vm3956_vm0, %v8186_v48 }
 0xae9   : > { %v8188_v59 = vpop.permute.xlu1 %8187 }
 0xaea   : > { %v8674_v26 = vpop.permute.xlu0 %8673  ;;  %8252 = vst.msk [vmem:[#allocation5 + $0xf8] sm:$0xff] %vm3956_vm0, %v8188_v59  ;;  %v8281_v4 = vld [vmem:[#allocation5 + $0xe0] sm:$0xff] }
 0xaeb   : > { %8769 = vst.msk [vmem:[#allocation4] sm:$0xff] %vm2604_vm1, %v8674_v26 }
 0xaed   : > { %v8676_v56 = vpop.permute.xlu1 %8675  ;;  %v8282_v53 = vld [vmem:[#allocation5 + $0xe8] sm:$0xff] }
 0xaee   : > { %v8678_v30 = vpop.permute.xlu0 %8677  ;;  %8770 = vst.msk [vmem:[#allocation4 + $0x8] sm:$0xff] %vm2604_vm1, %v8676_v56  ;;  %v8299_v60 = vpack.c.bf16 %v8282_v53, %v8281_v4  ;;  %v8283_v61 = vld [vmem:[#allocation5 + $0xf0] sm:$0xff]  ;;  %v8565_v56 = vld [vmem:[#allocation4 + $0xa0] sm:$0xff] }
 0xaef   : > { %8771 = vst.msk [vmem:[#allocation4 + $0x10] sm:$0xff] %vm2604_vm1, %v8678_v30  ;;  %v8567_v53 = vld [vmem:[#allocation4 + $0xb0] sm:$0xff] }
 0xaf0   : > { %9653 = vmatprep.mubr.msk.bf16.mxu0 %vm4069_vm9, %v8299_v60 }
 0xaf1   : > { %v8680_v10 = vpop.permute.xlu1 %8679  ;;  %v8284_v49 = vld [vmem:[#allocation5 + $0xf8] sm:$0xff] }
 0xaf2   : > { %v8682_v36 = vpop.permute.xlu0 %8681  ;;  %8772 = vst.msk [vmem:[#allocation4 + $0x18] sm:$0xff] %vm2604_vm1, %v8680_v10  ;;  %v8300_v38 = vpack.c.bf16 %v8284_v49, %v8283_v61  ;;  %v8801_v0 = vld [vmem:[#allocation4] sm:$0xff] }
 0xaf3   : > { %8773 = vst.msk [vmem:[#allocation4 + $0x20] sm:$0xff] %vm2604_vm1, %v8682_v36 }
 0xaf4   : > { %9654 = vmatmul.mubr.msk.bf16.gmra.mxu0 %vm4069_vm9, %v8300_v38 }
 0xaf5   : > { %v8684_v25 = vpop.permute.xlu1 %8683  ;;  %v8802_v31 = vld [vmem:[#allocation4 + $0x8] sm:$0xff] }
 0xaf6   : > { %v8686_v32 = vpop.permute.xlu0 %8685  ;;  %8774 = vst.msk [vmem:[#allocation4 + $0x28] sm:$0xff] %vm2604_vm1, %v8684_v25  ;;  %v8833_v50 = vpack.c.bf16 %v8802_v31, %v8801_v0  ;;  %v8803_v63 = vld [vmem:[#allocation4 + $0x10] sm:$0xff] }
 0xaf7   : > { %8775 = vst.msk [vmem:[#allocation4 + $0x30] sm:$0xff] %vm2604_vm1, %v8686_v32  ;;  %v8566_v32 = vld [vmem:[#allocation4 + $0xa8] sm:$0xff] }
 0xaf8   : > { %v9643_v9 = vpop.f32.mrf.mxu0  ;;  %9659 = vmatprep.mubr.msk.bf16.mxu1 %vm8862_vm10, %v8833_v50  ;;  %v8568_v50 = vld [vmem:[#allocation4 + $0xb8] sm:$0xff] }
 0xaf9   : > { %v8688_v58 = vpop.permute.xlu1 %8687  ;;  %v8804_v22 = vld [vmem:[#allocation4 + $0x18] sm:$0xff]  ;;  %v8491_v40 = vadd.f32 %v9643_v9, %v14010_v2 }
 0xafa   : > { %v8690_v52 = vpop.permute.xlu0 %8689  ;;  %8776 = vst.msk [vmem:[#allocation4 + $0x38] sm:$0xff] %vm2604_vm1, %v8688_v58  ;;  %v8482_v29 = vpop.f32.mrf.mxu0  ;;  %v8834_v1 = vpack.c.bf16 %v8804_v22, %v8803_v63  ;;  %v8805_v46 = vld [vmem:[#allocation4 + $0x20] sm:$0xff] }
 0xafb   : > { %8777 = vst.msk [vmem:[#allocation4 + $0x40] sm:$0xff] %vm2604_vm1, %v8690_v52  ;;  %v8483_v24 = vadd.f32 %v14010_v2, %v8482_v29  ;;  %v8595_v45 = vadd.f32 %v8563_v8, %v8491_v40 }
 0xafc   : > { %v9644_v6 = vpop.f32.mrf.mxu0  ;;  %9660 = vmatmul.mubr.msk.bf16.vlgmr.msra.gmra.mxu1 %vm8862_vm10, %v8834_v1 }
 0xafd   : > { %v8593_v5 = vadd.f32 %v8561_v20, %v8483_v24  ;;  %v8692_v11 = vpop.permute.xlu1 %8691  ;;  %v8806_v44 = vld [vmem:[#allocation4 + $0x28] sm:$0xff]  ;;  %v8494_v33 = vadd.f32 %v9644_v6, %v14010_v2  ;;  %v8627_v55 = vmax.f32 %v8595_v45, 0.0 }
 0xafe   : > { %v8694_v27 = vpop.permute.xlu0 %8693  ;;  %8778 = vst.msk [vmem:[#allocation4 + $0x48] sm:$0xff] %vm2604_vm1, %v8692_v11  ;;  %v8485_v19 = vpop.f32.mrf.mxu0  ;;  %v8835_v16 = vpack.c.bf16 %v8806_v44, %v8805_v46  ;;  %v8807_v3 = vld [vmem:[#allocation4 + $0x30] sm:$0xff]  ;;  %v8569_v44 = vld [vmem:[#allocation4 + $0xc0] sm:$0xff] }
 0xaff   : > { %8779 = vst.msk [vmem:[#allocation4 + $0x50] sm:$0xff] %vm2604_vm1, %v8694_v27  ;;  %v8625_v18 = vmax.f32 %v8593_v5, 0.0  ;;  %v8486_v41 = vadd.f32 %v14010_v2, %v8485_v19  ;;  %v8596_v35 = vadd.f32 %v8564_v15, %v8494_v33 }
 0xb00   : > { %9663 = vmatprep.mubr.msk.bf16.mxu1 %vm8862_vm10, %v8835_v16  ;;  %v8571_v16 = vld [vmem:[#allocation4 + $0xd0] sm:$0xff] }
 0xb01   : > { %v8594_v51 = vadd.f32 %v8562_v39, %v8486_v41  ;;  %v8696_v47 = vpop.permute.xlu1 %8695  ;;  %8705 = vrot.lane.b32.xlu0 %v8625_v18, %s9749_s29  ;;  %v8808_v13 = vld [vmem:[#allocation4 + $0x38] sm:$0xff]  ;;  %v8628_v62 = vmax.f32 %v8596_v35, 0.0 }
 0xb02   : > { %8780 = vst.msk [vmem:[#allocation4 + $0x58] sm:$0xff] %vm2604_vm1, %v8696_v47  ;;  %v8836_v14 = vpack.c.bf16 %v8808_v13, %v8807_v3  ;;  %v8809_v23 = vld [vmem:[#allocation4 + $0x40] sm:$0xff]  ;;  %v8570_v3 = vld [vmem:[#allocation4 + $0xc8] sm:$0xff] }
 0xb03   : > { %v8626_v12 = vmax.f32 %v8594_v51, 0.0 }
 0xb04   : > { %9664 = vmatmul.mubr.msk.bf16.gmra.mxu1 %vm8862_vm10, %v8836_v14  ;;  %v8572_v14 = vld [vmem:[#allocation4 + $0xd8] sm:$0xff] }
 0xb05   : > { %8707 = vrot.lane.b32.xlu1 %v8626_v12, %s9749_s29  ;;  %8709 = vrot.lane.b32.xlu0 %v8627_v55, %s9749_s29  ;;  %v8810_v42 = vld [vmem:[#allocation4 + $0x48] sm:$0xff] }
 0xb06   : > { %v8837_v17 = vpack.c.bf16 %v8810_v42, %v8809_v23  ;;  %v8811_v57 = vld [vmem:[#allocation4 + $0x50] sm:$0xff] }
 0xb08   : > { %9667 = vmatprep.mubr.msk.bf16.mxu1 %vm8862_vm10, %v8837_v17 }
 0xb09   : > { %8711 = vrot.lane.b32.xlu1 %v8628_v62, %s9749_s29  ;;  %v8812_v28 = vld [vmem:[#allocation4 + $0x58] sm:$0xff] }
 0xb0a   : > { %v8838_v43 = vpack.c.bf16 %v8812_v28, %v8811_v57 }
 0xb0c   : > { %9668 = vmatmul.mubr.msk.bf16.gmra.mxu1 %vm8862_vm10, %v8838_v43 }
 0xb33   : > { %v8698_v34 = vpop.permute.xlu0 %8697 }
 0xb34   : > { %8781 = vst.msk [vmem:[#allocation4 + $0x60] sm:$0xff] %vm2604_vm1, %v8698_v34 }
 0xb37   : > { %v8700_v21 = vpop.permute.xlu1 %8699  ;;  %v8702_v37 = vpop.permute.xlu0 %8701 }
 0xb38   : > { %8782 = vst.msk [vmem:[#allocation4 + $0x68] sm:$0xff] %vm2604_vm1, %v8700_v21  ;;  %8783 = vst.msk [vmem:[#allocation4 + $0x70] sm:$0xff] %vm2604_vm1, %v8702_v37  ;;  %v9647_v54 = vpop.f32.mrf.mxu0 }
 0xb39   : > { %v8507_v48 = vadd.f32 %v9647_v54, %v14010_v2 }
 0xb3a   : > { %v8498_v7 = vpop.f32.mrf.mxu0 }
 0xb3b   : > { %v8499_v59 = vadd.f32 %v14010_v2, %v8498_v7  ;;  %v8704_v26 = vpop.permute.xlu1 %8703  ;;  %v8599_v61 = vadd.f32 %v8567_v53, %v8507_v48  ;;  %v8813_v38 = vld [vmem:[#allocation4 + $0x60] sm:$0xff] }
 0xb3c   : > { %8784 = vst.msk [vmem:[#allocation4 + $0x78] sm:$0xff] %vm2604_vm1, %v8704_v26  ;;  %v9648_v30 = vpop.f32.mrf.mxu0  ;;  %v8573_v7 = vld [vmem:[#allocation4 + $0xe0] sm:$0xff] }
 0xb3d   : > { %v8597_v4 = vadd.f32 %v8565_v56, %v8499_v59  ;;  %v8510_v36 = vadd.f32 %v9648_v30, %v14010_v2  ;;  %v8631_v9 = vmax.f32 %v8599_v61, 0.0  ;;  %v8575_v59 = vld [vmem:[#allocation4 + $0xf0] sm:$0xff] }
 0xb3e   : > { %v8501_v60 = vpop.f32.mrf.mxu0 }
 0xb3f   : > { %v8629_v10 = vmax.f32 %v8597_v4, 0.0  ;;  %v8502_v49 = vadd.f32 %v14010_v2, %v8501_v60  ;;  %v8814_v25 = vld [vmem:[#allocation4 + $0x68] sm:$0xff]  ;;  %v8600_v58 = vadd.f32 %v8568_v50, %v8510_v36  ;;  %v8815_v63 = vld [vmem:[#allocation4 + $0x70] sm:$0xff]  ;;  %v14183_v4 = vld [vmem:[%s14316_s4 + $0x5] ss:$0 sm:$0xff] }
 0xb40   : > { %v8839_v0 = vpack.c.bf16 %v8814_v25, %v8813_v38  ;;  %v8574_v36 = vld [vmem:[#allocation4 + $0xe8] sm:$0xff] }
 0xb41   : > { %v8598_v31 = vadd.f32 %v8566_v32, %v8502_v49  ;;  %8713 = vrot.lane.b32.xlu0 %v8629_v10, %s9749_s29  ;;  %v8632_v1 = vmax.f32 %v8600_v58, 0.0 }
 0xb42   : > { %9671 = vmatprep.mubr.msk.bf16.mxu1 %vm8862_vm10, %v8839_v0  ;;  %v8576_v0 = vld [vmem:[#allocation4 + $0xf8] sm:$0xff] }
 0xb43   : > { %v8630_v52 = vmax.f32 %v8598_v31, 0.0  ;;  %v8816_v22 = vld [vmem:[#allocation4 + $0x78] sm:$0xff] }
 0xb44   : > { %v8840_v29 = vpack.c.bf16 %v8816_v22, %v8815_v63 }
 0xb45   : > { %8715 = vrot.lane.b32.xlu1 %v8630_v52, %s9749_s29  ;;  %8717 = vrot.lane.b32.xlu0 %v8631_v9, %s9749_s29 }
 0xb46   : > { %9672 = vmatmul.mubr.msk.bf16.gmra.mxu1 %vm8862_vm10, %v8840_v29 }
 0xb49   : > { %8719 = vrot.lane.b32.xlu1 %v8632_v1, %s9749_s29 }
 0xb73   : > { %v8706_v40 = vpop.permute.xlu0 %8705 }
 0xb74   : > { %8785 = vst.msk [vmem:[#allocation4 + $0x80] sm:$0xff] %vm2604_vm1, %v8706_v40 }
 0xb77   : > { %v8708_v24 = vpop.permute.xlu1 %8707  ;;  %v8710_v20 = vpop.permute.xlu0 %8709 }
 0xb78   : > { %8786 = vst.msk [vmem:[#allocation4 + $0x88] sm:$0xff] %vm2604_vm1, %v8708_v24  ;;  %8787 = vst.msk [vmem:[#allocation4 + $0x90] sm:$0xff] %vm2604_vm1, %v8710_v20  ;;  %v9651_v6 = vpop.f32.mrf.mxu0 }
 0xb79   : > { %v8523_v11 = vadd.f32 %v9651_v6, %v14010_v2 }
 0xb7a   : > { %v8514_v5 = vpop.f32.mrf.mxu0 }
 0xb7b   : > { %v8515_v27 = vadd.f32 %v14010_v2, %v8514_v5  ;;  %v8712_v46 = vpop.permute.xlu1 %8711  ;;  %v8603_v18 = vadd.f32 %v8571_v16, %v8523_v11  ;;  %v8817_v51 = vld [vmem:[#allocation4 + $0x80] sm:$0xff] }
 0xb7c   : > { %8788 = vst.msk [vmem:[#allocation4 + $0x98] sm:$0xff] %vm2604_vm1, %v8712_v46  ;;  %v9652_v8 = vpop.f32.mrf.mxu0 }
 0xb7d   : > { %v8601_v19 = vadd.f32 %v8569_v44, %v8515_v27  ;;  %v8526_v41 = vadd.f32 %v9652_v8, %v14010_v2  ;;  %v8635_v55 = vmax.f32 %v8603_v18, 0.0 }
 0xb7e   : > { %v8517_v45 = vpop.f32.mrf.mxu0 }
 0xb7f   : > { %v8633_v33 = vmax.f32 %v8601_v19, 0.0  ;;  %v8518_v39 = vadd.f32 %v14010_v2, %v8517_v45  ;;  %v8818_v47 = vld [vmem:[#allocation4 + $0x88] sm:$0xff]  ;;  %v8604_v35 = vadd.f32 %v8572_v14, %v8526_v41  ;;  %v8819_v23 = vld [vmem:[#allocation4 + $0x90] sm:$0xff] }
 0xb80   : > { %v8841_v13 = vpack.c.bf16 %v8818_v47, %v8817_v51 }
 0xb81   : > { %v8602_v15 = vadd.f32 %v8570_v3, %v8518_v39  ;;  %8721 = vrot.lane.b32.xlu0 %v8633_v33, %s9749_s29  ;;  %v8636_v62 = vmax.f32 %v8604_v35, 0.0 }
 0xb82   : > { %9675 = vmatprep.mubr.msk.bf16.mxu1 %vm8862_vm10, %v8841_v13 }
 0xb83   : > { %v8634_v12 = vmax.f32 %v8602_v15, 0.0  ;;  %v8820_v42 = vld [vmem:[#allocation4 + $0x98] sm:$0xff] }
 0xb84   : > { %v8842_v17 = vpack.c.bf16 %v8820_v42, %v8819_v23 }
 0xb85   : > { %8723 = vrot.lane.b32.xlu1 %v8634_v12, %s9749_s29  ;;  %8725 = vrot.lane.b32.xlu0 %v8635_v55, %s9749_s29 }
 0xb86   : > { %9676 = vmatmul.mubr.msk.bf16.gmra.mxu1 %vm8862_vm10, %v8842_v17 }
 0xb89   : > { %8727 = vrot.lane.b32.xlu1 %v8636_v62, %s9749_s29 }
 0xbb3   : > { %v8714_v57 = vpop.permute.xlu0 %8713 }
 0xbb4   : > { %8789 = vst.msk [vmem:[#allocation4 + $0xa0] sm:$0xff] %vm2604_vm1, %v8714_v57  ;;  %v9655_v28 = vpop.f32.mrf.mxu0 }
 0xbb5   : > { %v8539_v43 = vadd.f32 %v9655_v28, %v14010_v2 }
 0xbb6   : > { %v8530_v34 = vpop.f32.mrf.mxu0 }
 0xbb7   : > { %v8531_v21 = vadd.f32 %v14010_v2, %v8530_v34  ;;  %v8716_v37 = vpop.permute.xlu1 %8715  ;;  %v8718_v54 = vpop.permute.xlu0 %8717  ;;  %v8607_v56 = vadd.f32 %v8575_v59, %v8539_v43 }
 0xbb8   : > { %8790 = vst.msk [vmem:[#allocation4 + $0xa8] sm:$0xff] %vm2604_vm1, %v8716_v37  ;;  %8791 = vst.msk [vmem:[#allocation4 + $0xb0] sm:$0xff] %vm2604_vm1, %v8718_v54  ;;  %v9656_v48 = vpop.f32.mrf.mxu0 }
 0xbb9   : > { %v8605_v26 = vadd.f32 %v8573_v7, %v8531_v21  ;;  %v8542_v60 = vadd.f32 %v9656_v48, %v14010_v2  ;;  %v8639_v32 = vmax.f32 %v8607_v56, 0.0 }
 0xbba   : > { %v8533_v30 = vpop.f32.mrf.mxu0 }
 0xbbb   : > { %v8637_v53 = vmax.f32 %v8605_v26, 0.0  ;;  %v8534_v61 = vadd.f32 %v14010_v2, %v8533_v30  ;;  %v8720_v10 = vpop.permute.xlu1 %8719  ;;  %v8608_v31 = vadd.f32 %v8576_v0, %v8542_v60  ;;  %v8821_v52 = vld [vmem:[#allocation4 + $0xa0] sm:$0xff] }
 0xbbc   : > { %8792 = vst.msk [vmem:[#allocation4 + $0xb8] sm:$0xff] %vm2604_vm1, %v8720_v10  ;;  %v9661_v49 = vpop.f32.mrf.mxu1 }
 0xbbd   : > { %v8606_v38 = vadd.f32 %v8574_v36, %v8534_v61  ;;  %v8954_v25 = vadd.f32 %v9661_v49, %v14183_v4  ;;  %8729 = vrot.lane.b32.xlu0 %v8637_v53, %s9749_s29  ;;  %v8640_v20 = vmax.f32 %v8608_v31, 0.0 }
 0xbbe   : > { %v8945_v2 = vpop.f32.mrf.mxu1 }
 0xbbf   : > { %v8638_v50 = vmax.f32 %v8606_v38, 0.0  ;;  %v9074_v9 = vmax.f32 %v8954_v25, 0.0  ;;  %v8946_v58 = vadd.f32 %v14183_v4, %v8945_v2  ;;  %v8822_v63 = vld [vmem:[#allocation4 + $0xa8] sm:$0xff]  ;;  %v8823_v11 = vld [vmem:[#allocation4 + $0xb0] sm:$0xff] }
 0xbc0   : > { %v9662_v22 = vpop.f32.mrf.mxu1  ;;  %v8843_v29 = vpack.c.bf16 %v8822_v63, %v8821_v52 }
 0xbc1   : > { %9106 = vst.msk [vmem:[%s14195_s30 + $0x10] sm:$0xff] %vm299_vm11, %v9074_v9  ;;  %v9072_v1 = vmax.f32 %v8946_v58, 0.0  ;;  %v8957_v40 = vadd.f32 %v9662_v22, %v14183_v4  ;;  %8731 = vrot.lane.b32.xlu1 %v8638_v50, %s9749_s29  ;;  %8733 = vrot.lane.b32.xlu0 %v8639_v32, %s9749_s29 }
 0xbc2   : > { %v8948_v24 = vpop.f32.mrf.mxu1  ;;  %9679 = vmatprep.mubr.msk.bf16.mxu1 %vm8862_vm10, %v8843_v29 }
 0xbc3   : > { %9104 = vst.msk [vmem:[%s14195_s30] sm:$0xff] %vm299_vm11, %v9072_v1  ;;  %v9075_v6 = vmax.f32 %v8957_v40, 0.0  ;;  %v8949_v5 = vadd.f32 %v14183_v4, %v8948_v24  ;;  %v8824_v27 = vld [vmem:[#allocation4 + $0xb8] sm:$0xff] }
 0xbc4   : > { %v9665_v46 = vpop.f32.mrf.mxu1  ;;  %v8844_v44 = vpack.c.bf16 %v8824_v27, %v8823_v11 }
 0xbc5   : > { %9107 = vst.msk [vmem:[%s14195_s30 + $0x18] sm:$0xff] %vm299_vm11, %v9075_v6  ;;  %v9073_v8 = vmax.f32 %v8949_v5, 0.0  ;;  %v8970_v19 = vadd.f32 %v9665_v46, %v14183_v4  ;;  %8735 = vrot.lane.b32.xlu1 %v8640_v20, %s9749_s29 }
 0xbc6   : > { %v8961_v16 = vpop.f32.mrf.mxu1  ;;  %9680 = vmatmul.mubr.msk.bf16.gmra.mxu1 %vm8862_vm10, %v8844_v44 }
 0xbc7   : > { %9105 = vst.msk [vmem:[%s14195_s30 + $0x8] sm:$0xff] %vm299_vm11, %v9073_v8  ;;  %v9078_v45 = vmax.f32 %v8970_v19, 0.0  ;;  %v8962_v18 = vadd.f32 %v14183_v4, %v8961_v16 }
 0xbc8   : > { %v9666_v33 = vpop.f32.mrf.mxu1 }
 0xbc9   : > { %9110 = vst.msk [vmem:[%s14195_s30 + $0x30] sm:$0xff] %vm299_vm11, %v9078_v45  ;;  %v9076_v41 = vmax.f32 %v8962_v18, 0.0  ;;  %v8973_v39 = vadd.f32 %v9666_v33, %v14183_v4 }
 0xbca   : > { %v8964_v51 = vpop.f32.mrf.mxu1 }
 0xbcb   : > { %9108 = vst.msk [vmem:[%s14195_s30 + $0x20] sm:$0xff] %vm299_vm11, %v9076_v41  ;;  %v9079_v47 = vmax.f32 %v8973_v39, 0.0  ;;  %v8965_v3 = vadd.f32 %v14183_v4, %v8964_v51 }
 0xbcc   : > { %v9669_v13 = vpop.f32.mrf.mxu1 }
 0xbcd   : > { %9111 = vst.msk [vmem:[%s14195_s30 + $0x38] sm:$0xff] %vm299_vm11, %v9079_v47  ;;  %v9077_v15 = vmax.f32 %v8965_v3, 0.0  ;;  %v8986_v14 = vadd.f32 %v9669_v13, %v14183_v4 }
 0xbce   : > { %v8977_v55 = vpop.f32.mrf.mxu1 }
 0xbcf   : > { %9109 = vst.msk [vmem:[%s14195_s30 + $0x28] sm:$0xff] %vm299_vm11, %v9077_v15  ;;  %v9082_v35 = vmax.f32 %v8986_v14, 0.0  ;;  %v8978_v12 = vadd.f32 %v14183_v4, %v8977_v55 }
 0xbd0   : > { %v9670_v23 = vpop.f32.mrf.mxu1 }
 0xbd1   : > { %9114 = vst.msk [vmem:[%s14195_s30 + $0x50] sm:$0xff] %vm299_vm11, %v9082_v35  ;;  %v9080_v42 = vmax.f32 %v8978_v12, 0.0  ;;  %v8989_v17 = vadd.f32 %v9670_v23, %v14183_v4 }
 0xbd2   : > { %v8980_v62 = vpop.f32.mrf.mxu1 }
 0xbd3   : > { %9112 = vst.msk [vmem:[%s14195_s30 + $0x40] sm:$0xff] %vm299_vm11, %v9080_v42  ;;  %v9083_v57 = vmax.f32 %v8989_v17, 0.0  ;;  %v8981_v28 = vadd.f32 %v14183_v4, %v8980_v62 }
 0xbd5   : > { %9115 = vst.msk [vmem:[%s14195_s30 + $0x58] sm:$0xff] %vm299_vm11, %v9083_v57  ;;  %v9081_v43 = vmax.f32 %v8981_v28, 0.0 }
 0xbd7   : > { %9113 = vst.msk [vmem:[%s14195_s30 + $0x48] sm:$0xff] %vm299_vm11, %v9081_v43 }
 0xbf3   : > { %v8722_v34 = vpop.permute.xlu0 %8721 }
 0xbf4   : > { %8793 = vst.msk [vmem:[#allocation4 + $0xc0] sm:$0xff] %vm2604_vm1, %v8722_v34 }
 0xbf7   : > { %v8724_v21 = vpop.permute.xlu1 %8723  ;;  %v8726_v37 = vpop.permute.xlu0 %8725 }
 0xbf8   : > { %8794 = vst.msk [vmem:[#allocation4 + $0xc8] sm:$0xff] %vm2604_vm1, %v8724_v21  ;;  %8795 = vst.msk [vmem:[#allocation4 + $0xd0] sm:$0xff] %vm2604_vm1, %v8726_v37 }
 0xbfb   : > { %v8728_v54 = vpop.permute.xlu1 %8727  ;;  %v8825_v7 = vld [vmem:[#allocation4 + $0xc0] sm:$0xff] }
 0xbfc   : > { %8796 = vst.msk [vmem:[#allocation4 + $0xd8] sm:$0xff] %vm2604_vm1, %v8728_v54 }
 0xbff   : > { %v8826_v48 = vld [vmem:[#allocation4 + $0xc8] sm:$0xff]  ;;  %v8827_v26 = vld [vmem:[#allocation4 + $0xd0] sm:$0xff] }
 0xc00   : > { %v8845_v59 = vpack.c.bf16 %v8826_v48, %v8825_v7 }
 0xc02   : > { %9683 = vmatprep.mubr.msk.bf16.mxu1 %vm8862_vm10, %v8845_v59 }
 0xc03   : > { %v8828_v56 = vld [vmem:[#allocation4 + $0xd8] sm:$0xff] }
 0xc04   : > { %v8846_v30 = vpack.c.bf16 %v8828_v56, %v8827_v26 }
 0xc06   : > { %v9673_v53 = vpop.f32.mrf.mxu1  ;;  %9684 = vmatmul.mubr.msk.bf16.gmra.mxu1 %vm8862_vm10, %v8846_v30 }
 0xc07   : > { %v9002_v60 = vadd.f32 %v9673_v53, %v14183_v4 }
 0xc08   : > { %v8993_v61 = vpop.f32.mrf.mxu1 }
 0xc09   : > { %v9086_v10 = vmax.f32 %v9002_v60, 0.0  ;;  %v8994_v36 = vadd.f32 %v14183_v4, %v8993_v61 }
 0xc0a   : > { %v9674_v49 = vpop.f32.mrf.mxu1 }
 0xc0b   : > { %9118 = vst.msk [vmem:[%s14195_s30 + $0x70] sm:$0xff] %vm299_vm11, %v9086_v10  ;;  %v9084_v38 = vmax.f32 %v8994_v36, 0.0  ;;  %v9005_v25 = vadd.f32 %v9674_v49, %v14183_v4 }
 0xc0c   : > { %v8996_v32 = vpop.f32.mrf.mxu1 }
 0xc0d   : > { %9116 = vst.msk [vmem:[%s14195_s30 + $0x60] sm:$0xff] %vm299_vm11, %v9084_v38  ;;  %v9087_v0 = vmax.f32 %v9005_v25, 0.0  ;;  %v8997_v2 = vadd.f32 %v14183_v4, %v8996_v32 }
 0xc0f   : > { %9119 = vst.msk [vmem:[%s14195_s30 + $0x78] sm:$0xff] %vm299_vm11, %v9087_v0  ;;  %v9085_v31 = vmax.f32 %v8997_v2, 0.0 }
 0xc11   : > { %9117 = vst.msk [vmem:[%s14195_s30 + $0x68] sm:$0xff] %vm299_vm11, %v9085_v31 }
 0xc2f   : > { %v8730_v50 = vpop.permute.xlu0 %8729 }
 0xc30   : > { %8797 = vst.msk [vmem:[#allocation4 + $0xe0] sm:$0xff] %vm2604_vm1, %v8730_v50 }
 0xc33   : > { %v8732_v9 = vpop.permute.xlu1 %8731  ;;  %v8734_v58 = vpop.permute.xlu0 %8733 }
 0xc34   : > { %8798 = vst.msk [vmem:[#allocation4 + $0xe8] sm:$0xff] %vm2604_vm1, %v8732_v9  ;;  %8799 = vst.msk [vmem:[#allocation4 + $0xf0] sm:$0xff] %vm2604_vm1, %v8734_v58 }
 0xc37   : > { %v8736_v52 = vpop.permute.xlu1 %8735  ;;  %v8829_v63 = vld [vmem:[#allocation4 + $0xe0] sm:$0xff] }
 0xc38   : > { %8800 = vst.msk [vmem:[#allocation4 + $0xf8] sm:$0xff] %vm2604_vm1, %v8736_v52 }
 0xc3b   : > { %v8830_v22 = vld [vmem:[#allocation4 + $0xe8] sm:$0xff]  ;;  %v8831_v1 = vld [vmem:[#allocation4 + $0xf0] sm:$0xff] }
 0xc3c   : > { %v8847_v29 = vpack.c.bf16 %v8830_v22, %v8829_v63 }
 0xc3e   : > { %9687 = vmatprep.mubr.msk.bf16.mxu1 %vm8862_vm10, %v8847_v29 }
 0xc3f   : > { %v8832_v40 = vld [vmem:[#allocation4 + $0xf8] sm:$0xff] }
 0xc40   : > { %v8848_v24 = vpack.c.bf16 %v8832_v40, %v8831_v1 }
 0xc42   : > { %9688 = vmatmul.mubr.msk.bf16.gmra.mxu1 %vm8862_vm10, %v8848_v24 }
 0xc46   : > { %v9677_v20 = vpop.f32.mrf.mxu1 }
 0xc47   : > { %v9018_v6 = vadd.f32 %v9677_v20, %v14183_v4 }
 0xc48   : > { %v9009_v5 = vpop.f32.mrf.mxu1 }
 0xc49   : > { %v9090_v11 = vmax.f32 %v9018_v6, 0.0  ;;  %v9010_v27 = vadd.f32 %v14183_v4, %v9009_v5 }
 0xc4a   : > { %v9678_v46 = vpop.f32.mrf.mxu1 }
 0xc4b   : > { %9122 = vst.msk [vmem:[%s14195_s30 + $0x90] sm:$0xff] %vm299_vm11, %v9090_v11  ;;  %v9088_v44 = vmax.f32 %v9010_v27, 0.0  ;;  %v9021_v8 = vadd.f32 %v9678_v46, %v14183_v4 }
 0xc4c   : > { %v9012_v19 = vpop.f32.mrf.mxu1 }
 0xc4d   : > { %9120 = vst.msk [vmem:[%s14195_s30 + $0x80] sm:$0xff] %vm299_vm11, %v9088_v44  ;;  %v9091_v16 = vmax.f32 %v9021_v8, 0.0  ;;  %v9013_v45 = vadd.f32 %v14183_v4, %v9012_v19 }
 0xc4f   : > { %9123 = vst.msk [vmem:[%s14195_s30 + $0x98] sm:$0xff] %vm299_vm11, %v9091_v16  ;;  %v9089_v18 = vmax.f32 %v9013_v45, 0.0 }
 0xc51   : > { %9121 = vst.msk [vmem:[%s14195_s30 + $0x88] sm:$0xff] %vm299_vm11, %v9089_v18 }
 0xc86   : > { %v9681_v33 = vpop.f32.mrf.mxu1 }
 0xc87   : > { %v9034_v41 = vadd.f32 %v9681_v33, %v14183_v4 }
 0xc88   : > { %v9025_v39 = vpop.f32.mrf.mxu1 }
 0xc89   : > { %v9094_v51 = vmax.f32 %v9034_v41, 0.0  ;;  %v9026_v47 = vadd.f32 %v14183_v4, %v9025_v39 }
 0xc8a   : > { %v9682_v3 = vpop.f32.mrf.mxu1 }
 0xc8b   : > { %9126 = vst.msk [vmem:[%s14195_s30 + $0xb0] sm:$0xff] %vm299_vm11, %v9094_v51  ;;  %v9092_v13 = vmax.f32 %v9026_v47, 0.0  ;;  %v9037_v15 = vadd.f32 %v9682_v3, %v14183_v4 }
 0xc8c   : > { %v9028_v14 = vpop.f32.mrf.mxu1 }
 0xc8d   : > { %9124 = vst.msk [vmem:[%s14195_s30 + $0xa0] sm:$0xff] %vm299_vm11, %v9092_v13  ;;  %v9095_v55 = vmax.f32 %v9037_v15, 0.0  ;;  %v9029_v35 = vadd.f32 %v14183_v4, %v9028_v14 }
 0xc8f   : > { %9127 = vst.msk [vmem:[%s14195_s30 + $0xb8] sm:$0xff] %vm299_vm11, %v9095_v55  ;;  %v9093_v12 = vmax.f32 %v9029_v35, 0.0 }
 0xc91   : > { %9125 = vst.msk [vmem:[%s14195_s30 + $0xa8] sm:$0xff] %vm299_vm11, %v9093_v12 }
 0xcc6   : > { %v9685_v23 = vpop.f32.mrf.mxu1 }
 0xcc7   : > { %v9050_v42 = vadd.f32 %v9685_v23, %v14183_v4 }
 0xcc8   : > { %v9041_v17 = vpop.f32.mrf.mxu1 }
 0xcc9   : > { %v9098_v62 = vmax.f32 %v9050_v42, 0.0  ;;  %v9042_v57 = vadd.f32 %v14183_v4, %v9041_v17 }
 0xcca   : > { %v9686_v28 = vpop.f32.mrf.mxu1 }
 0xccb   : > { %9130 = vst.msk [vmem:[%s14195_s30 + $0xd0] sm:$0xff] %vm299_vm11, %v9098_v62  ;;  %v9096_v43 = vmax.f32 %v9042_v57, 0.0  ;;  %v9053_v34 = vadd.f32 %v9686_v28, %v14183_v4 }
 0xccc   : > { %v9044_v21 = vpop.f32.mrf.mxu1 }
 0xccd   : > { %9128 = vst.msk [vmem:[%s14195_s30 + $0xc0] sm:$0xff] %vm299_vm11, %v9096_v43  ;;  %v9099_v37 = vmax.f32 %v9053_v34, 0.0  ;;  %v9045_v54 = vadd.f32 %v14183_v4, %v9044_v21 }
 0xccf   : > { %9131 = vst.msk [vmem:[%s14195_s30 + $0xd8] sm:$0xff] %vm299_vm11, %v9099_v37  ;;  %v9097_v7 = vmax.f32 %v9045_v54, 0.0 }
 0xcd1   : > { %9129 = vst.msk [vmem:[%s14195_s30 + $0xc8] sm:$0xff] %vm299_vm11, %v9097_v7 }
 0xd02   : > { %v9689_v48 = vpop.f32.mrf.mxu1 }
 0xd03   : > { %v9066_v59 = vadd.f32 %v9689_v48, %v14183_v4 }
 0xd04   : > { %v9057_v26 = vpop.f32.mrf.mxu1 }
 0xd05   : > { %v9102_v56 = vmax.f32 %v9066_v59, 0.0  ;;  %v9058_v30 = vadd.f32 %v14183_v4, %v9057_v26 }
 0xd06   : > { %v9690_v53 = vpop.f32.mrf.mxu1 }
 0xd07   : > { %9134 = vst.msk [vmem:[%s14195_s30 + $0xf0] sm:$0xff] %vm299_vm11, %v9102_v56  ;;  %v9100_v60 = vmax.f32 %v9058_v30, 0.0  ;;  %v9069_v61 = vadd.f32 %v9690_v53, %v14183_v4 }
 0xd08   : > { %v9060_v10 = vpop.f32.mrf.mxu1 }
 0xd09   : > { %9132 = vst.msk [vmem:[%s14195_s30 + $0xe0] sm:$0xff] %vm299_vm11, %v9100_v60  ;;  %v9103_v36 = vmax.f32 %v9069_v61, 0.0  ;;  %v9061_v49 = vadd.f32 %v14183_v4, %v9060_v10 }
 0xd0b   : > { %9135 = vst.msk [vmem:[%s14195_s30 + $0xf8] sm:$0xff] %vm299_vm11, %v9103_v36  ;;  %v9101_v38 = vmax.f32 %v9061_v49, 0.0 }
 0xd0d   : > { %9133 = vst.msk [vmem:[%s14195_s30 + $0xe8] sm:$0xff] %vm299_vm11, %v9101_v38 }
 0xd0e PF: > { %s16_s21 = sadd.s32 1, %s9745_s21  }
 0xd0f   : > { %p13_p4 = scmp.ge.s32.totalorder %s16_s21, 4  }
 0xd11   :  { %15 = sbr.rel (!%p13_p4) target bundleno = 1 (0x1), region = 82 }

</bundles_post_ra>
